<compile_context>
chip_gen: v7x
topology: tpu7x:2x2x1
jax: 0.10.0
libtpu: 0.0.40
codegen_flags: <defaults>
</compile_context>

<pallas_src>
from functools import partial

import jax
import jax.numpy as jnp
import numpy as np
from jax.experimental import pallas as pl
from jax.experimental.pallas import tpu as pltpu

# module constants (from the PyTorch source)
n_embd = 384
block_size = 256          # causal mask buffer size (we only need T <= block_size)
dropout_p = 0.2           # implemented as identity (eval mode)


# ---------------------------------------------------------------------------
# Fused kernel: QKV for all rows/heads, per-(batch, head) causal softmax
# attention into a concat scratch, then one output projection.
# ---------------------------------------------------------------------------
def _fused_mha_kernel(x_ref, wqkv_ref, pw_ref, pb_ref, o_ref,
                      qkv_ref, cat_ref,
                      *, batch, seq, num_heads, head_size):
    C = num_heads * head_size

    # 1) QKV for every row and every head in one wide MXU matmul (M = batch*seq),
    #    f32 accumulation, single bf16 cast into the VMEM scratch.
    qkv_ref[...] = jnp.dot(
        x_ref[...], wqkv_ref[...],
        preferred_element_type=jnp.float32).astype(jnp.bfloat16)

    # 2) Causal mask computed once, reused by every (b, h) (JAX does not CSE iota).
    row = jax.lax.broadcasted_iota(jnp.int32, (seq, seq), 0)
    col = jax.lax.broadcasted_iota(jnp.int32, (seq, seq), 1)
    causal = row >= col

    # NOTE: for T approaching block_size=256 the (T,T) f32 score tile should be
    # Tq=128-tiled (and causally-dead KV columns skipped) to avoid vreg spills;
    # at T <= 128 a single score tile is fine.
    for b in range(batch):
        r0 = b * seq
        for h in range(num_heads):
            lo = h * head_size
            # softmax scale is pre-folded into the Q weight columns.
            q = qkv_ref[r0:r0 + seq, lo:lo + head_size]                  # (T, hs) bf16
            k = qkv_ref[r0:r0 + seq, C + lo:C + lo + head_size]          # (T, hs) bf16
            v = qkv_ref[r0:r0 + seq, 2 * C + lo:2 * C + lo + head_size]  # (T, hs) bf16

            # q k^T without materializing a transpose (contract on head dim).
            s = jax.lax.dot_general(
                q, k, (((1,), (1,)), ((), ())),
                preferred_element_type=jnp.float32)                      # (T, T) f32
            # Safe: every causal row has >=1 unmasked column (no padded rows).
            s = jnp.where(causal, s, -jnp.inf)

            m = jnp.max(s, axis=-1, keepdims=True)
            # f32 exp keeps the kernel lowerable on v5e (no bf16 EUP); on
            # v6e/v7x `jnp.exp((s - m).astype(jnp.bfloat16))` halves EUP work.
            p = jnp.exp(s - m)                                           # unnormalized
            denom = jnp.sum(p, axis=-1, keepdims=True)                   # (T, 1)
            # TODO(synk): attention dropout omitted (eval-mode identity)

            out_h = jnp.dot(p.astype(jnp.bfloat16), v,
                            preferred_element_type=jnp.float32)          # (T, hs)
            # deferred softmax normalization on the small (T,hs) tensor, via EUP
            out_h = out_h * pl.reciprocal(denom, approx=True)

            # write this head's slice into the concat scratch (128-aligned cols)
            cat_ref[r0:r0 + seq, lo:lo + head_size] = out_h.astype(jnp.bfloat16)

    # 3) One output projection for all rows:
    #    y = cat @ proj_w^T  (contract proj_w dim 1; no transpose materialized)
    y = jax.lax.dot_general(
        cat_ref[...], pw_ref[...],
        (((1,), (1,)), ((), ())),
        preferred_element_type=jnp.float32)                              # (rows, C)
    # TODO(synk): output dropout omitted (eval-mode identity)
    o_ref[...] = (y + pb_ref[...]).astype(o_ref.dtype)


# ---------------------------------------------------------------------------
# One-time weight packing (setup cost, not per forward call)
# ---------------------------------------------------------------------------
def pack_qkv_weights(wq, wk, wv, scale, dtype=jnp.bfloat16):
    """(H, C, hs) per-head weights -> (C, 3*C) fused [Q_all | K_all | V_all].

    The softmax scale is folded into the Q columns (in f32, before the cast),
    so the kernel never multiplies by it.
    """
    H, C, hs = wq.shape

    def cat(w):  # (H, C, hs) -> (C, H*hs), heads contiguous along columns
        return jnp.transpose(w, (1, 0, 2)).reshape(C, H * hs)

    return jnp.concatenate([cat(wq) * scale, cat(wk), cat(wv)],
                           axis=1).astype(dtype)


def pack_proj_weight(proj_w, dtype=jnp.bfloat16):
    """Keep PyTorch (out_features, in_features) layout; just pre-cast."""
    return proj_w.astype(dtype)


# ---------------------------------------------------------------------------
# Wrapper
# ---------------------------------------------------------------------------
def masked_multi_head_attention(x, w_qkv, proj_w, proj_b, *, num_heads,
                                batch_per_step=None):
    """
    x      : (B, T, C) float32
    w_qkv  : (C, 3*C)  packed per-head q/k/v weights (see pack_qkv_weights,
             softmax scale already folded into Q columns)
    proj_w : (C, C)    PyTorch convention (out_features, in_features), bf16
    proj_b : (C,)      float32
    batch_per_step : how many batch rows each grid step processes.
             Default = B (single grid step; best on single-TC v5e/v6e:
             M = B*T fills the MXU and weights are fetched once).
             On v7x set to B // 2 so the "parallel" batch axis shards across
             the two TensorCores.
    """
    B, T, C = x.shape
    assert C == n_embd and C % num_heads == 0 and T <= block_size
    head_size = C // num_heads

    if batch_per_step is None:
        batch_per_step = B
    assert B % batch_per_step == 0
    rows = batch_per_step * T

    # bf16 input at the call boundary (halves input DMA); weights pre-packed.
    x2 = x.reshape(B * T, C).astype(jnp.bfloat16)
    proj_b_2d = proj_b.reshape(1, C).astype(jnp.float32)

    out = pl.pallas_call(
        partial(_fused_mha_kernel,
                batch=batch_per_step, seq=T,
                num_heads=num_heads, head_size=head_size),
        out_shape=jax.ShapeDtypeStruct((B * T, C), jnp.float32),
        grid_spec=pltpu.PrefetchScalarGridSpec(
            num_scalar_prefetch=0,
            grid=(B // batch_per_step,),
            in_specs=[
                pl.BlockSpec((rows, C), lambda i: (i, 0)),
                pl.BlockSpec((C, 3 * C), lambda i: (0, 0)),
                pl.BlockSpec((C, C), lambda i: (0, 0)),
                pl.BlockSpec((1, C), lambda i: (0, 0)),
            ],
            out_specs=pl.BlockSpec((rows, C), lambda i: (i, 0)),
            scratch_shapes=[
                pltpu.VMEM((rows, 3 * C), jnp.bfloat16),   # qkv (bf16, cast once)
                pltpu.VMEM((rows, C), jnp.bfloat16),       # head-concat buffer
            ]),
        compiler_params=pltpu.CompilerParams(
            dimension_semantics=("parallel",)),
    )(x2, w_qkv, proj_w, proj_b_2d)

    return out.reshape(B, T, C)


# ---------------------------------------------------------------------------
# Pure-JAX f32 reference (mirrors the PyTorch forward, eval mode)
# ---------------------------------------------------------------------------
def reference(x, wq, wk, wv, proj_w, proj_b):
    B, T, C = x.shape
    H = wq.shape[0]
    outs = []
    mask = jnp.tril(jnp.ones((T, T), dtype=bool))
    for h in range(H):
        q = x @ wq[h]
        k = x @ wk[h]
        v = x @ wv[h]
        # NOTE: the PyTorch module scales by C**-0.5 (n_embd), NOT head_size**-0.5.
        wei = (q @ jnp.swapaxes(k, -2, -1)) * (C ** -0.5)
        wei = jnp.where(mask, wei, -jnp.inf)
        wei = jax.nn.softmax(wei, axis=-1)
        outs.append(wei @ v)
    cat = jnp.concatenate(outs, axis=-1)
    return cat @ proj_w.T + proj_b


if __name__ == "__main__":
    # small-but-consistent shapes: C must be n_embd = 384
    B, T = 2, 128
    num_heads, head_size = 3, 128          # 3 * 128 = 384 = n_embd
    assert T <= block_size

    key = jax.random.PRNGKey(0)
    kx, kq, kk, kv, kw, kb = jax.random.split(key, 6)

    x = jax.random.normal(kx, (B, T, n_embd), dtype=jnp.float32)
    wq = jax.random.normal(kq, (num_heads, n_embd, head_size), dtype=jnp.float32) * 0.02
    wk = jax.random.normal(kk, (num_heads, n_embd, head_size), dtype=jnp.float32) * 0.02
    wv = jax.random.normal(kv, (num_heads, n_embd, head_size), dtype=jnp.float32) * 0.02
    proj_w = jax.random.normal(kw, (n_embd, n_embd), dtype=jnp.float32) * 0.02
    proj_b = jax.random.normal(kb, (n_embd,), dtype=jnp.float32) * 0.02

    # one-time weight packing / bf16 pre-cast / scale fold (outside per-call path)
    scale = float(n_embd) ** (-0.5)        # matches PyTorch: C ** -0.5 with C=n_embd
    w_qkv = pack_qkv_weights(wq, wk, wv, scale)
    proj_w_bf16 = pack_proj_weight(proj_w)

    out = masked_multi_head_attention(x, w_qkv, proj_w_bf16, proj_b,
                                      num_heads=num_heads)
    out = jax.block_until_ready(out)

    ref = jax.block_until_ready(reference(x, wq, wk, wv, proj_w, proj_b))
    # bf16 MXU operands + approx reciprocal -> relaxed tolerance vs f32 reference
    np.testing.assert_allclose(np.asarray(out), np.asarray(ref),
                               atol=5e-3, rtol=2e-2)

    print("KERNEL_OK")
</pallas_src>

<mosaic_0001>
module attributes {stable_mosaic.version = 11 : i64} {
  func.func @_fused_mha_kernel(%arg0: i32, %arg1: memref<256x384xbf16, #tpu.memory_space<vmem>>, %arg2: memref<384x1152xbf16, #tpu.memory_space<vmem>>, %arg3: memref<384x384xbf16, #tpu.memory_space<vmem>>, %arg4: memref<1x384xf32, #tpu.memory_space<vmem>>, %arg5: memref<256x384xf32, #tpu.memory_space<vmem>>, %arg6: memref<256x1152xbf16, #tpu.memory_space<vmem>>, %arg7: memref<256x384xbf16, #tpu.memory_space<vmem>>) attributes {dimension_semantics = [#tpu.dimension_semantics<parallel>], iteration_bounds = array<i64: 1>, scalar_prefetch = 0 : i64, scratch_operands = 2 : i64, tpu.core_type = #tpu.core_type<tc>, window_params = [{transform_indices = @transform_0, window_bounds = array<i64: 256, 384>}, {pipeline_mode = #tpu.pipeline_mode<synchronous>, transform_indices = @transform_1, window_bounds = array<i64: 384, 1152>}, {pipeline_mode = #tpu.pipeline_mode<synchronous>, transform_indices = @transform_2, window_bounds = array<i64: 384, 384>}, {pipeline_mode = #tpu.pipeline_mode<synchronous>, transform_indices = @transform_3, window_bounds = array<i64: 1, 384>}, {transform_indices = @transform_4, window_bounds = array<i64: 256, 384>}]} {
    %c0 = arith.constant 0 : index
    %c0_0 = arith.constant 0 : index
    %0 = vector.load %arg1[%c0, %c0_0] : memref<256x384xbf16, #tpu.memory_space<vmem>>, vector<256x384xbf16>
    %c0_1 = arith.constant 0 : index
    %c0_2 = arith.constant 0 : index
    %1 = vector.load %arg2[%c0_1, %c0_2] : memref<384x1152xbf16, #tpu.memory_space<vmem>>, vector<384x1152xbf16>
    %cst = arith.constant dense<0.000000e+00> : vector<256x1152xf32>
    %2 = tpu.matmul %0, %1, %cst {dimension_numbers = #tpu.dot_dimension_numbers<[1], [0], [0], [1], [0, 0, 1, 1], [], []>} : vector<256x384xbf16>, vector<384x1152xbf16>, vector<256x1152xf32> -> vector<256x1152xf32>
    %3 = arith.truncf %2 : vector<256x1152xf32> to vector<256x1152xbf16>
    %c0_3 = arith.constant 0 : index
    %c0_4 = arith.constant 0 : index
    %4 = vector.load %arg6[%c0_3, %c0_4] : memref<256x1152xbf16, #tpu.memory_space<vmem>>, vector<256x1152xbf16>
    tpu.vector_store %arg6[%c0_3, %c0_4], %3 {strides = array<i32>} : memref<256x1152xbf16, #tpu.memory_space<vmem>>, vector<256x1152xbf16>,
    %5 = tpu.iota {dimensions = array<i32: 0>} : vector<128x128xi32>
    %6 = tpu.iota {dimensions = array<i32: 1>} : vector<128x128xi32>
    %7 = arith.cmpi sge, %5, %6 : vector<128x128xi32>
    %c0_5 = arith.constant 0 : index
    %c0_6 = arith.constant 0 : index
    %8 = vector.load %arg6[%c0_5, %c0_6] : memref<256x1152xbf16, #tpu.memory_space<vmem>>, vector<128x128xbf16>
    %c0_7 = arith.constant 0 : index
    %c384 = arith.constant 384 : index
    %9 = vector.load %arg6[%c0_7, %c384] : memref<256x1152xbf16, #tpu.memory_space<vmem>>, vector<128x128xbf16>
    %c0_8 = arith.constant 0 : index
    %c768 = arith.constant 768 : index
    %10 = vector.load %arg6[%c0_8, %c768] : memref<256x1152xbf16, #tpu.memory_space<vmem>>, vector<128x128xbf16>
    %cst_9 = arith.constant dense<0.000000e+00> : vector<128x128xf32>
    %11 = tpu.matmul %8, %9, %cst_9 {dimension_numbers = #tpu.dot_dimension_numbers<[1], [1], [0], [0], [0, 0, 1, 0], [], []>} : vector<128x128xbf16>, vector<128x128xbf16>, vector<128x128xf32> -> vector<128x128xf32>
    %cst_10 = arith.constant 0xFF800000 : f32
    %12 = vector.broadcast %cst_10 : f32 to vector<128x128xf32>
    %13 = arith.select %7, %11, %12 : vector<128x128xi1>, vector<128x128xf32>
    %cst_11 = arith.constant dense<0xFF800000> : vector<128xf32>
    %14 = vector.multi_reduction <maximumf>, %13, %cst_11 [1] : vector<128x128xf32> to vector<128xf32>
    %15 = vector.shape_cast %14 : vector<128xf32> to vector<128x1xf32>
    %16 = vector.broadcast %15 : vector<128x1xf32> to vector<128x128xf32>
    %17 = arith.subf %13, %16 : vector<128x128xf32>
    %18 = math.exp %17 : vector<128x128xf32>
    %cst_12 = arith.constant dense<0.000000e+00> : vector<128xf32>
    %19 = vector.multi_reduction <add>, %18, %cst_12 [1] : vector<128x128xf32> to vector<128xf32>
    %20 = vector.shape_cast %19 : vector<128xf32> to vector<128x1xf32>
    %21 = arith.truncf %18 : vector<128x128xf32> to vector<128x128xbf16>
    %cst_13 = arith.constant dense<0.000000e+00> : vector<128x128xf32>
    %22 = tpu.matmul %21, %10, %cst_13 {dimension_numbers = #tpu.dot_dimension_numbers<[1], [0], [0], [1], [0, 0, 1, 1], [], []>} : vector<128x128xbf16>, vector<128x128xbf16>, vector<128x128xf32> -> vector<128x128xf32>
    %23 = tpu.reciprocal %20 {approx = true} : vector<128x1xf32> -> vector<128x1xf32>
    %24 = vector.broadcast %23 : vector<128x1xf32> to vector<128x128xf32>
    %25 = arith.mulf %22, %24 : vector<128x128xf32>
    %26 = arith.truncf %25 : vector<128x128xf32> to vector<128x128xbf16>
    %c0_14 = arith.constant 0 : index
    %c0_15 = arith.constant 0 : index
    %27 = vector.load %arg7[%c0_14, %c0_15] : memref<256x384xbf16, #tpu.memory_space<vmem>>, vector<128x128xbf16>
    tpu.vector_store %arg7[%c0_14, %c0_15], %26 {strides = array<i32>} : memref<256x384xbf16, #tpu.memory_space<vmem>>, vector<128x128xbf16>,
    %c0_16 = arith.constant 0 : index
    %c128 = arith.constant 128 : index
    %28 = vector.load %arg6[%c0_16, %c128] : memref<256x1152xbf16, #tpu.memory_space<vmem>>, vector<128x128xbf16>
    %c0_17 = arith.constant 0 : index
    %c512 = arith.constant 512 : index
    %29 = vector.load %arg6[%c0_17, %c512] : memref<256x1152xbf16, #tpu.memory_space<vmem>>, vector<128x128xbf16>
    %c0_18 = arith.constant 0 : index
    %c896 = arith.constant 896 : index
    %30 = vector.load %arg6[%c0_18, %c896] : memref<256x1152xbf16, #tpu.memory_space<vmem>>, vector<128x128xbf16>
    %cst_19 = arith.constant dense<0.000000e+00> : vector<128x128xf32>
    %31 = tpu.matmul %28, %29, %cst_19 {dimension_numbers = #tpu.dot_dimension_numbers<[1], [1], [0], [0], [0, 0, 1, 0], [], []>} : vector<128x128xbf16>, vector<128x128xbf16>, vector<128x128xf32> -> vector<128x128xf32>
    %cst_20 = arith.constant 0xFF800000 : f32
    %32 = vector.broadcast %cst_20 : f32 to vector<128x128xf32>
    %33 = arith.select %7, %31, %32 : vector<128x128xi1>, vector<128x128xf32>
    %cst_21 = arith.constant dense<0xFF800000> : vector<128xf32>
    %34 = vector.multi_reduction <maximumf>, %33, %cst_21 [1] : vector<128x128xf32> to vector<128xf32>
    %35 = vector.shape_cast %34 : vector<128xf32> to vector<128x1xf32>
    %36 = vector.broadcast %35 : vector<128x1xf32> to vector<128x128xf32>
    %37 = arith.subf %33, %36 : vector<128x128xf32>
    %38 = math.exp %37 : vector<128x128xf32>
    %cst_22 = arith.constant dense<0.000000e+00> : vector<128xf32>
    %39 = vector.multi_reduction <add>, %38, %cst_22 [1] : vector<128x128xf32> to vector<128xf32>
    %40 = vector.shape_cast %39 : vector<128xf32> to vector<128x1xf32>
    %41 = arith.truncf %38 : vector<128x128xf32> to vector<128x128xbf16>
    %cst_23 = arith.constant dense<0.000000e+00> : vector<128x128xf32>
    %42 = tpu.matmul %41, %30, %cst_23 {dimension_numbers = #tpu.dot_dimension_numbers<[1], [0], [0], [1], [0, 0, 1, 1], [], []>} : vector<128x128xbf16>, vector<128x128xbf16>, vector<128x128xf32> -> vector<128x128xf32>
    %43 = tpu.reciprocal %40 {approx = true} : vector<128x1xf32> -> vector<128x1xf32>
    %44 = vector.broadcast %43 : vector<128x1xf32> to vector<128x128xf32>
    %45 = arith.mulf %42, %44 : vector<128x128xf32>
    %46 = arith.truncf %45 : vector<128x128xf32> to vector<128x128xbf16>
    %c0_24 = arith.constant 0 : index
    %c128_25 = arith.constant 128 : index
    %47 = vector.load %arg7[%c0_24, %c128_25] : memref<256x384xbf16, #tpu.memory_space<vmem>>, vector<128x128xbf16>
    tpu.vector_store %arg7[%c0_24, %c128_25], %46 {strides = array<i32>} : memref<256x384xbf16, #tpu.memory_space<vmem>>, vector<128x128xbf16>,
    %c0_26 = arith.constant 0 : index
    %c256 = arith.constant 256 : index
    %48 = vector.load %arg6[%c0_26, %c256] : memref<256x1152xbf16, #tpu.memory_space<vmem>>, vector<128x128xbf16>
    %c0_27 = arith.constant 0 : index
    %c640 = arith.constant 640 : index
    %49 = vector.load %arg6[%c0_27, %c640] : memref<256x1152xbf16, #tpu.memory_space<vmem>>, vector<128x128xbf16>
    %c0_28 = arith.constant 0 : index
    %c1024 = arith.constant 1024 : index
    %50 = vector.load %arg6[%c0_28, %c1024] : memref<256x1152xbf16, #tpu.memory_space<vmem>>, vector<128x128xbf16>
    %cst_29 = arith.constant dense<0.000000e+00> : vector<128x128xf32>
    %51 = tpu.matmul %48, %49, %cst_29 {dimension_numbers = #tpu.dot_dimension_numbers<[1], [1], [0], [0], [0, 0, 1, 0], [], []>} : vector<128x128xbf16>, vector<128x128xbf16>, vector<128x128xf32> -> vector<128x128xf32>
    %cst_30 = arith.constant 0xFF800000 : f32
    %52 = vector.broadcast %cst_30 : f32 to vector<128x128xf32>
    %53 = arith.select %7, %51, %52 : vector<128x128xi1>, vector<128x128xf32>
    %cst_31 = arith.constant dense<0xFF800000> : vector<128xf32>
    %54 = vector.multi_reduction <maximumf>, %53, %cst_31 [1] : vector<128x128xf32> to vector<128xf32>
    %55 = vector.shape_cast %54 : vector<128xf32> to vector<128x1xf32>
    %56 = vector.broadcast %55 : vector<128x1xf32> to vector<128x128xf32>
    %57 = arith.subf %53, %56 : vector<128x128xf32>
    %58 = math.exp %57 : vector<128x128xf32>
    %cst_32 = arith.constant dense<0.000000e+00> : vector<128xf32>
    %59 = vector.multi_reduction <add>, %58, %cst_32 [1] : vector<128x128xf32> to vector<128xf32>
    %60 = vector.shape_cast %59 : vector<128xf32> to vector<128x1xf32>
    %61 = arith.truncf %58 : vector<128x128xf32> to vector<128x128xbf16>
    %cst_33 = arith.constant dense<0.000000e+00> : vector<128x128xf32>
    %62 = tpu.matmul %61, %50, %cst_33 {dimension_numbers = #tpu.dot_dimension_numbers<[1], [0], [0], [1], [0, 0, 1, 1], [], []>} : vector<128x128xbf16>, vector<128x128xbf16>, vector<128x128xf32> -> vector<128x128xf32>
    %63 = tpu.reciprocal %60 {approx = true} : vector<128x1xf32> -> vector<128x1xf32>
    %64 = vector.broadcast %63 : vector<128x1xf32> to vector<128x128xf32>
    %65 = arith.mulf %62, %64 : vector<128x128xf32>
    %66 = arith.truncf %65 : vector<128x128xf32> to vector<128x128xbf16>
    %c0_34 = arith.constant 0 : index
    %c256_35 = arith.constant 256 : index
    %67 = vector.load %arg7[%c0_34, %c256_35] : memref<256x384xbf16, #tpu.memory_space<vmem>>, vector<128x128xbf16>
    tpu.vector_store %arg7[%c0_34, %c256_35], %66 {strides = array<i32>} : memref<256x384xbf16, #tpu.memory_space<vmem>>, vector<128x128xbf16>,
    %c128_36 = arith.constant 128 : index
    %c0_37 = arith.constant 0 : index
    %68 = vector.load %arg6[%c128_36, %c0_37] : memref<256x1152xbf16, #tpu.memory_space<vmem>>, vector<128x128xbf16>
    %c128_38 = arith.constant 128 : index
    %c384_39 = arith.constant 384 : index
    %69 = vector.load %arg6[%c128_38, %c384_39] : memref<256x1152xbf16, #tpu.memory_space<vmem>>, vector<128x128xbf16>
    %c128_40 = arith.constant 128 : index
    %c768_41 = arith.constant 768 : index
    %70 = vector.load %arg6[%c128_40, %c768_41] : memref<256x1152xbf16, #tpu.memory_space<vmem>>, vector<128x128xbf16>
    %cst_42 = arith.constant dense<0.000000e+00> : vector<128x128xf32>
    %71 = tpu.matmul %68, %69, %cst_42 {dimension_numbers = #tpu.dot_dimension_numbers<[1], [1], [0], [0], [0, 0, 1, 0], [], []>} : vector<128x128xbf16>, vector<128x128xbf16>, vector<128x128xf32> -> vector<128x128xf32>
    %cst_43 = arith.constant 0xFF800000 : f32
    %72 = vector.broadcast %cst_43 : f32 to vector<128x128xf32>
    %73 = arith.select %7, %71, %72 : vector<128x128xi1>, vector<128x128xf32>
    %cst_44 = arith.constant dense<0xFF800000> : vector<128xf32>
    %74 = vector.multi_reduction <maximumf>, %73, %cst_44 [1] : vector<128x128xf32> to vector<128xf32>
    %75 = vector.shape_cast %74 : vector<128xf32> to vector<128x1xf32>
    %76 = vector.broadcast %75 : vector<128x1xf32> to vector<128x128xf32>
    %77 = arith.subf %73, %76 : vector<128x128xf32>
    %78 = math.exp %77 : vector<128x128xf32>
    %cst_45 = arith.constant dense<0.000000e+00> : vector<128xf32>
    %79 = vector.multi_reduction <add>, %78, %cst_45 [1] : vector<128x128xf32> to vector<128xf32>
    %80 = vector.shape_cast %79 : vector<128xf32> to vector<128x1xf32>
    %81 = arith.truncf %78 : vector<128x128xf32> to vector<128x128xbf16>
    %cst_46 = arith.constant dense<0.000000e+00> : vector<128x128xf32>
    %82 = tpu.matmul %81, %70, %cst_46 {dimension_numbers = #tpu.dot_dimension_numbers<[1], [0], [0], [1], [0, 0, 1, 1], [], []>} : vector<128x128xbf16>, vector<128x128xbf16>, vector<128x128xf32> -> vector<128x128xf32>
    %83 = tpu.reciprocal %80 {approx = true} : vector<128x1xf32> -> vector<128x1xf32>
    %84 = vector.broadcast %83 : vector<128x1xf32> to vector<128x128xf32>
    %85 = arith.mulf %82, %84 : vector<128x128xf32>
    %86 = arith.truncf %85 : vector<128x128xf32> to vector<128x128xbf16>
    %c128_47 = arith.constant 128 : index
    %c0_48 = arith.constant 0 : index
    %87 = vector.load %arg7[%c128_47, %c0_48] : memref<256x384xbf16, #tpu.memory_space<vmem>>, vector<128x128xbf16>
    tpu.vector_store %arg7[%c128_47, %c0_48], %86 {strides = array<i32>} : memref<256x384xbf16, #tpu.memory_space<vmem>>, vector<128x128xbf16>,
    %c128_49 = arith.constant 128 : index
    %c128_50 = arith.constant 128 : index
    %88 = vector.load %arg6[%c128_49, %c128_50] : memref<256x1152xbf16, #tpu.memory_space<vmem>>, vector<128x128xbf16>
    %c128_51 = arith.constant 128 : index
    %c512_52 = arith.constant 512 : index
    %89 = vector.load %arg6[%c128_51, %c512_52] : memref<256x1152xbf16, #tpu.memory_space<vmem>>, vector<128x128xbf16>
    %c128_53 = arith.constant 128 : index
    %c896_54 = arith.constant 896 : index
    %90 = vector.load %arg6[%c128_53, %c896_54] : memref<256x1152xbf16, #tpu.memory_space<vmem>>, vector<128x128xbf16>
    %cst_55 = arith.constant dense<0.000000e+00> : vector<128x128xf32>
    %91 = tpu.matmul %88, %89, %cst_55 {dimension_numbers = #tpu.dot_dimension_numbers<[1], [1], [0], [0], [0, 0, 1, 0], [], []>} : vector<128x128xbf16>, vector<128x128xbf16>, vector<128x128xf32> -> vector<128x128xf32>
    %cst_56 = arith.constant 0xFF800000 : f32
    %92 = vector.broadcast %cst_56 : f32 to vector<128x128xf32>
    %93 = arith.select %7, %91, %92 : vector<128x128xi1>, vector<128x128xf32>
    %cst_57 = arith.constant dense<0xFF800000> : vector<128xf32>
    %94 = vector.multi_reduction <maximumf>, %93, %cst_57 [1] : vector<128x128xf32> to vector<128xf32>
    %95 = vector.shape_cast %94 : vector<128xf32> to vector<128x1xf32>
    %96 = vector.broadcast %95 : vector<128x1xf32> to vector<128x128xf32>
    %97 = arith.subf %93, %96 : vector<128x128xf32>
    %98 = math.exp %97 : vector<128x128xf32>
    %cst_58 = arith.constant dense<0.000000e+00> : vector<128xf32>
    %99 = vector.multi_reduction <add>, %98, %cst_58 [1] : vector<128x128xf32> to vector<128xf32>
    %100 = vector.shape_cast %99 : vector<128xf32> to vector<128x1xf32>
    %101 = arith.truncf %98 : vector<128x128xf32> to vector<128x128xbf16>
    %cst_59 = arith.constant dense<0.000000e+00> : vector<128x128xf32>
    %102 = tpu.matmul %101, %90, %cst_59 {dimension_numbers = #tpu.dot_dimension_numbers<[1], [0], [0], [1], [0, 0, 1, 1], [], []>} : vector<128x128xbf16>, vector<128x128xbf16>, vector<128x128xf32> -> vector<128x128xf32>
    %103 = tpu.reciprocal %100 {approx = true} : vector<128x1xf32> -> vector<128x1xf32>
    %104 = vector.broadcast %103 : vector<128x1xf32> to vector<128x128xf32>
    %105 = arith.mulf %102, %104 : vector<128x128xf32>
    %106 = arith.truncf %105 : vector<128x128xf32> to vector<128x128xbf16>
    %c128_60 = arith.constant 128 : index
    %c128_61 = arith.constant 128 : index
    %107 = vector.load %arg7[%c128_60, %c128_61] : memref<256x384xbf16, #tpu.memory_space<vmem>>, vector<128x128xbf16>
    tpu.vector_store %arg7[%c128_60, %c128_61], %106 {strides = array<i32>} : memref<256x384xbf16, #tpu.memory_space<vmem>>, vector<128x128xbf16>,
    %c128_62 = arith.constant 128 : index
    %c256_63 = arith.constant 256 : index
    %108 = vector.load %arg6[%c128_62, %c256_63] : memref<256x1152xbf16, #tpu.memory_space<vmem>>, vector<128x128xbf16>
    %c128_64 = arith.constant 128 : index
    %c640_65 = arith.constant 640 : index
    %109 = vector.load %arg6[%c128_64, %c640_65] : memref<256x1152xbf16, #tpu.memory_space<vmem>>, vector<128x128xbf16>
    %c128_66 = arith.constant 128 : index
    %c1024_67 = arith.constant 1024 : index
    %110 = vector.load %arg6[%c128_66, %c1024_67] : memref<256x1152xbf16, #tpu.memory_space<vmem>>, vector<128x128xbf16>
    %cst_68 = arith.constant dense<0.000000e+00> : vector<128x128xf32>
    %111 = tpu.matmul %108, %109, %cst_68 {dimension_numbers = #tpu.dot_dimension_numbers<[1], [1], [0], [0], [0, 0, 1, 0], [], []>} : vector<128x128xbf16>, vector<128x128xbf16>, vector<128x128xf32> -> vector<128x128xf32>
    %cst_69 = arith.constant 0xFF800000 : f32
    %112 = vector.broadcast %cst_69 : f32 to vector<128x128xf32>
    %113 = arith.select %7, %111, %112 : vector<128x128xi1>, vector<128x128xf32>
    %cst_70 = arith.constant dense<0xFF800000> : vector<128xf32>
    %114 = vector.multi_reduction <maximumf>, %113, %cst_70 [1] : vector<128x128xf32> to vector<128xf32>
    %115 = vector.shape_cast %114 : vector<128xf32> to vector<128x1xf32>
    %116 = vector.broadcast %115 : vector<128x1xf32> to vector<128x128xf32>
    %117 = arith.subf %113, %116 : vector<128x128xf32>
    %118 = math.exp %117 : vector<128x128xf32>
    %cst_71 = arith.constant dense<0.000000e+00> : vector<128xf32>
    %119 = vector.multi_reduction <add>, %118, %cst_71 [1] : vector<128x128xf32> to vector<128xf32>
    %120 = vector.shape_cast %119 : vector<128xf32> to vector<128x1xf32>
    %121 = arith.truncf %118 : vector<128x128xf32> to vector<128x128xbf16>
    %cst_72 = arith.constant dense<0.000000e+00> : vector<128x128xf32>
    %122 = tpu.matmul %121, %110, %cst_72 {dimension_numbers = #tpu.dot_dimension_numbers<[1], [0], [0], [1], [0, 0, 1, 1], [], []>} : vector<128x128xbf16>, vector<128x128xbf16>, vector<128x128xf32> -> vector<128x128xf32>
    %123 = tpu.reciprocal %120 {approx = true} : vector<128x1xf32> -> vector<128x1xf32>
    %124 = vector.broadcast %123 : vector<128x1xf32> to vector<128x128xf32>
    %125 = arith.mulf %122, %124 : vector<128x128xf32>
    %126 = arith.truncf %125 : vector<128x128xf32> to vector<128x128xbf16>
    %c128_73 = arith.constant 128 : index
    %c256_74 = arith.constant 256 : index
    %127 = vector.load %arg7[%c128_73, %c256_74] : memref<256x384xbf16, #tpu.memory_space<vmem>>, vector<128x128xbf16>
    tpu.vector_store %arg7[%c128_73, %c256_74], %126 {strides = array<i32>} : memref<256x384xbf16, #tpu.memory_space<vmem>>, vector<128x128xbf16>,
    %c0_75 = arith.constant 0 : index
    %c0_76 = arith.constant 0 : index
    %128 = vector.load %arg7[%c0_75, %c0_76] : memref<256x384xbf16, #tpu.memory_space<vmem>>, vector<256x384xbf16>
    %c0_77 = arith.constant 0 : index
    %c0_78 = arith.constant 0 : index
    %129 = vector.load %arg3[%c0_77, %c0_78] : memref<384x384xbf16, #tpu.memory_space<vmem>>, vector<384x384xbf16>
    %cst_79 = arith.constant dense<0.000000e+00> : vector<256x384xf32>
    %130 = tpu.matmul %128, %129, %cst_79 {dimension_numbers = #tpu.dot_dimension_numbers<[1], [1], [0], [0], [0, 0, 1, 0], [], []>} : vector<256x384xbf16>, vector<384x384xbf16>, vector<256x384xf32> -> vector<256x384xf32>
    %c0_80 = arith.constant 0 : index
    %c0_81 = arith.constant 0 : index
    %131 = vector.load %arg4[%c0_80, %c0_81] : memref<1x384xf32, #tpu.memory_space<vmem>>, vector<1x384xf32>
    %132 = vector.broadcast %131 : vector<1x384xf32> to vector<256x384xf32>
    %133 = arith.addf %130, %132 : vector<256x384xf32>
    %c0_82 = arith.constant 0 : index
    %c0_83 = arith.constant 0 : index
    %134 = vector.load %arg5[%c0_82, %c0_83] : memref<256x384xf32, #tpu.memory_space<vmem>>, vector<256x384xf32>
    tpu.vector_store %arg5[%c0_82, %c0_83], %133 {strides = array<i32>} : memref<256x384xf32, #tpu.memory_space<vmem>>, vector<256x384xf32>,
    return
  }
  func.func @transform_0(%arg0: i32) -> (i32, i32) {
    %c0_i32 = arith.constant 0 : i32
    %c0_i32_0 = arith.constant 0 : i32
    return %arg0, %c0_i32 : i32, i32
  }
  func.func @transform_1(%arg0: i32) -> (i32, i32) {
    %c0_i32 = arith.constant 0 : i32
    %c0_i32_0 = arith.constant 0 : i32
    %c0_i32_1 = arith.constant 0 : i32
    return %c0_i32, %c0_i32_0 : i32, i32
  }
  func.func @transform_2(%arg0: i32) -> (i32, i32) {
    %c0_i32 = arith.constant 0 : i32
    %c0_i32_0 = arith.constant 0 : i32
    %c0_i32_1 = arith.constant 0 : i32
    return %c0_i32, %c0_i32_0 : i32, i32
  }
  func.func @transform_3(%arg0: i32) -> (i32, i32) {
    %c0_i32 = arith.constant 0 : i32
    %c0_i32_0 = arith.constant 0 : i32
    %c0_i32_1 = arith.constant 0 : i32
    return %c0_i32, %c0_i32_0 : i32, i32
  }
  func.func @transform_4(%arg0: i32) -> (i32, i32) {
    %c0_i32 = arith.constant 0 : i32
    %c0_i32_0 = arith.constant 0 : i32
    return %arg0, %c0_i32 : i32, i32
  }
}

</mosaic_0001>

<bundles_post_ra>
// kernel: tpu_custom_call.1
= control target key start
LH: loop header
LB: loop body
LE: loop exit
PB: predicated region body
PF: predicated region fallthrough
CT: control target
= control target key end

     0   :  { %9 = vsyncpa [#allocation5], 0  ;;  %s13494_s0 = inlined_call_operand.hbm [shape: bf16[256,384], index: 0, kind: input, shape index: {}]   ;;  %s13495_s1 = inlined_call_operand.hbm [shape: bf16[384,1152], index: 1, kind: input, shape index: {}]   ;;  %s13496_s2 = inlined_call_operand.hbm [shape: bf16[384,384], index: 2, kind: input, shape index: {}]   ;;  %s13497_s3 = inlined_call_operand.vmem [shape: f32[1,384], index: 3, kind: input, shape index: {}]   ;;  %s13498_s4 = inlined_call_operand.hbm [shape: f32[256,384], index: 4, kind: output, shape index: {}]  }
   0x1   :  { %10 = vsyncpa [#allocation8], 0 }
   0x2   :  { %11 = vsyncpa [#allocation6], 0  ;;  %s10342_s15 = smov [#allocation7]   ;;  %s10248_s19 = scalar_lea.hbm %s13495_s1, 27648 }
   0x3   :  { %s29_s16 = sshll.u32 %s10342_s15, 4  ;;  %p10249_p0 = scmp.ne.s32.totalorder %s13495_s1, %s10248_s19  ;;  %s30_s16 = int_to_ptr.vmem [resolvable:$true] %s29_s16 }
   0x4   :  { %p10252_p1 = scmp.lt.u32.totalorder %s10248_s19, %s13495_s1 }
   0x6   :  { %p10254_p2 = pnand %p10252_p1, %p10249_p0 }
   0x8   :  { %10257 = shalt.err (!%p10254_p2)
}
   0x9   :  { %s10258_s24 = scalar_lea.vmem %s30_s16, 27648  ;;  %p10263_p4 = scmp.lt.s32.totalorder %s30_s16, %s30_s16 }
   0xa   :  { %p10259_p3 = scmp.ne.s32.totalorder %s30_s16, %s10258_s24  ;;  %p10264_p5 = scmp.lt.s32.totalorder %s10258_s24, %s10258_s24 }
   0xc   :  { %p10265_p6 = por %p10264_p5, %p10263_p4 }
   0xe   :  { %p10266_p7 = pnand %p10265_p6, %p10259_p3 }
  0x10   :  { %10269 = shalt.err (!%p10266_p7)
}
  0x11   :  { %s10343_s25 = smov 576   ;;  %s10344_s26 = smov 36  }
  0x12   :  { %35 = dma.hbm_to_vmem [thread:$0]  %s13495_s1, 27648, %s30_s16, [#allocation8], %s10343_s25, %s10343_s25, %s10344_s26  }
  0x13   :  { %s10345_s29 = smov [#allocation4]   ;;  %s10270_s7 = scalar_lea.hbm %s13494_s0, 6144 }
  0x14   :  { %s17_s30 = sshll.u32 %s10345_s29, 4  ;;  %p10271_p8 = scmp.ne.s32.totalorder %s13494_s0, %s10270_s7  ;;  %s18_s30 = int_to_ptr.vmem [resolvable:$true] %s17_s30 }
  0x15   :  { %p10274_p9 = scmp.lt.u32.totalorder %s10270_s7, %s13494_s0 }
  0x17   :  { %p10276_p10 = pnand %p10274_p9, %p10271_p8 }
  0x19   :  { %10279 = shalt.err (!%p10276_p10)
}
  0x1a   :  { %s10280_s12 = scalar_lea.vmem %s18_s30, 6144  ;;  %p10285_p12 = scmp.lt.s32.totalorder %s18_s30, %s18_s30 }
  0x1b   :  { %p10281_p11 = scmp.ne.s32.totalorder %s18_s30, %s10280_s12  ;;  %p10286_p13 = scmp.lt.s32.totalorder %s10280_s12, %s10280_s12 }
  0x1d   :  { %p10287_p0 = por %p10286_p13, %p10285_p12 }
  0x1f   :  { %p10288_p1 = pnand %p10287_p0, %p10281_p11 }
  0x21   :  { %10291 = shalt.err (!%p10288_p1)
}
  0x22   :  { %s10346_s1 = smov 192   ;;  %s10347_s13 = smov 12  }
  0x23   :  { %23 = dma.hbm_to_vmem [thread:$0]  %s13494_s0, 6144, %s18_s30, [#allocation5], %s10346_s1, %s10346_s1, %s10347_s13  }
  0x24   :  { %s10348_s16 = smov [#allocation9]   ;;  %s10292_s20 = scalar_lea.hbm %s13496_s2, 9216 }
  0x25   :  { %s41_s17 = sshll.u32 %s10348_s16, 4  ;;  %p10293_p2 = scmp.ne.s32.totalorder %s13496_s2, %s10292_s20  ;;  %s42_s17 = int_to_ptr.vmem [resolvable:$true] %s41_s17 }
  0x26   :  { %p10296_p3 = scmp.lt.u32.totalorder %s10292_s20, %s13496_s2 }
  0x28   :  { %p10298_p4 = pnand %p10296_p3, %p10293_p2 }
  0x2a   :  { %10301 = shalt.err (!%p10298_p4)
}
  0x2b   :  { %s10302_s25 = scalar_lea.vmem %s42_s17, 9216  ;;  %p10307_p6 = scmp.lt.s32.totalorder %s42_s17, %s42_s17 }
  0x2c   :  { %p10303_p5 = scmp.ne.s32.totalorder %s42_s17, %s10302_s25  ;;  %p10308_p7 = scmp.lt.s32.totalorder %s10302_s25, %s10302_s25 }
  0x2e   :  { %p10309_p8 = por %p10308_p7, %p10307_p6 }
  0x30   :  { %p10310_p9 = pnand %p10309_p8, %p10303_p5 }
  0x32   :  { %10313 = shalt.err (!%p10310_p9)
}
  0x33   :  { %47 = dma.hbm_to_vmem [thread:$0]  %s13496_s2, 9216, %s42_s17, [#allocation8], %s10346_s1, %s10346_s1, %s10347_s13  }
  0x34   :  { %10336 = dma.done.wait [#allocation5], 6144  }
  0x35   :  { %10337 = vsyncadd [#allocation5], 4294961152 }
  0x36   :  { %10338 = dma.done.wait [#allocation8], 36864  }
  0x37   :  { %10339 = vsyncadd [#allocation8], 4294930432  ;;  %v9335_v0 = vld [vmem:[#allocation7 + $0x4] ss:$36 sps:$4 sm:$0xff]   ;;  %v9338_v2 = vld [vmem:[#allocation7 + $0x4c] ss:$36 sps:$4 sm:$0xff]  }
  0x38   :  { %v9337_v1 = vld [vmem:[#allocation7] ss:$36 sps:$4 sm:$0xff]   ;;  %1724 = vmatprep.subr.bf16.mxu0 %v9335_v0  ;;  %8908 = vmatprep.subr.bf16.mxu1 %v9335_v0  ;;  %v9340_v3 = vld [vmem:[#allocation7 + $0x48] ss:$36 sps:$4 sm:$0xff]   ;;  %v9341_v4 = vld [vmem:[#allocation7 + $0x94] ss:$36 sps:$4 sm:$0xff]  }
  0x39   :  { %1725 = vmatpush1.bf16.msra.mxu0 %v9337_v1  ;;  %8924 = vmatpush1.bf16.msra.mxu1 %v9337_v1  ;;  %v9343_v5 = vld [vmem:[#allocation7 + $0x90] ss:$36 sps:$4 sm:$0xff]   ;;  %v9344_v6 = vld [vmem:[#allocation7 + $0xdc] ss:$36 sps:$4 sm:$0xff]   ;;  %v9347_v8 = vld [vmem:[#allocation7 + $0x124] ss:$36 sps:$4 sm:$0xff]  }
  0x3a   :  { %1726 = vmatprep.subr.bf16.mxu0 %v9338_v2  ;;  %8909 = vmatprep.subr.bf16.mxu1 %v9338_v2  ;;  %v9346_v7 = vld [vmem:[#allocation7 + $0xd8] ss:$36 sps:$4 sm:$0xff]   ;;  %v9349_v9 = vld [vmem:[#allocation7 + $0x120] ss:$36 sps:$4 sm:$0xff]   ;;  %v9350_v10 = vld [vmem:[#allocation7 + $0x16c] ss:$36 sps:$4 sm:$0xff]  }
  0x3b   :  { %v9352_v11 = vld [vmem:[#allocation7 + $0x168] ss:$36 sps:$4 sm:$0xff]   ;;  %v9353_v12 = vld [vmem:[#allocation7 + $0x1b4] ss:$36 sps:$4 sm:$0xff]   ;;  %v10414_v13 = vld [vmem:[#allocation4 + $0x4] ss:$12 sps:$4 sm:$0xff]  }
  0x3c   :  { %v9355_v14 = vld [vmem:[#allocation7 + $0x1b0] ss:$36 sps:$4 sm:$0xff]   ;;  %v9356_v16 = vld [vmem:[#allocation7 + $0x1fc] ss:$36 sps:$4 sm:$0xff]   ;;  %1756 = vmatprep.mubr.bf16.mxu0 %v10414_v13  ;;  %v9359_v18 = vld [vmem:[#allocation7 + $0x244] ss:$36 sps:$4 sm:$0xff]  }
  0x3d   :  { %1727 = vmatpush1.bf16.msra.mxu0 %v9340_v3  ;;  %8925 = vmatpush1.bf16.msra.mxu1 %v9340_v3  ;;  %v9385_v15 = vld [vmem:[#allocation4 + $0xc4] ss:$12 sps:$4 sm:$0xff]   ;;  %v9358_v17 = vld [vmem:[#allocation7 + $0x1f8] ss:$36 sps:$4 sm:$0xff]   ;;  %v9364_v21 = vld [vmem:[#allocation7 + $0x288] ss:$36 sps:$4 sm:$0xff]  }
  0x3e   :  { %1728 = vmatprep.subr.bf16.mxu0 %v9341_v4  ;;  %8910 = vmatprep.subr.bf16.mxu1 %v9341_v4  ;;  %v9361_v19 = vld [vmem:[#allocation7 + $0x240] ss:$36 sps:$4 sm:$0xff]   ;;  %v9362_v20 = vld [vmem:[#allocation7 + $0x28c] ss:$36 sps:$4 sm:$0xff]   ;;  %v9365_v22 = vld [vmem:[#allocation7 + $0x2d4] ss:$36 sps:$4 sm:$0xff]  }
  0x3f   :  { %1836 = vmatprep.mubr.bf16.mxu1 %v9385_v15  ;;  %v9367_v23 = vld [vmem:[#allocation7 + $0x2d0] ss:$36 sps:$4 sm:$0xff]   ;;  %v9368_v24 = vld [vmem:[#allocation7 + $0x31c] ss:$36 sps:$4 sm:$0xff]   ;;  %v9371_v26 = vld [vmem:[#allocation7 + $0x364] ss:$36 sps:$4 sm:$0xff]  }
  0x40   :  { %v9370_v25 = vld [vmem:[#allocation7 + $0x318] ss:$36 sps:$4 sm:$0xff]   ;;  %v9373_v27 = vld [vmem:[#allocation7 + $0x360] ss:$36 sps:$4 sm:$0xff]   ;;  %v9374_v28 = vld [vmem:[#allocation7 + $0x3ac] ss:$36 sps:$4 sm:$0xff]  }
  0x41   :  { %1729 = vmatpush1.bf16.msra.mxu0 %v9343_v5  ;;  %8926 = vmatpush1.bf16.msra.mxu1 %v9343_v5  ;;  %v9376_v29 = vld [vmem:[#allocation7 + $0x3a8] ss:$36 sps:$4 sm:$0xff]   ;;  %v9377_v30 = vld [vmem:[#allocation7 + $0x3f4] ss:$36 sps:$4 sm:$0xff]   ;;  %v9380_v32 = vld [vmem:[#allocation7 + $0x43c] ss:$36 sps:$4 sm:$0xff]  }
  0x42   :  { %1730 = vmatprep.subr.bf16.mxu0 %v9344_v6  ;;  %8911 = vmatprep.subr.bf16.mxu1 %v9344_v6  ;;  %v9379_v31 = vld [vmem:[#allocation7 + $0x3f0] ss:$36 sps:$4 sm:$0xff]   ;;  %v9382_v33 = vld [vmem:[#allocation7 + $0x438] ss:$36 sps:$4 sm:$0xff]   ;;  %v9439_v35 = vld [vmem:[#allocation7 + $0x484] ss:$36 sps:$4 sm:$0xff]  }
  0x43   :  { %v9391_v34 = vld [vmem:[#allocation7 + $0xc] ss:$36 sps:$4 sm:$0xff]   ;;  %v9394_v39 = vld [vmem:[#allocation7 + $0x54] ss:$36 sps:$4 sm:$0xff]   ;;  %v10419_v40 = vld [vmem:[#allocation4 + $0x1c] ss:$12 sps:$4 sm:$0xff]  }
  0x44   :  { %v10417_v36 = vld [vmem:[#allocation4] ss:$12 sps:$4 sm:$0xff]   ;;  %v9397_v41 = vld [vmem:[#allocation4 + $0xdc] ss:$12 sps:$4 sm:$0xff]   ;;  %v9392_v44 = vld [vmem:[#allocation7 + $0x50] ss:$36 sps:$4 sm:$0xff]  }
  0x45   :  { %1731 = vmatpush1.bf16.msra.mxu0 %v9346_v7  ;;  %8927 = vmatpush1.bf16.msra.mxu1 %v9346_v7  ;;  %v9388_v37 = vld [vmem:[#allocation4 + $0xc0] ss:$12 sps:$4 sm:$0xff]   ;;  %v10423_v45 = vld [vmem:[#allocation4 + $0x18] ss:$12 sps:$4 sm:$0xff]   ;;  %v9455_v55 = vld [vmem:[#allocation7 + $0x510] ss:$36 sps:$4 sm:$0xff]  }
  0x46   :  { %1732 = vmatprep.subr.bf16.mxu0 %v9347_v8  ;;  %8912 = vmatprep.subr.bf16.mxu1 %v9347_v8  ;;  %v9389_v38 = vld [vmem:[#allocation7 + $0x8] ss:$36 sps:$4 sm:$0xff]   ;;  %v9437_v42 = vld [vmem:[#allocation7 + $0x480] ss:$36 sps:$4 sm:$0xff]   ;;  %v9401_v49 = vld [vmem:[#allocation7 + $0x98] ss:$36 sps:$4 sm:$0xff]  }
  0x47   :  { %v9445_v43 = vld [vmem:[#allocation7 + $0x4cc] ss:$36 sps:$4 sm:$0xff]   ;;  %v9403_v46 = vld [vmem:[#allocation7 + $0x9c] ss:$36 sps:$4 sm:$0xff]   ;;  %v9400_v48 = vld [vmem:[#allocation4 + $0xd8] ss:$12 sps:$4 sm:$0xff]  }
  0x48   :  { %v9443_v47 = vld [vmem:[#allocation7 + $0x4c8] ss:$36 sps:$4 sm:$0xff]   ;;  %v10425_v51 = vld [vmem:[#allocation4 + $0x34] ss:$12 sps:$4 sm:$0xff]   ;;  %v10429_v57 = vld [vmem:[#allocation4 + $0x30] ss:$12 sps:$4 sm:$0xff]  }
  0x49   :  { %1733 = vmatpush1.bf16.msra.mxu0 %v9349_v9  ;;  %8928 = vmatpush1.bf16.msra.mxu1 %v9349_v9  ;;  %v9406_v50 = vld [vmem:[#allocation7 + $0xe4] ss:$36 sps:$4 sm:$0xff]   ;;  %v9409_v52 = vld [vmem:[#allocation4 + $0xf4] ss:$12 sps:$4 sm:$0xff]   ;;  %v9415_v58 = vld [vmem:[#allocation7 + $0x12c] ss:$36 sps:$4 sm:$0xff]  }
  0x4a   :  { %1734 = vmatprep.subr.bf16.mxu0 %v9350_v10  ;;  %8913 = vmatprep.subr.bf16.mxu1 %v9350_v10  ;;  %v9457_v53 = vld [vmem:[#allocation7 + $0x514] ss:$36 sps:$4 sm:$0xff]   ;;  %v9404_v54 = vld [vmem:[#allocation7 + $0xe0] ss:$36 sps:$4 sm:$0xff]   ;;  %v9412_v59 = vld [vmem:[#allocation4 + $0xf0] ss:$12 sps:$4 sm:$0xff]  }
  0x4b   :  { %v9463_v56 = vld [vmem:[#allocation7 + $0x55c] ss:$36 sps:$4 sm:$0xff]   ;;  %v9413_v60 = vld [vmem:[#allocation7 + $0x128] ss:$36 sps:$4 sm:$0xff]   ;;  %v9418_v61 = vld [vmem:[#allocation7 + $0x174] ss:$36 sps:$4 sm:$0xff]  }
  0x4c   :  { %v10431_v62 = vld [vmem:[#allocation4 + $0x4c] ss:$12 sps:$4 sm:$0xff]   ;;  %v9475_v1 = vld [vmem:[#allocation7 + $0x5a4] ss:$36 sps:$4 sm:$0xff]   ;;  %v9416_v2 = vld [vmem:[#allocation7 + $0x170] ss:$36 sps:$4 sm:$0xff]  }
  0x4d   :  { %1735 = vmatpush1.bf16.msra.mxu0 %v9352_v11  ;;  %8929 = vmatpush1.bf16.msra.mxu1 %v9352_v11  ;;  %v9421_v63 = vld [vmem:[#allocation4 + $0x10c] ss:$12 sps:$4 sm:$0xff]   ;;  %v10435_v3 = vld [vmem:[#allocation4 + $0x48] ss:$12 sps:$4 sm:$0xff]   ;;  %v9427_v4 = vld [vmem:[#allocation7 + $0x1bc] ss:$36 sps:$4 sm:$0xff]  }
  0x4e   :  { %1736 = vmatprep.subr.bf16.mxu0 %v9353_v12  ;;  %8914 = vmatprep.subr.bf16.mxu1 %v9353_v12  ;;  %v9461_v0 = vld [vmem:[#allocation7 + $0x558] ss:$36 sps:$4 sm:$0xff]   ;;  %v9424_v5 = vld [vmem:[#allocation4 + $0x108] ss:$12 sps:$4 sm:$0xff]   ;;  %v9473_v6 = vld [vmem:[#allocation7 + $0x5a0] ss:$36 sps:$4 sm:$0xff]  }
  0x4f   :  { %v9425_v7 = vld [vmem:[#allocation7 + $0x1b8] ss:$36 sps:$4 sm:$0xff]   ;;  %v9430_v8 = vld [vmem:[#allocation7 + $0x204] ss:$36 sps:$4 sm:$0xff]   ;;  %v9481_v11 = vld [vmem:[#allocation7 + $0x5ec] ss:$36 sps:$4 sm:$0xff]  }
  0x50   :  { %v10437_v9 = vld [vmem:[#allocation4 + $0x64] ss:$12 sps:$4 sm:$0xff]   ;;  %v9479_v12 = vld [vmem:[#allocation7 + $0x5e8] ss:$36 sps:$4 sm:$0xff]   ;;  %v9493_v15 = vld [vmem:[#allocation7 + $0x634] ss:$36 sps:$4 sm:$0xff]  }
  0x51   :  { %1737 = vmatpush1.bf16.msra.mxu0 %v9355_v14  ;;  %8930 = vmatpush1.bf16.msra.mxu1 %v9355_v14  ;;  %v10439_v10 = vld [vmem:[#allocation4 + $0x124] ss:$12 sps:$4 sm:$0xff]  }
  0x52   :  { %1738 = vmatprep.subr.bf16.mxu0 %v9356_v16  ;;  %8915 = vmatprep.subr.bf16.mxu1 %v9356_v16  ;;  %v9428_v14 = vld [vmem:[#allocation7 + $0x200] ss:$36 sps:$4 sm:$0xff]  }
  0x53   :  { %v10444_v16 = vld [vmem:[#allocation4 + $0x60] ss:$12 sps:$4 sm:$0xff]  }
  0x55   :  { %1739 = vmatpush1.bf16.msra.mxu0 %v9358_v17  ;;  %8931 = vmatpush1.bf16.msra.mxu1 %v9358_v17  ;;  %v9442_v17 = vld [vmem:[#allocation7 + $0x24c] ss:$36 sps:$4 sm:$0xff]  }
  0x56   :  { %1740 = vmatprep.subr.bf16.mxu0 %v9359_v18  ;;  %8916 = vmatprep.subr.bf16.mxu1 %v9359_v18  ;;  %v10446_v18 = vld [vmem:[#allocation4 + $0x120] ss:$12 sps:$4 sm:$0xff]  }
  0x59   :  { %1741 = vmatpush1.bf16.msra.mxu0 %v9361_v19  ;;  %8932 = vmatpush1.bf16.msra.mxu1 %v9361_v19  ;;  %v9440_v19 = vld [vmem:[#allocation7 + $0x248] ss:$36 sps:$4 sm:$0xff]  }
  0x5a   :  { %1742 = vmatprep.subr.bf16.mxu0 %v9362_v20  ;;  %8917 = vmatprep.subr.bf16.mxu1 %v9362_v20  ;;  %v9448_v20 = vld [vmem:[#allocation7 + $0x294] ss:$36 sps:$4 sm:$0xff]  }
  0x5d   :  { %1743 = vmatpush1.bf16.msra.mxu0 %v9364_v21  ;;  %8933 = vmatpush1.bf16.msra.mxu1 %v9364_v21  ;;  %v10448_v21 = vld [vmem:[#allocation4 + $0x7c] ss:$12 sps:$4 sm:$0xff]  }
  0x5e   :  { %1744 = vmatprep.subr.bf16.mxu0 %v9365_v22  ;;  %8918 = vmatprep.subr.bf16.mxu1 %v9365_v22  ;;  %v10450_v22 = vld [vmem:[#allocation4 + $0x13c] ss:$12 sps:$4 sm:$0xff]  }
  0x61   :  { %1745 = vmatpush1.bf16.msra.mxu0 %v9367_v23  ;;  %8934 = vmatpush1.bf16.msra.mxu1 %v9367_v23  ;;  %v9491_v23 = vld [vmem:[#allocation7 + $0x630] ss:$36 sps:$4 sm:$0xff]  }
  0x62   :  { %1746 = vmatprep.subr.bf16.mxu0 %v9368_v24  ;;  %8919 = vmatprep.subr.bf16.mxu1 %v9368_v24  ;;  %v9499_v24 = vld [vmem:[#allocation7 + $0x67c] ss:$36 sps:$4 sm:$0xff]  }
  0x65   :  { %1747 = vmatpush1.bf16.msra.mxu0 %v9370_v25  ;;  %8935 = vmatpush1.bf16.msra.mxu1 %v9370_v25  ;;  %v9446_v25 = vld [vmem:[#allocation7 + $0x290] ss:$36 sps:$4 sm:$0xff]  }
  0x66   :  { %1748 = vmatprep.subr.bf16.mxu0 %v9371_v26  ;;  %8920 = vmatprep.subr.bf16.mxu1 %v9371_v26  ;;  %v10456_v26 = vld [vmem:[#allocation4 + $0x78] ss:$12 sps:$4 sm:$0xff]  }
  0x69   :  { %1749 = vmatpush1.bf16.msra.mxu0 %v9373_v27  ;;  %8936 = vmatpush1.bf16.msra.mxu1 %v9373_v27  ;;  %v9460_v27 = vld [vmem:[#allocation7 + $0x2dc] ss:$36 sps:$4 sm:$0xff]  }
  0x6a   :  { %1750 = vmatprep.subr.bf16.mxu0 %v9374_v28  ;;  %8921 = vmatprep.subr.bf16.mxu1 %v9374_v28  ;;  %v9497_v28 = vld [vmem:[#allocation7 + $0x678] ss:$36 sps:$4 sm:$0xff]  }
  0x6d   :  { %1751 = vmatpush1.bf16.msra.mxu0 %v9376_v29  ;;  %8937 = vmatpush1.bf16.msra.mxu1 %v9376_v29  ;;  %v10458_v29 = vld [vmem:[#allocation4 + $0x138] ss:$12 sps:$4 sm:$0xff]  }
  0x6e   :  { %1752 = vmatprep.subr.bf16.mxu0 %v9377_v30  ;;  %8922 = vmatprep.subr.bf16.mxu1 %v9377_v30  ;;  %v9458_v30 = vld [vmem:[#allocation7 + $0x2d8] ss:$36 sps:$4 sm:$0xff]  }
  0x71   :  { %1753 = vmatpush1.bf16.msra.mxu0 %v9379_v31  ;;  %8938 = vmatpush1.bf16.msra.mxu1 %v9379_v31  ;;  %v9466_v31 = vld [vmem:[#allocation7 + $0x324] ss:$36 sps:$4 sm:$0xff]  }
  0x72   :  { %1754 = vmatprep.subr.bf16.mxu0 %v9380_v32  ;;  %8923 = vmatprep.subr.bf16.mxu1 %v9380_v32  ;;  %v10460_v32 = vld [vmem:[#allocation4 + $0x94] ss:$12 sps:$4 sm:$0xff]  }
  0x75   :  { %1755 = vmatpush1.bf16.msra.mxu0 %v9382_v33  ;;  %8939 = vmatpush1.bf16.msra.mxu1 %v9382_v33  ;;  %v10462_v33 = vld [vmem:[#allocation4 + $0x154] ss:$12 sps:$4 sm:$0xff]  }
  0x76   :  { %2110 = vmatprep.subr.bf16.mxu1 %v9391_v34  ;;  %1917 = vmatprep.subr.bf16.mxu0 %v9439_v35  ;;  %v9522_v34 = vld [vmem:[#allocation7 + $0x14] ss:$36 sps:$4 sm:$0xff]   ;;  %v9464_v35 = vld [vmem:[#allocation7 + $0x320] ss:$36 sps:$4 sm:$0xff]  }
  0x78   :  { %1757 = vmatmul.mubr.bf16.vlgmr.msra.gmra.mrb[0].mxu0 %v10417_v36  ;;  %1837 = vmatmul.mubr.bf16.vlgmr.msra.gmra.mrb[0].mxu1 %v9388_v37  ;;  %v10468_v37 = vld [vmem:[#allocation4 + $0x90] ss:$12 sps:$4 sm:$0xff]  }
  0x79   :  { %2111 = vmatpush1.bf16.msra.mxu1 %v9389_v38  ;;  %1766 = vmatprep.mubr.bf16.mxu0 %v10419_v40  ;;  %v9478_v38 = vld [vmem:[#allocation7 + $0x36c] ss:$36 sps:$4 sm:$0xff]  }
  0x7a   :  { %2112 = vmatprep.subr.bf16.mxu1 %v9394_v39  ;;  %1846 = vmatprep.mubr.bf16.mxu1 %v9397_v41  ;;  %v10470_v39 = vld [vmem:[#allocation4 + $0x150] ss:$12 sps:$4 sm:$0xff]   ;;  %v9476_v41 = vld [vmem:[#allocation7 + $0x368] ss:$36 sps:$4 sm:$0xff]  }
  0x7b   :  { %1918 = vmatpush1.bf16.msra.mxu0 %v9437_v42  ;;  %v10472_v42 = vld [vmem:[#allocation4 + $0xac] ss:$12 sps:$4 sm:$0xff]  }
  0x7c   :  { %1919 = vmatprep.subr.bf16.mxu0 %v9445_v43  ;;  %v9484_v43 = vld [vmem:[#allocation7 + $0x3b4] ss:$36 sps:$4 sm:$0xff]  }
  0x7d   :  { %2113 = vmatpush1.bf16.msra.mxu1 %v9392_v44  ;;  %v10474_v44 = vld [vmem:[#allocation4 + $0x16c] ss:$12 sps:$4 sm:$0xff]  }
  0x7e   :  { %2114 = vmatprep.subr.bf16.mxu1 %v9403_v46  ;;  %v9482_v46 = vld [vmem:[#allocation7 + $0x3b0] ss:$36 sps:$4 sm:$0xff]  }
  0x7f   :  { %1920 = vmatpush1.bf16.msra.mxu0 %v9443_v47  ;;  %v9496_v47 = vld [vmem:[#allocation7 + $0x3fc] ss:$36 sps:$4 sm:$0xff]  }
  0x80   :  { %1767 = vmatmul.mubr.bf16.gmra.mrb[4].mxu0 %v10423_v45  ;;  %1847 = vmatmul.mubr.bf16.gmra.mrb[4].mxu1 %v9400_v48  ;;  %v10480_v48 = vld [vmem:[#allocation4 + $0xa8] ss:$12 sps:$4 sm:$0xff]  }
  0x81   :  { %2115 = vmatpush1.bf16.msra.mxu1 %v9401_v49  ;;  %1776 = vmatprep.mubr.bf16.mxu0 %v10425_v51  ;;  %v10482_v49 = vld [vmem:[#allocation4 + $0x168] ss:$12 sps:$4 sm:$0xff]  }
  0x82   :  { %2116 = vmatprep.subr.bf16.mxu1 %v9406_v50  ;;  %1856 = vmatprep.mubr.bf16.mxu1 %v9409_v52  ;;  %v9494_v50 = vld [vmem:[#allocation7 + $0x3f8] ss:$36 sps:$4 sm:$0xff]   ;;  %v9502_v52 = vld [vmem:[#allocation7 + $0x444] ss:$36 sps:$4 sm:$0xff]  }
  0x83   :  { %1921 = vmatprep.subr.bf16.mxu0 %v9457_v53  ;;  %v9500_v53 = vld [vmem:[#allocation7 + $0x440] ss:$36 sps:$4 sm:$0xff]  }
  0x84   :  { %1922 = vmatpush1.bf16.msra.mxu0 %v9455_v55  ;;  %v9508_v55 = vld [vmem:[#allocation7 + $0x48c] ss:$36 sps:$4 sm:$0xff]  }
  0x85   :  { %2117 = vmatpush1.bf16.msra.mxu1 %v9404_v54  ;;  %1923 = vmatprep.subr.bf16.mxu0 %v9463_v56  ;;  %v13504_v54 = vmov 0   ;;  %v10488_v56 = vld [vmem:[#allocation4 + $0x8] ss:$12 sps:$4 sm:$0xff]  }
  0x86   :  { %2118 = vmatprep.subr.bf16.mxu1 %v9415_v58  ;;  %v9506_v58 = vld [vmem:[#allocation7 + $0x488] ss:$36 sps:$4 sm:$0xff]  }
  0x88   :  { %1777 = vmatmul.mubr.bf16.gmra.mrb[8].mxu0 %v10429_v57  ;;  %1857 = vmatmul.mubr.bf16.gmra.mrb[8].mxu1 %v9412_v59  ;;  %v9520_v59 = vld [vmem:[#allocation7 + $0x10] ss:$36 sps:$4 sm:$0xff]  }
  0x89   :  { %2119 = vmatpush1.bf16.msra.mxu1 %v9413_v60  ;;  %1786 = vmatprep.mubr.bf16.mxu0 %v10431_v62  ;;  %v9513_v60 = vld [vmem:[#allocation7 + $0x4d4] ss:$36 sps:$4 sm:$0xff]  }
  0x8a   :  { %2120 = vmatprep.subr.bf16.mxu1 %v9418_v61  ;;  %1866 = vmatprep.mubr.bf16.mxu1 %v9421_v63  ;;  %v9529_v61 = vld [vmem:[#allocation7 + $0x5c] ss:$36 sps:$4 sm:$0xff]   ;;  %v9511_v63 = vld [vmem:[#allocation7 + $0x4d0] ss:$36 sps:$4 sm:$0xff]  }
  0x8b   :  { %1924 = vmatpush1.bf16.msra.mxu0 %v9461_v0  ;;  %v9527_v0 = vld [vmem:[#allocation7 + $0x58] ss:$36 sps:$4 sm:$0xff]  }
  0x8c   :  { %1925 = vmatprep.subr.bf16.mxu0 %v9475_v1  ;;  %v9518_v1 = vld [vmem:[#allocation7 + $0x51c] ss:$36 sps:$4 sm:$0xff]  }
  0x8d   :  { %2121 = vmatpush1.bf16.msra.mxu1 %v9416_v2  ;;  %v10494_v2 = vld [vmem:[#allocation4 + $0x20] ss:$12 sps:$4 sm:$0xff]  }
  0x8e   :  { %2122 = vmatprep.subr.bf16.mxu1 %v9427_v4  ;;  %v9516_v4 = vld [vmem:[#allocation7 + $0x518] ss:$36 sps:$4 sm:$0xff]  }
  0x8f   :  { %1926 = vmatpush1.bf16.msra.mxu0 %v9473_v6  ;;  %v9526_v6 = vld [vmem:[#allocation7 + $0x564] ss:$36 sps:$4 sm:$0xff]  }
  0x90   :  { %1787 = vmatmul.mubr.bf16.gmra.mrb[12].mxu0 %v10435_v3  ;;  %1867 = vmatmul.mubr.bf16.gmra.mrb[12].mxu1 %v9424_v5  ;;  %v9531_v5 = vld [vmem:[#allocation7 + $0xa0] ss:$36 sps:$4 sm:$0xff]  }
  0x91   :  { %2123 = vmatpush1.bf16.msra.mxu1 %v9425_v7  ;;  %1796 = vmatprep.mubr.bf16.mxu0 %v10437_v9  ;;  %v9536_v7 = vld [vmem:[#allocation7 + $0xec] ss:$36 sps:$4 sm:$0xff]  }
  0x92   :  { %2124 = vmatprep.subr.bf16.mxu1 %v9430_v8  ;;  %1876 = vmatprep.mubr.bf16.mxu1 %v10439_v10  ;;  %v9540_v8 = vld [vmem:[#allocation7 + $0x134] ss:$36 sps:$4 sm:$0xff]  }
  0x93   :  { %1927 = vmatprep.subr.bf16.mxu0 %v9481_v11  ;;  %v9543_v11 = vld [vmem:[#allocation7 + $0x5ac] ss:$36 sps:$4 sm:$0xff]  }
  0x94   :  { %1928 = vmatpush1.bf16.msra.mxu0 %v9479_v12  ;;  %v10500_v12 = vld [vmem:[#allocation4 + $0x38] ss:$12 sps:$4 sm:$0xff]  }
  0x95   :  { %2125 = vmatpush1.bf16.msra.mxu1 %v9428_v14  ;;  %1929 = vmatprep.subr.bf16.mxu0 %v9493_v15  ;;  %v9538_v14 = vld [vmem:[#allocation7 + $0x130] ss:$36 sps:$4 sm:$0xff]   ;;  %v9541_v15 = vld [vmem:[#allocation7 + $0x5a8] ss:$36 sps:$4 sm:$0xff]  }
  0x96   :  { %2126 = vmatprep.subr.bf16.mxu1 %v9442_v17  ;;  %v9546_v17 = vld [vmem:[#allocation7 + $0x17c] ss:$36 sps:$4 sm:$0xff]  }
  0x98   :  { %1797 = vmatmul.mubr.bf16.gmra.mrb[16].mxu0 %v10444_v16  ;;  %1877 = vmatmul.mubr.bf16.gmra.mrb[16].mxu1 %v10446_v18 }
  0x99   :  { %2127 = vmatpush1.bf16.msra.mxu1 %v9440_v19  ;;  %1806 = vmatprep.mubr.bf16.mxu0 %v10448_v21  ;;  %v9560_v19 = vld [vmem:[#allocation7 + $0x5f4] ss:$36 sps:$4 sm:$0xff]  }
  0x9a   :  { %2128 = vmatprep.subr.bf16.mxu1 %v9448_v20  ;;  %1886 = vmatprep.mubr.bf16.mxu1 %v10450_v22  ;;  %v9550_v20 = vld [vmem:[#allocation7 + $0x1c4] ss:$36 sps:$4 sm:$0xff]  }
  0x9b   :  { %1930 = vmatpush1.bf16.msra.mxu0 %v9491_v23  ;;  %v9577_v23 = vld [vmem:[#allocation7 + $0x63c] ss:$36 sps:$4 sm:$0xff]  }
  0x9c   :  { %1931 = vmatprep.subr.bf16.mxu0 %v9499_v24  ;;  %v10506_v24 = vld [vmem:[#allocation4 + $0x50] ss:$12 sps:$4 sm:$0xff]  }
  0x9d   :  { %2129 = vmatpush1.bf16.msra.mxu1 %v9446_v25  ;;  %v9548_v25 = vld [vmem:[#allocation7 + $0x1c0] ss:$36 sps:$4 sm:$0xff]  }
  0x9e   :  { %2130 = vmatprep.subr.bf16.mxu1 %v9460_v27  ;;  %v9575_v27 = vld [vmem:[#allocation7 + $0x638] ss:$36 sps:$4 sm:$0xff]  }
  0x9f   :  { %1932 = vmatpush1.bf16.msra.mxu0 %v9497_v28  ;;  %v9553_v28 = vld [vmem:[#allocation7 + $0x20c] ss:$36 sps:$4 sm:$0xff]  }
  0xa0   :  { %1807 = vmatmul.mubr.bf16.gmra.mrb[20].mxu0 %v10456_v26  ;;  %1887 = vmatmul.mubr.bf16.gmra.mrb[20].mxu1 %v10458_v29 }
  0xa1   :  { %2131 = vmatpush1.bf16.msra.mxu1 %v9458_v30  ;;  %1816 = vmatprep.mubr.bf16.mxu0 %v10460_v32  ;;  %v9587_v30 = vld [vmem:[#allocation7 + $0x684] ss:$36 sps:$4 sm:$0xff]  }
  0xa2   :  { %2132 = vmatprep.subr.bf16.mxu1 %v9466_v31  ;;  %1896 = vmatprep.mubr.bf16.mxu1 %v10462_v33  ;;  %v9557_v31 = vld [vmem:[#allocation7 + $0x254] ss:$36 sps:$4 sm:$0xff]  }
  0xa3   :  { %2496 = vmatprep.subr.bf16.mxu0 %v9522_v34  ;;  %v9593_v34 = vld [vmem:[#allocation7 + $0x1c] ss:$36 sps:$4 sm:$0xff]  }
  0xa5   :  { %2133 = vmatpush1.bf16.msra.mxu1 %v9464_v35  ;;  %v10512_v35 = vld [vmem:[#allocation4 + $0x68] ss:$12 sps:$4 sm:$0xff]  }
  0xa6   :  { %2134 = vmatprep.subr.bf16.mxu1 %v9478_v38  ;;  %v9555_v38 = vld [vmem:[#allocation7 + $0x250] ss:$36 sps:$4 sm:$0xff]  }
  0xa8   :  { %1817 = vmatmul.mubr.bf16.gmra.mrb[24].mxu0 %v10468_v37  ;;  %1897 = vmatmul.mubr.bf16.gmra.mrb[24].mxu1 %v10470_v39 }
  0xa9   :  { %2135 = vmatpush1.bf16.msra.mxu1 %v9476_v41  ;;  %1826 = vmatprep.mubr.bf16.mxu0 %v10472_v42  ;;  %v9563_v41 = vld [vmem:[#allocation7 + $0x29c] ss:$36 sps:$4 sm:$0xff]  }
  0xaa   :  { %2136 = vmatprep.subr.bf16.mxu1 %v9484_v43  ;;  %1906 = vmatprep.mubr.bf16.mxu1 %v10474_v44  ;;  %v10518_v43 = vld [vmem:[#allocation4 + $0x80] ss:$12 sps:$4 sm:$0xff]  }
  0xad   :  { %2137 = vmatpush1.bf16.msra.mxu1 %v9482_v46  ;;  %v9565_v46 = vld [vmem:[#allocation7 + $0x2e0] ss:$36 sps:$4 sm:$0xff]  }
  0xae   :  { %2138 = vmatprep.subr.bf16.mxu1 %v9496_v47  ;;  %v9570_v47 = vld [vmem:[#allocation7 + $0x32c] ss:$36 sps:$4 sm:$0xff]  }
  0xb0   :  { %1827 = vmatmul.mubr.bf16.gmra.mrb[28].mxu0 %v10480_v48  ;;  %1907 = vmatmul.mubr.bf16.gmra.mrb[28].mxu1 %v10482_v49 }
  0xb1   :  { %2139 = vmatpush1.bf16.msra.mxu1 %v9494_v50  ;;  %1949 = vmatprep.mubr.bf16.mxu0 %v13504_v54  ;;  %v9568_v50 = vld [vmem:[#allocation7 + $0x328] ss:$36 sps:$4 sm:$0xff]  }
  0xb2   :  { %2140 = vmatprep.subr.bf16.mxu1 %v9502_v52  ;;  %2142 = vmatprep.mubr.bf16.mxu1 %v10414_v13  ;;  %v9533_v13 = vld [vmem:[#allocation7 + $0xa4] ss:$36 sps:$4 sm:$0xff]   ;;  %v9572_v52 = vld [vmem:[#allocation7 + $0x370] ss:$36 sps:$4 sm:$0xff]  }
  0xb5   :  { %2141 = vmatpush1.bf16.msra.mxu1 %v9500_v53  ;;  %v9580_v53 = vld [vmem:[#allocation7 + $0x3bc] ss:$36 sps:$4 sm:$0xff]  }
  0xb6   :  { %2303 = vmatprep.subr.bf16.mxu1 %v9508_v55  ;;  %v9578_v55 = vld [vmem:[#allocation7 + $0x3b8] ss:$36 sps:$4 sm:$0xff]  }
  0xb8   :  { %1950 = vmatmul.mubr.bf16.vlgmr.msra.gmra.mrb[0].mxu0 %v10488_v56  ;;  %2143 = vmatmul.mubr.bf16.vlgmr.msra.gmra.mrb[32].mxu1 %v10417_v36  ;;  %v9524_v36 = vld [vmem:[#allocation7 + $0x560] ss:$36 sps:$4 sm:$0xff]  }
  0xb9   :  { %1959 = vmatprep.mubr.bf16.mxu0 %v13504_v54  ;;  %2152 = vmatprep.mubr.bf16.mxu1 %v10419_v40  ;;  %v9534_v40 = vld [vmem:[#allocation7 + $0xe8] ss:$36 sps:$4 sm:$0xff]  }
  0xba   :  { %2304 = vmatpush1.bf16.msra.mxu1 %v9506_v58  ;;  %2497 = vmatpush1.bf16.msra.mxu0 %v9520_v59  ;;  %v9582_v58 = vld [vmem:[#allocation7 + $0x400] ss:$36 sps:$4 sm:$0xff]   ;;  %v9590_v59 = vld [vmem:[#allocation7 + $0x44c] ss:$36 sps:$4 sm:$0xff]  }
  0xbb   :  { %2305 = vmatprep.subr.bf16.mxu1 %v9513_v60  ;;  %2498 = vmatprep.subr.bf16.mxu0 %v9529_v61  ;;  %v9611_v60 = vld [vmem:[#allocation7 + $0x494] ss:$36 sps:$4 sm:$0xff]  }
  0xbc   :  { %v10538_v61 = vld [vmem:[#allocation4 + $0xc8] ss:$12 sps:$4 sm:$0xff]  }
  0xbe   :  { %2306 = vmatpush1.bf16.msra.mxu1 %v9511_v63  ;;  %2499 = vmatpush1.bf16.msra.mxu0 %v9527_v0  ;;  %v10541_v63 = vld [vmem:[#allocation4 + $0xc0] ss:$12 sps:$4 sm:$0xff]  }
  0xbf   :  { %2307 = vmatprep.subr.bf16.mxu1 %v9518_v1  ;;  %2500 = vmatprep.subr.bf16.mxu0 %v9533_v13  ;;  %v10548_v0 = vld [vmem:[#allocation4 + $0xe0] ss:$12 sps:$4 sm:$0xff]   ;;  %v10551_v1 = vld [vmem:[#allocation4 + $0xd8] ss:$12 sps:$4 sm:$0xff]  }
  0xc0   :  { %1960 = vmatmul.mubr.bf16.gmra.mrb[4].mxu0 %v10494_v2  ;;  %2153 = vmatmul.mubr.bf16.gmra.mrb[36].mxu1 %v10423_v45  ;;  %v9544_v45 = vld [vmem:[#allocation7 + $0x178] ss:$36 sps:$4 sm:$0xff]   ;;  %13749 = vst [vmem:[#allocation15_spill] sm:$0xff] %v10548_v0  ;;  %13750 = vst [vmem:[#allocation16_spill] sm:$0xff] %v10551_v1  ;;  %v10555_v13 = vld [vmem:[#allocation4 + $0xf4] ss:$12 sps:$4 sm:$0xff]  }
  0xc1   :  { %1969 = vmatprep.mubr.bf16.mxu0 %v13504_v54  ;;  %2162 = vmatprep.mubr.bf16.mxu1 %v10425_v51  ;;  %v9558_v51 = vld [vmem:[#allocation7 + $0x5f0] ss:$36 sps:$4 sm:$0xff]   ;;  %13751 = vst [vmem:[#allocation17_spill] sm:$0xff] %v10555_v13 }
  0xc2   :  { %2308 = vmatpush1.bf16.msra.mxu1 %v9516_v4  ;;  %2501 = vmatpush1.bf16.msra.mxu0 %v9531_v5  ;;  %v10558_v4 = vld [vmem:[#allocation4 + $0xf8] ss:$12 sps:$4 sm:$0xff]   ;;  %v10561_v5 = vld [vmem:[#allocation4 + $0xf0] ss:$12 sps:$4 sm:$0xff]  }
  0xc3   :  { %2309 = vmatprep.subr.bf16.mxu1 %v9526_v6  ;;  %2502 = vmatprep.subr.bf16.mxu0 %v9536_v7  ;;  %13752 = vst [vmem:[#allocation18_spill] sm:$0xff] %v10558_v4  ;;  %13753 = vst [vmem:[#allocation19_spill] sm:$0xff] %v10561_v5  ;;  %v10565_v6 = vld [vmem:[#allocation4 + $0x10c] ss:$12 sps:$4 sm:$0xff]   ;;  %v10568_v7 = vld [vmem:[#allocation4 + $0x110] ss:$12 sps:$4 sm:$0xff]  }
  0xc4   :  { %13754 = vst [vmem:[#allocation20_spill] sm:$0xff] %v10565_v6 }
  0xc6   :  { %2310 = vmatpush1.bf16.msra.mxu1 %v9524_v36  ;;  %2503 = vmatpush1.bf16.msra.mxu0 %v9534_v40  ;;  %v10571_v36 = vld [vmem:[#allocation4 + $0x108] ss:$12 sps:$4 sm:$0xff]  }
  0xc7   :  { %2504 = vmatprep.subr.bf16.mxu0 %v9540_v8  ;;  %2311 = vmatprep.subr.bf16.mxu1 %v9543_v11  ;;  %v10576_v40 = vld [vmem:[#allocation4 + $0x128] ss:$12 sps:$4 sm:$0xff]   ;;  %v10582_v8 = vld [vmem:[#allocation4 + $0x140] ss:$12 sps:$4 sm:$0xff]  }
  0xc8   :  { %1970 = vmatmul.mubr.bf16.gmra.mrb[8].mxu0 %v10500_v12  ;;  %2163 = vmatmul.mubr.bf16.gmra.mrb[40].mxu1 %v10429_v57  ;;  %v9551_v57 = vld [vmem:[#allocation7 + $0x208] ss:$36 sps:$4 sm:$0xff]   ;;  %13755 = vst [vmem:[#allocation21_spill] sm:$0xff] %v10582_v8 }
  0xc9   :  { %1979 = vmatprep.mubr.bf16.mxu0 %v13504_v54  ;;  %2172 = vmatprep.mubr.bf16.mxu1 %v10431_v62  ;;  %v9585_v62 = vld [vmem:[#allocation7 + $0x680] ss:$36 sps:$4 sm:$0xff]  }
  0xca   :  { %2505 = vmatpush1.bf16.msra.mxu0 %v9538_v14  ;;  %2312 = vmatpush1.bf16.msra.mxu1 %v9541_v15  ;;  %v9596_v11 = vld [vmem:[#allocation7 + $0x64] ss:$36 sps:$4 sm:$0xff]   ;;  %v10603_v14 = vld [vmem:[#allocation4] ss:$12 sps:$4 sm:$0xff]   ;;  %v9618_v15 = vld [vmem:[#allocation7 + $0x4d8] ss:$36 sps:$4 sm:$0xff]  }
  0xcb   :  { %2506 = vmatprep.subr.bf16.mxu0 %v9546_v17  ;;  %2313 = vmatprep.subr.bf16.mxu1 %v9560_v19  ;;  %13759 = vst [vmem:[#allocation25_spill] sm:$0xff] %v10603_v14  ;;  %v9599_v17 = vld [vmem:[#allocation7 + $0xac] ss:$36 sps:$4 sm:$0xff]   ;;  %v9629_v19 = vld [vmem:[#allocation7 + $0x524] ss:$36 sps:$4 sm:$0xff]  }
  0xce   :  { %2507 = vmatpush1.bf16.msra.mxu0 %v9544_v45  ;;  %2314 = vmatpush1.bf16.msra.mxu1 %v9558_v51  ;;  %v9627_v45 = vld [vmem:[#allocation7 + $0x520] ss:$36 sps:$4 sm:$0xff]   ;;  %v9602_v51 = vld [vmem:[#allocation7 + $0xf4] ss:$36 sps:$4 sm:$0xff]  }
  0xcf   :  { %2508 = vmatprep.subr.bf16.mxu0 %v9550_v20  ;;  %2315 = vmatprep.subr.bf16.mxu1 %v9577_v23  ;;  %v9638_v20 = vld [vmem:[#allocation7 + $0x56c] ss:$36 sps:$4 sm:$0xff]   ;;  %v10611_v23 = vld [vmem:[#allocation4 + $0x18] ss:$12 sps:$4 sm:$0xff]  }
  0xd0   :  { %1980 = vmatmul.mubr.bf16.gmra.mrb[12].mxu0 %v10506_v24  ;;  %2173 = vmatmul.mubr.bf16.gmra.mrb[44].mxu1 %v10435_v3  ;;  %v9561_v3 = vld [vmem:[#allocation7 + $0x298] ss:$36 sps:$4 sm:$0xff]  }
  0xd1   :  { %1989 = vmatprep.mubr.bf16.mxu0 %v13504_v54  ;;  %2182 = vmatprep.mubr.bf16.mxu1 %v10437_v9  ;;  %v9567_v9 = vld [vmem:[#allocation7 + $0x2e4] ss:$36 sps:$4 sm:$0xff]  }
  0xd2   :  { %2509 = vmatpush1.bf16.msra.mxu0 %v9548_v25  ;;  %2316 = vmatpush1.bf16.msra.mxu1 %v9575_v27  ;;  %v10615_v25 = vld [vmem:[#allocation4 + $0x34] ss:$12 sps:$4 sm:$0xff]  }
  0xd3   :  { %2510 = vmatprep.subr.bf16.mxu0 %v9553_v28  ;;  %2317 = vmatprep.subr.bf16.mxu1 %v9587_v30  ;;  %13761 = vst [vmem:[#allocation27_spill] sm:$0xff] %v10615_v25  ;;  %v9600_v27 = vld [vmem:[#allocation7 + $0xf0] ss:$36 sps:$4 sm:$0xff]   ;;  %v9636_v28 = vld [vmem:[#allocation7 + $0x568] ss:$36 sps:$4 sm:$0xff]  }
  0xd4   :  { %v9605_v30 = vld [vmem:[#allocation7 + $0x13c] ss:$36 sps:$4 sm:$0xff]  }
  0xd6   :  { %2511 = vmatpush1.bf16.msra.mxu0 %v9551_v57  ;;  %2318 = vmatpush1.bf16.msra.mxu1 %v9585_v62  ;;  %v9641_v57 = vld [vmem:[#allocation7 + $0x5b4] ss:$36 sps:$4 sm:$0xff]  }
  0xd7   :  { %2512 = vmatprep.subr.bf16.mxu0 %v9557_v31  ;;  %2882 = vmatprep.subr.bf16.mxu1 %v9593_v34  ;;  %v9639_v62 = vld [vmem:[#allocation7 + $0x5b0] ss:$36 sps:$4 sm:$0xff]   ;;  %v9608_v31 = vld [vmem:[#allocation7 + $0x184] ss:$36 sps:$4 sm:$0xff]   ;;  %v9647_v34 = vld [vmem:[#allocation7 + $0x5fc] ss:$36 sps:$4 sm:$0xff]  }
  0xd8   :  { %1990 = vmatmul.mubr.bf16.gmra.mrb[16].mxu0 %v10512_v35  ;;  %2183 = vmatmul.mubr.bf16.gmra.mrb[48].mxu1 %v10444_v16  ;;  %v9574_v16 = vld [vmem:[#allocation7 + $0x374] ss:$36 sps:$4 sm:$0xff]  }
  0xd9   :  { %1999 = vmatprep.mubr.bf16.mxu0 %v13504_v54  ;;  %2192 = vmatprep.mubr.bf16.mxu1 %v10448_v21  ;;  %v10524_v21 = vld [vmem:[#allocation4 + $0x98] ss:$12 sps:$4 sm:$0xff]  }
  0xda   :  { %2513 = vmatpush1.bf16.msra.mxu0 %v9555_v38  ;;  %v10619_v38 = vld [vmem:[#allocation4 + $0x30] ss:$12 sps:$4 sm:$0xff]  }
  0xdb   :  { %2514 = vmatprep.subr.bf16.mxu0 %v9563_v41  ;;  %v10623_v41 = vld [vmem:[#allocation4 + $0x4c] ss:$12 sps:$4 sm:$0xff]  }
  0xdc   :  { %13762 = vst [vmem:[#allocation28_spill] sm:$0xff] %v10623_v41 }
  0xde   :  { %2515 = vmatpush1.bf16.msra.mxu0 %v9561_v3  ;;  %v9606_v3 = vld [vmem:[#allocation7 + $0x180] ss:$36 sps:$4 sm:$0xff]  }
  0xdf   :  { %2516 = vmatprep.subr.bf16.mxu0 %v9567_v9  ;;  %v9645_v9 = vld [vmem:[#allocation7 + $0x5f8] ss:$36 sps:$4 sm:$0xff]  }
  0xe0   :  { %2000 = vmatmul.mubr.bf16.gmra.mrb[20].mxu0 %v10518_v43  ;;  %2193 = vmatmul.mubr.bf16.gmra.mrb[52].mxu1 %v10456_v26  ;;  %v9584_v26 = vld [vmem:[#allocation7 + $0x404] ss:$36 sps:$4 sm:$0xff]  }
  0xe1   :  { %2009 = vmatprep.mubr.bf16.mxu0 %v13504_v54  ;;  %2202 = vmatprep.mubr.bf16.mxu1 %v10460_v32  ;;  %v10530_v32 = vld [vmem:[#allocation4 + $0xb0] ss:$12 sps:$4 sm:$0xff]  }
  0xe2   :  { %2517 = vmatpush1.bf16.msra.mxu0 %v9565_v46 }
  0xe3   :  { %2518 = vmatprep.subr.bf16.mxu0 %v9570_v47  ;;  %v9614_v47 = vld [vmem:[#allocation7 + $0x1cc] ss:$36 sps:$4 sm:$0xff]  }
  0xe6   :  { %2519 = vmatpush1.bf16.msra.mxu0 %v9568_v50 }
  0xe7   :  { %2520 = vmatprep.subr.bf16.mxu0 %v9574_v16 }
  0xe8   :  { %2010 = vmatmul.mubr.bf16.gmra.mrb[24].mxu0 %v10524_v21  ;;  %2203 = vmatmul.mubr.bf16.gmra.mrb[56].mxu1 %v10468_v37  ;;  %v10535_v37 = vld [vmem:[#allocation4 + $0xc4] ss:$12 sps:$4 sm:$0xff]  }
  0xe9   :  { %2019 = vmatprep.mubr.bf16.mxu0 %v13504_v54  ;;  %2212 = vmatprep.mubr.bf16.mxu1 %v10472_v42  ;;  %v9588_v42 = vld [vmem:[#allocation7 + $0x448] ss:$36 sps:$4 sm:$0xff]  }
  0xea   :  { %2521 = vmatpush1.bf16.msra.mxu0 %v9572_v52 }
  0xeb   :  { %2522 = vmatprep.subr.bf16.mxu0 %v9580_v53  ;;  %v9612_v53 = vld [vmem:[#allocation7 + $0x1c8] ss:$36 sps:$4 sm:$0xff]  }
  0xee   :  { %2523 = vmatpush1.bf16.msra.mxu0 %v9578_v55  ;;  %v9651_v55 = vld [vmem:[#allocation7 + $0x640] ss:$36 sps:$4 sm:$0xff]  }
  0xef   :  { %2524 = vmatprep.subr.bf16.mxu0 %v9584_v26  ;;  %v9617_v26 = vld [vmem:[#allocation7 + $0x214] ss:$36 sps:$4 sm:$0xff]  }
  0xf0   :  { %2020 = vmatmul.mubr.bf16.gmra.mrb[28].mxu0 %v10530_v32  ;;  %2213 = vmatmul.mubr.bf16.gmra.mrb[60].mxu1 %v10480_v48  ;;  %v10545_v48 = vld [vmem:[#allocation4 + $0xdc] ss:$12 sps:$4 sm:$0xff]  }
  0xf1   :  { %2029 = vmatprep.mubr.bf16.mxu0 %v13504_v54  ;;  %2222 = vmatprep.mubr.bf16.mxu1 %v10535_v37  ;;  %13748 = vst [vmem:[#allocation14_spill] sm:$0xff] %v10545_v48 }
  0xf2   :  { %2525 = vmatpush1.bf16.msra.mxu0 %v9582_v58  ;;  %v9659_v58 = vld [vmem:[#allocation7 + $0x68c] ss:$36 sps:$4 sm:$0xff]  }
  0xf3   :  { %2526 = vmatprep.subr.bf16.mxu0 %v9590_v59  ;;  %v10635_v59 = vld [vmem:[#allocation4 + $0x48] ss:$12 sps:$4 sm:$0xff]  }
  0xf6   :  { %2527 = vmatpush1.bf16.msra.mxu0 %v9588_v42  ;;  %v10639_v42 = vld [vmem:[#allocation4 + $0x64] ss:$12 sps:$4 sm:$0xff]  }
  0xf7   :  { %2689 = vmatprep.subr.bf16.mxu0 %v9611_v60  ;;  %v9615_v60 = vld [vmem:[#allocation7 + $0x210] ss:$36 sps:$4 sm:$0xff]  }
  0xf8   :  { %2030 = vmatmul.mubr.bf16.gmra.mrb[32].mxu0 %v10538_v61  ;;  %2223 = vmatmul.mubr.bf16.gmra.mrb[64].mxu1 %v10541_v63 }
  0xf9   :  { %2039 = vmatprep.mubr.bf16.mxu0 %v13504_v54  ;;  %2232 = vmatprep.mubr.bf16.mxu1 %v10545_v48 }
 0x100   :  { %2040 = vmatmul.mubr.bf16.gmra.mrb[36].mxu0 %v10548_v0  ;;  %2233 = vmatmul.mubr.bf16.gmra.mrb[68].mxu1 %v10551_v1 }
 0x101   :  { %2049 = vmatprep.mubr.bf16.mxu0 %v13504_v54  ;;  %2242 = vmatprep.mubr.bf16.mxu1 %v10555_v13 }
 0x108   :  { %2050 = vmatmul.mubr.bf16.gmra.mrb[40].mxu0 %v10558_v4  ;;  %2243 = vmatmul.mubr.bf16.gmra.mrb[72].mxu1 %v10561_v5 }
 0x109   :  { %2059 = vmatprep.mubr.bf16.mxu0 %v13504_v54  ;;  %2252 = vmatprep.mubr.bf16.mxu1 %v10565_v6 }
 0x110   :  { %2060 = vmatmul.mubr.bf16.gmra.mrb[44].mxu0 %v10568_v7  ;;  %2253 = vmatmul.mubr.bf16.gmra.mrb[76].mxu1 %v10571_v36 }
 0x111   :  { %2069 = vmatprep.mubr.bf16.mxu0 %v13504_v54  ;;  %2262 = vmatprep.mubr.bf16.mxu1 %v10439_v10  ;;  %v10588_v10 = vld [vmem:[#allocation4 + $0x158] ss:$12 sps:$4 sm:$0xff]  }
 0x112   :  { %13756 = vst [vmem:[#allocation22_spill] sm:$0xff] %v10588_v10 }
 0x118   :  { %2070 = vmatmul.mubr.bf16.gmra.mrb[48].mxu0 %v10576_v40  ;;  %2263 = vmatmul.mubr.bf16.gmra.mrb[80].mxu1 %v10446_v18  ;;  %v10594_v18 = vld [vmem:[#allocation4 + $0x170] ss:$12 sps:$4 sm:$0xff]  }
 0x119   :  { %2079 = vmatprep.mubr.bf16.mxu0 %v13504_v54  ;;  %2272 = vmatprep.mubr.bf16.mxu1 %v10450_v22  ;;  %13757 = vst [vmem:[#allocation23_spill] sm:$0xff] %v10594_v18  ;;  %v10599_v22 = vld [vmem:[#allocation4 + $0x4] ss:$12 sps:$4 sm:$0xff]  }
 0x11a   :  { %13758 = vst [vmem:[#allocation24_spill] sm:$0xff] %v10599_v22 }
 0x120   :  { %2080 = vmatmul.mubr.bf16.gmra.mrb[52].mxu0 %v10582_v8  ;;  %2273 = vmatmul.mubr.bf16.gmra.mrb[84].mxu1 %v10458_v29  ;;  %v9591_v29 = vld [vmem:[#allocation7 + $0x18] ss:$36 sps:$4 sm:$0xff]  }
 0x121   :  { %2089 = vmatprep.mubr.bf16.mxu0 %v13504_v54  ;;  %2282 = vmatprep.mubr.bf16.mxu1 %v10462_v33  ;;  %v9609_v33 = vld [vmem:[#allocation7 + $0x490] ss:$36 sps:$4 sm:$0xff]  }
 0x128   :  { %2090 = vmatmul.mubr.bf16.gmra.mrb[56].mxu0 %v10588_v10  ;;  %2283 = vmatmul.mubr.bf16.gmra.mrb[88].mxu1 %v10470_v39  ;;  %v9620_v39 = vld [vmem:[#allocation7 + $0x4dc] ss:$36 sps:$4 sm:$0xff]  }
 0x129   :  { %2099 = vmatprep.mubr.bf16.mxu0 %v13504_v54  ;;  %2292 = vmatprep.mubr.bf16.mxu1 %v10474_v44  ;;  %v10607_v44 = vld [vmem:[#allocation4 + $0x1c] ss:$12 sps:$4 sm:$0xff]  }
 0x12a   :  { %13760 = vst [vmem:[#allocation26_spill] sm:$0xff] %v10607_v44 }
 0x130   :  { %2100 = vmatmul.mubr.bf16.gmra.mrb[60].mxu0 %v10594_v18  ;;  %2293 = vmatmul.mubr.bf16.gmra.mrb[92].mxu1 %v10482_v49  ;;  %v9594_v49 = vld [vmem:[#allocation7 + $0x60] ss:$36 sps:$4 sm:$0xff]  }
 0x131   :  { %2335 = vmatprep.mubr.bf16.mxu1 %v13504_v54  ;;  %2528 = vmatprep.mubr.bf16.mxu0 %v10599_v22 }
 0x138   :  { %2336 = vmatmul.mubr.bf16.vlgmr.msra.gmra.mrb[32].mxu1 %v10488_v56  ;;  %2529 = vmatmul.mubr.bf16.vlgmr.msra.gmra.mrb[64].mxu0 %v10603_v14  ;;  %v9597_v56 = vld [vmem:[#allocation7 + $0xa8] ss:$36 sps:$4 sm:$0xff]  }
 0x139   :  { %2345 = vmatprep.mubr.bf16.mxu1 %v13504_v54  ;;  %2538 = vmatprep.mubr.bf16.mxu0 %v10607_v44 }
 0x13a   :  { %2883 = vmatpush1.bf16.msra.mxu1 %v9591_v29  ;;  %2690 = vmatpush1.bf16.msra.mxu0 %v9609_v33  ;;  %v9657_v29 = vld [vmem:[#allocation7 + $0x688] ss:$36 sps:$4 sm:$0xff]  }
 0x13b   :  { %2884 = vmatprep.subr.bf16.mxu1 %v9596_v11  ;;  %2691 = vmatprep.subr.bf16.mxu0 %v9620_v39  ;;  %v9623_v11 = vld [vmem:[#allocation7 + $0x25c] ss:$36 sps:$4 sm:$0xff]  }
 0x13e   :  { %2885 = vmatpush1.bf16.msra.mxu1 %v9594_v49  ;;  %2692 = vmatpush1.bf16.msra.mxu0 %v9618_v15  ;;  %v9621_v15 = vld [vmem:[#allocation7 + $0x258] ss:$36 sps:$4 sm:$0xff]  }
 0x13f   :  { %2886 = vmatprep.subr.bf16.mxu1 %v9599_v17  ;;  %2693 = vmatprep.subr.bf16.mxu0 %v9629_v19  ;;  %v9626_v17 = vld [vmem:[#allocation7 + $0x2a4] ss:$36 sps:$4 sm:$0xff]   ;;  %v10651_v19 = vld [vmem:[#allocation4 + $0x60] ss:$12 sps:$4 sm:$0xff]  }
 0x140   :  { %2346 = vmatmul.mubr.bf16.gmra.mrb[36].mxu1 %v10494_v2  ;;  %2539 = vmatmul.mubr.bf16.gmra.mrb[68].mxu0 %v10611_v23  ;;  %v9603_v2 = vld [vmem:[#allocation7 + $0x138] ss:$36 sps:$4 sm:$0xff]  }
 0x141   :  { %2355 = vmatprep.mubr.bf16.mxu1 %v13504_v54  ;;  %2548 = vmatprep.mubr.bf16.mxu0 %v10615_v25 }
 0x142   :  { %2887 = vmatpush1.bf16.msra.mxu1 %v9597_v56  ;;  %2694 = vmatpush1.bf16.msra.mxu0 %v9627_v45  ;;  %v10655_v56 = vld [vmem:[#allocation4 + $0x7c] ss:$12 sps:$4 sm:$0xff]   ;;  %v9624_v45 = vld [vmem:[#allocation7 + $0x2a0] ss:$36 sps:$4 sm:$0xff]  }
 0x143   :  { %2888 = vmatprep.subr.bf16.mxu1 %v9602_v51  ;;  %2695 = vmatprep.subr.bf16.mxu0 %v9638_v20  ;;  %v9632_v20 = vld [vmem:[#allocation7 + $0x2ec] ss:$36 sps:$4 sm:$0xff]  }
 0x146   :  { %2889 = vmatpush1.bf16.msra.mxu1 %v9600_v27  ;;  %2696 = vmatpush1.bf16.msra.mxu0 %v9636_v28 }
 0x147   :  { %2890 = vmatprep.subr.bf16.mxu1 %v9605_v30  ;;  %2697 = vmatprep.subr.bf16.mxu0 %v9641_v57  ;;  %v9630_v30 = vld [vmem:[#allocation7 + $0x2e8] ss:$36 sps:$4 sm:$0xff]   ;;  %v9635_v57 = vld [vmem:[#allocation7 + $0x334] ss:$36 sps:$4 sm:$0xff]  }
 0x148   :  { %2356 = vmatmul.mubr.bf16.gmra.mrb[40].mxu1 %v10500_v12  ;;  %2549 = vmatmul.mubr.bf16.gmra.mrb[72].mxu0 %v10619_v38  ;;  %v9653_v12 = vld [vmem:[#allocation7 + $0x644] ss:$36 sps:$4 sm:$0xff]  }
 0x149   :  { %2365 = vmatprep.mubr.bf16.mxu1 %v13504_v54  ;;  %2558 = vmatprep.mubr.bf16.mxu0 %v10623_v41 }
 0x14a   :  { %2891 = vmatpush1.bf16.msra.mxu1 %v9603_v2  ;;  %2698 = vmatpush1.bf16.msra.mxu0 %v9639_v62  ;;  %v10667_v2 = vld [vmem:[#allocation4 + $0x78] ss:$12 sps:$4 sm:$0xff]   ;;  %v10671_v62 = vld [vmem:[#allocation4 + $0x94] ss:$12 sps:$4 sm:$0xff]  }
 0x14b   :  { %v10626_v46 = vpop.f32.mrb[0].mxu1  ;;  %2892 = vmatprep.subr.bf16.mxu1 %v9608_v31  ;;  %2699 = vmatprep.subr.bf16.mxu0 %v9647_v34  ;;  %v9633_v31 = vld [vmem:[#allocation7 + $0x330] ss:$36 sps:$4 sm:$0xff]  }
 0x14c   :  { %v10628_v50 = vpop.f32.mrb[1].mxu1 }
 0x14d   :  { %v10630_v16 = vpop.f32.mrb[2].mxu1 }
 0x14e   :  { %v10632_v52 = vpop.f32.mrb[3].mxu1  ;;  %2893 = vmatpush1.bf16.msra.mxu1 %v9606_v3  ;;  %2700 = vmatpush1.bf16.msra.mxu0 %v9645_v9  ;;  %v9644_v3 = vld [vmem:[#allocation7 + $0x37c] ss:$36 sps:$4 sm:$0xff]  }
 0x14f   :  { %2894 = vmatprep.subr.bf16.mxu1 %v9614_v47  ;;  %2701 = vmatprep.subr.bf16.mxu0 %v9653_v12  ;;  %v9642_v12 = vld [vmem:[#allocation7 + $0x378] ss:$36 sps:$4 sm:$0xff]  }
 0x150   :  { %2366 = vmatmul.mubr.bf16.gmra.mrb[44].mxu1 %v10506_v24  ;;  %2559 = vmatmul.mubr.bf16.gmra.mrb[76].mxu0 %v10635_v59 }
 0x151   :  { %2375 = vmatprep.mubr.bf16.mxu1 %v13504_v54  ;;  %2568 = vmatprep.mubr.bf16.mxu0 %v10639_v42 }
 0x152   :  { %2895 = vmatpush1.bf16.msra.mxu1 %v9612_v53  ;;  %2702 = vmatpush1.bf16.msra.mxu0 %v9651_v55  ;;  %v9650_v53 = vld [vmem:[#allocation7 + $0x3c4] ss:$36 sps:$4 sm:$0xff]   ;;  %v10683_v55 = vld [vmem:[#allocation4 + $0x90] ss:$12 sps:$4 sm:$0xff]  }
 0x153   :  { %v10642_v33 = vpop.f32.mrb[4].mxu1  ;;  %2896 = vmatprep.subr.bf16.mxu1 %v9617_v26  ;;  %2703 = vmatprep.subr.bf16.mxu0 %v9659_v58  ;;  %v10687_v26 = vld [vmem:[#allocation4 + $0xac] ss:$12 sps:$4 sm:$0xff]   ;;  %v9648_v58 = vld [vmem:[#allocation7 + $0x3c0] ss:$36 sps:$4 sm:$0xff]  }
 0x154   :  { %v10644_v24 = vpop.f32.mrb[5].mxu1 }
 0x155   :  { %v10646_v39 = vpop.f32.mrb[6].mxu1 }
 0x156   :  { %v10648_v49 = vpop.f32.mrb[7].mxu1  ;;  %2897 = vmatpush1.bf16.msra.mxu1 %v9615_v60  ;;  %2704 = vmatpush1.bf16.msra.mxu0 %v9657_v29  ;;  %v9656_v29 = vld [vmem:[#allocation7 + $0x40c] ss:$36 sps:$4 sm:$0xff]  }
 0x157   :  { %2898 = vmatprep.subr.bf16.mxu1 %v9623_v11 }
 0x158   :  { %2376 = vmatmul.mubr.bf16.gmra.mrb[48].mxu1 %v10512_v35  ;;  %2569 = vmatmul.mubr.bf16.gmra.mrb[80].mxu0 %v10651_v19 }
 0x159   :  { %2385 = vmatprep.mubr.bf16.mxu1 %v13504_v54  ;;  %2578 = vmatprep.mubr.bf16.mxu0 %v10655_v56 }
 0x15a   :  { %2899 = vmatpush1.bf16.msra.mxu1 %v9621_v15 }
 0x15b   :  { %v10658_v51 = vpop.f32.mrb[8].mxu1  ;;  %2900 = vmatprep.subr.bf16.mxu1 %v9626_v17 }
 0x15c   :  { %v10660_v27 = vpop.f32.mrb[9].mxu1 }
 0x15d   :  { %v10662_v28 = vpop.f32.mrb[10].mxu1 }
 0x15e   :  { %v10664_v35 = vpop.f32.mrb[11].mxu1  ;;  %2901 = vmatpush1.bf16.msra.mxu1 %v9624_v45  ;;  %v9654_v45 = vld [vmem:[#allocation7 + $0x408] ss:$36 sps:$4 sm:$0xff]  }
 0x15f   :  { %2902 = vmatprep.subr.bf16.mxu1 %v9632_v20  ;;  %v9662_v20 = vld [vmem:[#allocation7 + $0x454] ss:$36 sps:$4 sm:$0xff]  }
 0x160   :  { %2386 = vmatmul.mubr.bf16.gmra.mrb[52].mxu1 %v10518_v43  ;;  %2579 = vmatmul.mubr.bf16.gmra.mrb[84].mxu0 %v10667_v2 }
 0x161   :  { %2395 = vmatprep.mubr.bf16.mxu1 %v13504_v54  ;;  %2588 = vmatprep.mubr.bf16.mxu0 %v10671_v62 }
 0x162   :  { %2903 = vmatpush1.bf16.msra.mxu1 %v9630_v30  ;;  %v10699_v30 = vld [vmem:[#allocation4 + $0xa8] ss:$12 sps:$4 sm:$0xff]  }
 0x163   :  { %v10674_v34 = vpop.f32.mrb[12].mxu1  ;;  %2904 = vmatprep.subr.bf16.mxu1 %v9635_v57  ;;  %v9660_v57 = vld [vmem:[#allocation7 + $0x450] ss:$36 sps:$4 sm:$0xff]  }
 0x164   :  { %v10676_v9 = vpop.f32.mrb[13].mxu1 }
 0x165   :  { %v10678_v47 = vpop.f32.mrb[14].mxu1 }
 0x166   :  { %v10680_v43 = vpop.f32.mrb[15].mxu1  ;;  %2905 = vmatpush1.bf16.msra.mxu1 %v9633_v31 }
 0x167   :  { %2906 = vmatprep.subr.bf16.mxu1 %v9644_v3  ;;  %v9665_v3 = vld [vmem:[#allocation7 + $0x49c] ss:$36 sps:$4 sm:$0xff]  }
 0x168   :  { %2396 = vmatmul.mubr.bf16.gmra.mrb[56].mxu1 %v10524_v21  ;;  %2589 = vmatmul.mubr.bf16.gmra.mrb[88].mxu0 %v10683_v55 }
 0x169   :  { %2405 = vmatprep.mubr.bf16.mxu1 %v13504_v54  ;;  %2598 = vmatprep.mubr.bf16.mxu0 %v10687_v26 }
 0x16a   :  { %2907 = vmatpush1.bf16.msra.mxu1 %v9642_v12 }
 0x16b   :  { %v10690_v60 = vpop.f32.mrb[16].mxu1  ;;  %2908 = vmatprep.subr.bf16.mxu1 %v9650_v53 }
 0x16c   :  { %v10692_v11 = vpop.f32.mrb[17].mxu1 }
 0x16d   :  { %v10694_v15 = vpop.f32.mrb[18].mxu1 }
 0x16e   :  { %v10696_v17 = vpop.f32.mrb[19].mxu1  ;;  %2909 = vmatpush1.bf16.msra.mxu1 %v9648_v58 }
 0x16f   :  { %2910 = vmatprep.subr.bf16.mxu1 %v9656_v29 }
 0x170   :  { %2406 = vmatmul.mubr.bf16.gmra.mrb[60].mxu1 %v10530_v32  ;;  %2599 = vmatmul.mubr.bf16.gmra.mrb[92].mxu0 %v10699_v30 }
 0x171   :  { %2415 = vmatprep.mubr.bf16.mxu1 %v13504_v54  ;;  %2608 = vmatprep.mubr.bf16.mxu0 %v10535_v37 }
 0x172   :  { %2911 = vmatpush1.bf16.msra.mxu1 %v9654_v45 }
 0x173   :  { %v10704_v31 = vpop.f32.mrb[20].mxu1  ;;  %2912 = vmatprep.subr.bf16.mxu1 %v9662_v20 }
 0x174   :  { %v10706_v12 = vpop.f32.mrb[21].mxu1 }
 0x175   :  { %13763 = vst [vmem:[#allocation29_spill] sm:$0xff] %v10706_v12  ;;  %v10708_v53 = vpop.f32.mrb[22].mxu1 }
 0x176   :  { %v10710_v58 = vpop.f32.mrb[23].mxu1  ;;  %2913 = vmatpush1.bf16.msra.mxu1 %v9660_v57 }
 0x177   :  { %3075 = vmatprep.subr.bf16.mxu1 %v9665_v3 }
 0x178   :  { %2416 = vmatmul.mubr.bf16.gmra.mrb[64].mxu1 %v10538_v61  ;;  %2609 = vmatmul.mubr.bf16.gmra.mrb[96].mxu0 %v10541_v63 }
 0x179   :  { %2425 = vmatprep.mubr.bf16.mxu1 %v13504_v54  ;;  %2618 = vmatprep.mubr.bf16.mxu0 %v10545_v48 }
 0x17b   :  { %v10716_v29 = vpop.f32.mrb[24].mxu1 }
 0x17c   :  { %13764 = vst [vmem:[#allocation30_spill] sm:$0xff] %v10716_v29  ;;  %v10718_v45 = vpop.f32.mrb[25].mxu1 }
 0x17d   :  { %v10720_v20 = vpop.f32.mrb[26].mxu1 }
 0x17e   :  { %v10722_v12 = vpop.f32.mrb[27].mxu1 }
 0x180   :  { %2426 = vmatmul.mubr.bf16.gmra.mrb[68].mxu1 %v10548_v0  ;;  %2619 = vmatmul.mubr.bf16.gmra.mrb[100].mxu0 %v10551_v1 }
 0x181   :  { %2435 = vmatprep.mubr.bf16.mxu1 %v13504_v54  ;;  %2628 = vmatprep.mubr.bf16.mxu0 %v10555_v13 }
 0x183   :  { %v10728_v57 = vpop.f32.mrb[28].mxu1 }
 0x184   :  { %v10730_v3 = vpop.f32.mrb[29].mxu1 }
 0x185   :  { %13765 = vst [vmem:[#allocation31_spill] sm:$0xff] %v10730_v3  ;;  %v10732_v48 = vpop.f32.mrb[30].mxu1 }
 0x186   :  { %13766 = vst [vmem:[#allocation32_spill] sm:$0xff] %v10732_v48  ;;  %v10734_v29 = vpop.f32.mrb[31].mxu1 }
 0x187   :  { %13767 = vst [vmem:[#allocation33_spill] sm:$0xff] %v10734_v29 }
 0x188   :  { %2436 = vmatmul.mubr.bf16.gmra.mrb[72].mxu1 %v10558_v4  ;;  %2629 = vmatmul.mubr.bf16.gmra.mrb[104].mxu0 %v10561_v5  ;;  %v10755_v5 = vld [vmem:[#allocation4 + $0x124] ss:$12 sps:$4 sm:$0xff]  }
 0x189   :  { %2445 = vmatprep.mubr.bf16.mxu1 %v13504_v54  ;;  %2638 = vmatprep.mubr.bf16.mxu0 %v10565_v6  ;;  %v9678_v54 = vld [vmem:[#allocation7 + $0x260] ss:$36 sps:$4 sm:$0xff]   ;;  %v13772_v6 = vmov 0   ;;  %13773 = vst [vmem:[#allocation38_spill] sm:$0xff] %v10755_v5 }
 0x18a   :  { %8028 = vmatprep.subr.bf16.mxu0 %v9678_v54  ;;  %v10775_v54 = vld [vmem:[#allocation4 + $0x13c] ss:$12 sps:$4 sm:$0xff]  }
 0x18b   :  { %v10740_v1 = vpop.f32.mrb[0].mxu0  ;;  %13779 = vst [vmem:[#allocation44_spill] sm:$0xff] %v10775_v54 }
 0x18c   :  { %13768 = vst [vmem:[#allocation34_spill] sm:$0xff] %v10740_v1  ;;  %v10742_v0 = vpop.f32.mrb[1].mxu0 }
 0x18d   :  { %13769 = vst [vmem:[#allocation35_spill] sm:$0xff] %v10742_v0  ;;  %v10744_v13 = vpop.f32.mrb[2].mxu0 }
 0x18e   :  { %13770 = vst [vmem:[#allocation36_spill] sm:$0xff] %v10744_v13  ;;  %v10748_v48 = vpop.f32.mrb[3].mxu0 }
 0x18f   :  { %13771 = vst [vmem:[#allocation37_spill] sm:$0xff] %v10748_v48  ;;  %v10771_v48 = vld [vmem:[#allocation4 + $0x120] ss:$12 sps:$4 sm:$0xff]  }
 0x190   :  { %2446 = vmatmul.mubr.bf16.gmra.mrb[76].mxu1 %v10568_v7  ;;  %2639 = vmatmul.mubr.bf16.gmra.mrb[108].mxu0 %v10571_v36  ;;  %13778 = vst [vmem:[#allocation43_spill] sm:$0xff] %v10771_v48 }
 0x191   :  { %2455 = vmatprep.mubr.bf16.mxu1 %v13772_v6  ;;  %2648 = vmatprep.mubr.bf16.mxu0 %v10755_v5 }
 0x193   :  { %v10758_v29 = vpop.f32.mrb[4].mxu0 }
 0x194   :  { %13774 = vst [vmem:[#allocation39_spill] sm:$0xff] %v10758_v29  ;;  %v10760_v3 = vpop.f32.mrb[5].mxu0 }
 0x195   :  { %13775 = vst [vmem:[#allocation40_spill] sm:$0xff] %v10760_v3  ;;  %v10762_v1 = vpop.f32.mrb[6].mxu0 }
 0x196   :  { %13776 = vst [vmem:[#allocation41_spill] sm:$0xff] %v10762_v1  ;;  %v10766_v13 = vpop.f32.mrb[7].mxu0 }
 0x197   :  { %13777 = vst [vmem:[#allocation42_spill] sm:$0xff] %v10766_v13  ;;  %v10791_v13 = vld [vmem:[#allocation4 + $0x138] ss:$12 sps:$4 sm:$0xff]  }
 0x198   :  { %2456 = vmatmul.mubr.bf16.gmra.mrb[80].mxu1 %v10576_v40  ;;  %2649 = vmatmul.mubr.bf16.gmra.mrb[112].mxu0 %v10771_v48  ;;  %13784 = vst [vmem:[#allocation49_spill] sm:$0xff] %v10791_v13 }
 0x199   :  { %2465 = vmatprep.mubr.bf16.mxu1 %v13772_v6  ;;  %2658 = vmatprep.mubr.bf16.mxu0 %v10775_v54  ;;  %v10795_v54 = vld [vmem:[#allocation4 + $0x154] ss:$12 sps:$4 sm:$0xff]  }
 0x19a   :  { %13785 = vst [vmem:[#allocation50_spill] sm:$0xff] %v10795_v54 }
 0x19b   :  { %v10778_v5 = vpop.f32.mrb[8].mxu0 }
 0x19c   :  { %13780 = vst [vmem:[#allocation45_spill] sm:$0xff] %v10778_v5  ;;  %v10780_v4 = vpop.f32.mrb[9].mxu0 }
 0x19d   :  { %13781 = vst [vmem:[#allocation46_spill] sm:$0xff] %v10780_v4  ;;  %v10782_v29 = vpop.f32.mrb[10].mxu0 }
 0x19e   :  { %13782 = vst [vmem:[#allocation47_spill] sm:$0xff] %v10782_v29  ;;  %v10786_v1 = vpop.f32.mrb[11].mxu0 }
 0x19f   :  { %13783 = vst [vmem:[#allocation48_spill] sm:$0xff] %v10786_v1  ;;  %v10811_v1 = vld [vmem:[#allocation4 + $0x150] ss:$12 sps:$4 sm:$0xff]  }
 0x1a0   :  { %2466 = vmatmul.mubr.bf16.gmra.mrb[84].mxu1 %v10582_v8  ;;  %2659 = vmatmul.mubr.bf16.gmra.mrb[116].mxu0 %v10791_v13  ;;  %13790 = vst [vmem:[#allocation55_spill] sm:$0xff] %v10811_v1  ;;  %v9684_v8 = vld [vmem:[#allocation7 + $0x68] ss:$36 sps:$4 sm:$0xff]  }
 0x1a1   :  { %2475 = vmatprep.mubr.bf16.mxu1 %v13772_v6  ;;  %2668 = vmatprep.mubr.bf16.mxu0 %v10795_v54  ;;  %v10815_v54 = vld [vmem:[#allocation4 + $0x16c] ss:$12 sps:$4 sm:$0xff]  }
 0x1a2   :  { %13791 = vst [vmem:[#allocation56_spill] sm:$0xff] %v10815_v54 }
 0x1a3   :  { %v10798_v48 = vpop.f32.mrb[12].mxu0 }
 0x1a4   :  { %13786 = vst [vmem:[#allocation51_spill] sm:$0xff] %v10798_v48  ;;  %v10800_v0 = vpop.f32.mrb[13].mxu0 }
 0x1a5   :  { %13787 = vst [vmem:[#allocation52_spill] sm:$0xff] %v10800_v0  ;;  %v10802_v5 = vpop.f32.mrb[14].mxu0  ;;  %v9679_v0 = vld [vmem:[#allocation7 + $0x20] ss:$36 sps:$4 sm:$0xff]  }
 0x1a6   :  { %13788 = vst [vmem:[#allocation53_spill] sm:$0xff] %v10802_v5  ;;  %v10806_v29 = vpop.f32.mrb[15].mxu0 }
 0x1a7   :  { %13789 = vst [vmem:[#allocation54_spill] sm:$0xff] %v10806_v29  ;;  %v10831_v29 = vld [vmem:[#allocation4 + $0x168] ss:$12 sps:$4 sm:$0xff]  }
 0x1a8   :  { %2476 = vmatmul.mubr.bf16.gmra.mrb[88].mxu1 %v10588_v10  ;;  %2669 = vmatmul.mubr.bf16.gmra.mrb[120].mxu0 %v10811_v1  ;;  %13796 = vst [vmem:[#allocation61_spill] sm:$0xff] %v10831_v29 }
 0x1a9   :  { %2485 = vmatprep.mubr.bf16.mxu1 %v13772_v6  ;;  %2678 = vmatprep.mubr.bf16.mxu0 %v10815_v54 }
 0x1ab   :  { %v10818_v13 = vpop.f32.mrb[16].mxu0 }
 0x1ac   :  { %13792 = vst [vmem:[#allocation57_spill] sm:$0xff] %v10818_v13  ;;  %v10820_v3 = vpop.f32.mrb[17].mxu0  ;;  %v9663_v13 = vld [vmem:[#allocation7 + $0x498] ss:$36 sps:$4 sm:$0xff]  }
 0x1ad   :  { %13793 = vst [vmem:[#allocation58_spill] sm:$0xff] %v10820_v3  ;;  %v10822_v48 = vpop.f32.mrb[18].mxu0  ;;  %v9668_v3 = vld [vmem:[#allocation7 + $0x4e4] ss:$36 sps:$4 sm:$0xff]  }
 0x1ae   :  { %13794 = vst [vmem:[#allocation59_spill] sm:$0xff] %v10822_v48  ;;  %v10824_v5 = vpop.f32.mrb[19].mxu0 }
 0x1af   :  { %13795 = vst [vmem:[#allocation60_spill] sm:$0xff] %v10824_v5  ;;  %v9683_v5 = vld [vmem:[#allocation7 + $0x2a8] ss:$36 sps:$4 sm:$0xff]  }
 0x1b0   :  { %2486 = vmatmul.mubr.bf16.gmra.mrb[92].mxu1 %v10594_v18  ;;  %2679 = vmatmul.mubr.bf16.gmra.mrb[124].mxu0 %v10831_v29  ;;  %v10848_v18 = vld [vmem:[#allocation4 + $0x8] ss:$12 sps:$4 sm:$0xff]  }
 0x1b1   :  { %2721 = vmatprep.mubr.bf16.mxu0 %v13772_v6  ;;  %2914 = vmatprep.mubr.bf16.mxu1 %v10599_v22  ;;  %13801 = vst [vmem:[#allocation66_spill] sm:$0xff] %v10848_v18  ;;  %v9666_v22 = vld [vmem:[#allocation7 + $0x4e0] ss:$36 sps:$4 sm:$0xff]   ;;  %v9685_v29 = vld [vmem:[#allocation7 + $0x2f0] ss:$36 sps:$4 sm:$0xff]  }
 0x1b3   :  { %v10836_v54 = vpop.f32.mrb[20].mxu0 }
 0x1b4   :  { %13797 = vst [vmem:[#allocation62_spill] sm:$0xff] %v10836_v54  ;;  %v10838_v1 = vpop.f32.mrb[21].mxu0  ;;  %v9671_v54 = vld [vmem:[#allocation7 + $0x52c] ss:$36 sps:$4 sm:$0xff]  }
 0x1b5   :  { %13798 = vst [vmem:[#allocation63_spill] sm:$0xff] %v10838_v1  ;;  %v10840_v10 = vpop.f32.mrb[22].mxu0 }
 0x1b6   :  { %13799 = vst [vmem:[#allocation64_spill] sm:$0xff] %v10840_v10  ;;  %v10842_v4 = vpop.f32.mrb[23].mxu0 }
 0x1b7   :  { %13800 = vst [vmem:[#allocation65_spill] sm:$0xff] %v10842_v4 }
 0x1b8   :  { %2722 = vmatmul.mubr.bf16.vlgmr.msra.gmra.mrb[64].mxu0 %v10848_v18  ;;  %2915 = vmatmul.mubr.bf16.vlgmr.msra.gmra.mrb[96].mxu1 %v10603_v14  ;;  %v9669_v14 = vld [vmem:[#allocation7 + $0x528] ss:$36 sps:$4 sm:$0xff]  }
 0x1b9   :  { %2731 = vmatprep.mubr.bf16.mxu0 %v13772_v6  ;;  %2924 = vmatprep.mubr.bf16.mxu1 %v10607_v44  ;;  %v9686_v44 = vld [vmem:[#allocation7 + $0xb0] ss:$36 sps:$4 sm:$0xff]   ;;  %v10866_v18 = vld [vmem:[#allocation4 + $0x20] ss:$12 sps:$4 sm:$0xff]  }
 0x1ba   :  { %3076 = vmatpush1.bf16.msra.mxu1 %v9663_v13  ;;  %8029 = vmatpush3.bf16.msra.mxu0 %v9679_v0  ;;  %v9674_v13 = vld [vmem:[#allocation7 + $0x574] ss:$36 sps:$4 sm:$0xff]   ;;  %v9689_v0 = vld [vmem:[#allocation7 + $0x380] ss:$36 sps:$4 sm:$0xff]  }
 0x1bb   :  { %v10854_v48 = vpop.f32.mrb[24].mxu0  ;;  %3077 = vmatprep.subr.bf16.mxu1 %v9668_v3  ;;  %8030 = vmatprep.subr.bf16.mxu0 %v9683_v5  ;;  %v9687_v3 = vld [vmem:[#allocation7 + $0x338] ss:$36 sps:$4 sm:$0xff]  }
 0x1bc   :  { %13802 = vst [vmem:[#allocation67_spill] sm:$0xff] %v10854_v48  ;;  %v10856_v10 = vpop.f32.mrb[25].mxu0 }
 0x1bd   :  { %13803 = vst [vmem:[#allocation68_spill] sm:$0xff] %v10856_v10  ;;  %v10858_v1 = vpop.f32.mrb[26].mxu0  ;;  %v9675_v10 = vld [vmem:[#allocation7 + $0x5b8] ss:$36 sps:$4 sm:$0xff]  }
 0x1be   :  { %13804 = vst [vmem:[#allocation69_spill] sm:$0xff] %v10858_v1  ;;  %v10860_v4 = vpop.f32.mrb[27].mxu0  ;;  %3078 = vmatpush1.bf16.msra.mxu1 %v9666_v22  ;;  %8031 = vmatpush3.bf16.msra.mxu0 %v9684_v8  ;;  %v9672_v8 = vld [vmem:[#allocation7 + $0x570] ss:$36 sps:$4 sm:$0xff]   ;;  %v9688_v22 = vld [vmem:[#allocation7 + $0xf8] ss:$36 sps:$4 sm:$0xff]  }
 0x1bf   :  { %13805 = vst [vmem:[#allocation70_spill] sm:$0xff] %v10860_v4  ;;  %3079 = vmatprep.subr.bf16.mxu1 %v9671_v54  ;;  %8032 = vmatprep.subr.bf16.mxu0 %v9685_v29  ;;  %v9677_v29 = vld [vmem:[#allocation7 + $0x5bc] ss:$36 sps:$4 sm:$0xff]  }
 0x1c0   :  { %2732 = vmatmul.mubr.bf16.gmra.mrb[68].mxu0 %v10866_v18  ;;  %2925 = vmatmul.mubr.bf16.gmra.mrb[100].mxu1 %v10611_v23  ;;  %v9690_v4 = vld [vmem:[#allocation7 + $0x140] ss:$36 sps:$4 sm:$0xff]  }
 0x1c1   :  { %2741 = vmatprep.mubr.bf16.mxu0 %v13772_v6  ;;  %2934 = vmatprep.mubr.bf16.mxu1 %v10615_v25  ;;  %v10884_v25 = vld [vmem:[#allocation4 + $0x38] ss:$12 sps:$4 sm:$0xff]  }
 0x1c2   :  { %3080 = vmatpush1.bf16.msra.mxu1 %v9669_v14  ;;  %8033 = vmatpush3.bf16.msra.mxu0 %v9686_v44  ;;  %v9682_v44 = vld [vmem:[#allocation7 + $0x604] ss:$36 sps:$4 sm:$0xff]   ;;  %v9696_v14 = vld [vmem:[#allocation7 + $0x410] ss:$36 sps:$4 sm:$0xff]  }
 0x1c3   :  { %v10872_v54 = vpop.f32.mrb[28].mxu0  ;;  %3081 = vmatprep.subr.bf16.mxu1 %v9674_v13  ;;  %8034 = vmatprep.subr.bf16.mxu0 %v9687_v3  ;;  %v9694_v13 = vld [vmem:[#allocation7 + $0x3c8] ss:$36 sps:$4 sm:$0xff]  }
 0x1c4   :  { %13806 = vst [vmem:[#allocation71_spill] sm:$0xff] %v10872_v54  ;;  %v10874_v5 = vpop.f32.mrb[29].mxu0 }
 0x1c5   :  { %13807 = vst [vmem:[#allocation72_spill] sm:$0xff] %v10874_v5  ;;  %v10876_v48 = vpop.f32.mrb[30].mxu0 }
 0x1c6   :  { %13808 = vst [vmem:[#allocation73_spill] sm:$0xff] %v10876_v48  ;;  %v10878_v1 = vpop.f32.mrb[31].mxu0  ;;  %3082 = vmatpush1.bf16.msra.mxu1 %v9672_v8  ;;  %8035 = vmatpush3.bf16.msra.mxu0 %v9688_v22  ;;  %v9680_v8 = vld [vmem:[#allocation7 + $0x600] ss:$36 sps:$4 sm:$0xff]   ;;  %v9695_v22 = vld [vmem:[#allocation7 + $0x188] ss:$36 sps:$4 sm:$0xff]  }
 0x1c7   :  { %13809 = vst [vmem:[#allocation74_spill] sm:$0xff] %v10878_v1  ;;  %3083 = vmatprep.subr.bf16.mxu1 %v9677_v29  ;;  %8036 = vmatprep.subr.bf16.mxu0 %v9689_v0  ;;  %v9693_v0 = vld [vmem:[#allocation7 + $0x64c] ss:$36 sps:$4 sm:$0xff]  }
 0x1c8   :  { %2742 = vmatmul.mubr.bf16.gmra.mrb[72].mxu0 %v10884_v25  ;;  %2935 = vmatmul.mubr.bf16.gmra.mrb[104].mxu1 %v10619_v38 }
 0x1c9   :  { %2751 = vmatprep.mubr.bf16.mxu0 %v13772_v6  ;;  %2944 = vmatprep.mubr.bf16.mxu1 %v10623_v41  ;;  %v9697_v41 = vld [vmem:[#allocation7 + $0x1d0] ss:$36 sps:$4 sm:$0xff]  }
 0x1ca   :  { %3084 = vmatpush1.bf16.msra.mxu1 %v9675_v10  ;;  %8037 = vmatpush3.bf16.msra.mxu0 %v9690_v4  ;;  %v9691_v4 = vld [vmem:[#allocation7 + $0x648] ss:$36 sps:$4 sm:$0xff]  }
 0x1cb   :  { %v2031_v29 = vpop.f32.mrb[32].mxu0  ;;  %3085 = vmatprep.subr.bf16.mxu1 %v9682_v44  ;;  %8038 = vmatprep.subr.bf16.mxu0 %v9694_v13  ;;  %v9701_v13 = vld [vmem:[#allocation7 + $0x458] ss:$36 sps:$4 sm:$0xff]  }
 0x1cc   :  { %v10891_v3 = vadd.f32 %v2031_v29, %v10626_v46  ;;  %v2033_v54 = vpop.f32.mrb[33].mxu0  ;;  %v9700_v46 = vld [vmem:[#allocation7 + $0x694] ss:$36 sps:$4 sm:$0xff]   ;;  %v10902_v29 = vld [vmem:[#allocation4 + $0x50] ss:$12 sps:$4 sm:$0xff]  }
 0x1cd   :  { %v10894_v48 = vadd.f32 %v2033_v54, %v10628_v50  ;;  %v2035_v5 = vpop.f32.mrb[34].mxu0 }
 0x1ce   :  { %13810 = vst [vmem:[#allocation75_spill] sm:$0xff] %v10891_v3  ;;  %v10897_v1 = vadd.f32 %v2035_v5, %v10630_v16  ;;  %v2037_v10 = vpop.f32.mrb[35].mxu0  ;;  %3086 = vmatpush1.bf16.msra.mxu1 %v9680_v8  ;;  %8039 = vmatpush3.bf16.msra.mxu0 %v9695_v22  ;;  %v9702_v5 = vld [vmem:[#allocation7 + $0x218] ss:$36 sps:$4 sm:$0xff]  }
 0x1cf   :  { %13811 = vst [vmem:[#allocation76_spill] sm:$0xff] %v10894_v48  ;;  %v10900_v44 = vadd.f32 %v2037_v10, %v10632_v52  ;;  %3087 = vmatprep.subr.bf16.mxu1 %v9693_v0  ;;  %8040 = vmatprep.subr.bf16.mxu0 %v9696_v14  ;;  %v9698_v52 = vld [vmem:[#allocation7 + $0x690] ss:$36 sps:$4 sm:$0xff]   ;;  %v10912_v14 = vld [vmem:[#allocation7 + $0x4a0] ss:$36 sps:$4 sm:$0xff]  }
 0x1d0   :  { %13812 = vst [vmem:[#allocation77_spill] sm:$0xff] %v10897_v1  ;;  %2752 = vmatmul.mubr.bf16.gmra.mrb[76].mxu0 %v10902_v29  ;;  %2945 = vmatmul.mubr.bf16.gmra.mrb[108].mxu1 %v10635_v59 }
 0x1d1   :  { %13813 = vst [vmem:[#allocation78_spill] sm:$0xff] %v10900_v44  ;;  %2761 = vmatprep.mubr.bf16.mxu0 %v13772_v6  ;;  %2954 = vmatprep.mubr.bf16.mxu1 %v10639_v42 }
 0x1d2   :  { %3088 = vmatpush1.bf16.msra.mxu1 %v9691_v4  ;;  %8041 = vmatpush3.bf16.msra.mxu0 %v9697_v41 }
 0x1d3   :  { %v2041_v54 = vpop.f32.mrb[36].mxu0  ;;  %3089 = vmatprep.subr.bf16.mxu1 %v9700_v46  ;;  %8042 = vmatprep.subr.bf16.mxu0 %v9701_v13  ;;  %v10929_v46 = vld [vmem:[#allocation4 + $0x68] ss:$12 sps:$4 sm:$0xff]  }
 0x1d4   :  { %v10915_v8 = vadd.f32 %v2041_v54, %v10642_v33  ;;  %v2043_v22 = vpop.f32.mrb[37].mxu0  ;;  %v13852_v33 = vld [vmem:[#allocation19_spill] sm:$0xff] }
 0x1d5   :  { %v10918_v0 = vadd.f32 %v2043_v22, %v10644_v24  ;;  %v2045_v10 = vpop.f32.mrb[38].mxu0 }
 0x1d6   :  { %13814 = vst [vmem:[#allocation79_spill] sm:$0xff] %v10915_v8  ;;  %v10921_v50 = vadd.f32 %v2045_v10, %v10646_v39  ;;  %v2047_v4 = vpop.f32.mrb[39].mxu0  ;;  %3090 = vmatpush1.bf16.msra.mxu1 %v9698_v52  ;;  %8043 = vmatpush3.bf16.msra.mxu0 %v9702_v5 }
 0x1d7   :  { %13815 = vst [vmem:[#allocation80_spill] sm:$0xff] %v10918_v0  ;;  %v10924_v41 = vadd.f32 %v2047_v4, %v10648_v49  ;;  %8428 = vmatprep.subr.bf16.mxu1 %v10912_v14  ;;  %v10949_v4 = vld [vmem:[#allocation4 + $0x80] ss:$12 sps:$4 sm:$0xff]  }
 0x1d8   :  { %13816 = vst [vmem:[#allocation81_spill] sm:$0xff] %v10921_v50  ;;  %2762 = vmatmul.mubr.bf16.gmra.mrb[80].mxu0 %v10929_v46  ;;  %2955 = vmatmul.mubr.bf16.gmra.mrb[112].mxu1 %v10651_v19 }
 0x1d9   :  { %13817 = vst [vmem:[#allocation82_spill] sm:$0xff] %v10924_v41  ;;  %2771 = vmatprep.mubr.bf16.mxu0 %v13772_v6  ;;  %2964 = vmatprep.mubr.bf16.mxu1 %v10655_v56 }
 0x1db   :  { %v2051_v39 = vpop.f32.mrb[40].mxu0 }
 0x1dc   :  { %v10938_v49 = vadd.f32 %v2051_v39, %v10658_v51  ;;  %v2053_v13 = vpop.f32.mrb[41].mxu0 }
 0x1dd   :  { %v10941_v52 = vadd.f32 %v2053_v13, %v10660_v27  ;;  %v2055_v5 = vpop.f32.mrb[42].mxu0 }
 0x1de   :  { %13818 = vst [vmem:[#allocation83_spill] sm:$0xff] %v10938_v49  ;;  %v10944_v54 = vadd.f32 %v2055_v5, %v10662_v28  ;;  %v2057_v22 = vpop.f32.mrb[43].mxu0  ;;  %v9710_v49 = vld [vmem:[#allocation7 + $0x698] ss:$36 sps:$4 sm:$0xff]  }
 0x1df   :  { %13819 = vst [vmem:[#allocation84_spill] sm:$0xff] %v10941_v52  ;;  %v10947_v10 = vadd.f32 %v2057_v22, %v10664_v35 }
 0x1e0   :  { %13820 = vst [vmem:[#allocation85_spill] sm:$0xff] %v10944_v54  ;;  %2772 = vmatmul.mubr.bf16.gmra.mrb[84].mxu0 %v10949_v4  ;;  %2965 = vmatmul.mubr.bf16.gmra.mrb[116].mxu1 %v10667_v2 }
 0x1e1   :  { %13821 = vst [vmem:[#allocation86_spill] sm:$0xff] %v10947_v10  ;;  %2781 = vmatprep.mubr.bf16.mxu0 %v13772_v6  ;;  %2974 = vmatprep.mubr.bf16.mxu1 %v10671_v62 }
 0x1e3   :  { %v2061_v28 = vpop.f32.mrb[44].mxu0 }
 0x1e4   :  { %v10960_v35 = vadd.f32 %v2061_v28, %v10674_v34  ;;  %v2063_v39 = vpop.f32.mrb[45].mxu0 }
 0x1e5   :  { %v10963_v13 = vadd.f32 %v2063_v39, %v10676_v9  ;;  %v2065_v5 = vpop.f32.mrb[46].mxu0 }
 0x1e6   :  { %13822 = vst [vmem:[#allocation87_spill] sm:$0xff] %v10960_v35  ;;  %v10966_v22 = vadd.f32 %v2065_v5, %v10678_v47  ;;  %v2067_v24 = vpop.f32.mrb[47].mxu0  ;;  %v9708_v35 = vld [vmem:[#allocation7 + $0x608] ss:$36 sps:$4 sm:$0xff]  }
 0x1e7   :  { %13823 = vst [vmem:[#allocation88_spill] sm:$0xff] %v10963_v13  ;;  %v10969_v16 = vadd.f32 %v2067_v24, %v10680_v43 }
 0x1e8   :  { %13824 = vst [vmem:[#allocation89_spill] sm:$0xff] %v10966_v22  ;;  %2782 = vmatmul.mubr.bf16.gmra.mrb[88].mxu0 %v10524_v21  ;;  %2975 = vmatmul.mubr.bf16.gmra.mrb[120].mxu1 %v10683_v55 }
 0x1e9   :  { %13825 = vst [vmem:[#allocation90_spill] sm:$0xff] %v10969_v16  ;;  %2791 = vmatprep.mubr.bf16.mxu0 %v13772_v6  ;;  %2984 = vmatprep.mubr.bf16.mxu1 %v10687_v26 }
 0x1eb   :  { %v2071_v9 = vpop.f32.mrb[48].mxu0 }
 0x1ec   :  { %v10980_v47 = vadd.f32 %v2071_v9, %v10690_v60  ;;  %v2073_v43 = vpop.f32.mrb[49].mxu0  ;;  %v13849_v60 = vld [vmem:[#allocation33_spill] sm:$0xff] }
 0x1ed   :  { %v10983_v24 = vadd.f32 %v2073_v43, %v10692_v11  ;;  %v2075_v28 = vpop.f32.mrb[50].mxu0  ;;  %v13831_v43 = vld [vmem:[#allocation29_spill] sm:$0xff] }
 0x1ee   :  { %13826 = vst [vmem:[#allocation91_spill] sm:$0xff] %v10980_v47  ;;  %v10986_v21 = vadd.f32 %v2075_v28, %v10694_v15  ;;  %v2077_v39 = vpop.f32.mrb[51].mxu0 }
 0x1ef   :  { %13827 = vst [vmem:[#allocation92_spill] sm:$0xff] %v10983_v24  ;;  %v10989_v5 = vadd.f32 %v2077_v39, %v10696_v17 }
 0x1f0   :  { %13828 = vst [vmem:[#allocation93_spill] sm:$0xff] %v10986_v21  ;;  %2792 = vmatmul.mubr.bf16.gmra.mrb[92].mxu0 %v10530_v32  ;;  %2985 = vmatmul.mubr.bf16.gmra.mrb[124].mxu1 %v10699_v30 }
 0x1f1   :  { %13829 = vst [vmem:[#allocation94_spill] sm:$0xff] %v10989_v5  ;;  %2801 = vmatprep.mubr.bf16.mxu0 %v13772_v6  ;;  %2994 = vmatprep.mubr.bf16.mxu1 %v10535_v37  ;;  %v13842_v37 = vld [vmem:[#allocation16_spill] sm:$0xff] }
 0x1f3   :  { %v2081_v15 = vpop.f32.mrb[52].mxu0 }
 0x1f4   :  { %v11000_v9 = vadd.f32 %v2081_v15, %v10704_v31  ;;  %v2083_v17 = vpop.f32.mrb[53].mxu0  ;;  %v13835_v31 = vld [vmem:[#allocation14_spill] sm:$0xff] }
 0x1f5   :  { %v11003_v28 = vadd.f32 %v2083_v17, %v13831_v43  ;;  %v2085_v32 = vpop.f32.mrb[54].mxu0  ;;  %v13836_v17 = vld [vmem:[#allocation30_spill] sm:$0xff] }
 0x1f6   :  { %13830 = vst [vmem:[#allocation95_spill] sm:$0xff] %v11000_v9  ;;  %v11006_v39 = vadd.f32 %v2085_v32, %v10708_v53  ;;  %v2087_v34 = vpop.f32.mrb[55].mxu0 }
 0x1f7   :  { %13832 = vst [vmem:[#allocation29_spill] sm:$0xff] %v11003_v28  ;;  %v11009_v27 = vadd.f32 %v2087_v34, %v10710_v58 }
 0x1f8   :  { %13833 = vst [vmem:[#allocation96_spill] sm:$0xff] %v11006_v39  ;;  %2802 = vmatmul.mubr.bf16.gmra.mrb[96].mxu0 %v10538_v61  ;;  %2995 = vmatmul.mubr.bf16.gmra.mrb[128].mxu1 %v10541_v63 }
 0x1f9   :  { %13834 = vst [vmem:[#allocation97_spill] sm:$0xff] %v11009_v27  ;;  %2811 = vmatprep.mubr.bf16.mxu0 %v13772_v6  ;;  %3004 = vmatprep.mubr.bf16.mxu1 %v13835_v31  ;;  %v13841_v31 = vld [vmem:[#allocation15_spill] sm:$0xff] }
 0x1fb   :  { %v2091_v53 = vpop.f32.mrb[56].mxu0 }
 0x1fc   :  { %v11020_v43 = vadd.f32 %v2091_v53, %v13836_v17  ;;  %v2093_v58 = vpop.f32.mrb[57].mxu0  ;;  %v13843_v17 = vld [vmem:[#allocation17_spill] sm:$0xff] }
 0x1fd   :  { %v11023_v34 = vadd.f32 %v2093_v58, %v10718_v45  ;;  %v2095_v32 = vpop.f32.mrb[58].mxu0  ;;  %v13851_v45 = vld [vmem:[#allocation18_spill] sm:$0xff] }
 0x1fe   :  { %13837 = vst [vmem:[#allocation14_spill] sm:$0xff] %v11020_v43  ;;  %v11026_v61 = vadd.f32 %v2095_v32, %v10720_v20  ;;  %v2097_v63 = vpop.f32.mrb[59].mxu0  ;;  %v13845_v32 = vld [vmem:[#allocation31_spill] sm:$0xff] }
 0x1ff   :  { %13838 = vst [vmem:[#allocation30_spill] sm:$0xff] %v11023_v34  ;;  %v11029_v11 = vadd.f32 %v2097_v63, %v10722_v12  ;;  %v9704_v43 = vld [vmem:[#allocation7 + $0x4e8] ss:$36 sps:$4 sm:$0xff]  }
 0x200   :  { %13839 = vst [vmem:[#allocation98_spill] sm:$0xff] %v11026_v61  ;;  %2812 = vmatmul.mubr.bf16.gmra.mrb[100].mxu0 %v13841_v31  ;;  %3005 = vmatmul.mubr.bf16.gmra.mrb[132].mxu1 %v13842_v37  ;;  %v13847_v37 = vld [vmem:[#allocation32_spill] sm:$0xff] }
 0x201   :  { %13840 = vst [vmem:[#allocation99_spill] sm:$0xff] %v11029_v11  ;;  %2821 = vmatprep.mubr.bf16.mxu0 %v13772_v6  ;;  %3014 = vmatprep.mubr.bf16.mxu1 %v13843_v17  ;;  %v9705_v61 = vld [vmem:[#allocation7 + $0x530] ss:$36 sps:$4 sm:$0xff]  }
 0x203   :  { %v2101_v20 = vpop.f32.mrb[60].mxu0 }
 0x204   :  { %v11040_v58 = vadd.f32 %v2101_v20, %v10728_v57  ;;  %v2103_v12 = vpop.f32.mrb[61].mxu0  ;;  %v13853_v57 = vld [vmem:[#allocation20_spill] sm:$0xff] }
 0x205   :  { %v11043_v63 = vadd.f32 %v2103_v12, %v13845_v32  ;;  %v2105_v31 = vpop.f32.mrb[62].mxu0 }
 0x206   :  { %13844 = vst [vmem:[#allocation15_spill] sm:$0xff] %v11040_v58  ;;  %v11046_v15 = vadd.f32 %v2105_v31, %v13847_v37  ;;  %v2107_v53 = vpop.f32.mrb[63].mxu0 }
 0x207   :  { %13846 = vst [vmem:[#allocation16_spill] sm:$0xff] %v11043_v63  ;;  %v11049_v51 = vadd.f32 %v2107_v53, %v13849_v60 }
 0x208   :  { %13848 = vst [vmem:[#allocation17_spill] sm:$0xff] %v11046_v15  ;;  %2822 = vmatmul.mubr.bf16.gmra.mrb[104].mxu0 %v13851_v45  ;;  %3015 = vmatmul.mubr.bf16.gmra.mrb[136].mxu1 %v13852_v33  ;;  %v13854_v33 = vld [vmem:[#allocation38_spill] sm:$0xff] }
 0x209   :  { %13850 = vst [vmem:[#allocation31_spill] sm:$0xff] %v11049_v51  ;;  %2831 = vmatprep.mubr.bf16.mxu0 %v13772_v6  ;;  %3024 = vmatprep.mubr.bf16.mxu1 %v13853_v57 }
 0x20b   :  { %v11059_v12 = vpop.f32.mrb[32].mxu1 }
 0x20c   :  { %v2339_v32 = vpop.f32.mrb[33].mxu1 }
 0x20d   :  { %v11061_v31 = vpop.f32.mrb[34].mxu1 }
 0x20e   :  { %v2343_v53 = vpop.f32.mrb[35].mxu1 }
 0x20f   :  { %v11065_v37 = vpack.c.bf16 %v2343_v53, %v2339_v32 }
 0x210   :  { %2832 = vmatmul.mubr.bf16.gmra.mrb[108].mxu0 %v10568_v7  ;;  %3025 = vmatmul.mubr.bf16.gmra.mrb[140].mxu1 %v10571_v36  ;;  %v13855_v7 = vld [vmem:[#allocation43_spill] sm:$0xff]  ;;  %v13856_v36 = vld [vmem:[#allocation44_spill] sm:$0xff] }
 0x211   :  { %2841 = vmatprep.mubr.bf16.mxu0 %v13772_v6  ;;  %3034 = vmatprep.mubr.bf16.mxu1 %v13854_v33 }
 0x213   :  { %v11071_v45 = vpop.f32.mrb[36].mxu1 }
 0x214   :  { %v2349_v57 = vpop.f32.mrb[37].mxu1 }
 0x215   :  { %v11073_v20 = vpop.f32.mrb[38].mxu1 }
 0x216   :  { %v2353_v60 = vpop.f32.mrb[39].mxu1 }
 0x217   :  { %v11077_v63 = vpack.c.bf16 %v2353_v60, %v2349_v57  ;;  %v13857_v60 = vld [vmem:[#allocation21_spill] sm:$0xff]  ;;  %v13859_v57 = vld [vmem:[#allocation50_spill] sm:$0xff] }
 0x218   :  { %2842 = vmatmul.mubr.bf16.gmra.mrb[112].mxu0 %v10576_v40  ;;  %3035 = vmatmul.mubr.bf16.gmra.mrb[144].mxu1 %v13855_v7  ;;  %v13858_v40 = vld [vmem:[#allocation49_spill] sm:$0xff] }
 0x219   :  { %2851 = vmatprep.mubr.bf16.mxu0 %v13772_v6  ;;  %3044 = vmatprep.mubr.bf16.mxu1 %v13856_v36 }
 0x21b   :  { %v11083_v32 = vpop.f32.mrb[40].mxu1 }
 0x21c   :  { %v2359_v53 = vpop.f32.mrb[41].mxu1 }
 0x21d   :  { %v11085_v51 = vpop.f32.mrb[42].mxu1 }
 0x21e   :  { %v2363_v17 = vpop.f32.mrb[43].mxu1 }
 0x21f   :  { %v11089_v11 = vpack.c.bf16 %v2363_v17, %v2359_v53  ;;  %v13860_v17 = vld [vmem:[#allocation22_spill] sm:$0xff]  ;;  %v13861_v53 = vld [vmem:[#allocation55_spill] sm:$0xff] }
 0x220   :  { %2852 = vmatmul.mubr.bf16.gmra.mrb[116].mxu0 %v13857_v60  ;;  %3045 = vmatmul.mubr.bf16.gmra.mrb[148].mxu1 %v13858_v40  ;;  %v13862_v60 = vld [vmem:[#allocation56_spill] sm:$0xff] }
 0x221   :  { %2861 = vmatprep.mubr.bf16.mxu0 %v13772_v6  ;;  %3054 = vmatprep.mubr.bf16.mxu1 %v13859_v57 }
 0x223   :  { %v11095_v28 = vpop.f32.mrb[44].mxu1 }
 0x224   :  { %v2369_v27 = vpop.f32.mrb[45].mxu1 }
 0x225   :  { %v11097_v24 = vpop.f32.mrb[46].mxu1 }
 0x226   :  { %v2373_v34 = vpop.f32.mrb[47].mxu1 }
 0x227   :  { %v11101_v13 = vpack.c.bf16 %v2373_v34, %v2369_v27  ;;  %v13863_v27 = vld [vmem:[#allocation23_spill] sm:$0xff]  ;;  %v13864_v34 = vld [vmem:[#allocation61_spill] sm:$0xff] }
 0x228   :  { %2862 = vmatmul.mubr.bf16.gmra.mrb[120].mxu0 %v13860_v17  ;;  %3055 = vmatmul.mubr.bf16.gmra.mrb[152].mxu1 %v13861_v53  ;;  %v13865_v17 = vld [vmem:[#allocation24_spill] sm:$0xff] }
 0x229   :  { %2871 = vmatprep.mubr.bf16.mxu0 %v13772_v6  ;;  %3064 = vmatprep.mubr.bf16.mxu1 %v13862_v60 }
 0x22b   :  { %v11107_v16 = vpop.f32.mrb[48].mxu1 }
 0x22c   :  { %v2379_v52 = vpop.f32.mrb[49].mxu1 }
 0x22d   :  { %v11109_v10 = vpop.f32.mrb[50].mxu1 }
 0x22e   :  { %v2383_v5 = vpop.f32.mrb[51].mxu1 }
 0x22f   :  { %v11113_v41 = vpack.c.bf16 %v2383_v5, %v2379_v52  ;;  %v13866_v5 = vld [vmem:[#allocation66_spill] sm:$0xff] }
 0x230   :  { %2872 = vmatmul.mubr.bf16.gmra.mrb[124].mxu0 %v13863_v27  ;;  %3065 = vmatmul.mubr.bf16.gmra.mrb[156].mxu1 %v13864_v34  ;;  %v13867_v27 = vld [vmem:[#allocation25_spill] sm:$0xff] }
 0x231   :  { %3107 = vmatprep.mubr.bf16.mxu1 %v13772_v6  ;;  %3300 = vmatprep.mubr.bf16.mxu0 %v13865_v17  ;;  %v13868_v17 = vld [vmem:[#allocation26_spill] sm:$0xff] }
 0x233   :  { %v11119_v48 = vpop.f32.mrb[52].mxu1 }
 0x234   :  { %v2389_v44 = vpop.f32.mrb[53].mxu1 }
 0x235   :  { %v11121_v58 = vpop.f32.mrb[54].mxu1 }
 0x236   :  { %v2393_v0 = vpop.f32.mrb[55].mxu1 }
 0x237   :  { %v11125_v52 = vpack.c.bf16 %v2393_v0, %v2389_v44 }
 0x238   :  { %3108 = vmatmul.mubr.bf16.vlgmr.msra.gmra.mrb[96].mxu1 %v13866_v5  ;;  %3301 = vmatmul.mubr.bf16.vlgmr.msra.gmra.mrb[128].mxu0 %v13867_v27  ;;  %v9706_v27 = vld [vmem:[#allocation7 + $0x578] ss:$36 sps:$4 sm:$0xff]  }
 0x239   :  { %8429 = vmatpush3.bf16.msra.mxu1 %v10912_v14  ;;  %3117 = vmatprep.mubr.bf16.mxu1 %v13772_v6  ;;  %v13869_v14 = vld [vmem:[#allocation27_spill] sm:$0xff] }
 0x23a   :  { %8430 = vmatprep.subr.bf16.mxu1 %v9704_v43  ;;  %3308 = vmatprep.mubr.bf16.mxu0 %v13868_v17 }
 0x23b   :  { %v11132_v9 = vpop.f32.mrb[56].mxu1 }
 0x23c   :  { %v2399_v39 = vpop.f32.mrb[57].mxu1 }
 0x23d   :  { %8431 = vmatpush3.bf16.msra.mxu1 %v9704_v43  ;;  %v11134_v15 = vpop.f32.mrb[58].mxu1  ;;  %v9707_v43 = vld [vmem:[#allocation7 + $0x5c0] ss:$36 sps:$4 sm:$0xff]  }
 0x23e   :  { %v2403_v0 = vpop.f32.mrb[59].mxu1  ;;  %8432 = vmatprep.subr.bf16.mxu1 %v9705_v61 }
 0x23f   :  { %v11138_v47 = vpack.c.bf16 %v2403_v0, %v2399_v39 }
 0x240   :  { %3118 = vmatmul.mubr.bf16.gmra.mrb[100].mxu1 %v10866_v18  ;;  %3309 = vmatmul.mubr.bf16.gmra.mrb[132].mxu0 %v10611_v23 }
 0x241   :  { %8433 = vmatpush3.bf16.msra.mxu1 %v9705_v61  ;;  %3127 = vmatprep.mubr.bf16.mxu1 %v13772_v6  ;;  %v13870_v61 = vld [vmem:[#allocation28_spill] sm:$0xff] }
 0x242   :  { %8434 = vmatprep.subr.bf16.mxu1 %v9706_v27  ;;  %3316 = vmatprep.mubr.bf16.mxu0 %v13869_v14 }
 0x243   :  { %v11144_v17 = vpop.f32.mrb[60].mxu1 }
 0x244   :  { %v2409_v21 = vpop.f32.mrb[61].mxu1 }
 0x245   :  { %8435 = vmatpush3.bf16.msra.mxu1 %v9706_v27  ;;  %v11146_v44 = vpop.f32.mrb[62].mxu1  ;;  %v9709_v27 = vld [vmem:[#allocation7 + $0x650] ss:$36 sps:$4 sm:$0xff]  }
 0x246   :  { %v2413_v0 = vpop.f32.mrb[63].mxu1  ;;  %8436 = vmatprep.subr.bf16.mxu1 %v9707_v43 }
 0x247   :  { %v11150_v23 = vpack.c.bf16 %v2413_v0, %v2409_v21 }
 0x248   :  { %3128 = vmatmul.mubr.bf16.gmra.mrb[104].mxu1 %v10884_v25  ;;  %3317 = vmatmul.mubr.bf16.gmra.mrb[136].mxu0 %v10619_v38 }
 0x249   :  { %8437 = vmatpush3.bf16.msra.mxu1 %v9707_v43  ;;  %3137 = vmatprep.mubr.bf16.mxu1 %v13772_v6 }
 0x24a   :  { %8438 = vmatprep.subr.bf16.mxu1 %v9708_v35  ;;  %3324 = vmatprep.mubr.bf16.mxu0 %v13870_v61 }
 0x24b   :  { %v11156_v14 = vpop.f32.mrb[64].mxu1 }
 0x24c   :  { %13871 = vst [vmem:[#allocation32_spill] sm:$0xff] %v11156_v14  ;;  %v2419_v22 = vpop.f32.mrb[65].mxu1 }
 0x24d   :  { %8439 = vmatpush3.bf16.msra.mxu1 %v9708_v35  ;;  %v11158_v39 = vpop.f32.mrb[66].mxu1 }
 0x24e   :  { %13872 = vst [vmem:[#allocation33_spill] sm:$0xff] %v11158_v39  ;;  %v2423_v0 = vpop.f32.mrb[67].mxu1  ;;  %8440 = vmatprep.subr.bf16.mxu1 %v9709_v27 }
 0x24f   :  { %v11162_v38 = vpack.c.bf16 %v2423_v0, %v2419_v22 }
 0x250   :  { %3138 = vmatmul.mubr.bf16.gmra.mrb[108].mxu1 %v10902_v29  ;;  %3325 = vmatmul.mubr.bf16.gmra.mrb[140].mxu0 %v10635_v59 }
 0x251   :  { %13873 = vst [vmem:[#allocation18_spill] sm:$0xff] %v11162_v38  ;;  %8441 = vmatpush3.bf16.msra.mxu1 %v9709_v27  ;;  %3147 = vmatprep.mubr.bf16.mxu1 %v13772_v6 }
 0x252   :  { %8442 = vmatprep.subr.bf16.mxu1 %v9710_v49  ;;  %3332 = vmatprep.mubr.bf16.mxu0 %v10639_v42 }
 0x253   :  { %v11168_v35 = vpop.f32.mrb[68].mxu1 }
 0x254   :  { %13874 = vst [vmem:[#allocation19_spill] sm:$0xff] %v11168_v35  ;;  %v2429_v43 = vpop.f32.mrb[69].mxu1 }
 0x255   :  { %8443 = vmatpush3.bf16.msra.mxu1 %v9710_v49  ;;  %v11170_v61 = vpop.f32.mrb[70].mxu1 }
 0x256   :  { %13875 = vst [vmem:[#allocation20_spill] sm:$0xff] %v11170_v61  ;;  %8476 = vmatprep.subr.bf16.mxu1 %v11065_v37  ;;  %v2433_v0 = vpop.f32.mrb[71].mxu1 }
 0x257   :  { %v11175_v21 = vpack.c.bf16 %v2433_v0, %v2429_v43  ;;  %v11258_v0 = vld [vmem:[#allocation4 + $0x110] ss:$12 sps:$4 sm:$0xff]  }
 0x258   :  { %3148 = vmatmul.mubr.bf16.gmra.mrb[112].mxu1 %v10929_v46  ;;  %3333 = vmatmul.mubr.bf16.gmra.mrb[144].mxu0 %v10651_v19 }
 0x259   :  { %13876 = vst [vmem:[#allocation38_spill] sm:$0xff] %v11175_v21  ;;  %3157 = vmatprep.mubr.bf16.mxu1 %v13772_v6  ;;  %3340 = vmatprep.mubr.bf16.mxu0 %v10655_v56  ;;  %v14026_v21 = vmov 0 }
 0x25b   :  { %v11181_v59 = vpop.f32.mrb[72].mxu1 }
 0x25c   :  { %13877 = vst [vmem:[#allocation43_spill] sm:$0xff] %v11181_v59  ;;  %v2439_v42 = vpop.f32.mrb[73].mxu1 }
 0x25d   :  { %v11183_v49 = vpop.f32.mrb[74].mxu1 }
 0x25e   :  { %13878 = vst [vmem:[#allocation44_spill] sm:$0xff] %v11183_v49  ;;  %v2443_v22 = vpop.f32.mrb[75].mxu1 }
 0x25f   :  { %v11187_v35 = vpack.c.bf16 %v2443_v22, %v2439_v42  ;;  %v11201_v22 = vld [vmem:[#allocation4 + $0x98] ss:$12 sps:$4 sm:$0xff]  }
 0x260   :  { %3158 = vmatmul.mubr.bf16.gmra.mrb[116].mxu1 %v10949_v4  ;;  %3341 = vmatmul.mubr.bf16.gmra.mrb[148].mxu0 %v10667_v2 }
 0x261   :  { %13879 = vst [vmem:[#allocation21_spill] sm:$0xff] %v11187_v35  ;;  %3167 = vmatprep.mubr.bf16.mxu1 %v13772_v6  ;;  %3348 = vmatprep.mubr.bf16.mxu0 %v10671_v62 }
 0x263   :  { %v11193_v19 = vpop.f32.mrb[76].mxu1 }
 0x264   :  { %13880 = vst [vmem:[#allocation49_spill] sm:$0xff] %v11193_v19  ;;  %v2449_v56 = vpop.f32.mrb[77].mxu1  ;;  %v11215_v19 = vld [vmem:[#allocation4 + $0xb0] ss:$12 sps:$4 sm:$0xff]  }
 0x265   :  { %v11195_v43 = vpop.f32.mrb[78].mxu1 }
 0x266   :  { %13881 = vst [vmem:[#allocation50_spill] sm:$0xff] %v11195_v43  ;;  %v2453_v27 = vpop.f32.mrb[79].mxu1 }
 0x267   :  { %v11199_v59 = vpack.c.bf16 %v2453_v27, %v2449_v56 }
 0x268   :  { %3168 = vmatmul.mubr.bf16.gmra.mrb[120].mxu1 %v11201_v22  ;;  %3349 = vmatmul.mubr.bf16.gmra.mrb[152].mxu0 %v10683_v55  ;;  %v10231_v55 = vld [vmem:[#allocation4 + $0xc4] ss:$12 sps:$4 sm:$0xff]  }
 0x269   :  { %13882 = vst [vmem:[#allocation22_spill] sm:$0xff] %v11199_v59  ;;  %3177 = vmatprep.mubr.bf16.mxu1 %v13772_v6  ;;  %3356 = vmatprep.mubr.bf16.mxu0 %v10687_v26 }
 0x26b   :  { %v11207_v2 = vpop.f32.mrb[80].mxu1 }
 0x26c   :  { %13883 = vst [vmem:[#allocation55_spill] sm:$0xff] %v11207_v2  ;;  %v2459_v62 = vpop.f32.mrb[81].mxu1  ;;  %v11228_v2 = vld [vmem:[#allocation4 + $0xc8] ss:$12 sps:$4 sm:$0xff]  }
 0x26d   :  { %v11209_v42 = vpop.f32.mrb[82].mxu1 }
 0x26e   :  { %13884 = vst [vmem:[#allocation56_spill] sm:$0xff] %v11209_v42  ;;  %v2463_v27 = vpop.f32.mrb[83].mxu1 }
 0x26f   :  { %v11213_v56 = vpack.c.bf16 %v2463_v27, %v2459_v62 }
 0x270   :  { %3178 = vmatmul.mubr.bf16.gmra.mrb[124].mxu1 %v11215_v19  ;;  %3357 = vmatmul.mubr.bf16.gmra.mrb[156].mxu0 %v10699_v30  ;;  %v10233_v30 = vld [vmem:[#allocation4 + $0xc0] ss:$12 sps:$4 sm:$0xff]  }
 0x271   :  { %13885 = vst [vmem:[#allocation23_spill] sm:$0xff] %v11213_v56  ;;  %3187 = vmatprep.mubr.bf16.mxu1 %v13772_v6  ;;  %3364 = vmatprep.mubr.bf16.mxu0 %v10231_v55  ;;  %v10234_v55 = vld [vmem:[#allocation4 + $0xdc] ss:$12 sps:$4 sm:$0xff]  }
 0x273   :  { %v11220_v26 = vpop.f32.mrb[84].mxu1 }
 0x274   :  { %13886 = vst [vmem:[#allocation61_spill] sm:$0xff] %v11220_v26  ;;  %v2469_v43 = vpop.f32.mrb[85].mxu1  ;;  %v11240_v26 = vld [vmem:[#allocation4 + $0xe0] ss:$12 sps:$4 sm:$0xff]  }
 0x275   :  { %v11222_v49 = vpop.f32.mrb[86].mxu1 }
 0x276   :  { %13887 = vst [vmem:[#allocation24_spill] sm:$0xff] %v11222_v49  ;;  %v2473_v62 = vpop.f32.mrb[87].mxu1 }
 0x277   :  { %v11226_v27 = vpack.c.bf16 %v2473_v62, %v2469_v43 }
 0x278   :  { %3188 = vmatmul.mubr.bf16.gmra.mrb[128].mxu1 %v11228_v2  ;;  %3365 = vmatmul.mubr.bf16.gmra.mrb[160].mxu0 %v10233_v30  ;;  %v10236_v30 = vld [vmem:[#allocation4 + $0xd8] ss:$12 sps:$4 sm:$0xff]  }
 0x279   :  { %13888 = vst [vmem:[#allocation66_spill] sm:$0xff] %v11226_v27  ;;  %3197 = vmatprep.mubr.bf16.mxu1 %v13772_v6  ;;  %3372 = vmatprep.mubr.bf16.mxu0 %v10234_v55  ;;  %v10237_v55 = vld [vmem:[#allocation4 + $0xf4] ss:$12 sps:$4 sm:$0xff]  }
 0x27b   :  { %v11232_v42 = vpop.f32.mrb[88].mxu1 }
 0x27c   :  { %13889 = vst [vmem:[#allocation25_spill] sm:$0xff] %v11232_v42  ;;  %v2479_v61 = vpop.f32.mrb[89].mxu1  ;;  %v11252_v42 = vld [vmem:[#allocation4 + $0xf8] ss:$12 sps:$4 sm:$0xff]  }
 0x27d   :  { %v11234_v14 = vpop.f32.mrb[90].mxu1 }
 0x27e   :  { %13890 = vst [vmem:[#allocation26_spill] sm:$0xff] %v11234_v14  ;;  %v2483_v43 = vpop.f32.mrb[91].mxu1 }
 0x27f   :  { %v11238_v62 = vpack.c.bf16 %v2483_v43, %v2479_v61 }
 0x280   :  { %3198 = vmatmul.mubr.bf16.gmra.mrb[132].mxu1 %v11240_v26  ;;  %3373 = vmatmul.mubr.bf16.gmra.mrb[164].mxu0 %v10236_v30  ;;  %v10239_v30 = vld [vmem:[#allocation4 + $0xf0] ss:$12 sps:$4 sm:$0xff]  }
 0x281   :  { %13891 = vst [vmem:[#allocation27_spill] sm:$0xff] %v11238_v62  ;;  %3207 = vmatprep.mubr.bf16.mxu1 %v13772_v6  ;;  %3380 = vmatprep.mubr.bf16.mxu0 %v10237_v55  ;;  %v10240_v55 = vld [vmem:[#allocation4 + $0x10c] ss:$12 sps:$4 sm:$0xff]  }
 0x283   :  { %v11244_v49 = vpop.f32.mrb[92].mxu1 }
 0x284   :  { %13892 = vst [vmem:[#allocation28_spill] sm:$0xff] %v11244_v49  ;;  %v2489_v39 = vpop.f32.mrb[93].mxu1 }
 0x285   :  { %v11246_v54 = vpop.f32.mrb[94].mxu1 }
 0x286   :  { %13893 = vst [vmem:[#allocation100_spill] sm:$0xff] %v11246_v54  ;;  %v2493_v61 = vpop.f32.mrb[95].mxu1 }
 0x287   :  { %v11250_v43 = vpack.c.bf16 %v2493_v61, %v2489_v39  ;;  %v10242_v39 = vld [vmem:[#allocation4 + $0x108] ss:$12 sps:$4 sm:$0xff]  }
 0x288   :  { %3208 = vmatmul.mubr.bf16.gmra.mrb[136].mxu1 %v11252_v42  ;;  %3381 = vmatmul.mubr.bf16.gmra.mrb[168].mxu0 %v10239_v30 }
 0x289   :  { %13894 = vst [vmem:[#allocation101_spill] sm:$0xff] %v11250_v43  ;;  %3217 = vmatprep.mubr.bf16.mxu1 %v13772_v6  ;;  %3388 = vmatprep.mubr.bf16.mxu0 %v10240_v55 }
 0x28b   :  { %v2723_v14 = vpop.f32.mrb[64].mxu0 }
 0x28c   :  { %v2725_v8 = vpop.f32.mrb[65].mxu0 }
 0x28d   :  { %v2727_v50 = vpop.f32.mrb[66].mxu0 }
 0x28e   :  { %v2729_v62 = vpop.f32.mrb[67].mxu0  ;;  %v3594_v27 = vpack.c.bf16 %v2727_v50, %v2723_v14 }
 0x28f   :  { %v11256_v56 = vpack.c.bf16 %v2729_v62, %v2725_v8  ;;  %v11265_v8 = vld [vmem:[#allocation4 + $0x128] ss:$12 sps:$4 sm:$0xff]  }
 0x290   :  { %3218 = vmatmul.mubr.bf16.gmra.mrb[140].mxu1 %v11258_v0  ;;  %3389 = vmatmul.mubr.bf16.gmra.mrb[172].mxu0 %v10242_v39 }
 0x291   :  { %8540 = vmatprep.subr.bf16.mxu0 %v3594_v27  ;;  %3227 = vmatprep.mubr.bf16.mxu1 %v13772_v6 }
 0x292   :  { %8541 = vmatpush3.bf16.xpose.msra.mxu0 %v3594_v27  ;;  %3396 = vmatprep.mubr.bf16.mxu0 %v13854_v33 }
 0x293   :  { %v2733_v61 = vpop.f32.mrb[68].mxu0 }
 0x294   :  { %v2735_v30 = vpop.f32.mrb[69].mxu0 }
 0x295   :  { %v2737_v55 = vpop.f32.mrb[70].mxu0 }
 0x296   :  { %v2739_v49 = vpop.f32.mrb[71].mxu0  ;;  %v3603_v54 = vpack.c.bf16 %v2737_v55, %v2733_v61 }
 0x297   :  { %v11263_v50 = vpack.c.bf16 %v2739_v49, %v2735_v30  ;;  %v11273_v49 = vld [vmem:[#allocation4 + $0x140] ss:$12 sps:$4 sm:$0xff]  }
 0x298   :  { %3228 = vmatmul.mubr.bf16.gmra.mrb[144].mxu1 %v11265_v8  ;;  %3397 = vmatmul.mubr.bf16.gmra.mrb[176].mxu0 %v13855_v7 }
 0x299   :  { %8542 = vmatprep.subr.bf16.mxu0 %v3603_v54  ;;  %3237 = vmatprep.mubr.bf16.mxu1 %v13772_v6 }
 0x29a   :  { %8543 = vmatpush3.bf16.xpose.msra.mxu0 %v3603_v54  ;;  %3404 = vmatprep.mubr.bf16.mxu0 %v13856_v36 }
 0x29b   :  { %v2743_v33 = vpop.f32.mrb[72].mxu0 }
 0x29c   :  { %v2745_v14 = vpop.f32.mrb[73].mxu0 }
 0x29d   :  { %v2747_v27 = vpop.f32.mrb[74].mxu0 }
 0x29e   :  { %v2749_v62 = vpop.f32.mrb[75].mxu0  ;;  %v3612_v39 = vpack.c.bf16 %v2747_v27, %v2743_v33 }
 0x29f   :  { %v11271_v61 = vpack.c.bf16 %v2749_v62, %v2745_v14  ;;  %v11281_v14 = vld [vmem:[#allocation4 + $0x158] ss:$12 sps:$4 sm:$0xff]  }
 0x2a0   :  { %3238 = vmatmul.mubr.bf16.gmra.mrb[148].mxu1 %v11273_v49  ;;  %3405 = vmatmul.mubr.bf16.gmra.mrb[180].mxu0 %v13858_v40 }
 0x2a1   :  { %8544 = vmatprep.subr.bf16.mxu0 %v3612_v39  ;;  %3247 = vmatprep.mubr.bf16.mxu1 %v13772_v6 }
 0x2a2   :  { %8545 = vmatpush3.bf16.xpose.msra.mxu0 %v3612_v39  ;;  %3412 = vmatprep.mubr.bf16.mxu0 %v13859_v57 }
 0x2a3   :  { %v2753_v54 = vpop.f32.mrb[76].mxu0 }
 0x2a4   :  { %v2755_v7 = vpop.f32.mrb[77].mxu0 }
 0x2a5   :  { %v2757_v36 = vpop.f32.mrb[78].mxu0 }
 0x2a6   :  { %v2759_v30 = vpop.f32.mrb[79].mxu0  ;;  %v3621_v55 = vpack.c.bf16 %v2757_v36, %v2753_v54  ;;  %v13896_v36 = vld [vmem:[#allocation35_spill] sm:$0xff] }
 0x2a7   :  { %v11279_v33 = vpack.c.bf16 %v2759_v30, %v2755_v7  ;;  %v11289_v7 = vld [vmem:[#allocation4 + $0x170] ss:$12 sps:$4 sm:$0xff]  }
 0x2a8   :  { %3248 = vmatmul.mubr.bf16.gmra.mrb[152].mxu1 %v11281_v14  ;;  %3413 = vmatmul.mubr.bf16.gmra.mrb[184].mxu0 %v13861_v53  ;;  %v13895_v53 = vld [vmem:[#allocation37_spill] sm:$0xff] }
 0x2a9   :  { %8546 = vmatprep.subr.bf16.mxu0 %v3621_v55  ;;  %3257 = vmatprep.mubr.bf16.mxu1 %v13772_v6  ;;  %v13897_v6 = vpack.c.bf16 %v13895_v53, %v13896_v36 }
 0x2aa   :  { %8547 = vmatpush3.bf16.xpose.msra.mxu0 %v3621_v55  ;;  %3420 = vmatprep.mubr.bf16.mxu0 %v13862_v60 }
 0x2ab   :  { %v2763_v40 = vpop.f32.mrb[80].mxu0 }
 0x2ac   :  { %v2765_v57 = vpop.f32.mrb[81].mxu0 }
 0x2ad   :  { %v2767_v27 = vpop.f32.mrb[82].mxu0 }
 0x2ae   :  { %v3630_v62 = vpack.c.bf16 %v2767_v27, %v2763_v40  ;;  %v2769_v39 = vpop.f32.mrb[83].mxu0 }
 0x2af   :  { %v11287_v54 = vpack.c.bf16 %v2769_v39, %v2765_v57 }
 0x2b0   :  { %3258 = vmatmul.mubr.bf16.gmra.mrb[156].mxu1 %v11289_v7  ;;  %3421 = vmatmul.mubr.bf16.gmra.mrb[188].mxu0 %v13864_v34 }
 0x2b1   :  { %8548 = vmatprep.subr.bf16.mxu0 %v3630_v62  ;;  %8556 = vmatprep.mubr.bf16.mxu0 %v13897_v6 }
 0x2b2   :  { %8549 = vmatpush3.bf16.xpose.msra.mxu0 %v3630_v62  ;;  %8444 = vmatprep.mubr.bf16.mxu1 %v13866_v5 }
 0x2b3   :  { %v2773_v60 = vpop.f32.mrb[84].mxu0 }
 0x2b4   :  { %v2775_v30 = vpop.f32.mrb[85].mxu0 }
 0x2b5   :  { %v2777_v55 = vpop.f32.mrb[86].mxu0 }
 0x2b6   :  { %v3639_v40 = vpack.c.bf16 %v2777_v55, %v2773_v60  ;;  %v2779_v57 = vpop.f32.mrb[87].mxu0 }
 0x2b7   :  { %v11297_v27 = vpack.c.bf16 %v2779_v57, %v2775_v30 }
 0x2b8   :  { %8445 = vmatmul.mubr.bf16.vlgmr.msra.gmra.mrb[160].mxu1 %v10866_v18  ;;  %8550 = vmatprep.subr.bf16.mxu0 %v3639_v40 }
 0x2b9   :  { %8477 = vmatpush3.bf16.xpose.msra.mxu1 %v11065_v37  ;;  %8448 = vmatprep.mubr.bf16.mxu1 %v10884_v25 }
 0x2ba   :  { %8478 = vmatprep.subr.bf16.mxu1 %v11077_v63  ;;  %8551 = vmatpush3.bf16.xpose.msra.mxu0 %v3639_v40 }
 0x2bb   :  { %v2783_v34 = vpop.f32.mrb[88].mxu0 }
 0x2bc   :  { %v2785_v62 = vpop.f32.mrb[89].mxu0 }
 0x2bd   :  { %v2787_v5 = vpop.f32.mrb[90].mxu0 }
 0x2be   :  { %v3648_v39 = vpack.c.bf16 %v2787_v5, %v2783_v34  ;;  %v2789_v53 = vpop.f32.mrb[91].mxu0  ;;  %v13903_v34 = vld [vmem:[#allocation48_spill] sm:$0xff] }
 0x2bf   :  { %v11303_v36 = vpack.c.bf16 %v2789_v53, %v2785_v62  ;;  %v13904_v62 = vld [vmem:[#allocation46_spill] sm:$0xff] }
 0x2c0   :  { %8449 = vmatmul.mubr.bf16.gmra.mrb[164].mxu1 %v10902_v29  ;;  %8552 = vmatprep.subr.bf16.mxu0 %v3648_v39  ;;  %v13905_v5 = vpack.c.bf16 %v13903_v34, %v13904_v62 }
 0x2c1   :  { %8479 = vmatpush3.bf16.xpose.msra.mxu1 %v11077_v63  ;;  %8452 = vmatprep.mubr.bf16.mxu1 %v10929_v46 }
 0x2c2   :  { %8480 = vmatprep.subr.bf16.mxu1 %v11089_v11  ;;  %8553 = vmatpush3.bf16.xpose.msra.mxu0 %v3648_v39 }
 0x2c3   :  { %v2793_v18 = vpop.f32.mrb[92].mxu0 }
 0x2c4   :  { %v2795_v25 = vpop.f32.mrb[93].mxu0 }
 0x2c5   :  { %v2797_v37 = vpop.f32.mrb[94].mxu0 }
 0x2c6   :  { %v3657_v6 = vpack.c.bf16 %v2797_v37, %v2793_v18  ;;  %v2799_v60 = vpop.f32.mrb[95].mxu0  ;;  %v13908_v37 = vld [vmem:[#allocation54_spill] sm:$0xff] }
 0x2c7   :  { %v11309_v30 = vpack.c.bf16 %v2799_v60, %v2795_v25 }
 0x2c8   :  { %8453 = vmatmul.mubr.bf16.gmra.mrb[168].mxu1 %v10949_v4  ;;  %8554 = vmatprep.subr.bf16.mxu0 %v3657_v6  ;;  %v13900_v4 = vld [vmem:[#allocation42_spill] sm:$0xff] }
 0x2c9   :  { %8481 = vmatpush3.bf16.xpose.msra.mxu1 %v11089_v11  ;;  %8456 = vmatprep.mubr.bf16.mxu1 %v11201_v22  ;;  %v13901_v11 = vld [vmem:[#allocation40_spill] sm:$0xff] }
 0x2ca   :  { %8482 = vmatprep.subr.bf16.mxu1 %v11101_v13  ;;  %8555 = vmatpush3.bf16.xpose.msra.mxu0 %v3657_v6  ;;  %v13902_v22 = vpack.c.bf16 %v13900_v4, %v13901_v11  ;;  %v13909_v6 = vld [vmem:[#allocation52_spill] sm:$0xff]  ;;  %v13916_v11 = vld [vmem:[#allocation65_spill] sm:$0xff] }
 0x2cb   :  { %8604 = vmatprep.subr.bf16.mxu0 %v11256_v56  ;;  %v2803_v29 = vpop.f32.mrb[96].mxu0  ;;  %v13910_v60 = vpack.c.bf16 %v13908_v37, %v13909_v6  ;;  %v13925_v37 = vld [vmem:[#allocation72_spill] sm:$0xff] }
 0x2cc   :  { %v2805_v46 = vpop.f32.mrb[97].mxu0 }
 0x2cd   :  { %v2807_v63 = vpop.f32.mrb[98].mxu0 }
 0x2ce   :  { %v11316_v55 = vpack.c.bf16 %v2807_v63, %v2803_v29  ;;  %v2809_v40 = vpop.f32.mrb[99].mxu0 }
 0x2cf   :  { %v11318_v57 = vpack.c.bf16 %v2809_v40, %v2805_v46 }
 0x2d0   :  { %13898 = vst [vmem:[#allocation37_spill] sm:$0xff] %v11316_v55  ;;  %8457 = vmatmul.mubr.bf16.gmra.mrb[172].mxu1 %v11215_v19 }
 0x2d1   :  { %13899 = vst [vmem:[#allocation35_spill] sm:$0xff] %v11318_v57  ;;  %8483 = vmatpush3.bf16.xpose.msra.mxu1 %v11101_v13  ;;  %8557 = vmatmul.mubr.bf16.vlgmr.msra.gmra.mrb[192].mxu0 %v13902_v22  ;;  %v13917_v22 = vld [vmem:[#allocation63_spill] sm:$0xff] }
 0x2d2   :  { %8484 = vmatprep.subr.bf16.mxu1 %v11113_v41  ;;  %8560 = vmatprep.mubr.bf16.mxu0 %v13905_v5  ;;  %v13918_v34 = vpack.c.bf16 %v13916_v11, %v13917_v22  ;;  %v13935_v11 = vld [vmem:[#allocation41_spill] sm:$0xff] }
 0x2d3   :  { %8605 = vmatpush3.bf16.xpose.msra.mxu0 %v11256_v56  ;;  %v2813_v39 = vpop.f32.mrb[100].mxu0  ;;  %8460 = vmatprep.mubr.bf16.mxu1 %v11228_v2  ;;  %v13911_v2 = vld [vmem:[#allocation60_spill] sm:$0xff]  ;;  %v13912_v56 = vld [vmem:[#allocation58_spill] sm:$0xff] }
 0x2d4   :  { %8606 = vmatprep.subr.bf16.mxu0 %v11263_v50  ;;  %v2815_v19 = vpop.f32.mrb[101].mxu0  ;;  %v13913_v29 = vpack.c.bf16 %v13911_v2, %v13912_v56 }
 0x2d5   :  { %v2817_v53 = vpop.f32.mrb[102].mxu0 }
 0x2d6   :  { %v11332_v13 = vpack.c.bf16 %v2817_v53, %v2813_v39  ;;  %v2819_v18 = vpop.f32.mrb[103].mxu0 }
 0x2d7   :  { %v11334_v25 = vpack.c.bf16 %v2819_v18, %v2815_v19  ;;  %v13924_v18 = vld [vmem:[#allocation74_spill] sm:$0xff] }
 0x2d8   :  { %13906 = vst [vmem:[#allocation42_spill] sm:$0xff] %v11332_v13  ;;  %8461 = vmatmul.mubr.bf16.gmra.mrb[176].mxu1 %v11240_v26  ;;  %v13926_v6 = vpack.c.bf16 %v13924_v18, %v13925_v37  ;;  %v13944_v18 = vld [vmem:[#allocation51_spill] sm:$0xff] }
 0x2d9   :  { %13907 = vst [vmem:[#allocation40_spill] sm:$0xff] %v11334_v25  ;;  %8485 = vmatpush3.bf16.xpose.msra.mxu1 %v11113_v41  ;;  %8561 = vmatmul.mubr.bf16.gmra.mrb[196].mxu0 %v13910_v60 }
 0x2da   :  { %8486 = vmatprep.subr.bf16.mxu1 %v11125_v52  ;;  %8564 = vmatprep.mubr.bf16.mxu0 %v13913_v29 }
 0x2db   :  { %8607 = vmatpush3.bf16.xpose.msra.mxu0 %v11263_v50  ;;  %v2823_v46 = vpop.f32.mrb[104].mxu0  ;;  %8464 = vmatprep.mubr.bf16.mxu1 %v11252_v42  ;;  %v13919_v42 = vld [vmem:[#allocation70_spill] sm:$0xff]  ;;  %v13920_v50 = vld [vmem:[#allocation68_spill] sm:$0xff] }
 0x2dc   :  { %8608 = vmatprep.subr.bf16.mxu0 %v11271_v61  ;;  %v2825_v26 = vpop.f32.mrb[105].mxu0  ;;  %v13921_v62 = vpack.c.bf16 %v13919_v42, %v13920_v50 }
 0x2dd   :  { %v2827_v63 = vpop.f32.mrb[106].mxu0 }
 0x2de   :  { %v11348_v41 = vpack.c.bf16 %v2827_v63, %v2823_v46  ;;  %v2829_v40 = vpop.f32.mrb[107].mxu0 }
 0x2df   :  { %v11350_v4 = vpack.c.bf16 %v2829_v40, %v2825_v26 }
 0x2e0   :  { %13914 = vst [vmem:[#allocation48_spill] sm:$0xff] %v11348_v41  ;;  %8465 = vmatmul.mubr.bf16.gmra.mrb[180].mxu1 %v11258_v0 }
 0x2e1   :  { %13915 = vst [vmem:[#allocation46_spill] sm:$0xff] %v11350_v4  ;;  %8487 = vmatpush3.bf16.xpose.msra.mxu1 %v11125_v52  ;;  %8565 = vmatmul.mubr.bf16.gmra.mrb[200].mxu0 %v13918_v34  ;;  %v13939_v34 = vld [vmem:[#allocation45_spill] sm:$0xff] }
 0x2e2   :  { %8488 = vmatprep.subr.bf16.mxu1 %v11138_v47  ;;  %8568 = vmatprep.mubr.bf16.mxu0 %v13921_v62 }
 0x2e3   :  { %8609 = vmatpush3.bf16.xpose.msra.mxu0 %v11271_v61  ;;  %v2833_v5 = vpop.f32.mrb[108].mxu0  ;;  %8468 = vmatprep.mubr.bf16.mxu1 %v11265_v8  ;;  %v13927_v8 = vpack.c.bf16 %v11061_v31, %v11059_v12  ;;  %v13930_v12 = vld [vmem:[#allocation36_spill] sm:$0xff]  ;;  %v13931_v31 = vld [vmem:[#allocation34_spill] sm:$0xff] }
 0x2e4   :  { %8610 = vmatprep.subr.bf16.mxu0 %v11279_v33  ;;  %v2835_v0 = vpop.f32.mrb[109].mxu0  ;;  %v13932_v29 = vpack.c.bf16 %v13930_v12, %v13931_v31 }
 0x2e5   :  { %v2837_v39 = vpop.f32.mrb[110].mxu0 }
 0x2e6   :  { %v11364_v52 = vpack.c.bf16 %v2837_v39, %v2833_v5  ;;  %v2839_v19 = vpop.f32.mrb[111].mxu0 }
 0x2e7   :  { %v11366_v53 = vpack.c.bf16 %v2839_v19, %v2835_v0  ;;  %v13943_v19 = vld [vmem:[#allocation53_spill] sm:$0xff] }
 0x2e8   :  { %13922 = vst [vmem:[#allocation54_spill] sm:$0xff] %v11364_v52  ;;  %8469 = vmatmul.mubr.bf16.gmra.mrb[184].mxu1 %v11273_v49  ;;  %v13945_v37 = vpack.c.bf16 %v13943_v19, %v13944_v18 }
 0x2e9   :  { %13923 = vst [vmem:[#allocation52_spill] sm:$0xff] %v11366_v53  ;;  %8489 = vmatpush3.bf16.xpose.msra.mxu1 %v11138_v47  ;;  %8569 = vmatmul.mubr.bf16.gmra.mrb[204].mxu0 %v13926_v6  ;;  %v13946_v6 = vld [vmem:[#allocation59_spill] sm:$0xff] }
 0x2ea   :  { %8490 = vmatprep.subr.bf16.mxu1 %v11150_v23  ;;  %8620 = vmatprep.mubr.bf16.mxu0 %v13927_v8  ;;  %v13947_v8 = vld [vmem:[#allocation57_spill] sm:$0xff] }
 0x2eb   :  { %8611 = vmatpush3.bf16.xpose.msra.mxu0 %v11279_v33  ;;  %v2843_v61 = vpop.f32.mrb[112].mxu0  ;;  %8472 = vmatprep.mubr.bf16.mxu1 %v11281_v14 }
 0x2ec   :  { %8612 = vmatprep.subr.bf16.mxu0 %v11287_v54  ;;  %v2845_v49 = vpop.f32.mrb[113].mxu0 }
 0x2ed   :  { %v2847_v60 = vpop.f32.mrb[114].mxu0 }
 0x2ee   :  { %v11380_v47 = vpack.c.bf16 %v2847_v60, %v2843_v61  ;;  %v2849_v2 = vpop.f32.mrb[115].mxu0  ;;  %v13948_v61 = vpack.c.bf16 %v13946_v6, %v13947_v8  ;;  %v13958_v6 = vld [vmem:[#allocation71_spill] sm:$0xff] }
 0x2ef   :  { %v11382_v56 = vpack.c.bf16 %v2849_v2, %v2845_v49 }
 0x2f0   :  { %13928 = vst [vmem:[#allocation60_spill] sm:$0xff] %v11380_v47  ;;  %8473 = vmatmul.mubr.bf16.gmra.mrb[188].mxu1 %v11289_v7  ;;  %v13936_v7 = vld [vmem:[#allocation39_spill] sm:$0xff] }
 0x2f1   :  { %13929 = vst [vmem:[#allocation58_spill] sm:$0xff] %v11382_v56  ;;  %8491 = vmatpush3.bf16.xpose.msra.mxu1 %v11150_v23  ;;  %8492 = vmatprep.mubr.bf16.mxu1 %v13932_v29  ;;  %v13937_v22 = vpack.c.bf16 %v13935_v11, %v13936_v7  ;;  %v13938_v23 = vld [vmem:[#allocation47_spill] sm:$0xff]  ;;  %v13951_v29 = vld [vmem:[#allocation64_spill] sm:$0xff] }
 0x2f2   :  { %v13940_v42 = vpack.c.bf16 %v13938_v23, %v13939_v34 }
 0x2f3   :  { %8613 = vmatpush3.bf16.xpose.msra.mxu0 %v11287_v54  ;;  %v2853_v33 = vpop.f32.mrb[116].mxu0 }
 0x2f4   :  { %8614 = vmatprep.subr.bf16.mxu0 %v11297_v27  ;;  %v2855_v14 = vpop.f32.mrb[117].mxu0 }
 0x2f5   :  { %v2857_v46 = vpop.f32.mrb[118].mxu0 }
 0x2f6   :  { %v11391_v26 = vpack.c.bf16 %v2857_v46, %v2853_v33  ;;  %v2859_v63 = vpop.f32.mrb[119].mxu0  ;;  %v13952_v33 = vld [vmem:[#allocation62_spill] sm:$0xff]  ;;  %v13954_v46 = vld [vmem:[#allocation69_spill] sm:$0xff] }
 0x2f7   :  { %v11393_v40 = vpack.c.bf16 %v2859_v63, %v2855_v14  ;;  %v13953_v14 = vpack.c.bf16 %v13951_v29, %v13952_v33  ;;  %v13955_v63 = vld [vmem:[#allocation67_spill] sm:$0xff] }
 0x2f8   :  { %13933 = vst [vmem:[#allocation65_spill] sm:$0xff] %v11391_v26  ;;  %8493 = vmatmul.mubr.bf16.vlgmr.msra.gmra.mrb[192].mxu1 %v13937_v22  ;;  %v13956_v11 = vpack.c.bf16 %v13954_v46, %v13955_v63 }
 0x2f9   :  { %13934 = vst [vmem:[#allocation63_spill] sm:$0xff] %v11393_v40  ;;  %8496 = vmatprep.mubr.bf16.mxu1 %v13940_v42 }
 0x2fb   :  { %8615 = vmatpush3.bf16.xpose.msra.mxu0 %v11297_v27  ;;  %v2863_v54 = vpop.f32.mrb[120].mxu0 }
 0x2fc   :  { %8616 = vmatprep.subr.bf16.mxu0 %v11303_v36  ;;  %v2865_v50 = vpop.f32.mrb[121].mxu0 }
 0x2fd   :  { %v2867_v62 = vpop.f32.mrb[122].mxu0 }
 0x2fe   :  { %v11403_v5 = vpack.c.bf16 %v2867_v62, %v2863_v54  ;;  %v2869_v0 = vpop.f32.mrb[123].mxu0 }
 0x2ff   :  { %v11405_v39 = vpack.c.bf16 %v2869_v0, %v2865_v50 }
 0x300   :  { %13941 = vst [vmem:[#allocation70_spill] sm:$0xff] %v11403_v5  ;;  %8497 = vmatmul.mubr.bf16.gmra.mrb[196].mxu1 %v13945_v37  ;;  %v13957_v37 = vld [vmem:[#allocation73_spill] sm:$0xff] }
 0x301   :  { %13942 = vst [vmem:[#allocation68_spill] sm:$0xff] %v11405_v39  ;;  %8500 = vmatprep.mubr.bf16.mxu1 %v13948_v61  ;;  %v13959_v8 = vpack.c.bf16 %v13957_v37, %v13958_v6  ;;  %v13961_v61 = vpack.c.bf16 %v11085_v51, %v11083_v32  ;;  %v13962_v51 = vpack.c.bf16 %v11097_v24, %v11095_v28 }
 0x303   :  { %8617 = vmatpush3.bf16.xpose.msra.mxu0 %v11303_v36  ;;  %v2873_v27 = vpop.f32.mrb[124].mxu0 }
 0x304   :  { %8618 = vmatprep.subr.bf16.mxu0 %v11309_v30  ;;  %v2875_v49 = vpop.f32.mrb[125].mxu0 }
 0x305   :  { %v2877_v60 = vpop.f32.mrb[126].mxu0 }
 0x306   :  { %v11415_v2 = vpack.c.bf16 %v2877_v60, %v2873_v27  ;;  %v2879_v12 = vpop.f32.mrb[127].mxu0 }
 0x307   :  { %v11417_v31 = vpack.c.bf16 %v2879_v12, %v2875_v49 }
 0x308   :  { %13949 = vst [vmem:[#allocation74_spill] sm:$0xff] %v11415_v2  ;;  %8501 = vmatmul.mubr.bf16.gmra.mrb[200].mxu1 %v13953_v14 }
 0x309   :  { %13950 = vst [vmem:[#allocation72_spill] sm:$0xff] %v11417_v31  ;;  %8504 = vmatprep.mubr.bf16.mxu1 %v13956_v11 }
 0x30b   :  { %8619 = vmatpush3.bf16.xpose.msra.mxu0 %v11309_v30  ;;  %v3109_v36 = vpop.f32.mrb[96].mxu1  ;;  %v8044_v7 = vpop.f32.mrb[128].mxu0  ;;  %v13960_v30 = vpack.c.bf16 %v11073_v20, %v11071_v45  ;;  %v13963_v20 = vpack.c.bf16 %v11109_v10, %v11107_v16  ;;  %v13964_v16 = vpack.c.bf16 %v11121_v58, %v11119_v48  ;;  %v13965_v10 = vpack.c.bf16 %v11134_v15, %v11132_v9 }
 0x30c   :  { %v3111_v22 = vpop.f32.mrb[97].mxu1  ;;  %v8045_v23 = vpop.f32.mrb[129].mxu0  ;;  %v13966_v48 = vpack.c.bf16 %v11146_v44, %v11144_v17 }
 0x30d   :  { %v3113_v34 = vpop.f32.mrb[98].mxu1  ;;  %v11426_v42 = vadd.f32 %v8045_v23, %v8044_v7  ;;  %v8047_v54 = vpop.f32.mrb[130].mxu0 }
 0x30e   :  { %v3596_v50 = vpack.c.bf16 %v3113_v34, %v3109_v36  ;;  %v3115_v62 = vpop.f32.mrb[99].mxu1  ;;  %v8048_v0 = vpop.f32.mrb[131].mxu0 }
 0x30f   :  { %v11428_v19 = vpack.c.bf16 %v3115_v62, %v3111_v22  ;;  %v11430_v18 = vadd.f32 %v8048_v0, %v8047_v54 }
 0x310   :  { %8505 = vmatmul.mubr.bf16.gmra.mrb[204].mxu1 %v13959_v8  ;;  %8508 = vmatprep.subr.bf16.mxu1 %v3596_v50 }
 0x311   :  { %8509 = vmatpush3.bf16.msra.mxu1 %v3596_v50 }
 0x312   :  { %8621 = vmatmul.mubr.bf16.vlgmr.msra.gmra.mrb[208].mxu0 %v13960_v30 }
 0x313   :  { %8624 = vmatprep.mubr.bf16.mxu0 %v13961_v61  ;;  %v3119_v27 = vpop.f32.mrb[100].mxu1  ;;  %v8050_v49 = vpop.f32.mrb[132].mxu0 }
 0x314   :  { %v3121_v60 = vpop.f32.mrb[101].mxu1  ;;  %v8051_v12 = vpop.f32.mrb[133].mxu0 }
 0x315   :  { %v3123_v29 = vpop.f32.mrb[102].mxu1  ;;  %v11441_v33 = vadd.f32 %v8051_v12, %v8050_v49  ;;  %v8053_v14 = vpop.f32.mrb[134].mxu0 }
 0x316   :  { %v3605_v46 = vpack.c.bf16 %v3123_v29, %v3119_v27  ;;  %v3125_v63 = vpop.f32.mrb[103].mxu1  ;;  %v8054_v11 = vpop.f32.mrb[135].mxu0 }
 0x317   :  { %v11443_v36 = vpack.c.bf16 %v3125_v63, %v3121_v60  ;;  %v11445_v7 = vadd.f32 %v8054_v11, %v8053_v14 }
 0x318   :  { %8510 = vmatprep.subr.bf16.mxu1 %v3605_v46 }
 0x319   :  { %8511 = vmatpush3.bf16.msra.mxu1 %v3605_v46 }
 0x31a   :  { %8625 = vmatmul.mubr.bf16.gmra.mrb[212].mxu0 %v13962_v51 }
 0x31b   :  { %8628 = vmatprep.mubr.bf16.mxu0 %v13963_v20  ;;  %v3129_v45 = vpop.f32.mrb[104].mxu1  ;;  %v8056_v32 = vpop.f32.mrb[136].mxu0 }
 0x31c   :  { %v3131_v22 = vpop.f32.mrb[105].mxu1  ;;  %v8057_v23 = vpop.f32.mrb[137].mxu0 }
 0x31d   :  { %v3133_v34 = vpop.f32.mrb[106].mxu1  ;;  %v11453_v54 = vadd.f32 %v8057_v23, %v8056_v32  ;;  %v8059_v50 = vpop.f32.mrb[138].mxu0 }
 0x31e   :  { %v3614_v62 = vpack.c.bf16 %v3133_v34, %v3129_v45  ;;  %v3135_v0 = vpop.f32.mrb[107].mxu1  ;;  %v8060_v37 = vpop.f32.mrb[139].mxu0 }
 0x31f   :  { %v11455_v6 = vpack.c.bf16 %v3135_v0, %v3131_v22  ;;  %v11457_v8 = vadd.f32 %v8060_v37, %v8059_v50 }
 0x320   :  { %8512 = vmatprep.subr.bf16.mxu1 %v3614_v62 }
 0x321   :  { %8513 = vmatpush3.bf16.msra.mxu1 %v3614_v62 }
 0x322   :  { %8629 = vmatmul.mubr.bf16.gmra.mrb[216].mxu0 %v13964_v16 }
 0x323   :  { %8632 = vmatprep.mubr.bf16.mxu0 %v13965_v10  ;;  %v3139_v24 = vpop.f32.mrb[108].mxu1  ;;  %v8062_v28 = vpop.f32.mrb[140].mxu0 }
 0x324   :  { %v3141_v30 = vpop.f32.mrb[109].mxu1  ;;  %v8063_v61 = vpop.f32.mrb[141].mxu0 }
 0x325   :  { %v3143_v27 = vpop.f32.mrb[110].mxu1  ;;  %v11465_v49 = vadd.f32 %v8063_v61, %v8062_v28  ;;  %v8065_v60 = vpop.f32.mrb[142].mxu0 }
 0x326   :  { %v3623_v12 = vpack.c.bf16 %v3143_v27, %v3139_v24  ;;  %v3145_v29 = vpop.f32.mrb[111].mxu1  ;;  %v8066_v14 = vpop.f32.mrb[143].mxu0 }
 0x327   :  { %v11467_v46 = vpack.c.bf16 %v3145_v29, %v3141_v30  ;;  %v11469_v63 = vadd.f32 %v8066_v14, %v8065_v60 }
 0x328   :  { %8514 = vmatprep.subr.bf16.mxu1 %v3623_v12 }
 0x329   :  { %8515 = vmatpush3.bf16.msra.mxu1 %v3623_v12 }
 0x32a   :  { %8633 = vmatmul.mubr.bf16.gmra.mrb[220].mxu0 %v13966_v48 }
 0x32b   :  { %v3149_v9 = vpop.f32.mrb[112].mxu1  ;;  %v8068_v15 = vpop.f32.mrb[144].mxu0 }
 0x32c   :  { %v3151_v58 = vpop.f32.mrb[113].mxu1  ;;  %v8069_v11 = vpop.f32.mrb[145].mxu0 }
 0x32d   :  { %v3153_v51 = vpop.f32.mrb[114].mxu1  ;;  %v11474_v20 = vadd.f32 %v8069_v11, %v8068_v15  ;;  %v8071_v45 = vpop.f32.mrb[146].mxu0 }
 0x32e   :  { %v3632_v32 = vpack.c.bf16 %v3153_v51, %v3149_v9  ;;  %v3155_v22 = vpop.f32.mrb[115].mxu1  ;;  %v8072_v23 = vpop.f32.mrb[147].mxu0 }
 0x32f   :  { %v11476_v34 = vpack.c.bf16 %v3155_v22, %v3151_v58  ;;  %v11478_v50 = vadd.f32 %v8072_v23, %v8071_v45 }
 0x330   :  { %8516 = vmatprep.subr.bf16.mxu1 %v3632_v32 }
 0x331   :  { %13967 = vst [vmem:[#allocation36_spill] sm:$0xff] %v11476_v34  ;;  %8517 = vmatpush3.bf16.msra.mxu1 %v3632_v32 }
 0x333   :  { %v3159_v62 = vpop.f32.mrb[116].mxu1  ;;  %v8074_v44 = vpop.f32.mrb[148].mxu0 }
 0x334   :  { %v3161_v17 = vpop.f32.mrb[117].mxu1  ;;  %v8075_v0 = vpop.f32.mrb[149].mxu0 }
 0x335   :  { %v3163_v37 = vpop.f32.mrb[118].mxu1  ;;  %v11480_v16 = vadd.f32 %v8075_v0, %v8074_v44  ;;  %v8077_v10 = vpop.f32.mrb[150].mxu0 }
 0x336   :  { %v3641_v24 = vpack.c.bf16 %v3163_v37, %v3159_v62  ;;  %v3165_v28 = vpop.f32.mrb[119].mxu1  ;;  %v8078_v30 = vpop.f32.mrb[151].mxu0 }
 0x337   :  { %v11482_v61 = vpack.c.bf16 %v3165_v28, %v3161_v17  ;;  %v11484_v27 = vadd.f32 %v8078_v30, %v8077_v10  ;;  %v13615_v30 = vlaneseq }
 0x338   :  { %8518 = vmatprep.subr.bf16.mxu1 %v3641_v24 }
 0x339   :  { %13968 = vst [vmem:[#allocation34_spill] sm:$0xff] %v11482_v61  ;;  %8519 = vmatpush3.bf16.msra.mxu1 %v3641_v24 }
 0x33b   :  { %v3169_v60 = vpop.f32.mrb[120].mxu1  ;;  %v8080_v12 = vpop.f32.mrb[152].mxu0 }
 0x33c   :  { %v3171_v29 = vpop.f32.mrb[121].mxu1  ;;  %v8081_v14 = vpop.f32.mrb[153].mxu0 }
 0x33d   :  { %v3173_v48 = vpop.f32.mrb[122].mxu1  ;;  %v11486_v9 = vadd.f32 %v8081_v14, %v8080_v12  ;;  %v8083_v15 = vpop.f32.mrb[154].mxu0 }
 0x33e   :  { %v3650_v58 = vpack.c.bf16 %v3173_v48, %v3169_v60  ;;  %v3175_v11 = vpop.f32.mrb[123].mxu1  ;;  %v8084_v51 = vpop.f32.mrb[155].mxu0 }
 0x33f   :  { %v11488_v45 = vpack.c.bf16 %v3175_v11, %v3171_v29  ;;  %v11490_v32 = vadd.f32 %v8084_v51, %v8083_v15  ;;  %v11500_v29 = vshrl.u32 %v13615_v30, 7 }
 0x340   :  { %8520 = vmatprep.subr.bf16.mxu1 %v3650_v58 }
 0x341   :  { %13969 = vst [vmem:[#allocation41_spill] sm:$0xff] %v11488_v45  ;;  %8521 = vmatpush3.bf16.msra.mxu1 %v3650_v58  ;;  %13971 = vst [vmem:[#allocation47_spill] sm:$0xff] %v11500_v29  ;;  %v6473_v11 = vsub.s32 0, %v11500_v29  ;;  %v6477_v51 = vsub.s32 1, %v11500_v29  ;;  %v3891_v35 = vadd.s32 96, %v11500_v29 }
 0x343   :  { %v3179_v22 = vpop.f32.mrb[124].mxu1  ;;  %v8086_v23 = vpop.f32.mrb[156].mxu0 }
 0x344   :  { %v3181_v62 = vpop.f32.mrb[125].mxu1  ;;  %v8087_v44 = vpop.f32.mrb[157].mxu0 }
 0x345   :  { %v3183_v17 = vpop.f32.mrb[126].mxu1  ;;  %v11492_v0 = vadd.f32 %v8087_v44, %v8086_v23  ;;  %v8089_v37 = vpop.f32.mrb[158].mxu0  ;;  %v6469_v44 = vld [vmem:[%s13497_s3] sm:$0x7] }
 0x346   :  { %v3659_v10 = vpack.c.bf16 %v3183_v17, %v3179_v22  ;;  %v3185_v24 = vpop.f32.mrb[127].mxu1  ;;  %v8090_v28 = vpop.f32.mrb[159].mxu0 }
 0x347   :  { %v11494_v60 = vpack.c.bf16 %v3185_v24, %v3181_v62  ;;  %v11496_v12 = vadd.f32 %v8090_v28, %v8089_v37  ;;  %v11509_v24 = vrot.slane %v6469_v44, %v6473_v11  ;;  %v11511_v28 = vrot.slane %v6469_v44, %v6477_v51 }
 0x348   :  { %8522 = vmatprep.subr.bf16.mxu1 %v3659_v10 }
 0x349   :  { %13970 = vst [vmem:[#allocation39_spill] sm:$0xff] %v11494_v60  ;;  %8523 = vmatpush3.bf16.msra.mxu1 %v3659_v10  ;;  %13972 = vst [vmem:[#allocation45_spill] sm:$0xff] %v11509_v24 }
 0x34a   :  { %8572 = vmatprep.subr.bf16.mxu1 %v11428_v19  ;;  %13973 = vst [vmem:[#allocation53_spill] sm:$0xff] %v11511_v28 }
 0x34b   :  { %v3189_v14 = vpop.f32.mrb[128].mxu1  ;;  %v8092_v48 = vpop.f32.mrb[160].mxu0 }
 0x34c   :  { %v3191_v15 = vpop.f32.mrb[129].mxu1  ;;  %v8093_v58 = vpop.f32.mrb[161].mxu0 }
 0x34d   :  { %v3193_v22 = vpop.f32.mrb[130].mxu1  ;;  %v11504_v23 = vadd.f32 %v8093_v58, %v8092_v48  ;;  %v8095_v62 = vpop.f32.mrb[162].mxu0 }
 0x34e   :  { %v3668_v17 = vpack.c.bf16 %v3193_v22, %v3189_v14  ;;  %v3195_v37 = vpop.f32.mrb[131].mxu1  ;;  %v8096_v10 = vpop.f32.mrb[163].mxu0 }
 0x34f   :  { %v11513_v30 = vpack.c.bf16 %v3195_v37, %v3191_v15  ;;  %v11515_v31 = vadd.f32 %v8096_v10, %v8095_v62 }
 0x350   :  { %8700 = vmatprep.subr.bf16.mxu0 %v3668_v17 }
 0x351   :  { %13974 = vst [vmem:[#allocation51_spill] sm:$0xff] %v11513_v30  ;;  %8701 = vmatpush3.bf16.msra.mxu0 %v3668_v17 }
 0x353   :  { %v3199_v48 = vpop.f32.mrb[132].mxu1  ;;  %v8098_v58 = vpop.f32.mrb[164].mxu0 }
 0x354   :  { %v3201_v39 = vpop.f32.mrb[133].mxu1  ;;  %v8099_v40 = vpop.f32.mrb[165].mxu0 }
 0x355   :  { %v3203_v56 = vpop.f32.mrb[134].mxu1  ;;  %v11517_v53 = vadd.f32 %v8099_v40, %v8098_v58  ;;  %v8101_v14 = vpop.f32.mrb[166].mxu0 }
 0x356   :  { %v3677_v22 = vpack.c.bf16 %v3203_v56, %v3199_v48  ;;  %v3205_v4 = vpop.f32.mrb[135].mxu1  ;;  %v8102_v11 = vpop.f32.mrb[167].mxu0 }
 0x357   :  { %v11519_v24 = vpack.c.bf16 %v3205_v4, %v3201_v39  ;;  %v11521_v51 = vadd.f32 %v8102_v11, %v8101_v14 }
 0x358   :  { %8702 = vmatprep.subr.bf16.mxu0 %v3677_v22 }
 0x359   :  { %13975 = vst [vmem:[#allocation59_spill] sm:$0xff] %v11519_v24  ;;  %8703 = vmatpush3.bf16.msra.mxu0 %v3677_v22 }
 0x35b   :  { %v3209_v15 = vpop.f32.mrb[136].mxu1  ;;  %v8104_v62 = vpop.f32.mrb[168].mxu0 }
 0x35c   :  { %v3211_v44 = vpop.f32.mrb[137].mxu1  ;;  %v8105_v17 = vpop.f32.mrb[169].mxu0 }
 0x35d   :  { %v3213_v37 = vpop.f32.mrb[138].mxu1  ;;  %v11523_v10 = vadd.f32 %v8105_v17, %v8104_v62  ;;  %v8107_v28 = vpop.f32.mrb[170].mxu0 }
 0x35e   :  { %v3686_v40 = vpack.c.bf16 %v3213_v37, %v3209_v15  ;;  %v3215_v58 = vpop.f32.mrb[139].mxu1  ;;  %v8108_v25 = vpop.f32.mrb[171].mxu0 }
 0x35f   :  { %v11525_v56 = vpack.c.bf16 %v3215_v58, %v3211_v44  ;;  %v11527_v48 = vadd.f32 %v8108_v25, %v8107_v28 }
 0x360   :  { %8704 = vmatprep.subr.bf16.mxu0 %v3686_v40 }
 0x361   :  { %13976 = vst [vmem:[#allocation57_spill] sm:$0xff] %v11525_v56  ;;  %8705 = vmatpush3.bf16.msra.mxu0 %v3686_v40 }
 0x363   :  { %v3219_v4 = vpop.f32.mrb[140].mxu1  ;;  %v8110_v39 = vpop.f32.mrb[172].mxu0 }
 0x364   :  { %v3221_v14 = vpop.f32.mrb[141].mxu1  ;;  %v8111_v22 = vpop.f32.mrb[173].mxu0 }
 0x365   :  { %v3223_v11 = vpop.f32.mrb[142].mxu1  ;;  %v11529_v2 = vadd.f32 %v8111_v22, %v8110_v39  ;;  %v8113_v5 = vpop.f32.mrb[174].mxu0 }
 0x366   :  { %v3695_v62 = vpack.c.bf16 %v3223_v11, %v3219_v4  ;;  %v3225_v17 = vpop.f32.mrb[143].mxu1  ;;  %v8114_v26 = vpop.f32.mrb[175].mxu0 }
 0x367   :  { %v11531_v15 = vpack.c.bf16 %v3225_v17, %v3221_v14  ;;  %v11533_v37 = vadd.f32 %v8114_v26, %v8113_v5 }
 0x368   :  { %8706 = vmatprep.subr.bf16.mxu0 %v3695_v62 }
 0x369   :  { %13977 = vst [vmem:[#allocation64_spill] sm:$0xff] %v11531_v15  ;;  %8707 = vmatpush3.bf16.msra.mxu0 %v3695_v62 }
 0x36b   :  { %v3229_v25 = vpop.f32.mrb[144].mxu1  ;;  %v8116_v28 = vpop.f32.mrb[176].mxu0 }
 0x36c   :  { %v3231_v44 = vpop.f32.mrb[145].mxu1  ;;  %v8117_v40 = vpop.f32.mrb[177].mxu0 }
 0x36d   :  { %v3233_v58 = vpop.f32.mrb[146].mxu1  ;;  %v11535_v47 = vadd.f32 %v8117_v40, %v8116_v28  ;;  %v8119_v52 = vpop.f32.mrb[178].mxu0 }
 0x36e   :  { %v3704_v39 = vpack.c.bf16 %v3233_v58, %v3229_v25  ;;  %v3235_v22 = vpop.f32.mrb[147].mxu1  ;;  %v8120_v41 = vpop.f32.mrb[179].mxu0 }
 0x36f   :  { %v11537_v4 = vpack.c.bf16 %v3235_v22, %v3231_v44  ;;  %v11539_v11 = vadd.f32 %v8120_v41, %v8119_v52 }
 0x370   :  { %8708 = vmatprep.subr.bf16.mxu0 %v3704_v39 }
 0x371   :  { %13978 = vst [vmem:[#allocation62_spill] sm:$0xff] %v11537_v4  ;;  %8709 = vmatpush3.bf16.msra.mxu0 %v3704_v39 }
 0x373   :  { %v3239_v26 = vpop.f32.mrb[148].mxu1  ;;  %v8122_v5 = vpop.f32.mrb[180].mxu0 }
 0x374   :  { %v3241_v14 = vpop.f32.mrb[149].mxu1  ;;  %v8123_v62 = vpop.f32.mrb[181].mxu0 }
 0x375   :  { %v3243_v17 = vpop.f32.mrb[150].mxu1  ;;  %v11541_v13 = vadd.f32 %v8123_v62, %v8122_v5  ;;  %v8125_v57 = vpop.f32.mrb[182].mxu0 }
 0x376   :  { %v3713_v28 = vpack.c.bf16 %v3243_v17, %v3239_v26  ;;  %v3245_v40 = vpop.f32.mrb[151].mxu1  ;;  %v8126_v15 = vpop.f32.mrb[183].mxu0 }
 0x377   :  { %v11543_v25 = vpack.c.bf16 %v3245_v40, %v3241_v14  ;;  %v11545_v58 = vadd.f32 %v8126_v15, %v8125_v57 }
 0x378   :  { %8710 = vmatprep.subr.bf16.mxu0 %v3713_v28 }
 0x379   :  { %13979 = vst [vmem:[#allocation69_spill] sm:$0xff] %v11543_v25  ;;  %8711 = vmatpush3.bf16.msra.mxu0 %v3713_v28 }
 0x37b   :  { %v3249_v41 = vpop.f32.mrb[152].mxu1  ;;  %v8128_v52 = vpop.f32.mrb[184].mxu0 }
 0x37c   :  { %v3251_v44 = vpop.f32.mrb[153].mxu1  ;;  %v8129_v39 = vpop.f32.mrb[185].mxu0 }
 0x37d   :  { %v3253_v22 = vpop.f32.mrb[154].mxu1  ;;  %v11547_v4 = vadd.f32 %v8129_v39, %v8128_v52  ;;  %v8131_v56 = vpop.f32.mrb[186].mxu0 }
 0x37e   :  { %v3722_v5 = vpack.c.bf16 %v3253_v22, %v3249_v41  ;;  %v3255_v62 = vpop.f32.mrb[155].mxu1  ;;  %v8132_v24 = vpop.f32.mrb[187].mxu0 }
 0x37f   :  { %v11549_v26 = vpack.c.bf16 %v3255_v62, %v3251_v44  ;;  %v11551_v17 = vadd.f32 %v8132_v24, %v8131_v56 }
 0x380   :  { %8712 = vmatprep.subr.bf16.mxu0 %v3722_v5 }
 0x381   :  { %13980 = vst [vmem:[#allocation67_spill] sm:$0xff] %v11549_v26  ;;  %8713 = vmatpush3.bf16.msra.mxu0 %v3722_v5 }
 0x383   :  { %v3259_v57 = vpop.f32.mrb[156].mxu1  ;;  %v8134_v15 = vpop.f32.mrb[188].mxu0 }
 0x384   :  { %v3261_v14 = vpop.f32.mrb[157].mxu1  ;;  %v8135_v28 = vpop.f32.mrb[189].mxu0 }
 0x385   :  { %v3263_v40 = vpop.f32.mrb[158].mxu1  ;;  %v11553_v25 = vadd.f32 %v8135_v28, %v8134_v15  ;;  %v8137_v30 = vpop.f32.mrb[190].mxu0 }
 0x386   :  { %v3731_v52 = vpack.c.bf16 %v3263_v40, %v3259_v57  ;;  %v3265_v39 = vpop.f32.mrb[159].mxu1  ;;  %v8138_v43 = vpop.f32.mrb[191].mxu0 }
 0x387   :  { %v11555_v41 = vpack.c.bf16 %v3265_v39, %v3261_v14  ;;  %v11557_v22 = vadd.f32 %v8138_v43, %v8137_v30 }
 0x388   :  { %8714 = vmatprep.subr.bf16.mxu0 %v3731_v52 }
 0x389   :  { %13981 = vst [vmem:[#allocation73_spill] sm:$0xff] %v11555_v41  ;;  %8715 = vmatpush3.bf16.msra.mxu0 %v3731_v52 }
 0x38a   :  { %8732 = vmatprep.subr.bf16.mxu0 %v11316_v55 }
 0x38b   :  { %v8446_v24 = vpop.f32.mrb[160].mxu1 }
 0x38c   :  { %v3472_v56 = vadd.f32 %v8446_v24, %v11441_v33  ;;  %v3463_v44 = vpop.f32.mrb[161].mxu1 }
 0x38d   :  { %v3464_v5 = vadd.f32 %v11426_v42, %v3463_v44  ;;  %v8447_v62 = vpop.f32.mrb[162].mxu1 }
 0x38e   :  { %v3475_v15 = vadd.f32 %v8447_v62, %v11445_v7  ;;  %v3466_v57 = vpop.f32.mrb[163].mxu1 }
 0x38f   :  { %v3467_v28 = vadd.f32 %v11430_v18, %v3466_v57 }
 0x390   :  { %v11564_v14 = vpack.c.bf16 %v3475_v15, %v3472_v56 }
 0x391   :  { %v11566_v43 = vpack.c.bf16 %v3467_v28, %v3464_v5 }
 0x392   :  { %13982 = vst [vmem:[#allocation71_spill] sm:$0xff] %v11564_v14 }
 0x393   :  { %13983 = vst [vmem:[#allocation102_spill] sm:$0xff] %v11566_v43  ;;  %v8450_v30 = vpop.f32.mrb[164].mxu1 }
 0x394   :  { %v3488_v40 = vadd.f32 %v8450_v30, %v11465_v49  ;;  %v3479_v52 = vpop.f32.mrb[165].mxu1 }
 0x395   :  { %v3480_v39 = vadd.f32 %v11453_v54, %v3479_v52  ;;  %v8451_v33 = vpop.f32.mrb[166].mxu1 }
 0x396   :  { %v3491_v24 = vadd.f32 %v8451_v33, %v11469_v63  ;;  %v3482_v42 = vpop.f32.mrb[167].mxu1 }
 0x397   :  { %v3483_v44 = vadd.f32 %v11457_v8, %v3482_v42 }
 0x398   :  { %v11572_v7 = vpack.c.bf16 %v3491_v24, %v3488_v40 }
 0x399   :  { %v11574_v62 = vpack.c.bf16 %v3483_v44, %v3480_v39 }
 0x39a   :  { %13984 = vst [vmem:[#allocation103_spill] sm:$0xff] %v11572_v7 }
 0x39b   :  { %13985 = vst [vmem:[#allocation104_spill] sm:$0xff] %v11574_v62  ;;  %v8454_v18 = vpop.f32.mrb[168].mxu1  ;;  %v14032_v62 = vmov 0 }
 0x39c   :  { %v3504_v56 = vadd.f32 %v8454_v18, %v11480_v16  ;;  %v3495_v5 = vpop.f32.mrb[169].mxu1 }
 0x39d   :  { %v3496_v15 = vadd.f32 %v11474_v20, %v3495_v5  ;;  %v8455_v49 = vpop.f32.mrb[170].mxu1 }
 0x39e   :  { %v3507_v57 = vadd.f32 %v8455_v49, %v11484_v27  ;;  %v3498_v54 = vpop.f32.mrb[171].mxu1 }
 0x39f   :  { %v3499_v28 = vadd.f32 %v11478_v50, %v3498_v54 }
 0x3a0   :  { %v11580_v63 = vpack.c.bf16 %v3507_v57, %v3504_v56 }
 0x3a1   :  { %v11582_v30 = vpack.c.bf16 %v3499_v28, %v3496_v15 }
 0x3a2   :  { %13986 = vst [vmem:[#allocation105_spill] sm:$0xff] %v11580_v63 }
 0x3a3   :  { %13987 = vst [vmem:[#allocation106_spill] sm:$0xff] %v11582_v30  ;;  %v8458_v8 = vpop.f32.mrb[172].mxu1 }
 0x3a4   :  { %v3520_v40 = vadd.f32 %v8458_v8, %v11492_v0  ;;  %v11585_v52 = vpop.f32.mrb[192].mxu0  ;;  %v3511_v39 = vpop.f32.mrb[173].mxu1 }
 0x3a5   :  { %v3512_v16 = vadd.f32 %v11486_v9, %v3511_v39  ;;  %v11588_v33 = vpop.f32.mrb[193].mxu0  ;;  %v8459_v20 = vpop.f32.mrb[174].mxu1 }
 0x3a6   :  { %v3523_v27 = vadd.f32 %v8459_v20, %v11496_v12  ;;  %v11591_v24 = vpop.f32.mrb[194].mxu0  ;;  %v3514_v50 = vpop.f32.mrb[175].mxu1 }
 0x3a7   :  { %v3515_v42 = vadd.f32 %v11490_v32, %v3514_v50  ;;  %v11594_v44 = vpop.f32.mrb[195].mxu0 }
 0x3a8   :  { %v11596_v18 = vpack.c.bf16 %v3523_v27, %v3520_v40 }
 0x3a9   :  { %v11598_v0 = vpack.c.bf16 %v3515_v42, %v3512_v16 }
 0x3aa   :  { %13988 = vst [vmem:[#allocation107_spill] sm:$0xff] %v11596_v18 }
 0x3ab   :  { %13989 = vst [vmem:[#allocation108_spill] sm:$0xff] %v11598_v0  ;;  %v8462_v56 = vpop.f32.mrb[176].mxu1 }
 0x3ac   :  { %v3536_v5 = vadd.f32 %v8462_v56, %v11517_v53  ;;  %v11601_v9 = vpop.f32.mrb[196].mxu0  ;;  %v3527_v15 = vpop.f32.mrb[177].mxu1 }
 0x3ad   :  { %v3528_v49 = vadd.f32 %v11504_v23, %v3527_v15  ;;  %v11604_v12 = vpop.f32.mrb[197].mxu0  ;;  %v8463_v57 = vpop.f32.mrb[178].mxu1 }
 0x3ae   :  { %v3539_v54 = vadd.f32 %v8463_v57, %v11521_v51  ;;  %v11607_v32 = vpop.f32.mrb[198].mxu0  ;;  %v3530_v28 = vpop.f32.mrb[179].mxu1 }
 0x3af   :  { %v3531_v8 = vadd.f32 %v11515_v31, %v3530_v28  ;;  %v11610_v40 = vpop.f32.mrb[199].mxu0 }
 0x3b0   :  { %v11612_v39 = vpack.c.bf16 %v3539_v54, %v3536_v5 }
 0x3b1   :  { %v11614_v53 = vpack.c.bf16 %v3531_v8, %v3528_v49 }
 0x3b2   :  { %13990 = vst [vmem:[#allocation109_spill] sm:$0xff] %v11612_v39 }
 0x3b3   :  { %13991 = vst [vmem:[#allocation110_spill] sm:$0xff] %v11614_v53  ;;  %v8466_v16 = vpop.f32.mrb[180].mxu1  ;;  %v13996_v53 = vlaneseq }
 0x3b4   :  { %v3552_v20 = vadd.f32 %v8466_v16, %v11529_v2  ;;  %v11617_v23 = vpop.f32.mrb[200].mxu0  ;;  %v3543_v27 = vpop.f32.mrb[181].mxu1 }
 0x3b5   :  { %v3544_v50 = vadd.f32 %v11523_v10, %v3543_v27  ;;  %v11620_v51 = vpop.f32.mrb[201].mxu0  ;;  %v8467_v42 = vpop.f32.mrb[182].mxu1 }
 0x3b6   :  { %v3555_v56 = vadd.f32 %v8467_v42, %v11533_v37  ;;  %v11623_v31 = vpop.f32.mrb[202].mxu0  ;;  %v3546_v15 = vpop.f32.mrb[183].mxu1 }
 0x3b7   :  { %v3547_v5 = vadd.f32 %v11527_v48, %v3546_v15  ;;  %v11626_v49 = vpop.f32.mrb[203].mxu0 }
 0x3b8   :  { %v11628_v57 = vpack.c.bf16 %v3555_v56, %v3552_v20 }
 0x3b9   :  { %v11630_v2 = vpack.c.bf16 %v3547_v5, %v3544_v50 }
 0x3ba   :  { %13992 = vst [vmem:[#allocation111_spill] sm:$0xff] %v11628_v57 }
 0x3bb   :  { %13993 = vst [vmem:[#allocation112_spill] sm:$0xff] %v11630_v2  ;;  %v8470_v54 = vpop.f32.mrb[184].mxu1 }
 0x3bc   :  { %v11632_v28 = vpop.f32.mrb[204].mxu0  ;;  %v3568_v10 = vadd.f32 %v8470_v54, %v11541_v13  ;;  %v3559_v8 = vpop.f32.mrb[185].mxu1 }
 0x3bd   :  { %v11635_v16 = vpop.f32.mrb[205].mxu0  ;;  %v3560_v37 = vadd.f32 %v11535_v47, %v3559_v8  ;;  %v8471_v27 = vpop.f32.mrb[186].mxu1 }
 0x3be   :  { %v11638_v42 = vpop.f32.mrb[206].mxu0  ;;  %v3571_v48 = vadd.f32 %v8471_v27, %v11545_v58  ;;  %v3562_v15 = vpop.f32.mrb[187].mxu1  ;;  %v3881_v27 = vadd.s32 16, %v11500_v29 }
 0x3bf   :  { %v11641_v20 = vpop.f32.mrb[207].mxu0  ;;  %v3563_v50 = vadd.f32 %v11539_v11, %v3562_v15  ;;  %v11654_v11 = vand.u32 127, %v13996_v53  ;;  %v3880_v53 = vadd.s32 8, %v11500_v29 }
 0x3c0   :  { %v11644_v56 = vpack.c.bf16 %v3571_v48, %v3568_v10 }
 0x3c1   :  { %v11646_v5 = vpack.c.bf16 %v3563_v50, %v3560_v37  ;;  %vm11661_vm0 = vcmp.ge.s32.totalorder %v3881_v27, %v11654_v11  ;;  %vm11672_vm1 = vcmp.ge.s32.totalorder %v11500_v29, %v11654_v11  ;;  %vm11693_vm3 = vcmp.ge.s32.totalorder %v3880_v53, %v11654_v11  ;;  %v9714_v50 = vld [vmem:[#allocation9 + $0x198] ss:$12 sps:$4 sm:$0xff]  }
 0x3c2   :  { %13994 = vst [vmem:[#allocation113_spill] sm:$0xff] %v11644_v56  ;;  %v3887_v56 = vadd.s32 64, %v11500_v29  ;;  %vm11794_vm12 = vcmp.ge.s32.totalorder %v3891_v35, %v11654_v11  ;;  %v3894_v35 = vadd.s32 120, %v11500_v29  ;;  %v11840_v45 = vsel %vm11672_vm1, %v11588_v33, -inf }
 0x3c3   :  { %13995 = vst [vmem:[#allocation114_spill] sm:$0xff] %v11646_v5  ;;  %v8474_v13 = vpop.f32.mrb[188].mxu1  ;;  %v14014_v5 = vmov 0  ;;  %14041 = vst [vmem:[#allocation127_spill] sm:$0xff] %v11840_v45 }
 0x3c4   :  { %v3584_v54 = vadd.f32 %v8474_v13, %v11553_v25  ;;  %v3575_v57 = vpop.f32.mrb[189].mxu1  ;;  %vm11750_vm8 = vcmp.ge.s32.totalorder %v3887_v56, %v11654_v11  ;;  %v3890_v56 = vadd.s32 88, %v11500_v29  ;;  %vm11828_vm15 = vcmp.ge.s32.totalorder %v3894_v35, %v11654_v11 }
 0x3c5   :  { %v3576_v47 = vadd.f32 %v11547_v4, %v3575_v57  ;;  %v8475_v8 = vpop.f32.mrb[190].mxu1  ;;  %v3882_v4 = vadd.s32 24, %v11500_v29 }
 0x3c6   :  { %v3587_v2 = vadd.f32 %v8475_v8, %v11557_v22  ;;  %v3578_v39 = vpop.f32.mrb[191].mxu1  ;;  %vm11783_vm11 = vcmp.ge.s32.totalorder %v3890_v56, %v11654_v11  ;;  %v3893_v56 = vadd.s32 112, %v11500_v29 }
 0x3c7   :  { %v3579_v58 = vadd.f32 %v11551_v17, %v3578_v39  ;;  %vm11684_vm2 = vcmp.ge.s32.totalorder %v3882_v4, %v11654_v11  ;;  %v14027_v21 = vsel %vm11783_vm11, 4294967295, %v14026_v21 }
 0x3c8   :  { %v11656_v10 = vpack.c.bf16 %v3587_v2, %v3584_v54  ;;  %14028 = vst [vmem:[#allocation122_spill] sm:$0xff] %v14027_v21  ;;  %vm11818_vm14 = vcmp.ge.s32.totalorder %v3893_v56, %v11654_v11  ;;  %v11858_v33 = vsel %vm11684_vm2, %v11591_v24, -inf }
 0x3c9   :  { %v11658_v37 = vpack.c.bf16 %v3579_v58, %v3576_v47  ;;  %v3883_v47 = vadd.s32 32, %v11500_v29  ;;  %v3884_v58 = vadd.s32 40, %v11500_v29  ;;  %14044 = vst [vmem:[#allocation130_spill] sm:$0xff] %v11858_v33 }
 0x3ca   :  { %13997 = vst [vmem:[#allocation115_spill] sm:$0xff] %v11656_v10 }
 0x3cb   :  { %13998 = vst [vmem:[#allocation116_spill] sm:$0xff] %v11658_v37  ;;  %v8494_v48 = vpop.f32.mrb[192].mxu1  ;;  %vm11706_vm4 = vcmp.ge.s32.totalorder %v3883_v47, %v11654_v11  ;;  %vm11717_vm5 = vcmp.ge.s32.totalorder %v3884_v58, %v11654_v11  ;;  %v3886_v47 = vadd.s32 56, %v11500_v29 }
 0x3cc   :  { %v3971_v22 = vpop.f32.mrb[193].mxu1  ;;  %v11668_v17 = vsel %vm11661_vm0, %v8494_v48, -inf }
 0x3cd   :  { %4054 = vmax.xlane.f32.xlu1 %v11668_v17  ;;  %v8495_v57 = vpop.f32.mrb[194].mxu1  ;;  %v11680_v2 = vsel %vm11672_vm1, %v3971_v22, -inf  ;;  %v3885_v22 = vadd.s32 48, %v11500_v29  ;;  %vm11739_vm7 = vcmp.ge.s32.totalorder %v3886_v47, %v11654_v11  ;;  %v3889_v47 = vadd.s32 80, %v11500_v29 }
 0x3ce   :  { %4050 = vmax.xlane.f32.xlu0 %v11680_v2  ;;  %v3974_v15 = vpop.f32.mrb[195].mxu1  ;;  %v11690_v13 = vsel %vm11684_vm2, %v8495_v57, -inf  ;;  %v14015_v5 = vsel %vm11739_vm7, 4294967295, %v14014_v5 }
 0x3cf   :  { %v11701_v8 = vsel %vm11693_vm3, %v3974_v15, -inf  ;;  %vm11728_vm6 = vcmp.ge.s32.totalorder %v3885_v22, %v11654_v11  ;;  %14016 = vst [vmem:[#allocation118_spill] sm:$0xff] %v14015_v5  ;;  %vm11772_vm10 = vcmp.ge.s32.totalorder %v3889_v47, %v11654_v11 }
 0x3d0   :  { %v11876_v24 = vsel %vm11728_vm6, %v11601_v9, -inf }
 0x3d1   :  { %4056 = vmax.xlane.f32.xlu1 %v11690_v13  ;;  %14047 = vst [vmem:[#allocation133_spill] sm:$0xff] %v11876_v24 }
 0x3d2   :  { %4052 = vmax.xlane.f32.xlu0 %v11701_v8 }
 0x3d3   :  { %v8498_v27 = vpop.f32.mrb[196].mxu1 }
 0x3d4   :  { %v3987_v48 = vpop.f32.mrb[197].mxu1  ;;  %v11735_v58 = vsel %vm11728_vm6, %v8498_v27, -inf  ;;  %v14017_v27 = vmov 0 }
 0x3d5   :  { %v8499_v53 = vpop.f32.mrb[198].mxu1  ;;  %v11713_v57 = vsel %vm11706_vm4, %v3987_v48, -inf  ;;  %v14011_v48 = vmov 0  ;;  %v14018_v27 = vsel %vm11750_vm8, 4294967295, %v14017_v27 }
 0x3d6   :  { %4058 = vmax.xlane.f32.xlu0 %v11713_v57  ;;  %v3990_v15 = vpop.f32.mrb[199].mxu1  ;;  %v14012_v48 = vsel %vm11728_vm6, 4294967295, %v14011_v48  ;;  %v11746_v22 = vsel %vm11739_vm7, %v8499_v53, -inf  ;;  %14019 = vst [vmem:[#allocation119_spill] sm:$0xff] %v14018_v27  ;;  %v14020_v53 = vmov 0 }
 0x3d7   :  { %v11724_v37 = vsel %vm11717_vm5, %v3990_v15, -inf  ;;  %14013 = vst [vmem:[#allocation117_spill] sm:$0xff] %v14012_v48  ;;  %v3888_v15 = vadd.s32 72, %v11500_v29 }
 0x3d8   :  { %4060 = vmax.xlane.f32.xlu1 %v11724_v37 }
 0x3d9   :  { %vm11761_vm9 = vcmp.ge.s32.totalorder %v3888_v15, %v11654_v11 }
 0x3da   :  { %4062 = vmax.xlane.f32.xlu0 %v11735_v58  ;;  %v14021_v53 = vsel %vm11761_vm9, 4294967295, %v14020_v53 }
 0x3db   :  { %v8502_v55 = vpop.f32.mrb[200].mxu1  ;;  %14022 = vst [vmem:[#allocation120_spill] sm:$0xff] %v14021_v53 }
 0x3dc   :  { %4064 = vmax.xlane.f32.xlu1 %v11746_v22  ;;  %v4003_v41 = vpop.f32.mrb[201].mxu1  ;;  %v11779_v15 = vsel %vm11772_vm10, %v8502_v55, -inf  ;;  %v14029_v55 = vmov 0 }
 0x3dd   :  { %v8503_v26 = vpop.f32.mrb[202].mxu1  ;;  %v11757_v3 = vsel %vm11750_vm8, %v4003_v41, -inf  ;;  %v14023_v41 = vmov 0  ;;  %v14030_v55 = vsel %vm11794_vm12, 4294967295, %v14029_v55 }
 0x3de   :  { %4066 = vmax.xlane.f32.xlu0 %v11757_v3  ;;  %v4006_v1 = vpop.f32.mrb[203].mxu1  ;;  %v14024_v41 = vsel %vm11772_vm10, 4294967295, %v14023_v41  ;;  %v11790_v47 = vsel %vm11783_vm11, %v8503_v26, -inf  ;;  %14031 = vst [vmem:[#allocation123_spill] sm:$0xff] %v14030_v55 }
 0x3df   :  { %v11768_v59 = vsel %vm11761_vm9, %v4006_v1, -inf  ;;  %14025 = vst [vmem:[#allocation121_spill] sm:$0xff] %v14024_v41  ;;  %v3892_v1 = vadd.s32 104, %v11500_v29  ;;  %v14038_v29 = vmov 0 }
 0x3e0   :  { %4068 = vmax.xlane.f32.xlu1 %v11768_v59  ;;  %v14039_v29 = vsel %vm11828_vm15, 4294967295, %v14038_v29 }
 0x3e1   :  { %vm11807_vm13 = vcmp.ge.s32.totalorder %v3892_v1, %v11654_v11  ;;  %14040 = vst [vmem:[#allocation126_spill] sm:$0xff] %v14039_v29  ;;  %v11846_v11 = vsel %vm11693_vm3, %v11594_v44, -inf  ;;  %v11864_v44 = vsel %vm11706_vm4, %v11604_v12, -inf  ;;  %v11882_v12 = vsel %vm11739_vm7, %v11607_v32, -inf }
 0x3e2   :  { %4070 = vmax.xlane.f32.xlu0 %v11779_v15  ;;  %v14033_v62 = vsel %vm11807_vm13, 4294967295, %v14032_v62  ;;  %14042 = vst [vmem:[#allocation128_spill] sm:$0xff] %v11846_v11  ;;  %14045 = vst [vmem:[#allocation131_spill] sm:$0xff] %v11864_v44  ;;  %v11900_v32 = vsel %vm11772_vm10, %v11617_v23, -inf  ;;  %v11918_v23 = vsel %vm11807_vm13, %v11641_v20, -inf }
 0x3e3   :  { %v8506_v38 = vpop.f32.mrb[204].mxu1  ;;  %14034 = vst [vmem:[#allocation124_spill] sm:$0xff] %v14033_v62  ;;  %14048 = vst [vmem:[#allocation134_spill] sm:$0xff] %v11918_v23 }
 0x3e4   :  { %4072 = vmax.xlane.f32.xlu1 %v11790_v47  ;;  %v4019_v18 = vpop.f32.mrb[205].mxu1  ;;  %v11824_v1 = vsel %vm11818_vm14, %v8506_v38, -inf }
 0x3e5   :  { %v11799_v0 = vpop.f32.mrb[208].mxu0  ;;  %v8507_v63 = vpop.f32.mrb[206].mxu1  ;;  %v11803_v30 = vsel %vm11794_vm12, %v4019_v18, -inf  ;;  %v14035_v18 = vmov 0 }
 0x3e6   :  { %v4775_v7 = vpop.f32.mrb[209].mxu0  ;;  %4074 = vmax.xlane.f32.xlu0 %v11803_v30  ;;  %v4022_v26 = vpop.f32.mrb[207].mxu1  ;;  %v14036_v18 = vsel %vm11818_vm14, 4294967295, %v14035_v18 }
 0x3e7   :  { %v8623_v14 = vpop.f32.mrb[210].mxu0  ;;  %v11814_v43 = vsel %vm11807_vm13, %v4022_v26, -inf  ;;  %14037 = vst [vmem:[#allocation125_spill] sm:$0xff] %v14036_v18  ;;  %v11834_v26 = vsel %vm11828_vm15, %v8507_v63, -inf  ;;  %v11852_v63 = vsel %vm11661_vm0, %v11585_v52, -inf  ;;  %v11935_v20 = vsel %vm11672_vm1, %v4775_v7, -inf }
 0x3e8   :  { %v4778_v60 = vpop.f32.mrb[211].mxu0  ;;  %4076 = vmax.xlane.f32.xlu1 %v11814_v43  ;;  %14043 = vst [vmem:[#allocation129_spill] sm:$0xff] %v11852_v63 }
 0x3ea   :  { %4078 = vmax.xlane.f32.xlu0 %v11824_v1 }
 0x3ec   :  { %4080 = vmax.xlane.f32.xlu1 %v11834_v26 }
 0x3ed   :  { %v8626_v56 = vpop.f32.mrb[212].mxu0 }
 0x3ee   :  { %v4791_v38 = vpop.f32.mrb[213].mxu0  ;;  %4452 = vmax.xlane.f32.xlu0 %v11840_v45 }
 0x3ef   :  { %v8627_v61 = vpop.f32.mrb[214].mxu0  ;;  %v11956_v7 = vsel %vm11706_vm4, %v4791_v38, -inf }
 0x3f0   :  { %v4794_v35 = vpop.f32.mrb[215].mxu0  ;;  %4454 = vmax.xlane.f32.xlu1 %v11846_v11 }
 0x3f2   :  { %4456 = vmax.xlane.f32.xlu0 %v11852_v63  ;;  %v11870_v63 = vsel %vm11717_vm5, %v11610_v40, -inf  ;;  %v11888_v40 = vsel %vm11750_vm8, %v11620_v51, -inf  ;;  %v11906_v51 = vsel %vm11783_vm11, %v11623_v31, -inf  ;;  %v11924_v31 = vsel %vm11818_vm14, %v11632_v28, -inf }
 0x3f3   :  { %14046 = vst [vmem:[#allocation132_spill] sm:$0xff] %v11870_v63  ;;  %v11946_v28 = vsel %vm11661_vm0, %v11799_v0, -inf  ;;  %v11966_v0 = vsel %vm11728_vm6, %v8626_v56, -inf }
 0x3f4   :  { %4458 = vmax.xlane.f32.xlu1 %v11858_v33 }
 0x3f5   :  { %v8630_v34 = vpop.f32.mrb[216].mxu0 }
 0x3f6   :  { %v4807_v11 = vpop.f32.mrb[217].mxu0  ;;  %4460 = vmax.xlane.f32.xlu0 %v11864_v44  ;;  %v11986_v56 = vsel %vm11772_vm10, %v8630_v34, -inf }
 0x3f7   :  { %v8631_v52 = vpop.f32.mrb[218].mxu0  ;;  %v11976_v38 = vsel %vm11750_vm8, %v4807_v11, -inf }
 0x3f8   :  { %v4810_v45 = vpop.f32.mrb[219].mxu0  ;;  %4462 = vmax.xlane.f32.xlu1 %v11870_v63 }
 0x3fa   :  { %4464 = vmax.xlane.f32.xlu0 %v11876_v24  ;;  %v11894_v24 = vsel %vm11761_vm9, %v11626_v49, -inf  ;;  %v11912_v49 = vsel %vm11794_vm12, %v11635_v16, -inf  ;;  %v11930_v16 = vsel %vm11828_vm15, %v11638_v42, -inf  ;;  %v11951_v42 = vsel %vm11684_vm2, %v8623_v14, -inf }
 0x3fb   :  { %v11971_v14 = vsel %vm11739_vm7, %v8627_v61, -inf  ;;  %v11991_v61 = vsel %vm11783_vm11, %v8631_v52, -inf }
 0x3fc   :  { %4466 = vmax.xlane.f32.xlu1 %v11882_v12 }
 0x3fd   :  { %v8634_v44 = vpop.f32.mrb[220].mxu0 }
 0x3fe   :  { %v4823_v63 = vpop.f32.mrb[221].mxu0  ;;  %4468 = vmax.xlane.f32.xlu0 %v11888_v40  ;;  %v12006_v34 = vsel %vm11818_vm14, %v8634_v44, -inf }
 0x3ff   :  { %v8635_v9 = vpop.f32.mrb[222].mxu0  ;;  %v11996_v11 = vsel %vm11794_vm12, %v4823_v63, -inf }
 0x400   :  { %v4826_v33 = vpop.f32.mrb[223].mxu0  ;;  %4470 = vmax.xlane.f32.xlu1 %v11894_v24  ;;  %v12011_v52 = vsel %vm11828_vm15, %v8635_v9, -inf }
 0x402   :  { %4472 = vmax.xlane.f32.xlu0 %v11900_v32 }
 0x404   :  { %4474 = vmax.xlane.f32.xlu1 %v11906_v51 }
 0x406   :  { %4476 = vmax.xlane.f32.xlu0 %v11912_v49 }
 0x408   :  { %4478 = vmax.xlane.f32.xlu1 %v11918_v23  ;;  %v11940_v23 = vsel %vm11693_vm3, %v4778_v60, -inf  ;;  %v11961_v60 = vsel %vm11717_vm5, %v4794_v35, -inf  ;;  %v11981_v35 = vsel %vm11761_vm9, %v4810_v45, -inf  ;;  %v12001_v45 = vsel %vm11807_vm13, %v4826_v33, -inf }
 0x40a   :  { %4480 = vmax.xlane.f32.xlu0 %v11924_v31 }
 0x40c   :  { %4482 = vmax.xlane.f32.xlu1 %v11930_v16 }
 0x40e   :  { %4854 = vmax.xlane.f32.xlu0 %v11935_v20 }
 0x410   :  { %4856 = vmax.xlane.f32.xlu1 %v11940_v23 }
 0x412   :  { %4858 = vmax.xlane.f32.xlu0 %v11946_v28 }
 0x414   :  { %4860 = vmax.xlane.f32.xlu1 %v11951_v42 }
 0x416   :  { %4862 = vmax.xlane.f32.xlu0 %v11956_v7 }
 0x418   :  { %4864 = vmax.xlane.f32.xlu1 %v11961_v60 }
 0x41a   :  { %4866 = vmax.xlane.f32.xlu0 %v11966_v0 }
 0x41c   :  { %4868 = vmax.xlane.f32.xlu1 %v11971_v14 }
 0x41e   :  { %4870 = vmax.xlane.f32.xlu0 %v11976_v38 }
 0x420   :  { %4872 = vmax.xlane.f32.xlu1 %v11981_v35 }
 0x422   :  { %4874 = vmax.xlane.f32.xlu0 %v11986_v56 }
 0x424   :  { %4876 = vmax.xlane.f32.xlu1 %v11991_v61 }
 0x426   :  { %4878 = vmax.xlane.f32.xlu0 %v11996_v11 }
 0x428   :  { %4880 = vmax.xlane.f32.xlu1 %v12001_v45 }
 0x42a   :  { %4882 = vmax.xlane.f32.xlu0 %v12006_v34 }
 0x42c   :  { %4884 = vmax.xlane.f32.xlu1 %v12011_v52 }
 0x45a   :  { %v4055_v63 = vpop.xlane.xlu1 %4054 }
 0x45b   :  { %v4051_v55 = vpop.xlane.xlu0 %4050  ;;  %v4084_v33 = vsub.f32 %v11668_v17, %v4055_v63 }
 0x45c   :  { %v4082_v62 = vsub.f32 %v11680_v2, %v4051_v55 }
 0x45d   :  { %v4102_v27 = vmul.f32 1.442695, %v4084_v33 }
 0x45e   :  { %v4098_v21 = vmul.f32 1.442695, %v4082_v62  ;;  %v4057_v41 = vpop.xlane.xlu1 %4056 }
 0x45f   :  { %v4085_v18 = vsub.f32 %v11690_v13, %v4057_v41  ;;  %v4053_v44 = vpop.xlane.xlu0 %4052 }
 0x460   :  { %v4083_v53 = vsub.f32 %v11701_v8, %v4053_v44  ;;  %9807 = vpow2.f32 %v4098_v21 }
 0x461   :  { %v4104_v5 = vmul.f32 1.442695, %v4085_v18 }
 0x462   :  { %v4100_v9 = vmul.f32 1.442695, %v4083_v53 }
 0x463   :  { %9809 = vpow2.f32 %v4104_v5  ;;  %v4059_v29 = vpop.xlane.xlu0 %4058 }
 0x464   :  { %9811 = vpow2.f32 %v4100_v9  ;;  %v4086_v48 = vsub.f32 %v11713_v57, %v4059_v29 }
 0x465   :  { %9813 = vpow2.f32 %v4102_v27  ;;  %v4061_v2 = vpop.xlane.xlu1 %4060 }
 0x466   :  { %v4106_v55 = vmul.f32 1.442695, %v4086_v48  ;;  %v4087_v62 = vsub.f32 %v11724_v37, %v4061_v2 }
 0x467   :  { %v4063_v17 = vpop.xlane.xlu0 %4062 }
 0x468   :  { %v4108_v63 = vmul.f32 1.442695, %v4087_v62  ;;  %v4088_v13 = vsub.f32 %v11735_v58, %v4063_v17  ;;  %9815 = vpow2.f32 %v4106_v55 }
 0x469   :  { %v4065_v8 = vpop.xlane.xlu1 %4064 }
 0x46a   :  { %9817 = vpow2.f32 %v4108_v63  ;;  %v4110_v41 = vmul.f32 1.442695, %v4088_v13  ;;  %v4089_v21 = vsub.f32 %v11746_v22, %v4065_v8  ;;  %v12022_v53 = vpop.eup %9807 }
 0x46b   :  { %v4067_v5 = vpop.xlane.xlu0 %4066 }
 0x46c   :  { %v4112_v18 = vmul.f32 1.442695, %v4089_v21  ;;  %v4090_v29 = vsub.f32 %v11757_v3, %v4067_v5  ;;  %9819 = vpow2.f32 %v4110_v41 }
 0x46d   :  { %v12025_v57 = vpop.eup %9809  ;;  %v4069_v37 = vpop.xlane.xlu1 %4068 }
 0x46e   :  { %v12027_v48 = vpop.eup %9811  ;;  %9821 = vpow2.f32 %v4112_v18  ;;  %v4114_v58 = vmul.f32 1.442695, %v4090_v29  ;;  %v4091_v27 = vsub.f32 %v11768_v59, %v4069_v37 }
 0x46f   :  { %v12030_v33 = vpop.eup %9813  ;;  %v4071_v44 = vpop.xlane.xlu0 %4070  ;;  %v4162_v22 = vpack.c.bf16 %v12027_v48, %v12022_v53 }
 0x470   :  { %v4116_v9 = vmul.f32 1.442695, %v4091_v27  ;;  %v4092_v2 = vsub.f32 %v11779_v15, %v4071_v44  ;;  %v4163_v3 = vpack.c.bf16 %v12025_v57, %v12030_v33  ;;  %9823 = vpow2.f32 %v4114_v58 }
 0x471   :  { %v4073_v55 = vpop.xlane.xlu1 %4072  ;;  %8524 = vmatprep.mubr.bf16.mxu1 %v4162_v22 }
 0x472   :  { %9825 = vpow2.f32 %v4116_v9  ;;  %v4118_v62 = vmul.f32 1.442695, %v4092_v2  ;;  %v4093_v17 = vsub.f32 %v11790_v47, %v4073_v55  ;;  %8525 = vmatmul.mubr.bf16.vlgmr.msra.gmra.mrb[208].mxu1 %v4163_v3  ;;  %v12038_v59 = vpop.eup %9815 }
 0x473   :  { %8573 = vmatpush3.bf16.msra.mxu1 %v11428_v19  ;;  %v4075_v63 = vpop.xlane.xlu0 %4074 }
 0x474   :  { %v12041_v13 = vpop.eup %9817  ;;  %v4120_v8 = vmul.f32 1.442695, %v4093_v17  ;;  %8574 = vmatprep.subr.bf16.mxu1 %v11443_v36  ;;  %v4094_v15 = vsub.f32 %v11803_v30, %v4075_v63  ;;  %9827 = vpow2.f32 %v4118_v62  ;;  %v14054_v17 = vld [vmem:[#allocation128_spill] sm:$0xff] }
 0x475   :  { %v4077_v41 = vpop.xlane.xlu1 %4076  ;;  %v4164_v21 = vpack.c.bf16 %v12041_v13, %v12038_v59 }
 0x476   :  { %9829 = vpow2.f32 %v4120_v8  ;;  %v4122_v47 = vmul.f32 1.442695, %v4094_v15  ;;  %v4095_v5 = vsub.f32 %v11814_v43, %v4077_v41  ;;  %v12048_v18 = vpop.eup %9819 }
 0x477   :  { %14049 = vst [vmem:[#allocation135_spill] sm:$0xff] %v12048_v18  ;;  %8575 = vmatpush3.bf16.msra.mxu1 %v11443_v36  ;;  %8528 = vmatprep.mubr.bf16.mxu1 %v4164_v21  ;;  %v4079_v19 = vpop.xlane.xlu0 %4078  ;;  %v14057_v21 = vld [vmem:[#allocation36_spill] sm:$0xff] }
 0x478   :  { %v12051_v29 = vpop.eup %9821  ;;  %v4124_v37 = vmul.f32 1.442695, %v4095_v5  ;;  %8576 = vmatprep.subr.bf16.mxu1 %v11455_v6  ;;  %v4096_v30 = vsub.f32 %v11824_v1, %v4079_v19  ;;  %9831 = vpow2.f32 %v4122_v47  ;;  %v14053_v1 = vld [vmem:[#allocation127_spill] sm:$0xff]  ;;  %v14058_v47 = vld [vmem:[#allocation129_spill] sm:$0xff] }
 0x479   :  { %14050 = vst [vmem:[#allocation136_spill] sm:$0xff] %v12051_v29  ;;  %v4081_v58 = vpop.xlane.xlu1 %4080  ;;  %v4165_v27 = vpack.c.bf16 %v12051_v29, %v12048_v18 }
 0x47a   :  { %9833 = vpow2.f32 %v4124_v37  ;;  %v4126_v43 = vmul.f32 1.442695, %v4096_v30  ;;  %v4097_v44 = vsub.f32 %v11834_v26, %v4081_v58  ;;  %v12058_v22 = vpop.eup %9823  ;;  %v14059_v58 = vld [vmem:[#allocation130_spill] sm:$0xff] }
 0x47b   :  { %14051 = vst [vmem:[#allocation137_spill] sm:$0xff] %v12058_v22  ;;  %8577 = vmatpush3.bf16.msra.mxu1 %v11455_v6  ;;  %v4453_v36 = vpop.xlane.xlu0 %4452 }
 0x47c   :  { %v12061_v9 = vpop.eup %9825  ;;  %v4128_v2 = vmul.f32 1.442695, %v4097_v44  ;;  %8529 = vmatmul.mubr.bf16.gmra.mrb[212].mxu1 %v4165_v27  ;;  %8578 = vmatprep.subr.bf16.mxu1 %v11467_v46  ;;  %v4484_v3 = vsub.f32 %v14053_v1, %v4453_v36  ;;  %9835 = vpow2.f32 %v4126_v43  ;;  %v14063_v1 = vld [vmem:[#allocation131_spill] sm:$0xff] }
 0x47d   :  { %14052 = vst [vmem:[#allocation138_spill] sm:$0xff] %v12061_v9  ;;  %v4455_v55 = vpop.xlane.xlu1 %4454  ;;  %v4166_v62 = vpack.c.bf16 %v12061_v9, %v12058_v22 }
 0x47e   :  { %9837 = vpow2.f32 %v4128_v2  ;;  %v4500_v26 = vmul.f32 1.442695, %v4484_v3  ;;  %v4485_v63 = vsub.f32 %v14054_v17, %v4455_v55  ;;  %v12068_v8 = vpop.eup %9827  ;;  %v14062_v2 = vld [vmem:[#allocation34_spill] sm:$0xff]  ;;  %v14064_v17 = vld [vmem:[#allocation132_spill] sm:$0xff] }
 0x47f   :  { %14055 = vst [vmem:[#allocation127_spill] sm:$0xff] %v12068_v8  ;;  %8579 = vmatpush3.bf16.msra.mxu1 %v11467_v46  ;;  %8532 = vmatprep.mubr.bf16.mxu1 %v4166_v62  ;;  %v4457_v6 = vpop.xlane.xlu0 %4456 }
 0x480   :  { %v12071_v15 = vpop.eup %9829  ;;  %v4502_v41 = vmul.f32 1.442695, %v4485_v63  ;;  %8580 = vmatprep.subr.bf16.mxu1 %v14057_v21  ;;  %v4486_v5 = vsub.f32 %v14058_v47, %v4457_v6  ;;  %9839 = vpow2.f32 %v4500_v26 }
 0x481   :  { %14056 = vst [vmem:[#allocation128_spill] sm:$0xff] %v12071_v15  ;;  %v4459_v19 = vpop.xlane.xlu1 %4458  ;;  %v4167_v37 = vpack.c.bf16 %v12071_v15, %v12068_v8 }
 0x482   :  { %9841 = vpow2.f32 %v4502_v41  ;;  %v4504_v30 = vmul.f32 1.442695, %v4486_v5  ;;  %v4487_v27 = vsub.f32 %v14059_v58, %v4459_v19  ;;  %v12078_v43 = vpop.eup %9831  ;;  %v14067_v5 = vld [vmem:[#allocation41_spill] sm:$0xff] }
 0x483   :  { %14060 = vst [vmem:[#allocation36_spill] sm:$0xff] %v12078_v43  ;;  %8581 = vmatpush3.bf16.msra.mxu1 %v14057_v21  ;;  %v4461_v46 = vpop.xlane.xlu0 %4460  ;;  %v14068_v19 = vld [vmem:[#allocation133_spill] sm:$0xff] }
 0x484   :  { %v12081_v44 = vpop.eup %9833  ;;  %v4506_v36 = vmul.f32 1.442695, %v4487_v27  ;;  %8533 = vmatmul.mubr.bf16.gmra.mrb[216].mxu1 %v4167_v37  ;;  %8582 = vmatprep.subr.bf16.mxu1 %v14062_v2  ;;  %v4488_v3 = vsub.f32 %v14063_v1, %v4461_v46  ;;  %9843 = vpow2.f32 %v4504_v30 }
 0x485   :  { %14061 = vst [vmem:[#allocation129_spill] sm:$0xff] %v12081_v44  ;;  %v4463_v55 = vpop.xlane.xlu1 %4462  ;;  %v4168_v62 = vpack.c.bf16 %v12081_v44, %v12078_v43 }
 0x486   :  { %9845 = vpow2.f32 %v4506_v36  ;;  %v4508_v26 = vmul.f32 1.442695, %v4488_v3  ;;  %v4489_v63 = vsub.f32 %v14064_v17, %v4463_v55  ;;  %v12088_v6 = vpop.eup %9835  ;;  %v14069_v55 = vld [vmem:[#allocation39_spill] sm:$0xff] }
 0x487   :  { %14065 = vst [vmem:[#allocation130_spill] sm:$0xff] %v12088_v6  ;;  %8583 = vmatpush3.bf16.msra.mxu1 %v14062_v2  ;;  %8536 = vmatprep.mubr.bf16.mxu1 %v4168_v62  ;;  %v4465_v41 = vpop.xlane.xlu0 %4464 }
 0x488   :  { %v12091_v21 = vpop.eup %9837  ;;  %v4510_v47 = vmul.f32 1.442695, %v4489_v63  ;;  %8584 = vmatprep.subr.bf16.mxu1 %v14067_v5  ;;  %v4490_v37 = vsub.f32 %v14068_v19, %v4465_v41  ;;  %9847 = vpow2.f32 %v4508_v26 }
 0x489   :  { %14066 = vst [vmem:[#allocation34_spill] sm:$0xff] %v12091_v21  ;;  %v4467_v30 = vpop.xlane.xlu1 %4466  ;;  %v4169_v58 = vpack.c.bf16 %v12091_v21, %v12088_v6 }
 0x48a   :  { %9849 = vpow2.f32 %v4510_v47  ;;  %v4512_v27 = vmul.f32 1.442695, %v4490_v37  ;;  %v4491_v46 = vsub.f32 %v11882_v12, %v4467_v30  ;;  %v12098_v36 = vpop.eup %9839  ;;  %v14070_v37 = vld [vmem:[#allocation102_spill] sm:$0xff] }
 0x48b   :  { %8585 = vmatpush3.bf16.msra.mxu1 %v14067_v5  ;;  %v4469_v2 = vpop.xlane.xlu0 %4468 }
 0x48c   :  { %v12101_v1 = vpop.eup %9841  ;;  %v4514_v3 = vmul.f32 1.442695, %v4491_v46  ;;  %8537 = vmatmul.mubr.bf16.gmra.mrb[220].mxu1 %v4169_v58  ;;  %8586 = vmatprep.subr.bf16.mxu1 %v14069_v55  ;;  %v4492_v62 = vsub.f32 %v11888_v40, %v4469_v2  ;;  %9851 = vpow2.f32 %v4512_v27 }
 0x48d   :  { %v4471_v26 = vpop.xlane.xlu1 %4470  ;;  %v4564_v17 = vpack.c.bf16 %v12101_v1, %v12098_v36 }
 0x48e   :  { %9853 = vpow2.f32 %v4514_v3  ;;  %v4516_v12 = vmul.f32 1.442695, %v4492_v62  ;;  %v4493_v63 = vsub.f32 %v11894_v24, %v4471_v26  ;;  %v12108_v41 = vpop.eup %9843 }
 0x48f   :  { %8587 = vmatpush3.bf16.msra.mxu1 %v14069_v55  ;;  %8588 = vmatprep.mubr.bf16.mxu1 %v4564_v17  ;;  %v4473_v47 = vpop.xlane.xlu0 %4472 }
 0x490   :  { %v12111_v5 = vpop.eup %9845  ;;  %v4518_v19 = vmul.f32 1.442695, %v4493_v63  ;;  %v4494_v40 = vsub.f32 %v11900_v32, %v4473_v47  ;;  %8636 = vmatprep.subr.bf16.mxu1 %v14070_v37  ;;  %9855 = vpow2.f32 %v4516_v12  ;;  %v14071_v12 = vld [vmem:[#allocation71_spill] sm:$0xff] }
 0x491   :  { %v4475_v30 = vpop.xlane.xlu1 %4474  ;;  %v4565_v58 = vpack.c.bf16 %v12111_v5, %v12108_v41 }
 0x492   :  { %9857 = vpow2.f32 %v4518_v19  ;;  %v4520_v24 = vmul.f32 1.442695, %v4494_v40  ;;  %v4495_v27 = vsub.f32 %v11906_v51, %v4475_v30  ;;  %v12118_v46 = vpop.eup %9847  ;;  %v14072_v51 = vld [vmem:[#allocation134_spill] sm:$0xff] }
 0x493   :  { %v4477_v2 = vpop.xlane.xlu0 %4476 }
 0x494   :  { %v12120_v3 = vpop.eup %9849  ;;  %v4522_v55 = vmul.f32 1.442695, %v4495_v27  ;;  %8589 = vmatmul.mubr.bf16.vlgmr.msra.gmra.mrb[224].mxu1 %v4565_v58  ;;  %v4496_v32 = vsub.f32 %v11912_v49, %v4477_v2  ;;  %9859 = vpow2.f32 %v4520_v24  ;;  %v14073_v27 = vld [vmem:[#allocation104_spill] sm:$0xff] }
 0x495   :  { %8637 = vmatpush3.bf16.msra.mxu1 %v14070_v37  ;;  %v4479_v62 = vpop.xlane.xlu1 %4478  ;;  %v4566_v26 = vpack.c.bf16 %v12120_v3, %v12118_v46 }
 0x496   :  { %9861 = vpow2.f32 %v4522_v55  ;;  %v4524_v17 = vmul.f32 1.442695, %v4496_v32  ;;  %8638 = vmatprep.subr.bf16.mxu1 %v14071_v12  ;;  %v4497_v63 = vsub.f32 %v14072_v51, %v4479_v62  ;;  %v12128_v47 = vpop.eup %9851 }
 0x497   :  { %8592 = vmatprep.mubr.bf16.mxu1 %v4566_v26  ;;  %v4481_v19 = vpop.xlane.xlu0 %4480 }
 0x498   :  { %v12130_v40 = vpop.eup %9853  ;;  %v4526_v49 = vmul.f32 1.442695, %v4497_v63  ;;  %v4498_v30 = vsub.f32 %v11924_v31, %v4481_v19  ;;  %9863 = vpow2.f32 %v4524_v17  ;;  %v14076_v63 = vld [vmem:[#allocation103_spill] sm:$0xff] }
 0x499   :  { %8639 = vmatpush3.bf16.msra.mxu1 %v14071_v12  ;;  %v4483_v37 = vpop.xlane.xlu1 %4482  ;;  %v4567_v58 = vpack.c.bf16 %v12130_v40, %v12128_v47 }
 0x49a   :  { %9865 = vpow2.f32 %v4526_v49  ;;  %v4528_v24 = vmul.f32 1.442695, %v4498_v30  ;;  %8640 = vmatprep.subr.bf16.mxu1 %v14073_v27  ;;  %v4499_v2 = vsub.f32 %v11930_v16, %v4483_v37  ;;  %v12138_v55 = vpop.eup %9855 }
 0x49b   :  { %14074 = vst [vmem:[#allocation131_spill] sm:$0xff] %v12138_v55  ;;  %v4855_v32 = vpop.xlane.xlu0 %4854 }
 0x49c   :  { %v12140_v62 = vpop.eup %9857  ;;  %v4530_v26 = vmul.f32 1.442695, %v4499_v2  ;;  %8593 = vmatmul.mubr.bf16.gmra.mrb[228].mxu1 %v4567_v58  ;;  %v4886_v31 = vsub.f32 %v11935_v20, %v4855_v32  ;;  %9867 = vpow2.f32 %v4528_v24  ;;  %v14079_v2 = vld [vmem:[#allocation106_spill] sm:$0xff] }
 0x49d   :  { %14075 = vst [vmem:[#allocation132_spill] sm:$0xff] %v12140_v62  ;;  %8641 = vmatpush3.bf16.msra.mxu1 %v14073_v27  ;;  %v4857_v17 = vpop.xlane.xlu1 %4856  ;;  %v4568_v12 = vpack.c.bf16 %v12140_v62, %v12138_v55 }
 0x49e   :  { %9869 = vpow2.f32 %v4530_v26  ;;  %v4902_v51 = vmul.f32 1.442695, %v4886_v31  ;;  %8642 = vmatprep.subr.bf16.mxu1 %v14076_v63  ;;  %v4887_v16 = vsub.f32 %v11940_v23, %v4857_v17  ;;  %v12148_v19 = vpop.eup %9859 }
 0x49f   :  { %14077 = vst [vmem:[#allocation41_spill] sm:$0xff] %v12148_v19  ;;  %8596 = vmatprep.mubr.bf16.mxu1 %v4568_v12  ;;  %v4859_v49 = vpop.xlane.xlu0 %4858 }
 0x4a0   :  { %v12150_v30 = vpop.eup %9861  ;;  %v4904_v20 = vmul.f32 1.442695, %v4887_v16  ;;  %v4888_v37 = vsub.f32 %v11946_v28, %v4859_v49  ;;  %9871 = vpow2.f32 %v4902_v51  ;;  %v14082_v16 = vld [vmem:[#allocation105_spill] sm:$0xff] }
 0x4a1   :  { %14078 = vst [vmem:[#allocation133_spill] sm:$0xff] %v12150_v30  ;;  %8643 = vmatpush3.bf16.msra.mxu1 %v14076_v63  ;;  %v4861_v58 = vpop.xlane.xlu1 %4860  ;;  %v4569_v24 = vpack.c.bf16 %v12150_v30, %v12148_v19 }
 0x4a2   :  { %9873 = vpow2.f32 %v4904_v20  ;;  %v4906_v27 = vmul.f32 1.442695, %v4888_v37  ;;  %8644 = vmatprep.subr.bf16.mxu1 %v14079_v2  ;;  %v4889_v23 = vsub.f32 %v11951_v42, %v4861_v58  ;;  %v12158_v32 = vpop.eup %9863 }
 0x4a3   :  { %14080 = vst [vmem:[#allocation39_spill] sm:$0xff] %v12158_v32  ;;  %v4863_v26 = vpop.xlane.xlu0 %4862 }
 0x4a4   :  { %v12160_v31 = vpop.eup %9865  ;;  %v4908_v17 = vmul.f32 1.442695, %v4889_v23  ;;  %8597 = vmatmul.mubr.bf16.gmra.mrb[232].mxu1 %v4569_v24  ;;  %v4890_v28 = vsub.f32 %v11956_v7, %v4863_v26  ;;  %9875 = vpow2.f32 %v4906_v27  ;;  %v14085_v23 = vld [vmem:[#allocation108_spill] sm:$0xff] }
 0x4a5   :  { %14081 = vst [vmem:[#allocation102_spill] sm:$0xff] %v12160_v31  ;;  %8645 = vmatpush3.bf16.msra.mxu1 %v14079_v2  ;;  %v4865_v12 = vpop.xlane.xlu1 %4864  ;;  %v4570_v51 = vpack.c.bf16 %v12160_v31, %v12158_v32 }
 0x4a6   :  { %9877 = vpow2.f32 %v4908_v17  ;;  %v4910_v63 = vmul.f32 1.442695, %v4890_v28  ;;  %8646 = vmatprep.subr.bf16.mxu1 %v14082_v16  ;;  %v4891_v42 = vsub.f32 %v11961_v60, %v4865_v12  ;;  %v12168_v49 = vpop.eup %9867 }
 0x4a7   :  { %14083 = vst [vmem:[#allocation71_spill] sm:$0xff] %v12168_v49  ;;  %v4867_v20 = vpop.xlane.xlu0 %4866  ;;  %8600 = vmatprep.mubr.bf16.mxu1 %v4570_v51 }
 0x4a8   :  { %v12170_v37 = vpop.eup %9869  ;;  %v4912_v7 = vmul.f32 1.442695, %v4891_v42  ;;  %v4892_v58 = vsub.f32 %v11966_v0, %v4867_v20  ;;  %9879 = vpow2.f32 %v4910_v63  ;;  %v14088_v42 = vld [vmem:[#allocation107_spill] sm:$0xff] }
 0x4a9   :  { %14084 = vst [vmem:[#allocation134_spill] sm:$0xff] %v12170_v37  ;;  %8647 = vmatpush3.bf16.msra.mxu1 %v14082_v16  ;;  %v4869_v24 = vpop.xlane.xlu1 %4868  ;;  %v4571_v27 = vpack.c.bf16 %v12170_v37, %v12168_v49  ;;  %v9731_v49 = vld [vmem:[#allocation9 + $0x1fc] ss:$12 sps:$4 sm:$0xff]   ;;  %v9729_v37 = vld [vmem:[#allocation9 + $0x1f8] ss:$12 sps:$4 sm:$0xff]  }
 0x4aa   :  { %9881 = vpow2.f32 %v4912_v7  ;;  %v4914_v2 = vmul.f32 1.442695, %v4892_v58  ;;  %8648 = vmatprep.subr.bf16.mxu1 %v14085_v23  ;;  %v4893_v60 = vsub.f32 %v11971_v14, %v4869_v24  ;;  %v12178_v26 = vpop.eup %9871 }
 0x4ab   :  { %14086 = vst [vmem:[#allocation104_spill] sm:$0xff] %v12178_v26  ;;  %v4871_v17 = vpop.xlane.xlu0 %4870 }
 0x4ac   :  { %v12180_v28 = vpop.eup %9873  ;;  %v4916_v12 = vmul.f32 1.442695, %v4893_v60  ;;  %v4894_v0 = vsub.f32 %v11976_v38, %v4871_v17  ;;  %8601 = vmatmul.mubr.bf16.gmra.mrb[236].mxu1 %v4571_v27  ;;  %9883 = vpow2.f32 %v4914_v2  ;;  %v14091_v60 = vld [vmem:[#allocation18_spill] sm:$0xff] }
 0x4ad   :  { %14087 = vst [vmem:[#allocation103_spill] sm:$0xff] %v12180_v28  ;;  %8649 = vmatpush3.bf16.msra.mxu1 %v14085_v23  ;;  %v4873_v51 = vpop.xlane.xlu1 %4872  ;;  %v4966_v63 = vpack.c.bf16 %v12180_v28, %v12178_v26 }
 0x4ae   :  { %9885 = vpow2.f32 %v4916_v12  ;;  %v4918_v16 = vmul.f32 1.442695, %v4894_v0  ;;  %8650 = vmatprep.subr.bf16.mxu1 %v14088_v42  ;;  %v4895_v14 = vsub.f32 %v11981_v35, %v4873_v51  ;;  %v12188_v20 = vpop.eup %9875 }
 0x4af   :  { %14089 = vst [vmem:[#allocation106_spill] sm:$0xff] %v12188_v20  ;;  %v4875_v7 = vpop.xlane.xlu0 %4874  ;;  %8652 = vmatprep.mubr.bf16.mxu1 %v4966_v63 }
 0x4b0   :  { %v12190_v58 = vpop.eup %9877  ;;  %v4920_v38 = vmul.f32 1.442695, %v4895_v14  ;;  %v4896_v24 = vsub.f32 %v11986_v56, %v4875_v7  ;;  %9887 = vpow2.f32 %v4918_v16 }
 0x4b1   :  { %14090 = vst [vmem:[#allocation105_spill] sm:$0xff] %v12190_v58  ;;  %8651 = vmatpush3.bf16.msra.mxu1 %v14088_v42  ;;  %v4877_v27 = vpop.xlane.xlu1 %4876  ;;  %v4967_v2 = vpack.c.bf16 %v12190_v58, %v12188_v20 }
 0x4b2   :  { %9889 = vpow2.f32 %v4920_v38  ;;  %v4922_v23 = vmul.f32 1.442695, %v4896_v24  ;;  %8668 = vmatprep.subr.bf16.mxu1 %v14091_v60  ;;  %v4897_v35 = vsub.f32 %v11991_v61, %v4877_v27  ;;  %v12198_v17 = vpop.eup %9879 }
 0x4b3   :  { %14092 = vst [vmem:[#allocation108_spill] sm:$0xff] %v12198_v17  ;;  %v4879_v12 = vpop.xlane.xlu0 %4878 }
 0x4b4   :  { %v12200_v0 = vpop.eup %9881  ;;  %v4924_v51 = vmul.f32 1.442695, %v4897_v35  ;;  %v4898_v56 = vsub.f32 %v11996_v11, %v4879_v12  ;;  %8653 = vmatmul.mubr.bf16.vlgmr.msra.gmra.mrb[240].mxu1 %v4967_v2  ;;  %9891 = vpow2.f32 %v4922_v23  ;;  %v14097_v12 = vld [vmem:[#allocation38_spill] sm:$0xff] }
 0x4b5   :  { %14093 = vst [vmem:[#allocation107_spill] sm:$0xff] %v12200_v0  ;;  %v4881_v63 = vpop.xlane.xlu1 %4880  ;;  %v4968_v16 = vpack.c.bf16 %v12200_v0, %v12198_v17 }
 0x4b6   :  { %9893 = vpow2.f32 %v4924_v51  ;;  %v4926_v42 = vmul.f32 1.442695, %v4898_v56  ;;  %v4899_v14 = vsub.f32 %v12001_v45, %v4881_v63  ;;  %v12206_v7 = vpop.eup %9883 }
 0x4b7   :  { %14094 = vst [vmem:[#allocation18_spill] sm:$0xff] %v12206_v7  ;;  %v4883_v61 = vpop.xlane.xlu0 %4882  ;;  %8656 = vmatprep.mubr.bf16.mxu1 %v4968_v16 }
 0x4b8   :  { %v12208_v38 = vpop.eup %9885  ;;  %v4928_v24 = vmul.f32 1.442695, %v4899_v14  ;;  %v4900_v27 = vsub.f32 %v12006_v34, %v4883_v61  ;;  %9895 = vpow2.f32 %v4926_v42  ;;  %v14102_v42 = vld [vmem:[#allocation21_spill] sm:$0xff] }
 0x4b9   :  { %14095 = vst [vmem:[#allocation139_spill] sm:$0xff] %v12208_v38  ;;  %v4885_v11 = vpop.xlane.xlu1 %4884  ;;  %v4969_v2 = vpack.c.bf16 %v12208_v38, %v12206_v7 }
 0x4ba   :  { %9897 = vpow2.f32 %v4928_v24  ;;  %v4930_v23 = vmul.f32 1.442695, %v4900_v27  ;;  %8669 = vmatpush3.bf16.xpose.msra.mxu1 %v14091_v60  ;;  %v4901_v45 = vsub.f32 %v12011_v52, %v4885_v11  ;;  %v12215_v35 = vpop.eup %9887 }
 0x4bb   :  { %14096 = vst [vmem:[#allocation140_spill] sm:$0xff] %v12215_v35  ;;  %8670 = vmatprep.subr.bf16.mxu1 %v14097_v12 }
 0x4bc   :  { %v12218_v51 = vpop.eup %9889  ;;  %v4932_v56 = vmul.f32 1.442695, %v4901_v45  ;;  %8657 = vmatmul.mubr.bf16.gmra.mrb[244].mxu1 %v4969_v2  ;;  %9899 = vpow2.f32 %v4930_v23  ;;  %v14106_v2 = vld [vmem:[#allocation22_spill] sm:$0xff]  ;;  %v14107_v23 = vld [vmem:[#allocation77_spill] sm:$0xff]  ;;  %v14108_v45 = vld [vmem:[#allocation75_spill] sm:$0xff] }
 0x4bd   :  { %14098 = vst [vmem:[#allocation38_spill] sm:$0xff] %v12218_v51  ;;  %v4970_v34 = vpack.c.bf16 %v12218_v51, %v12215_v35 }
 0x4be   :  { %9901 = vpow2.f32 %v4932_v56  ;;  %v12222_v63 = vpop.eup %9891  ;;  %v14110_v56 = vld [vmem:[#allocation23_spill] sm:$0xff] }
 0x4bf   :  { %14099 = vst [vmem:[#allocation141_spill] sm:$0xff] %v12222_v63  ;;  %8660 = vmatprep.mubr.bf16.mxu1 %v4970_v34  ;;  %v14111_v34 = vld [vmem:[#allocation66_spill] sm:$0xff] }
 0x4c0   :  { %v12224_v16 = vpop.eup %9893 }
 0x4c1   :  { %14100 = vst [vmem:[#allocation142_spill] sm:$0xff] %v12224_v16  ;;  %v4971_v52 = vpack.c.bf16 %v12224_v16, %v12222_v63  ;;  %v9717_v63 = vld [vmem:[#allocation9 + $0x1b0] ss:$12 sps:$4 sm:$0xff]  }
 0x4c2   :  { %8671 = vmatpush3.bf16.xpose.msra.mxu1 %v14097_v12  ;;  %v12229_v60 = vpop.eup %9895  ;;  %v14109_v12 = vpack.c.bf16 %v14107_v23, %v14108_v45  ;;  %v14118_v45 = vld [vmem:[#allocation85_spill] sm:$0xff] }
 0x4c3   :  { %14101 = vst [vmem:[#allocation143_spill] sm:$0xff] %v12229_v60  ;;  %8672 = vmatprep.subr.bf16.mxu1 %v14102_v42 }
 0x4c4   :  { %v12232_v14 = vpop.eup %9897  ;;  %8661 = vmatmul.mubr.bf16.gmra.mrb[248].mxu1 %v4971_v52  ;;  %v14112_v52 = vld [vmem:[#allocation27_spill] sm:$0xff] }
 0x4c5   :  { %14103 = vst [vmem:[#allocation21_spill] sm:$0xff] %v12232_v14  ;;  %v4972_v61 = vpack.c.bf16 %v12232_v14, %v12229_v60  ;;  %v14126_v14 = vld [vmem:[#allocation93_spill] sm:$0xff]  ;;  %v14127_v60 = vld [vmem:[#allocation91_spill] sm:$0xff] }
 0x4c6   :  { %v12236_v24 = vpop.eup %9899 }
 0x4c7   :  { %14104 = vst [vmem:[#allocation144_spill] sm:$0xff] %v12236_v24  ;;  %8664 = vmatprep.mubr.bf16.mxu1 %v4972_v61  ;;  %v14114_v61 = vld [vmem:[#allocation51_spill] sm:$0xff] }
 0x4c8   :  { %v12238_v27 = vpop.eup %9901 }
 0x4c9   :  { %14105 = vst [vmem:[#allocation145_spill] sm:$0xff] %v12238_v27  ;;  %v4973_v11 = vpack.c.bf16 %v12238_v27, %v12236_v24  ;;  %v14123_v27 = vld [vmem:[#allocation89_spill] sm:$0xff] }
 0x4ca   :  { %8673 = vmatpush3.bf16.xpose.msra.mxu1 %v14102_v42  ;;  %v14113_v42 = vld [vmem:[#allocation101_spill] sm:$0xff] }
 0x4cb   :  { %8674 = vmatprep.subr.bf16.mxu1 %v14106_v2 }
 0x4cc   :  { %8665 = vmatmul.mubr.bf16.gmra.mrb[252].mxu1 %v4973_v11  ;;  %v14115_v11 = vld [vmem:[#allocation81_spill] sm:$0xff] }
 0x4cd   :  { %8684 = vmatprep.mubr.bf16.mxu1 %v14109_v12  ;;  %v14119_v12 = vld [vmem:[#allocation83_spill] sm:$0xff] }
 0x4d2   :  { %8675 = vmatpush3.bf16.xpose.msra.mxu1 %v14106_v2  ;;  %v14116_v2 = vld [vmem:[#allocation79_spill] sm:$0xff] }
 0x4d3   :  { %8676 = vmatprep.subr.bf16.mxu1 %v14110_v56  ;;  %v14117_v23 = vpack.c.bf16 %v14115_v11, %v14116_v2  ;;  %v14128_v11 = vpack.c.bf16 %v14126_v14, %v14127_v60  ;;  %v14129_v2 = vld [vmem:[#allocation64_spill] sm:$0xff]  ;;  %v14137_v60 = vld [vmem:[#allocation69_spill] sm:$0xff]  ;;  %v14138_v14 = vld [vmem:[#allocation67_spill] sm:$0xff] }
 0x4da   :  { %8677 = vmatpush3.bf16.xpose.msra.mxu1 %v14110_v56  ;;  %v14120_v56 = vpack.c.bf16 %v14118_v45, %v14119_v12  ;;  %v14132_v45 = vld [vmem:[#allocation95_spill] sm:$0xff] }
 0x4db   :  { %8678 = vmatprep.subr.bf16.mxu1 %v14111_v34 }
 0x4e2   :  { %8679 = vmatpush3.bf16.xpose.msra.mxu1 %v14111_v34  ;;  %v14121_v34 = vld [vmem:[#allocation59_spill] sm:$0xff] }
 0x4e3   :  { %8680 = vmatprep.subr.bf16.mxu1 %v14112_v52 }
 0x4ea   :  { %8681 = vmatpush3.bf16.xpose.msra.mxu1 %v14112_v52  ;;  %v14122_v52 = vld [vmem:[#allocation57_spill] sm:$0xff] }
 0x4eb   :  { %8682 = vmatprep.subr.bf16.mxu1 %v14113_v42 }
 0x4f2   :  { %8683 = vmatpush3.bf16.xpose.msra.mxu1 %v14113_v42  ;;  %v14124_v42 = vld [vmem:[#allocation87_spill] sm:$0xff] }
 0x4f3   :  { %8764 = vmatprep.subr.bf16.mxu1 %v14114_v61  ;;  %v14125_v24 = vpack.c.bf16 %v14123_v27, %v14124_v42 }
 0x4f9   :  { %8685 = vmatmul.mubr.bf16.vlgmr.msra.gmra.mrb[0].mxu1 %v14117_v23  ;;  %v14131_v23 = vld [vmem:[#allocation96_spill] sm:$0xff] }
 0x4fa   :  { %8688 = vmatprep.mubr.bf16.mxu1 %v14120_v56  ;;  %8765 = vmatpush3.bf16.msra.mxu1 %v14114_v61  ;;  %v14130_v61 = vld [vmem:[#allocation62_spill] sm:$0xff]  ;;  %v14133_v12 = vpack.c.bf16 %v14131_v23, %v14132_v45 }
 0x4fb   :  { %8766 = vmatprep.subr.bf16.mxu1 %v14121_v34  ;;  %v14134_v56 = vld [vmem:[#allocation98_spill] sm:$0xff] }
 0x4fe   :  { %8767 = vmatpush3.bf16.msra.mxu1 %v14121_v34  ;;  %v14135_v34 = vld [vmem:[#allocation14_spill] sm:$0xff] }
 0x4ff   :  { %8768 = vmatprep.subr.bf16.mxu1 %v14122_v52  ;;  %v14136_v27 = vpack.c.bf16 %v14134_v56, %v14135_v34 }
 0x501   :  { %8689 = vmatmul.mubr.bf16.gmra.mrb[4].mxu1 %v14125_v24  ;;  %v14139_v24 = vld [vmem:[#allocation17_spill] sm:$0xff] }
 0x502   :  { %8692 = vmatprep.mubr.bf16.mxu1 %v14128_v11  ;;  %8769 = vmatpush3.bf16.msra.mxu1 %v14122_v52  ;;  %v14140_v52 = vld [vmem:[#allocation15_spill] sm:$0xff]  ;;  %v14142_v11 = vld [vmem:[#allocation73_spill] sm:$0xff] }
 0x503   :  { %8770 = vmatprep.subr.bf16.mxu1 %v14129_v2  ;;  %v14141_v42 = vpack.c.bf16 %v14139_v24, %v14140_v52 }
 0x506   :  { %8771 = vmatpush3.bf16.msra.mxu1 %v14129_v2  ;;  %v14143_v2 = vld [vmem:[#allocation35_spill] sm:$0xff] }
 0x507   :  { %8772 = vmatprep.subr.bf16.mxu1 %v14130_v61 }
 0x509   :  { %8693 = vmatmul.mubr.bf16.gmra.mrb[8].mxu1 %v14133_v12 }
 0x50a   :  { %8696 = vmatprep.mubr.bf16.mxu1 %v14136_v27  ;;  %8773 = vmatpush3.bf16.msra.mxu1 %v14130_v61 }
 0x50b   :  { %8774 = vmatprep.subr.bf16.mxu1 %v14137_v60 }
 0x50e   :  { %8775 = vmatpush3.bf16.msra.mxu1 %v14137_v60 }
 0x50f   :  { %8776 = vmatprep.subr.bf16.mxu1 %v14138_v14 }
 0x511   :  { %8697 = vmatmul.mubr.bf16.gmra.mrb[12].mxu1 %v14141_v42 }
 0x512   :  { %8777 = vmatpush3.bf16.msra.mxu1 %v14138_v14 }
 0x513   :  { %8778 = vmatprep.subr.bf16.mxu1 %v14142_v11 }
 0x516   :  { %8779 = vmatpush3.bf16.msra.mxu1 %v14142_v11 }
 0x517   :  { %8796 = vmatprep.subr.bf16.mxu1 %v14143_v2 }
 0x545   :  { %v12294_v23 = vpop.f32.mrb[208].mxu1 }
 0x546   :  { %14144 = vst [vmem:[#allocation22_spill] sm:$0xff] %v12294_v23  ;;  %v12296_v61 = vpop.f32.mrb[209].mxu1 }
 0x547   :  { %14145 = vst [vmem:[#allocation77_spill] sm:$0xff] %v12296_v61  ;;  %v12298_v45 = vpop.f32.mrb[210].mxu1 }
 0x548   :  { %14146 = vst [vmem:[#allocation75_spill] sm:$0xff] %v12298_v45  ;;  %v12300_v12 = vpop.f32.mrb[211].mxu1 }
 0x549   :  { %14147 = vst [vmem:[#allocation23_spill] sm:$0xff] %v12300_v12 }
 0x54f   :  { %v12302_v56 = vpop.f32.mrb[212].mxu1 }
 0x550   :  { %14148 = vst [vmem:[#allocation66_spill] sm:$0xff] %v12302_v56  ;;  %v12304_v34 = vpop.f32.mrb[213].mxu1 }
 0x551   :  { %14149 = vst [vmem:[#allocation27_spill] sm:$0xff] %v12304_v34  ;;  %v12306_v27 = vpop.f32.mrb[214].mxu1 }
 0x552   :  { %14150 = vst [vmem:[#allocation101_spill] sm:$0xff] %v12306_v27  ;;  %v12308_v60 = vpop.f32.mrb[215].mxu1 }
 0x553   :  { %14151 = vst [vmem:[#allocation51_spill] sm:$0xff] %v12308_v60 }
 0x557   :  { %v12310_v14 = vpop.f32.mrb[216].mxu1 }
 0x558   :  { %14152 = vst [vmem:[#allocation81_spill] sm:$0xff] %v12310_v14  ;;  %v12312_v24 = vpop.f32.mrb[217].mxu1 }
 0x559   :  { %14153 = vst [vmem:[#allocation79_spill] sm:$0xff] %v12312_v24  ;;  %v12314_v52 = vpop.f32.mrb[218].mxu1 }
 0x55a   :  { %14154 = vst [vmem:[#allocation85_spill] sm:$0xff] %v12314_v52  ;;  %v12316_v42 = vpop.f32.mrb[219].mxu1 }
 0x55b   :  { %14155 = vst [vmem:[#allocation83_spill] sm:$0xff] %v12316_v42 }
 0x55f   :  { %v12318_v11 = vpop.f32.mrb[220].mxu1 }
 0x560   :  { %14156 = vst [vmem:[#allocation59_spill] sm:$0xff] %v12318_v11  ;;  %v12320_v45 = vpop.f32.mrb[221].mxu1 }
 0x561   :  { %14157 = vst [vmem:[#allocation57_spill] sm:$0xff] %v12320_v45  ;;  %v12322_v23 = vpop.f32.mrb[222].mxu1 }
 0x562   :  { %14158 = vst [vmem:[#allocation89_spill] sm:$0xff] %v12322_v23  ;;  %v12324_v56 = vpop.f32.mrb[223].mxu1 }
 0x563   :  { %14159 = vst [vmem:[#allocation87_spill] sm:$0xff] %v12324_v56 }
 0x567   :  { %v12326_v34 = vpop.f32.mrb[224].mxu1 }
 0x568   :  { %14160 = vst [vmem:[#allocation93_spill] sm:$0xff] %v12326_v34  ;;  %v12328_v27 = vpop.f32.mrb[225].mxu1 }
 0x569   :  { %14161 = vst [vmem:[#allocation91_spill] sm:$0xff] %v12328_v27  ;;  %v12330_v60 = vpop.f32.mrb[226].mxu1 }
 0x56a   :  { %14162 = vst [vmem:[#allocation64_spill] sm:$0xff] %v12330_v60  ;;  %v12332_v14 = vpop.f32.mrb[227].mxu1 }
 0x56b   :  { %14163 = vst [vmem:[#allocation62_spill] sm:$0xff] %v12332_v14 }
 0x56f   :  { %v12334_v24 = vpop.f32.mrb[228].mxu1 }
 0x570   :  { %14164 = vst [vmem:[#allocation96_spill] sm:$0xff] %v12334_v24  ;;  %v12336_v52 = vpop.f32.mrb[229].mxu1 }
 0x571   :  { %14165 = vst [vmem:[#allocation95_spill] sm:$0xff] %v12336_v52  ;;  %v12338_v42 = vpop.f32.mrb[230].mxu1 }
 0x572   :  { %14166 = vst [vmem:[#allocation98_spill] sm:$0xff] %v12338_v42  ;;  %v12340_v11 = vpop.f32.mrb[231].mxu1 }
 0x573   :  { %14167 = vst [vmem:[#allocation14_spill] sm:$0xff] %v12340_v11 }
 0x577   :  { %v12342_v45 = vpop.f32.mrb[232].mxu1 }
 0x578   :  { %14168 = vst [vmem:[#allocation69_spill] sm:$0xff] %v12342_v45  ;;  %v12344_v23 = vpop.f32.mrb[233].mxu1 }
 0x579   :  { %14169 = vst [vmem:[#allocation67_spill] sm:$0xff] %v12344_v23  ;;  %v12346_v56 = vpop.f32.mrb[234].mxu1 }
 0x57a   :  { %14170 = vst [vmem:[#allocation17_spill] sm:$0xff] %v12346_v56  ;;  %v12348_v34 = vpop.f32.mrb[235].mxu1 }
 0x57b   :  { %14171 = vst [vmem:[#allocation15_spill] sm:$0xff] %v12348_v34 }
 0x57f   :  { %v12350_v12 = vpop.f32.mrb[236].mxu1 }
 0x580   :  { %14172 = vst [vmem:[#allocation73_spill] sm:$0xff] %v12350_v12  ;;  %v12352_v60 = vpop.f32.mrb[237].mxu1 }
 0x581   :  { %14173 = vst [vmem:[#allocation35_spill] sm:$0xff] %v12352_v60  ;;  %v12354_v61 = vpop.f32.mrb[238].mxu1 }
 0x582   :  { %14174 = vst [vmem:[#allocation146_spill] sm:$0xff] %v12354_v61  ;;  %v12356_v24 = vpop.f32.mrb[239].mxu1 }
 0x583   :  { %14175 = vst [vmem:[#allocation147_spill] sm:$0xff] %v12356_v24 }
 0x587   :  { %v12358_v52 = vpop.f32.mrb[240].mxu1 }
 0x588   :  { %14176 = vst [vmem:[#allocation148_spill] sm:$0xff] %v12358_v52  ;;  %v12360_v42 = vpop.f32.mrb[241].mxu1 }
 0x589   :  { %14177 = vst [vmem:[#allocation149_spill] sm:$0xff] %v12360_v42  ;;  %v12362_v11 = vpop.f32.mrb[242].mxu1 }
 0x58a   :  { %14178 = vst [vmem:[#allocation150_spill] sm:$0xff] %v12362_v11  ;;  %v12364_v45 = vpop.f32.mrb[243].mxu1 }
 0x58b   :  { %14179 = vst [vmem:[#allocation151_spill] sm:$0xff] %v12364_v45 }
 0x58f   :  { %v12366_v23 = vpop.f32.mrb[244].mxu1 }
 0x590   :  { %14180 = vst [vmem:[#allocation152_spill] sm:$0xff] %v12366_v23  ;;  %v12368_v56 = vpop.f32.mrb[245].mxu1 }
 0x591   :  { %14181 = vst [vmem:[#allocation153_spill] sm:$0xff] %v12368_v56  ;;  %v12370_v34 = vpop.f32.mrb[246].mxu1 }
 0x592   :  { %14182 = vst [vmem:[#allocation154_spill] sm:$0xff] %v12370_v34  ;;  %v12372_v12 = vpop.f32.mrb[247].mxu1 }
 0x593   :  { %14183 = vst [vmem:[#allocation155_spill] sm:$0xff] %v12372_v12 }
 0x597   :  { %v12374_v60 = vpop.f32.mrb[248].mxu1 }
 0x598   :  { %14184 = vst [vmem:[#allocation156_spill] sm:$0xff] %v12374_v60  ;;  %v12376_v61 = vpop.f32.mrb[249].mxu1 }
 0x599   :  { %14185 = vst [vmem:[#allocation157_spill] sm:$0xff] %v12376_v61  ;;  %v12378_v24 = vpop.f32.mrb[250].mxu1 }
 0x59a   :  { %14186 = vst [vmem:[#allocation158_spill] sm:$0xff] %v12378_v24  ;;  %v12380_v52 = vpop.f32.mrb[251].mxu1 }
 0x59b   :  { %14187 = vst [vmem:[#allocation159_spill] sm:$0xff] %v12380_v52 }
 0x59f   :  { %v12382_v42 = vpop.f32.mrb[252].mxu1 }
 0x5a0   :  { %14188 = vst [vmem:[#allocation160_spill] sm:$0xff] %v12382_v42  ;;  %v12384_v11 = vpop.f32.mrb[253].mxu1 }
 0x5a1   :  { %14189 = vst [vmem:[#allocation161_spill] sm:$0xff] %v12384_v11  ;;  %v12386_v45 = vpop.f32.mrb[254].mxu1 }
 0x5a2   :  { %14190 = vst [vmem:[#allocation162_spill] sm:$0xff] %v12386_v45  ;;  %v12388_v23 = vpop.f32.mrb[255].mxu1 }
 0x5a3   :  { %14191 = vst [vmem:[#allocation163_spill] sm:$0xff] %v12388_v23 }
 0x5cc   :  { %v8686_v56 = vpop.f32.mrb[0].mxu1 }
 0x5cd   :  { %v5177_v34 = vpop.f32.mrb[1].mxu1  ;;  %v5242_v42 = vsel %vm11661_vm0, %v8686_v56, -inf }
 0x5ce   :  { %v8687_v14 = vpop.f32.mrb[2].mxu1  ;;  %v5240_v60 = vsel %vm11672_vm1, %v5177_v34, -inf }
 0x5cf   :  { %5256 = vmax.xlane.f32.xlu0 %v5240_v60  ;;  %v5180_v61 = vpop.f32.mrb[3].mxu1  ;;  %v5243_v45 = vsel %vm11684_vm2, %v8687_v14, -inf }
 0x5d0   :  { %v5241_v24 = vsel %vm11693_vm3, %v5180_v61, -inf }
 0x5d1   :  { %5258 = vmax.xlane.f32.xlu1 %v5241_v24 }
 0x5d3   :  { %5260 = vmax.xlane.f32.xlu0 %v5242_v42 }
 0x5d4   :  { %v8690_v11 = vpop.f32.mrb[4].mxu1 }
 0x5d5   :  { %5262 = vmax.xlane.f32.xlu1 %v5243_v45  ;;  %v5193_v23 = vpop.f32.mrb[5].mxu1  ;;  %v5246_v56 = vsel %vm11728_vm6, %v8690_v11, -inf }
 0x5d6   :  { %v8691_v52 = vpop.f32.mrb[6].mxu1  ;;  %v5244_v34 = vsel %vm11706_vm4, %v5193_v23, -inf }
 0x5d7   :  { %5264 = vmax.xlane.f32.xlu0 %v5244_v34  ;;  %v5196_v12 = vpop.f32.mrb[7].mxu1  ;;  %v5247_v14 = vsel %vm11739_vm7, %v8691_v52, -inf  ;;  %v9720_v52 = vld [vmem:[#allocation9 + $0x1c8] ss:$12 sps:$4 sm:$0xff]  }
 0x5d8   :  { %v5245_v61 = vsel %vm11717_vm5, %v5196_v12, -inf }
 0x5d9   :  { %5266 = vmax.xlane.f32.xlu1 %v5245_v61 }
 0x5db   :  { %5268 = vmax.xlane.f32.xlu0 %v5246_v56 }
 0x5dc   :  { %v8694_v16 = vpop.f32.mrb[8].mxu1 }
 0x5dd   :  { %5270 = vmax.xlane.f32.xlu1 %v5247_v14  ;;  %v5209_v51 = vpop.f32.mrb[9].mxu1  ;;  %v12412_v11 = vsel %vm11772_vm10, %v8694_v16, -inf  ;;  %v9725_v16 = vld [vmem:[#allocation9 + $0x1e4] ss:$12 sps:$4 sm:$0xff]  }
 0x5de   :  { %v8695_v35 = vpop.f32.mrb[10].mxu1  ;;  %v5248_v23 = vsel %vm11750_vm8, %v5209_v51, -inf }
 0x5df   :  { %5272 = vmax.xlane.f32.xlu0 %v5248_v23  ;;  %v5212_v7 = vpop.f32.mrb[11].mxu1  ;;  %v12417_v20 = vsel %vm11783_vm11, %v8695_v35, -inf }
 0x5e0   :  { %v5249_v12 = vsel %vm11761_vm9, %v5212_v7, -inf }
 0x5e1   :  { %5274 = vmax.xlane.f32.xlu1 %v5249_v12 }
 0x5e3   :  { %5276 = vmax.xlane.f32.xlu0 %v12412_v11 }
 0x5e4   :  { %v8698_v58 = vpop.f32.mrb[12].mxu1 }
 0x5e5   :  { %5278 = vmax.xlane.f32.xlu1 %v12417_v20  ;;  %v5225_v51 = vpop.f32.mrb[13].mxu1  ;;  %v12432_v35 = vsel %vm11818_vm14, %v8698_v58, -inf }
 0x5e6   :  { %v8699_v28 = vpop.f32.mrb[14].mxu1  ;;  %v12422_v21 = vsel %vm11794_vm12, %v5225_v51, -inf }
 0x5e7   :  { %5280 = vmax.xlane.f32.xlu0 %v12422_v21  ;;  %v5228_v7 = vpop.f32.mrb[15].mxu1  ;;  %v12437_v44 = vsel %vm11828_vm15, %v8699_v28, -inf }
 0x5e8   :  { %v12427_v6 = vsel %vm11807_vm13, %v5228_v7, -inf }
 0x5e9   :  { %5282 = vmax.xlane.f32.xlu1 %v12427_v6 }
 0x5eb   :  { %5284 = vmax.xlane.f32.xlu0 %v12432_v35 }
 0x5ed   :  { %5286 = vmax.xlane.f32.xlu1 %v12437_v44 }
 0x65c   :  { %v5257_v51 = vpop.xlane.xlu0 %5256 }
 0x65d   :  { %v5288_v43 = vsub.f32 %v5240_v60, %v5257_v51 }
 0x65e   :  { %v5259_v31 = vpop.xlane.xlu1 %5258 }
 0x65f   :  { %v5304_v32 = vmul.f32 1.442695, %v5288_v43  ;;  %v5289_v7 = vsub.f32 %v5241_v24, %v5259_v31 }
 0x660   :  { %v5261_v15 = vpop.xlane.xlu0 %5260 }
 0x661   :  { %v5306_v8 = vmul.f32 1.442695, %v5289_v7  ;;  %v5290_v30 = vsub.f32 %v5242_v42, %v5261_v15  ;;  %9903 = vpow2.f32 %v5304_v32 }
 0x662   :  { %v5263_v19 = vpop.xlane.xlu1 %5262 }
 0x663   :  { %9905 = vpow2.f32 %v5306_v8  ;;  %v5308_v58 = vmul.f32 1.442695, %v5290_v30  ;;  %v5291_v9 = vsub.f32 %v5243_v45, %v5263_v19 }
 0x664   :  { %v5265_v22 = vpop.xlane.xlu0 %5264 }
 0x665   :  { %v5310_v62 = vmul.f32 1.442695, %v5291_v9  ;;  %v5292_v55 = vsub.f32 %v5244_v34, %v5265_v22  ;;  %9907 = vpow2.f32 %v5308_v58 }
 0x666   :  { %v5267_v28 = vpop.xlane.xlu1 %5266 }
 0x667   :  { %9909 = vpow2.f32 %v5310_v62  ;;  %v5312_v29 = vmul.f32 1.442695, %v5292_v55  ;;  %v5293_v18 = vsub.f32 %v5245_v61, %v5267_v28 }
 0x668   :  { %v5269_v60 = vpop.xlane.xlu0 %5268 }
 0x669   :  { %v5314_v51 = vmul.f32 1.442695, %v5293_v18  ;;  %v5294_v43 = vsub.f32 %v5246_v56, %v5269_v60  ;;  %9911 = vpow2.f32 %v5312_v29 }
 0x66a   :  { %v5271_v31 = vpop.xlane.xlu1 %5270 }
 0x66b   :  { %9913 = vpow2.f32 %v5314_v51  ;;  %v5316_v15 = vmul.f32 1.442695, %v5294_v43  ;;  %v5295_v32 = vsub.f32 %v5247_v14, %v5271_v31  ;;  %v12440_v24 = vpop.eup %9903  ;;  %v14208_v51 = vld [vmem:[#allocation37_spill] sm:$0xff]  ;;  %v14209_v43 = vld [vmem:[#allocation42_spill] sm:$0xff] }
 0x66c   :  { %14202 = vst [vmem:[#allocation117_spill] sm:$0xff] %v12440_v24  ;;  %v5273_v8 = vpop.xlane.xlu0 %5272 }
 0x66d   :  { %v12442_v19 = vpop.eup %9905  ;;  %v5318_v9 = vmul.f32 1.442695, %v5295_v32  ;;  %v5296_v22 = vsub.f32 %v5248_v23, %v5273_v8  ;;  %9915 = vpow2.f32 %v5316_v15 }
 0x66e   :  { %14203 = vst [vmem:[#allocation118_spill] sm:$0xff] %v12442_v19  ;;  %v5275_v30 = vpop.xlane.xlu1 %5274  ;;  %v5368_v55 = vpack.c.bf16 %v12442_v19, %v12440_v24 }
 0x66f   :  { %9917 = vpow2.f32 %v5318_v9  ;;  %v5320_v18 = vmul.f32 1.442695, %v5296_v22  ;;  %v5297_v62 = vsub.f32 %v5249_v12, %v5275_v30  ;;  %v12446_v29 = vpop.eup %9907 }
 0x670   :  { %14204 = vst [vmem:[#allocation119_spill] sm:$0xff] %v12446_v29  ;;  %8716 = vmatprep.mubr.bf16.mxu0 %v5368_v55  ;;  %v5277_v45 = vpop.xlane.xlu0 %5276 }
 0x671   :  { %v12448_v42 = vpop.eup %9909  ;;  %v5322_v34 = vmul.f32 1.442695, %v5297_v62  ;;  %v5298_v61 = vsub.f32 %v12412_v11, %v5277_v45  ;;  %9919 = vpow2.f32 %v5320_v18 }
 0x672   :  { %14205 = vst [vmem:[#allocation120_spill] sm:$0xff] %v12448_v42  ;;  %v5279_v56 = vpop.xlane.xlu1 %5278  ;;  %v5369_v14 = vpack.c.bf16 %v12448_v42, %v12446_v29 }
 0x673   :  { %9921 = vpow2.f32 %v5322_v34  ;;  %v5324_v23 = vmul.f32 1.442695, %v5298_v61  ;;  %v5299_v7 = vsub.f32 %v12417_v20, %v5279_v56  ;;  %v12454_v58 = vpop.eup %9911  ;;  %v14214_v56 = vld [vmem:[#allocation48_spill] sm:$0xff] }
 0x674   :  { %14206 = vst [vmem:[#allocation121_spill] sm:$0xff] %v12454_v58  ;;  %8717 = vmatmul.mubr.bf16.vlgmr.msra.gmra.mrb[224].mxu0 %v5369_v14  ;;  %v5281_v12 = vpop.xlane.xlu0 %5280 }
 0x675   :  { %v12456_v28 = vpop.eup %9913  ;;  %v5326_v60 = vmul.f32 1.442695, %v5299_v7  ;;  %8733 = vmatpush3.bf16.xpose.msra.mxu0 %v14208_v51  ;;  %v5300_v11 = vsub.f32 %v12422_v21, %v5281_v12  ;;  %9923 = vpow2.f32 %v5324_v23 }
 0x676   :  { %14207 = vst [vmem:[#allocation122_spill] sm:$0xff] %v12456_v28  ;;  %8734 = vmatprep.subr.bf16.mxu0 %v14209_v43  ;;  %v5283_v31 = vpop.xlane.xlu1 %5282  ;;  %v5370_v15 = vpack.c.bf16 %v12456_v28, %v12454_v58 }
 0x677   :  { %9925 = vpow2.f32 %v5326_v60  ;;  %v5328_v20 = vmul.f32 1.442695, %v5300_v11  ;;  %v5301_v32 = vsub.f32 %v12427_v6, %v5283_v31  ;;  %v12464_v8 = vpop.eup %9915  ;;  %v14219_v60 = vld [vmem:[#allocation54_spill] sm:$0xff] }
 0x678   :  { %14210 = vst [vmem:[#allocation123_spill] sm:$0xff] %v12464_v8  ;;  %8720 = vmatprep.mubr.bf16.mxu0 %v5370_v15  ;;  %v5285_v9 = vpop.xlane.xlu0 %5284  ;;  %v14222_v15 = vld [vmem:[#allocation78_spill] sm:$0xff] }
 0x679   :  { %v12466_v22 = vpop.eup %9917  ;;  %v5330_v30 = vmul.f32 1.442695, %v5301_v32  ;;  %v5302_v21 = vsub.f32 %v12432_v35, %v5285_v9  ;;  %9927 = vpow2.f32 %v5328_v20  ;;  %v14223_v20 = vld [vmem:[#allocation76_spill] sm:$0xff] }
 0x67a   :  { %14211 = vst [vmem:[#allocation124_spill] sm:$0xff] %v12466_v22  ;;  %v5287_v55 = vpop.xlane.xlu1 %5286  ;;  %v5371_v18 = vpack.c.bf16 %v12466_v22, %v12464_v8  ;;  %v14224_v32 = vpack.c.bf16 %v14222_v15, %v14223_v20  ;;  %v14225_v9 = vld [vmem:[#allocation60_spill] sm:$0xff] }
 0x67b   :  { %9929 = vpow2.f32 %v5330_v30  ;;  %v5332_v62 = vmul.f32 1.442695, %v5302_v21  ;;  %v5303_v45 = vsub.f32 %v12437_v44, %v5287_v55  ;;  %v12472_v34 = vpop.eup %9919  ;;  %v14226_v30 = vld [vmem:[#allocation65_spill] sm:$0xff]  ;;  %v14227_v21 = vld [vmem:[#allocation70_spill] sm:$0xff]  ;;  %v14239_v15 = vld [vmem:[#allocation88_spill] sm:$0xff] }
 0x67c   :  { %14212 = vst [vmem:[#allocation125_spill] sm:$0xff] %v12472_v34  ;;  %8721 = vmatmul.mubr.bf16.gmra.mrb[228].mxu0 %v5371_v18  ;;  %v14228_v55 = vld [vmem:[#allocation74_spill] sm:$0xff] }
 0x67d   :  { %v12474_v6 = vpop.eup %9921  ;;  %v5334_v61 = vmul.f32 1.442695, %v5303_v45  ;;  %8735 = vmatpush3.bf16.xpose.msra.mxu0 %v14209_v43  ;;  %9931 = vpow2.f32 %v5332_v62  ;;  %v14229_v18 = vld [vmem:[#allocation110_spill] sm:$0xff]  ;;  %v14231_v45 = vld [vmem:[#allocation80_spill] sm:$0xff] }
 0x67e   :  { %14213 = vst [vmem:[#allocation126_spill] sm:$0xff] %v12474_v6  ;;  %8736 = vmatprep.subr.bf16.mxu0 %v14214_v56  ;;  %v5372_v35 = vpack.c.bf16 %v12474_v6, %v12472_v34  ;;  %v14230_v62 = vld [vmem:[#allocation82_spill] sm:$0xff] }
 0x67f   :  { %9933 = vpow2.f32 %v5334_v61  ;;  %v12480_v14 = vpop.eup %9923  ;;  %v14232_v61 = vpack.c.bf16 %v14230_v62, %v14231_v45  ;;  %v14247_v62 = vld [vmem:[#allocation29_spill] sm:$0xff] }
 0x680   :  { %14215 = vst [vmem:[#allocation37_spill] sm:$0xff] %v12480_v14  ;;  %8724 = vmatprep.mubr.bf16.mxu0 %v5372_v35  ;;  %v14234_v35 = vld [vmem:[#allocation84_spill] sm:$0xff] }
 0x681   :  { %v12482_v23 = vpop.eup %9925 }
 0x682   :  { %14216 = vst [vmem:[#allocation42_spill] sm:$0xff] %v12482_v23  ;;  %v5373_v44 = vpack.c.bf16 %v12482_v23, %v12480_v14 }
 0x683   :  { %v12486_v7 = vpop.eup %9927 }
 0x684   :  { %14217 = vst [vmem:[#allocation48_spill] sm:$0xff] %v12486_v7  ;;  %8725 = vmatmul.mubr.bf16.gmra.mrb[232].mxu0 %v5373_v44 }
 0x685   :  { %v12488_v12 = vpop.eup %9929  ;;  %8737 = vmatpush3.bf16.xpose.msra.mxu0 %v14214_v56  ;;  %v14233_v56 = vld [vmem:[#allocation86_spill] sm:$0xff] }
 0x686   :  { %14218 = vst [vmem:[#allocation164_spill] sm:$0xff] %v12488_v12  ;;  %8738 = vmatprep.subr.bf16.mxu0 %v14219_v60  ;;  %v5374_v51 = vpack.c.bf16 %v12488_v12, %v12486_v7  ;;  %v14235_v44 = vpack.c.bf16 %v14233_v56, %v14234_v35  ;;  %v14250_v56 = vld [vmem:[#allocation30_spill] sm:$0xff] }
 0x687   :  { %v12494_v11 = vpop.eup %9931 }
 0x688   :  { %14220 = vst [vmem:[#allocation54_spill] sm:$0xff] %v12494_v11  ;;  %8728 = vmatprep.mubr.bf16.mxu0 %v5374_v51  ;;  %v14237_v51 = vld [vmem:[#allocation112_spill] sm:$0xff] }
 0x689   :  { %v12496_v43 = vpop.eup %9933 }
 0x68a   :  { %14221 = vst [vmem:[#allocation165_spill] sm:$0xff] %v12496_v43  ;;  %v5375_v31 = vpack.c.bf16 %v12496_v43, %v12494_v11 }
 0x68c   :  { %8729 = vmatmul.mubr.bf16.gmra.mrb[236].mxu0 %v5375_v31  ;;  %v14238_v31 = vld [vmem:[#allocation90_spill] sm:$0xff] }
 0x68d   :  { %8739 = vmatpush3.bf16.xpose.msra.mxu0 %v14219_v60  ;;  %8748 = vmatprep.mubr.bf16.mxu0 %v14224_v32  ;;  %v14236_v60 = vld [vmem:[#allocation109_spill] sm:$0xff]  ;;  %v14240_v20 = vpack.c.bf16 %v14238_v31, %v14239_v15  ;;  %v14241_v32 = vld [vmem:[#allocation94_spill] sm:$0xff]  ;;  %v14255_v31 = vld [vmem:[#allocation16_spill] sm:$0xff] }
 0x68e   :  { %8740 = vmatprep.subr.bf16.mxu0 %v14225_v9 }
 0x695   :  { %8741 = vmatpush3.bf16.xpose.msra.mxu0 %v14225_v9  ;;  %v14242_v9 = vld [vmem:[#allocation92_spill] sm:$0xff] }
 0x696   :  { %8742 = vmatprep.subr.bf16.mxu0 %v14226_v30 }
 0x69d   :  { %8743 = vmatpush3.bf16.xpose.msra.mxu0 %v14226_v30  ;;  %v14243_v30 = vpack.c.bf16 %v14241_v32, %v14242_v9 }
 0x69e   :  { %8744 = vmatprep.subr.bf16.mxu0 %v14227_v21 }
 0x6a5   :  { %8745 = vmatpush3.bf16.xpose.msra.mxu0 %v14227_v21  ;;  %v14244_v21 = vld [vmem:[#allocation111_spill] sm:$0xff] }
 0x6a6   :  { %8746 = vmatprep.subr.bf16.mxu0 %v14228_v55 }
 0x6ad   :  { %8747 = vmatpush3.bf16.xpose.msra.mxu0 %v14228_v55  ;;  %v14245_v55 = vld [vmem:[#allocation114_spill] sm:$0xff] }
 0x6ae   :  { %8828 = vmatprep.subr.bf16.mxu0 %v14229_v18 }
 0x6b4   :  { %8749 = vmatmul.mubr.bf16.vlgmr.msra.gmra.mrb[240].mxu0 %v14232_v61  ;;  %v14249_v61 = vld [vmem:[#allocation99_spill] sm:$0xff] }
 0x6b5   :  { %8752 = vmatprep.mubr.bf16.mxu0 %v14235_v44  ;;  %8829 = vmatpush3.bf16.msra.mxu0 %v14229_v18  ;;  %v14246_v18 = vld [vmem:[#allocation97_spill] sm:$0xff]  ;;  %v14251_v35 = vpack.c.bf16 %v14249_v61, %v14250_v56 }
 0x6b6   :  { %8830 = vmatprep.subr.bf16.mxu0 %v14236_v60  ;;  %v14248_v45 = vpack.c.bf16 %v14246_v18, %v14247_v62  ;;  %v14252_v44 = vld [vmem:[#allocation113_spill] sm:$0xff] }
 0x6b9   :  { %8831 = vmatpush3.bf16.msra.mxu0 %v14236_v60  ;;  %v14253_v60 = vld [vmem:[#allocation116_spill] sm:$0xff] }
 0x6ba   :  { %8832 = vmatprep.subr.bf16.mxu0 %v14237_v51 }
 0x6bc   :  { %8753 = vmatmul.mubr.bf16.gmra.mrb[244].mxu0 %v14240_v20  ;;  %v14257_v20 = vld [vmem:[#allocation115_spill] sm:$0xff] }
 0x6bd   :  { %8756 = vmatprep.mubr.bf16.mxu0 %v14243_v30  ;;  %8833 = vmatpush3.bf16.msra.mxu0 %v14237_v51  ;;  %v14254_v51 = vld [vmem:[#allocation31_spill] sm:$0xff] }
 0x6be   :  { %8834 = vmatprep.subr.bf16.mxu0 %v14244_v21  ;;  %v14256_v15 = vpack.c.bf16 %v14254_v51, %v14255_v31 }
 0x6c1   :  { %8835 = vmatpush3.bf16.msra.mxu0 %v14244_v21 }
 0x6c2   :  { %8836 = vmatprep.subr.bf16.mxu0 %v14245_v55 }
 0x6c4   :  { %8757 = vmatmul.mubr.bf16.gmra.mrb[248].mxu0 %v14248_v45 }
 0x6c5   :  { %8760 = vmatprep.mubr.bf16.mxu0 %v14251_v35  ;;  %8837 = vmatpush3.bf16.msra.mxu0 %v14245_v55 }
 0x6c6   :  { %8838 = vmatprep.subr.bf16.mxu0 %v14252_v44 }
 0x6c9   :  { %8839 = vmatpush3.bf16.msra.mxu0 %v14252_v44 }
 0x6ca   :  { %8840 = vmatprep.subr.bf16.mxu0 %v14253_v60 }
 0x6cc   :  { %8761 = vmatmul.mubr.bf16.gmra.mrb[252].mxu0 %v14256_v15 }
 0x6cd   :  { %8841 = vmatpush3.bf16.msra.mxu0 %v14253_v60 }
 0x6ce   :  { %8842 = vmatprep.subr.bf16.mxu0 %v14257_v20 }
 0x6d1   :  { %8843 = vmatpush3.bf16.msra.mxu0 %v14257_v20 }
 0x747   :  { %v12549_v32 = vpop.f32.mrb[224].mxu0 }
 0x748   :  { %14258 = vst [vmem:[#allocation78_spill] sm:$0xff] %v12549_v32  ;;  %v12551_v9 = vpop.f32.mrb[225].mxu0 }
 0x749   :  { %14259 = vst [vmem:[#allocation76_spill] sm:$0xff] %v12551_v9  ;;  %v12553_v30 = vpop.f32.mrb[226].mxu0 }
 0x74a   :  { %14260 = vst [vmem:[#allocation60_spill] sm:$0xff] %v12553_v30  ;;  %v12555_v21 = vpop.f32.mrb[227].mxu0 }
 0x74b   :  { %14261 = vst [vmem:[#allocation65_spill] sm:$0xff] %v12555_v21 }
 0x74f   :  { %v12557_v55 = vpop.f32.mrb[228].mxu0 }
 0x750   :  { %14262 = vst [vmem:[#allocation70_spill] sm:$0xff] %v12557_v55  ;;  %v12559_v18 = vpop.f32.mrb[229].mxu0 }
 0x751   :  { %14263 = vst [vmem:[#allocation74_spill] sm:$0xff] %v12559_v18  ;;  %v12561_v62 = vpop.f32.mrb[230].mxu0 }
 0x752   :  { %14264 = vst [vmem:[#allocation110_spill] sm:$0xff] %v12561_v62  ;;  %v12563_v45 = vpop.f32.mrb[231].mxu0 }
 0x753   :  { %14265 = vst [vmem:[#allocation82_spill] sm:$0xff] %v12563_v45 }
 0x757   :  { %v12565_v61 = vpop.f32.mrb[232].mxu0 }
 0x758   :  { %14266 = vst [vmem:[#allocation80_spill] sm:$0xff] %v12565_v61  ;;  %v12567_v56 = vpop.f32.mrb[233].mxu0 }
 0x759   :  { %14267 = vst [vmem:[#allocation86_spill] sm:$0xff] %v12567_v56  ;;  %v12569_v35 = vpop.f32.mrb[234].mxu0 }
 0x75a   :  { %14268 = vst [vmem:[#allocation84_spill] sm:$0xff] %v12569_v35  ;;  %v12571_v44 = vpop.f32.mrb[235].mxu0 }
 0x75b   :  { %14269 = vst [vmem:[#allocation109_spill] sm:$0xff] %v12571_v44 }
 0x75f   :  { %v12573_v60 = vpop.f32.mrb[236].mxu0 }
 0x760   :  { %14270 = vst [vmem:[#allocation112_spill] sm:$0xff] %v12573_v60  ;;  %v12575_v51 = vpop.f32.mrb[237].mxu0 }
 0x761   :  { %14271 = vst [vmem:[#allocation90_spill] sm:$0xff] %v12575_v51  ;;  %v12577_v31 = vpop.f32.mrb[238].mxu0 }
 0x762   :  { %14272 = vst [vmem:[#allocation88_spill] sm:$0xff] %v12577_v31  ;;  %v12579_v15 = vpop.f32.mrb[239].mxu0 }
 0x763   :  { %14273 = vst [vmem:[#allocation94_spill] sm:$0xff] %v12579_v15 }
 0x787   :  { %v8750_v20 = vpop.f32.mrb[240].mxu0 }
 0x788   :  { %v5579_v62 = vpop.f32.mrb[241].mxu0  ;;  %v5644_v60 = vsel %vm11661_vm0, %v8750_v20, -inf }
 0x789   :  { %v8751_v55 = vpop.f32.mrb[242].mxu0  ;;  %v5642_v61 = vsel %vm11672_vm1, %v5579_v62, -inf }
 0x78a   :  { %5658 = vmax.xlane.f32.xlu0 %v5642_v61  ;;  %v5582_v56 = vpop.f32.mrb[243].mxu0  ;;  %v5645_v31 = vsel %vm11684_vm2, %v8751_v55, -inf }
 0x78b   :  { %v5643_v35 = vsel %vm11693_vm3, %v5582_v56, -inf }
 0x78c   :  { %5660 = vmax.xlane.f32.xlu1 %v5643_v35 }
 0x78e   :  { %5662 = vmax.xlane.f32.xlu0 %v5644_v60 }
 0x78f   :  { %v8754_v51 = vpop.f32.mrb[244].mxu0 }
 0x790   :  { %5664 = vmax.xlane.f32.xlu1 %v5645_v31  ;;  %v5595_v15 = vpop.f32.mrb[245].mxu0  ;;  %v5648_v20 = vsel %vm11728_vm6, %v8754_v51, -inf }
 0x791   :  { %v8755_v44 = vpop.f32.mrb[246].mxu0  ;;  %v5646_v62 = vsel %vm11706_vm4, %v5595_v15, -inf }
 0x792   :  { %5666 = vmax.xlane.f32.xlu0 %v5646_v62  ;;  %v5598_v45 = vpop.f32.mrb[247].mxu0  ;;  %v5649_v55 = vsel %vm11739_vm7, %v8755_v44, -inf }
 0x793   :  { %v5647_v56 = vsel %vm11717_vm5, %v5598_v45, -inf }
 0x794   :  { %5668 = vmax.xlane.f32.xlu1 %v5647_v56 }
 0x796   :  { %5670 = vmax.xlane.f32.xlu0 %v5648_v20 }
 0x797   :  { %v8758_v18 = vpop.f32.mrb[248].mxu0 }
 0x798   :  { %5672 = vmax.xlane.f32.xlu1 %v5649_v55  ;;  %v5611_v30 = vpop.f32.mrb[249].mxu0  ;;  %v12603_v51 = vsel %vm11772_vm10, %v8758_v18, -inf }
 0x799   :  { %v8759_v32 = vpop.f32.mrb[250].mxu0  ;;  %v5650_v15 = vsel %vm11750_vm8, %v5611_v30, -inf }
 0x79a   :  { %5674 = vmax.xlane.f32.xlu0 %v5650_v15  ;;  %v5614_v21 = vpop.f32.mrb[251].mxu0  ;;  %v12608_v44 = vsel %vm11783_vm11, %v8759_v32, -inf }
 0x79b   :  { %v5651_v45 = vsel %vm11761_vm9, %v5614_v21, -inf }
 0x79c   :  { %5676 = vmax.xlane.f32.xlu1 %v5651_v45 }
 0x79e   :  { %5678 = vmax.xlane.f32.xlu0 %v12603_v51 }
 0x79f   :  { %v8762_v9 = vpop.f32.mrb[252].mxu0 }
 0x7a0   :  { %5680 = vmax.xlane.f32.xlu1 %v12608_v44  ;;  %v5627_v30 = vpop.f32.mrb[253].mxu0  ;;  %v12623_v32 = vsel %vm11818_vm14, %v8762_v9, -inf }
 0x7a1   :  { %v8763_v43 = vpop.f32.mrb[254].mxu0  ;;  %v12613_v11 = vsel %vm11794_vm12, %v5627_v30, -inf }
 0x7a2   :  { %5682 = vmax.xlane.f32.xlu0 %v12613_v11  ;;  %v5630_v21 = vpop.f32.mrb[255].mxu0  ;;  %v12628_v12 = vsel %vm11828_vm15, %v8763_v43, -inf }
 0x7a3   :  { %v12618_v18 = vsel %vm11807_vm13, %v5630_v21, -inf }
 0x7a4   :  { %5684 = vmax.xlane.f32.xlu1 %v12618_v18 }
 0x7a6   :  { %5686 = vmax.xlane.f32.xlu0 %v12623_v32 }
 0x7a8   :  { %5688 = vmax.xlane.f32.xlu1 %v12628_v12 }
 0x817   :  { %v5659_v30 = vpop.xlane.xlu0 %5658 }
 0x818   :  { %v5690_v7 = vsub.f32 %v5642_v61, %v5659_v30 }
 0x819   :  { %v5661_v23 = vpop.xlane.xlu1 %5660 }
 0x81a   :  { %v5706_v14 = vmul.f32 1.442695, %v5690_v7  ;;  %v5691_v21 = vsub.f32 %v5643_v35, %v5661_v23 }
 0x81b   :  { %v5663_v6 = vpop.xlane.xlu0 %5662 }
 0x81c   :  { %v5708_v34 = vmul.f32 1.442695, %v5691_v21  ;;  %v5692_v22 = vsub.f32 %v5644_v60, %v5663_v6  ;;  %9935 = vpow2.f32 %v5706_v14 }
 0x81d   :  { %v5665_v8 = vpop.xlane.xlu1 %5664 }
 0x81e   :  { %9937 = vpow2.f32 %v5708_v34  ;;  %v5710_v9 = vmul.f32 1.442695, %v5692_v22  ;;  %v5693_v28 = vsub.f32 %v5645_v31, %v5665_v8 }
 0x81f   :  { %v5667_v58 = vpop.xlane.xlu0 %5666 }
 0x820   :  { %v5712_v42 = vmul.f32 1.442695, %v5693_v28  ;;  %v5694_v29 = vsub.f32 %v5646_v62, %v5667_v58  ;;  %9939 = vpow2.f32 %v5710_v9 }
 0x821   :  { %v5669_v43 = vpop.xlane.xlu1 %5668 }
 0x822   :  { %9941 = vpow2.f32 %v5712_v42  ;;  %v5714_v19 = vmul.f32 1.442695, %v5694_v29  ;;  %v5695_v24 = vsub.f32 %v5647_v56, %v5669_v43 }
 0x823   :  { %v5671_v61 = vpop.xlane.xlu0 %5670 }
 0x824   :  { %v5716_v30 = vmul.f32 1.442695, %v5695_v24  ;;  %v5696_v7 = vsub.f32 %v5648_v20, %v5671_v61  ;;  %9943 = vpow2.f32 %v5714_v19 }
 0x825   :  { %v5673_v23 = vpop.xlane.xlu1 %5672 }
 0x826   :  { %9945 = vpow2.f32 %v5716_v30  ;;  %v5718_v6 = vmul.f32 1.442695, %v5696_v7  ;;  %v5697_v14 = vsub.f32 %v5649_v55, %v5673_v23  ;;  %v12631_v35 = vpop.eup %9935  ;;  %v14274_v30 = vld [vmem:[#allocation40_spill] sm:$0xff] }
 0x827   :  { %v5675_v22 = vpop.xlane.xlu0 %5674 }
 0x828   :  { %v12633_v8 = vpop.eup %9937  ;;  %v5720_v28 = vmul.f32 1.442695, %v5697_v14  ;;  %v5698_v58 = vsub.f32 %v5650_v15, %v5675_v22  ;;  %9947 = vpow2.f32 %v5718_v6 }
 0x829   :  { %v5677_v34 = vpop.xlane.xlu1 %5676  ;;  %v5770_v29 = vpack.c.bf16 %v12633_v8, %v12631_v35 }
 0x82a   :  { %9949 = vpow2.f32 %v5720_v28  ;;  %v5722_v24 = vmul.f32 1.442695, %v5698_v58  ;;  %v5699_v42 = vsub.f32 %v5651_v45, %v5677_v34  ;;  %v12637_v19 = vpop.eup %9939 }
 0x82b   :  { %8780 = vmatprep.mubr.bf16.mxu1 %v5770_v29  ;;  %v5679_v60 = vpop.xlane.xlu0 %5678 }
 0x82c   :  { %v12639_v31 = vpop.eup %9941  ;;  %v5724_v62 = vmul.f32 1.442695, %v5699_v42  ;;  %v5700_v56 = vsub.f32 %v12603_v51, %v5679_v60  ;;  %9951 = vpow2.f32 %v5722_v24 }
 0x82d   :  { %v5771_v20 = vpack.c.bf16 %v12639_v31, %v12637_v19  ;;  %v5681_v55 = vpop.xlane.xlu1 %5680 }
 0x82e   :  { %9953 = vpow2.f32 %v5724_v62  ;;  %v5726_v15 = vmul.f32 1.442695, %v5700_v56  ;;  %v5701_v21 = vsub.f32 %v12608_v44, %v5681_v55  ;;  %v12645_v9 = vpop.eup %9943  ;;  %v14275_v62 = vld [vmem:[#allocation46_spill] sm:$0xff] }
 0x82f   :  { %8781 = vmatmul.mubr.bf16.vlgmr.msra.gmra.mrb[16].mxu1 %v5771_v20  ;;  %v5683_v45 = vpop.xlane.xlu0 %5682 }
 0x830   :  { %v12647_v43 = vpop.eup %9945  ;;  %v5728_v61 = vmul.f32 1.442695, %v5701_v21  ;;  %8797 = vmatpush3.bf16.xpose.msra.mxu1 %v14143_v2  ;;  %v5702_v51 = vsub.f32 %v12613_v11, %v5683_v45  ;;  %9955 = vpow2.f32 %v5726_v15  ;;  %v14276_v21 = vld [vmem:[#allocation52_spill] sm:$0xff] }
 0x831   :  { %8798 = vmatprep.subr.bf16.mxu1 %v14274_v30  ;;  %v5685_v7 = vpop.xlane.xlu1 %5684  ;;  %v5772_v23 = vpack.c.bf16 %v12647_v43, %v12645_v9 }
 0x832   :  { %9957 = vpow2.f32 %v5728_v61  ;;  %v5730_v44 = vmul.f32 1.442695, %v5702_v51  ;;  %v5703_v6 = vsub.f32 %v12618_v18, %v5685_v7  ;;  %v12655_v14 = vpop.eup %9947  ;;  %v14277_v7 = vld [vmem:[#allocation33_spill] sm:$0xff] }
 0x833   :  { %8784 = vmatprep.mubr.bf16.mxu1 %v5772_v23  ;;  %v5687_v22 = vpop.xlane.xlu0 %5686  ;;  %v14278_v23 = vld [vmem:[#allocation32_spill] sm:$0xff] }
 0x834   :  { %v12657_v28 = vpop.eup %9949  ;;  %v5732_v2 = vmul.f32 1.442695, %v5703_v6  ;;  %v5704_v11 = vsub.f32 %v12623_v32, %v5687_v22  ;;  %9959 = vpow2.f32 %v5730_v44  ;;  %v14279_v44 = vpack.c.bf16 %v14277_v7, %v14278_v23  ;;  %v14280_v6 = vld [vmem:[#allocation58_spill] sm:$0xff]  ;;  %v14281_v22 = vld [vmem:[#allocation63_spill] sm:$0xff]  ;;  %v14296_v23 = vld [vmem:[#allocation24_spill] sm:$0xff] }
 0x835   :  { %v5773_v58 = vpack.c.bf16 %v12657_v28, %v12655_v14  ;;  %v5689_v34 = vpop.xlane.xlu1 %5688 }
 0x836   :  { %9961 = vpow2.f32 %v5732_v2  ;;  %v5734_v29 = vmul.f32 1.442695, %v5704_v11  ;;  %v5705_v24 = vsub.f32 %v12628_v12, %v5689_v34  ;;  %v12663_v42 = vpop.eup %9951  ;;  %v14282_v2 = vld [vmem:[#allocation68_spill] sm:$0xff]  ;;  %v14285_v34 = vld [vmem:[#allocation19_spill] sm:$0xff] }
 0x837   :  { %8785 = vmatmul.mubr.bf16.gmra.mrb[20].mxu1 %v5773_v58  ;;  %v14283_v11 = vld [vmem:[#allocation72_spill] sm:$0xff] }
 0x838   :  { %v12665_v18 = vpop.eup %9953  ;;  %v5736_v60 = vmul.f32 1.442695, %v5705_v24  ;;  %8799 = vmatpush3.bf16.xpose.msra.mxu1 %v14274_v30  ;;  %9963 = vpow2.f32 %v5734_v29  ;;  %v14284_v58 = vld [vmem:[#allocation20_spill] sm:$0xff] }
 0x839   :  { %8800 = vmatprep.subr.bf16.mxu1 %v14275_v62  ;;  %v5774_v32 = vpack.c.bf16 %v12665_v18, %v12663_v42  ;;  %v14286_v29 = vpack.c.bf16 %v14284_v58, %v14285_v34  ;;  %v14287_v24 = vld [vmem:[#allocation44_spill] sm:$0xff] }
 0x83a   :  { %9965 = vpow2.f32 %v5736_v60  ;;  %v12671_v56 = vpop.eup %9955  ;;  %v14288_v60 = vld [vmem:[#allocation43_spill] sm:$0xff]  ;;  %v14302_v58 = vld [vmem:[#allocation100_spill] sm:$0xff] }
 0x83b   :  { %8788 = vmatprep.mubr.bf16.mxu1 %v5774_v32  ;;  %v14290_v32 = vld [vmem:[#allocation50_spill] sm:$0xff]  ;;  %v14303_v34 = vld [vmem:[#allocation28_spill] sm:$0xff] }
 0x83c   :  { %v12673_v20 = vpop.eup %9957 }
 0x83d   :  { %v5775_v12 = vpack.c.bf16 %v12673_v20, %v12671_v56 }
 0x83e   :  { %v12677_v55 = vpop.eup %9959 }
 0x83f   :  { %8789 = vmatmul.mubr.bf16.gmra.mrb[24].mxu1 %v5775_v12  ;;  %v14291_v12 = vld [vmem:[#allocation49_spill] sm:$0xff] }
 0x840   :  { %v12679_v15 = vpop.eup %9961  ;;  %8801 = vmatpush3.bf16.xpose.msra.mxu1 %v14275_v62  ;;  %v14289_v62 = vpack.c.bf16 %v14287_v24, %v14288_v60 }
 0x841   :  { %8802 = vmatprep.subr.bf16.mxu1 %v14276_v21  ;;  %v5776_v45 = vpack.c.bf16 %v12679_v15, %v12677_v55 }
 0x842   :  { %v12685_v61 = vpop.eup %9963 }
 0x843   :  { %8792 = vmatprep.mubr.bf16.mxu1 %v5776_v45  ;;  %v14293_v45 = vld [vmem:[#allocation56_spill] sm:$0xff] }
 0x844   :  { %v12687_v51 = vpop.eup %9965 }
 0x845   :  { %v5777_v30 = vpack.c.bf16 %v12687_v51, %v12685_v61 }
 0x847   :  { %8793 = vmatmul.mubr.bf16.gmra.mrb[28].mxu1 %v5777_v30  ;;  %v14294_v30 = vld [vmem:[#allocation55_spill] sm:$0xff] }
 0x848   :  { %8803 = vmatpush3.bf16.xpose.msra.mxu1 %v14276_v21  ;;  %8812 = vmatprep.mubr.bf16.mxu1 %v14279_v44  ;;  %v14292_v21 = vpack.c.bf16 %v14290_v32, %v14291_v12  ;;  %v14295_v7 = vpack.c.bf16 %v14293_v45, %v14294_v30  ;;  %v14297_v44 = vld [vmem:[#allocation61_spill] sm:$0xff] }
 0x849   :  { %8804 = vmatprep.subr.bf16.mxu1 %v14280_v6 }
 0x850   :  { %8805 = vmatpush3.bf16.xpose.msra.mxu1 %v14280_v6  ;;  %v14298_v6 = vpack.c.bf16 %v14296_v23, %v14297_v44 }
 0x851   :  { %8806 = vmatprep.subr.bf16.mxu1 %v14281_v22 }
 0x858   :  { %8807 = vmatpush3.bf16.xpose.msra.mxu1 %v14281_v22  ;;  %v14299_v22 = vld [vmem:[#allocation26_spill] sm:$0xff] }
 0x859   :  { %8808 = vmatprep.subr.bf16.mxu1 %v14282_v2 }
 0x860   :  { %8809 = vmatpush3.bf16.xpose.msra.mxu1 %v14282_v2  ;;  %v14300_v2 = vld [vmem:[#allocation25_spill] sm:$0xff] }
 0x861   :  { %8810 = vmatprep.subr.bf16.mxu1 %v14283_v11 }
 0x868   :  { %8811 = vmatpush3.bf16.xpose.msra.mxu1 %v14283_v11  ;;  %v14301_v11 = vpack.c.bf16 %v14299_v22, %v14300_v2 }
 0x86f   :  { %8813 = vmatmul.mubr.bf16.vlgmr.msra.gmra.mrb[32].mxu1 %v14286_v29  ;;  %v14304_v29 = vpack.c.bf16 %v14302_v58, %v14303_v34 }
 0x870   :  { %8816 = vmatprep.mubr.bf16.mxu1 %v14289_v62 }
 0x877   :  { %8817 = vmatmul.mubr.bf16.gmra.mrb[36].mxu1 %v14292_v21 }
 0x878   :  { %8820 = vmatprep.mubr.bf16.mxu1 %v14295_v7 }
 0x87f   :  { %8821 = vmatmul.mubr.bf16.gmra.mrb[40].mxu1 %v14298_v6 }
 0x880   :  { %8824 = vmatprep.mubr.bf16.mxu1 %v14301_v11 }
 0x887   :  { %8825 = vmatmul.mubr.bf16.gmra.mrb[44].mxu1 %v14304_v29 }
 0x902   :  { %v12724_v24 = vpop.f32.mrb[16].mxu1 }
 0x903   :  { %v12726_v60 = vpop.f32.mrb[17].mxu1 }
 0x904   :  { %v12728_v62 = vpop.f32.mrb[18].mxu1 }
 0x905   :  { %v12730_v32 = vpop.f32.mrb[19].mxu1 }
 0x90a   :  { %v12732_v12 = vpop.f32.mrb[20].mxu1 }
 0x90b   :  { %v12734_v21 = vpop.f32.mrb[21].mxu1 }
 0x90c   :  { %v12736_v45 = vpop.f32.mrb[22].mxu1 }
 0x90d   :  { %14305 = vst [vmem:[#allocation92_spill] sm:$0xff] %v12736_v45  ;;  %v12738_v30 = vpop.f32.mrb[23].mxu1 }
 0x912   :  { %v12740_v7 = vpop.f32.mrb[24].mxu1 }
 0x913   :  { %14306 = vst [vmem:[#allocation111_spill] sm:$0xff] %v12740_v7  ;;  %v12742_v23 = vpop.f32.mrb[25].mxu1 }
 0x914   :  { %v12744_v44 = vpop.f32.mrb[26].mxu1 }
 0x915   :  { %14307 = vst [vmem:[#allocation114_spill] sm:$0xff] %v12744_v44  ;;  %v12746_v6 = vpop.f32.mrb[27].mxu1 }
 0x916   :  { %14308 = vst [vmem:[#allocation97_spill] sm:$0xff] %v12746_v6 }
 0x91a   :  { %v12748_v22 = vpop.f32.mrb[28].mxu1 }
 0x91b   :  { %14309 = vst [vmem:[#allocation29_spill] sm:$0xff] %v12748_v22  ;;  %v12750_v2 = vpop.f32.mrb[29].mxu1  ;;  %v9713_v22 = vld [vmem:[#allocation9 + $0x184] ss:$12 sps:$4 sm:$0xff]  }
 0x91c   :  { %14310 = vst [vmem:[#allocation99_spill] sm:$0xff] %v12750_v2  ;;  %v12752_v11 = vpop.f32.mrb[30].mxu1  ;;  %7256 = vmatprep.subr.bf16.mxu1 %v9713_v22 }
 0x91d   :  { %14311 = vst [vmem:[#allocation30_spill] sm:$0xff] %v12752_v11  ;;  %v12754_v58 = vpop.f32.mrb[31].mxu1  ;;  %v9711_v11 = vld [vmem:[#allocation9 + $0x180] ss:$12 sps:$4 sm:$0xff]  }
 0x91e   :  { %14312 = vst [vmem:[#allocation113_spill] sm:$0xff] %v12754_v58  ;;  %7257 = vmatpush1.bf16.xpose.msra.mxu1 %v9711_v11  ;;  %v9716_v11 = vld [vmem:[#allocation9 + $0x19c] ss:$12 sps:$4 sm:$0xff]  }
 0x91f   :  { %7258 = vmatprep.subr.bf16.mxu1 %v9716_v11  ;;  %v9719_v11 = vld [vmem:[#allocation9 + $0x1b4] ss:$12 sps:$4 sm:$0xff]  }
 0x926   :  { %7259 = vmatpush1.bf16.xpose.msra.mxu1 %v9714_v50 }
 0x927   :  { %7260 = vmatprep.subr.bf16.mxu1 %v9719_v11  ;;  %v9722_v11 = vld [vmem:[#allocation9 + $0x1cc] ss:$12 sps:$4 sm:$0xff]  }
 0x92e   :  { %7261 = vmatpush1.bf16.xpose.msra.mxu1 %v9717_v63  ;;  %v9723_v63 = vld [vmem:[#allocation9 + $0x1e0] ss:$12 sps:$4 sm:$0xff]  }
 0x92f   :  { %7262 = vmatprep.subr.bf16.mxu1 %v9722_v11  ;;  %v14326_v11 = vld [vmem:[#allocation129_spill] sm:$0xff] }
 0x936   :  { %7263 = vmatpush1.bf16.xpose.msra.mxu1 %v9720_v52  ;;  %v14327_v52 = vld [vmem:[#allocation71_spill] sm:$0xff] }
 0x937   :  { %7264 = vmatprep.subr.bf16.mxu1 %v9725_v16  ;;  %v14328_v16 = vld [vmem:[#allocation134_spill] sm:$0xff] }
 0x93e   :  { %7265 = vmatpush1.bf16.xpose.msra.mxu1 %v9723_v63  ;;  %v14329_v63 = vld [vmem:[#allocation130_spill] sm:$0xff] }
 0x93f   :  { %7266 = vmatprep.subr.bf16.mxu1 %v9731_v49  ;;  %v14331_v49 = vld [vmem:[#allocation117_spill] sm:$0xff] }
 0x942   :  { %v8814_v34 = vpop.f32.mrb[32].mxu1 }
 0x943   :  { %v5981_v29 = vpop.f32.mrb[33].mxu1  ;;  %v12768_v58 = vsel %vm11661_vm0, %v8814_v34, -inf }
 0x944   :  { %v8815_v45 = vpop.f32.mrb[34].mxu1  ;;  %v12758_v7 = vsel %vm11672_vm1, %v5981_v29, -inf }
 0x945   :  { %6060 = vmax.xlane.f32.xlu0 %v12758_v7  ;;  %v5984_v44 = vpop.f32.mrb[35].mxu1  ;;  %v12773_v29 = vsel %vm11684_vm2, %v8815_v45, -inf }
 0x946   :  { %v12763_v6 = vsel %vm11693_vm3, %v5984_v44, -inf  ;;  %7267 = vmatpush1.bf16.xpose.msra.mxu1 %v9729_v37  ;;  %v14332_v37 = vld [vmem:[#allocation118_spill] sm:$0xff] }
 0x947   :  { %6062 = vmax.xlane.f32.xlu1 %v12763_v6 }
 0x949   :  { %6064 = vmax.xlane.f32.xlu0 %v12768_v58 }
 0x94a   :  { %v8818_v39 = vpop.f32.mrb[36].mxu1 }
 0x94b   :  { %6066 = vmax.xlane.f32.xlu1 %v12773_v29  ;;  %v5997_v54 = vpop.f32.mrb[37].mxu1  ;;  %v12788_v45 = vsel %vm11728_vm6, %v8818_v39, -inf }
 0x94c   :  { %v8819_v44 = vpop.f32.mrb[38].mxu1  ;;  %v12778_v2 = vsel %vm11706_vm4, %v5997_v54, -inf }
 0x94d   :  { %6068 = vmax.xlane.f32.xlu0 %v12778_v2  ;;  %v6000_v25 = vpop.f32.mrb[39].mxu1  ;;  %v12793_v34 = vsel %vm11739_vm7, %v8819_v44, -inf }
 0x94e   :  { %v12783_v22 = vsel %vm11717_vm5, %v6000_v25, -inf }
 0x94f   :  { %6070 = vmax.xlane.f32.xlu1 %v12783_v22 }
 0x951   :  { %6072 = vmax.xlane.f32.xlu0 %v12788_v45 }
 0x952   :  { %v8822_v4 = vpop.f32.mrb[40].mxu1 }
 0x953   :  { %6074 = vmax.xlane.f32.xlu1 %v12793_v34  ;;  %v6013_v10 = vpop.f32.mrb[41].mxu1  ;;  %v12808_v44 = vsel %vm11772_vm10, %v8822_v4, -inf }
 0x954   :  { %v8823_v54 = vpop.f32.mrb[42].mxu1  ;;  %v12798_v25 = vsel %vm11750_vm8, %v6013_v10, -inf }
 0x955   :  { %6076 = vmax.xlane.f32.xlu0 %v12798_v25  ;;  %v6016_v27 = vpop.f32.mrb[43].mxu1  ;;  %v12813_v50 = vsel %vm11783_vm11, %v8823_v54, -inf }
 0x956   :  { %v12803_v39 = vsel %vm11761_vm9, %v6016_v27, -inf }
 0x957   :  { %6078 = vmax.xlane.f32.xlu1 %v12803_v39 }
 0x959   :  { %6080 = vmax.xlane.f32.xlu0 %v12808_v44 }
 0x95a   :  { %v8826_v38 = vpop.f32.mrb[44].mxu1 }
 0x95b   :  { %6082 = vmax.xlane.f32.xlu1 %v12813_v50  ;;  %v6029_v0 = vpop.f32.mrb[45].mxu1  ;;  %v12828_v54 = vsel %vm11818_vm14, %v8826_v38, -inf  ;;  %v14323_v38 = vld [vmem:[#allocation39_spill] sm:$0xff] }
 0x95c   :  { %v8827_v10 = vpop.f32.mrb[46].mxu1  ;;  %v12818_v27 = vsel %vm11794_vm12, %v6029_v0, -inf  ;;  %v9728_v0 = vld [vmem:[#allocation9 + $0x4] ss:$12 sps:$4 sm:$0xff]  }
 0x95d   :  { %6084 = vmax.xlane.f32.xlu0 %v12818_v27  ;;  %v6032_v17 = vpop.f32.mrb[47].mxu1  ;;  %v12833_v26 = vsel %vm11828_vm15, %v8827_v10, -inf  ;;  %6870 = vmatprep.subr.bf16.mxu0 %v9728_v0  ;;  %v14324_v10 = vld [vmem:[#allocation102_spill] sm:$0xff] }
 0x95e   :  { %v12823_v4 = vsel %vm11807_vm13, %v6032_v17, -inf  ;;  %v14325_v17 = vld [vmem:[#allocation36_spill] sm:$0xff]  ;;  %v14330_v0 = vld [vmem:[#allocation34_spill] sm:$0xff] }
 0x95f   :  { %6086 = vmax.xlane.f32.xlu1 %v12823_v4 }
 0x961   :  { %6088 = vmax.xlane.f32.xlu0 %v12828_v54 }
 0x963   :  { %6090 = vmax.xlane.f32.xlu1 %v12833_v26 }
 0x965   :  { %4532 = vadd.xlane.f32.xlu0 %v12098_v36  ;;  %v9735_v36 = vld [vmem:[#allocation9 + $0x210] ss:$12 sps:$4 sm:$0xff]  }
 0x967   :  { %4534 = vadd.xlane.f32.xlu1 %v12101_v1  ;;  %v14313_v1 = vld [vmem:[#allocation135_spill] sm:$0xff] }
 0x969   :  { %4130 = vadd.xlane.f32.xlu0 %v12022_v53  ;;  %v9737_v53 = vld [vmem:[#allocation9 + $0x214] ss:$12 sps:$4 sm:$0xff]  }
 0x96a   :  { %7268 = vmatprep.subr.bf16.mxu1 %v9737_v53  ;;  %v14333_v53 = vld [vmem:[#allocation119_spill] sm:$0xff] }
 0x96b   :  { %4132 = vadd.xlane.f32.xlu1 %v12027_v48  ;;  %7269 = vmatpush1.bf16.xpose.msra.mxu1 %v9735_v36  ;;  %v9743_v48 = vld [vmem:[#allocation9 + $0x22c] ss:$12 sps:$4 sm:$0xff]   ;;  %v14334_v36 = vld [vmem:[#allocation120_spill] sm:$0xff] }
 0x96c   :  { %7270 = vmatprep.subr.bf16.mxu1 %v9743_v48  ;;  %v14335_v48 = vld [vmem:[#allocation121_spill] sm:$0xff] }
 0x96d   :  { %4536 = vadd.xlane.f32.xlu0 %v12108_v41  ;;  %v14315_v41 = vld [vmem:[#allocation131_spill] sm:$0xff] }
 0x96f   :  { %4538 = vadd.xlane.f32.xlu1 %v12111_v5  ;;  %v14316_v5 = vld [vmem:[#allocation132_spill] sm:$0xff] }
 0x971   :  { %4134 = vadd.xlane.f32.xlu0 %v12030_v33  ;;  %v9741_v33 = vld [vmem:[#allocation9 + $0x228] ss:$12 sps:$4 sm:$0xff]  }
 0x973   :  { %4136 = vadd.xlane.f32.xlu1 %v12025_v57  ;;  %7271 = vmatpush1.bf16.xpose.msra.mxu1 %v9741_v33  ;;  %v14314_v57 = vld [vmem:[#allocation136_spill] sm:$0xff] }
 0x975   :  { %4540 = vadd.xlane.f32.xlu0 %v12118_v46  ;;  %v14318_v46 = vld [vmem:[#allocation138_spill] sm:$0xff] }
 0x977   :  { %4542 = vadd.xlane.f32.xlu1 %v12120_v3  ;;  %v14320_v3 = vld [vmem:[#allocation133_spill] sm:$0xff] }
 0x979   :  { %4138 = vadd.xlane.f32.xlu0 %v12038_v59  ;;  %v14317_v59 = vld [vmem:[#allocation137_spill] sm:$0xff] }
 0x97b   :  { %4140 = vadd.xlane.f32.xlu1 %v12041_v13  ;;  %v14319_v13 = vld [vmem:[#allocation41_spill] sm:$0xff] }
 0x97d   :  { %4544 = vadd.xlane.f32.xlu0 %v12128_v47  ;;  %v14321_v47 = vld [vmem:[#allocation127_spill] sm:$0xff] }
 0x97f   :  { %4546 = vadd.xlane.f32.xlu1 %v12130_v40  ;;  %v14322_v40 = vld [vmem:[#allocation128_spill] sm:$0xff] }
 0x981   :  { %4142 = vadd.xlane.f32.xlu0 %v14313_v1 }
 0x983   :  { %4144 = vadd.xlane.f32.xlu1 %v14314_v57 }
 0x985   :  { %4548 = vadd.xlane.f32.xlu0 %v14315_v41 }
 0x987   :  { %4550 = vadd.xlane.f32.xlu1 %v14316_v5 }
 0x989   :  { %4146 = vadd.xlane.f32.xlu0 %v14317_v59 }
 0x98b   :  { %4148 = vadd.xlane.f32.xlu1 %v14318_v46  ;;  %v14343_v46 = vld [vmem:[#allocation48_spill] sm:$0xff] }
 0x98d   :  { %4552 = vadd.xlane.f32.xlu0 %v14319_v13 }
 0x98f   :  { %4554 = vadd.xlane.f32.xlu1 %v14320_v3 }
 0x991   :  { %4150 = vadd.xlane.f32.xlu0 %v14321_v47  ;;  %v14344_v47 = vld [vmem:[#allocation164_spill] sm:$0xff] }
 0x993   :  { %4152 = vadd.xlane.f32.xlu1 %v14322_v40 }
 0x995   :  { %4556 = vadd.xlane.f32.xlu0 %v14323_v38 }
 0x997   :  { %4558 = vadd.xlane.f32.xlu1 %v14324_v10 }
 0x999   :  { %4154 = vadd.xlane.f32.xlu0 %v14325_v17 }
 0x99b   :  { %4156 = vadd.xlane.f32.xlu1 %v14326_v11  ;;  %v14345_v11 = vld [vmem:[#allocation54_spill] sm:$0xff] }
 0x99d   :  { %4560 = vadd.xlane.f32.xlu0 %v14327_v52 }
 0x99f   :  { %4562 = vadd.xlane.f32.xlu1 %v14328_v16 }
 0x9a1   :  { %4158 = vadd.xlane.f32.xlu0 %v14329_v63 }
 0x9a3   :  { %4160 = vadd.xlane.f32.xlu1 %v14330_v0  ;;  %v14346_v0 = vld [vmem:[#allocation165_spill] sm:$0xff] }
 0x9a5   :  { %5738 = vadd.xlane.f32.xlu0 %v12631_v35  ;;  %v14336_v35 = vld [vmem:[#allocation122_spill] sm:$0xff] }
 0x9a7   :  { %5740 = vadd.xlane.f32.xlu1 %v12633_v8  ;;  %v14337_v8 = vld [vmem:[#allocation123_spill] sm:$0xff] }
 0x9a9   :  { %5336 = vadd.xlane.f32.xlu0 %v14331_v49 }
 0x9ab   :  { %5338 = vadd.xlane.f32.xlu1 %v14332_v37  ;;  %v14347_v37 = vld [vmem:[#allocation104_spill] sm:$0xff] }
 0x9ad   :  { %5742 = vadd.xlane.f32.xlu0 %v12637_v19  ;;  %v14338_v19 = vld [vmem:[#allocation124_spill] sm:$0xff] }
 0x9af   :  { %5744 = vadd.xlane.f32.xlu1 %v12639_v31  ;;  %v12886_v31 = vld [vmem:[#allocation9 + $0x188] ss:$12 sps:$4 sm:$0xff]  }
 0x9b0   :  { %8860 = vmatprep.subr.bf16.mxu1 %v12886_v31 }
 0x9b1   :  { %5340 = vadd.xlane.f32.xlu0 %v14333_v53 }
 0x9b3   :  { %5342 = vadd.xlane.f32.xlu1 %v14334_v36 }
 0x9b5   :  { %5746 = vadd.xlane.f32.xlu0 %v12645_v9  ;;  %v14339_v9 = vld [vmem:[#allocation125_spill] sm:$0xff] }
 0x9b7   :  { %5748 = vadd.xlane.f32.xlu1 %v12647_v43  ;;  %v14340_v43 = vld [vmem:[#allocation126_spill] sm:$0xff] }
 0x9b9   :  { %5344 = vadd.xlane.f32.xlu0 %v14335_v48 }
 0x9bb   :  { %5346 = vadd.xlane.f32.xlu1 %v14336_v35 }
 0x9bd   :  { %5750 = vadd.xlane.f32.xlu0 %v12655_v14  ;;  %v14341_v14 = vld [vmem:[#allocation37_spill] sm:$0xff] }
 0x9bf   :  { %5752 = vadd.xlane.f32.xlu1 %v12657_v28 }
 0x9c1   :  { %5348 = vadd.xlane.f32.xlu0 %v14337_v8  ;;  %v14348_v8 = vld [vmem:[#allocation103_spill] sm:$0xff] }
 0x9c3   :  { %5350 = vadd.xlane.f32.xlu1 %v14338_v19  ;;  %v9726_v19 = vld [vmem:[#allocation9] ss:$12 sps:$4 sm:$0xff]  }
 0x9c5   :  { %5754 = vadd.xlane.f32.xlu0 %v12663_v42  ;;  %v14342_v42 = vld [vmem:[#allocation42_spill] sm:$0xff] }
 0x9c7   :  { %5756 = vadd.xlane.f32.xlu1 %v12665_v18 }
 0x9c9   :  { %5352 = vadd.xlane.f32.xlu0 %v14339_v9 }
 0x9cb   :  { %5354 = vadd.xlane.f32.xlu1 %v14340_v43 }
 0x9cd   :  { %5758 = vadd.xlane.f32.xlu0 %v12671_v56 }
 0x9cf   :  { %5760 = vadd.xlane.f32.xlu1 %v12673_v20 }
 0x9d1   :  { %5356 = vadd.xlane.f32.xlu0 %v14341_v14 }
 0x9d2   :  { %v6061_v28 = vpop.xlane.xlu0 %6060 }
 0x9d3   :  { %v6092_v33 = vsub.f32 %v12758_v7, %v6061_v28  ;;  %5358 = vadd.xlane.f32.xlu1 %v14342_v42 }
 0x9d4   :  { %v6063_v18 = vpop.xlane.xlu1 %6062 }
 0x9d5   :  { %v6108_v1 = vmul.f32 1.442695, %v6092_v33  ;;  %v6093_v57 = vsub.f32 %v12763_v6, %v6063_v18  ;;  %5762 = vadd.xlane.f32.xlu0 %v12677_v55  ;;  %v14349_v33 = vld [vmem:[#allocation106_spill] sm:$0xff] }
 0x9d6   :  { %v6065_v41 = vpop.xlane.xlu0 %6064 }
 0x9d7   :  { %v6110_v5 = vmul.f32 1.442695, %v6093_v57  ;;  %v6094_v59 = vsub.f32 %v12768_v58, %v6065_v41  ;;  %5764 = vadd.xlane.f32.xlu1 %v12679_v15  ;;  %9967 = vpow2.f32 %v6108_v1  ;;  %v14350_v41 = vld [vmem:[#allocation105_spill] sm:$0xff] }
 0x9d8   :  { %v6067_v56 = vpop.xlane.xlu1 %6066 }
 0x9d9   :  { %9969 = vpow2.f32 %v6110_v5  ;;  %v6112_v20 = vmul.f32 1.442695, %v6094_v59  ;;  %v6095_v7 = vsub.f32 %v12773_v29, %v6067_v56  ;;  %5360 = vadd.xlane.f32.xlu0 %v14343_v46 }
 0x9da   :  { %v6069_v13 = vpop.xlane.xlu0 %6068 }
 0x9db   :  { %v6114_v3 = vmul.f32 1.442695, %v6095_v7  ;;  %v6096_v6 = vsub.f32 %v12778_v2, %v6069_v13  ;;  %5362 = vadd.xlane.f32.xlu1 %v14344_v47  ;;  %9971 = vpow2.f32 %v6112_v20  ;;  %v14351_v20 = vld [vmem:[#allocation108_spill] sm:$0xff]  ;;  %v9732_v47 = vld [vmem:[#allocation9 + $0x18] ss:$12 sps:$4 sm:$0xff]  }
 0x9dc   :  { %v6071_v55 = vpop.xlane.xlu1 %6070 }
 0x9dd   :  { %9973 = vpow2.f32 %v6114_v3  ;;  %v6116_v58 = vmul.f32 1.442695, %v6096_v6  ;;  %v6097_v15 = vsub.f32 %v12783_v22, %v6071_v55  ;;  %5766 = vadd.xlane.f32.xlu0 %v12685_v61  ;;  %v14352_v6 = vld [vmem:[#allocation107_spill] sm:$0xff] }
 0x9de   :  { %v6073_v40 = vpop.xlane.xlu0 %6072 }
 0x9df   :  { %v6118_v38 = vmul.f32 1.442695, %v6097_v15  ;;  %v6098_v29 = vsub.f32 %v12788_v45, %v6073_v40  ;;  %5768 = vadd.xlane.f32.xlu1 %v12687_v51  ;;  %9975 = vpow2.f32 %v6116_v58 }
 0x9e0   :  { %v6075_v10 = vpop.xlane.xlu1 %6074 }
 0x9e1   :  { %9977 = vpow2.f32 %v6118_v38  ;;  %v6120_v2 = vmul.f32 1.442695, %v6098_v29  ;;  %v6099_v17 = vsub.f32 %v12793_v34, %v6075_v10  ;;  %5364 = vadd.xlane.f32.xlu0 %v14345_v11  ;;  %v12910_v52 = vpop.eup %9967  ;;  %v14353_v38 = vld [vmem:[#allocation18_spill] sm:$0xff] }
 0x9e2   :  { %v6077_v16 = vpop.xlane.xlu0 %6076 }
 0x9e3   :  { %v12912_v22 = vpop.eup %9969  ;;  %v6122_v61 = vmul.f32 1.442695, %v6099_v17  ;;  %v6100_v63 = vsub.f32 %v12798_v25, %v6077_v16  ;;  %5366 = vadd.xlane.f32.xlu1 %v14346_v0  ;;  %9979 = vpow2.f32 %v6120_v2  ;;  %v14354_v17 = vld [vmem:[#allocation139_spill] sm:$0xff] }
 0x9e4   :  { %v6079_v51 = vpop.xlane.xlu1 %6078  ;;  %v6172_v45 = vpack.c.bf16 %v12912_v22, %v12910_v52 }
 0x9e5   :  { %9981 = vpow2.f32 %v6122_v61  ;;  %v6124_v49 = vmul.f32 1.442695, %v6100_v63  ;;  %v6101_v34 = vsub.f32 %v12803_v39, %v6079_v51  ;;  %4934 = vadd.xlane.f32.xlu0 %v14347_v37  ;;  %v12920_v53 = vpop.eup %9971  ;;  %v9734_v39 = vld [vmem:[#allocation9 + $0x1c] ss:$12 sps:$4 sm:$0xff]   ;;  %v14356_v51 = vld [vmem:[#allocation38_spill] sm:$0xff] }
 0x9e6   :  { %8844 = vmatprep.mubr.bf16.mxu0 %v6172_v45  ;;  %v6081_v36 = vpop.xlane.xlu0 %6080  ;;  %v9738_v45 = vld [vmem:[#allocation9 + $0x30] ss:$12 sps:$4 sm:$0xff]   ;;  %v9746_v37 = vld [vmem:[#allocation9 + $0x4c] ss:$12 sps:$4 sm:$0xff]  }
 0x9e7   :  { %v12922_v48 = vpop.eup %9973  ;;  %v6126_v25 = vmul.f32 1.442695, %v6101_v34  ;;  %v6102_v35 = vsub.f32 %v12808_v44, %v6081_v36  ;;  %4936 = vadd.xlane.f32.xlu1 %v14348_v8  ;;  %9983 = vpow2.f32 %v6124_v49  ;;  %v14357_v36 = vld [vmem:[#allocation141_spill] sm:$0xff] }
 0x9e8   :  { %v6173_v9 = vpack.c.bf16 %v12922_v48, %v12920_v53  ;;  %v6083_v43 = vpop.xlane.xlu1 %6082 }
 0x9e9   :  { %9985 = vpow2.f32 %v6126_v25  ;;  %v6128_v14 = vmul.f32 1.442695, %v6102_v35  ;;  %v6103_v28 = vsub.f32 %v12813_v50, %v6083_v43  ;;  %4938 = vadd.xlane.f32.xlu0 %v14349_v33  ;;  %v12930_v42 = vpop.eup %9975 }
 0x9ea   :  { %8845 = vmatmul.mubr.bf16.vlgmr.msra.gmra.mrb[0].mxu0 %v6173_v9  ;;  %v6085_v18 = vpop.xlane.xlu0 %6084 }
 0x9eb   :  { %v12932_v44 = vpop.eup %9977  ;;  %v6130_v1 = vmul.f32 1.442695, %v6103_v28  ;;  %6871 = vmatpush1.bf16.xpose.msra.mxu0 %v9726_v19  ;;  %v6104_v57 = vsub.f32 %v12818_v27, %v6085_v18  ;;  %4940 = vadd.xlane.f32.xlu1 %v14350_v41  ;;  %9987 = vpow2.f32 %v6128_v14  ;;  %v14358_v19 = vld [vmem:[#allocation142_spill] sm:$0xff]  ;;  %v14359_v14 = vld [vmem:[#allocation143_spill] sm:$0xff] }
 0x9ec   :  { %v6087_v5 = vpop.xlane.xlu1 %6086  ;;  %v6174_v59 = vpack.c.bf16 %v12932_v44, %v12930_v42  ;;  %6872 = vmatprep.subr.bf16.mxu0 %v9734_v39 }
 0x9ed   :  { %9989 = vpow2.f32 %v6130_v1  ;;  %v6132_v50 = vmul.f32 1.442695, %v6104_v57  ;;  %v6105_v56 = vsub.f32 %v12823_v4, %v6087_v5  ;;  %4942 = vadd.xlane.f32.xlu0 %v14351_v20  ;;  %v12940_v7 = vpop.eup %9979  ;;  %v9740_v4 = vld [vmem:[#allocation9 + $0x34] ss:$12 sps:$4 sm:$0xff]   ;;  %v14360_v1 = vld [vmem:[#allocation21_spill] sm:$0xff] }
 0x9ee   :  { %8848 = vmatprep.mubr.bf16.mxu0 %v6174_v59  ;;  %v6089_v46 = vpop.xlane.xlu0 %6088  ;;  %v9744_v57 = vld [vmem:[#allocation9 + $0x48] ss:$12 sps:$4 sm:$0xff]  }
 0x9ef   :  { %v12942_v13 = vpop.eup %9981  ;;  %v6134_v27 = vmul.f32 1.442695, %v6105_v56  ;;  %v6106_v3 = vsub.f32 %v12828_v54, %v6089_v46  ;;  %4944 = vadd.xlane.f32.xlu1 %v14352_v6  ;;  %9991 = vpow2.f32 %v6132_v50  ;;  %v9749_v50 = vld [vmem:[#allocation9 + $0x64] ss:$12 sps:$4 sm:$0xff]   ;;  %v14362_v46 = vld [vmem:[#allocation91_spill] sm:$0xff] }
 0x9f0   :  { %v6175_v55 = vpack.c.bf16 %v12942_v13, %v12940_v7  ;;  %v6091_v58 = vpop.xlane.xlu1 %6090  ;;  %v14361_v20 = vld [vmem:[#allocation144_spill] sm:$0xff] }
 0x9f1   :  { %9993 = vpow2.f32 %v6134_v27  ;;  %v6136_v15 = vmul.f32 1.442695, %v6106_v3  ;;  %v6107_v40 = vsub.f32 %v12833_v26, %v6091_v58  ;;  %4946 = vadd.xlane.f32.xlu0 %v14353_v38  ;;  %v12950_v29 = vpop.eup %9983  ;;  %v14355_v26 = vld [vmem:[#allocation140_spill] sm:$0xff]  ;;  %v14363_v3 = vld [vmem:[#allocation62_spill] sm:$0xff]  ;;  %v14364_v58 = vld [vmem:[#allocation145_spill] sm:$0xff] }
 0x9f2   :  { %8849 = vmatmul.mubr.bf16.gmra.mrb[4].mxu0 %v6175_v55  ;;  %v4533_v10 = vpop.xlane.xlu0 %4532  ;;  %v14366_v38 = vld [vmem:[#allocation23_spill] sm:$0xff] }
 0x9f3   :  { %v12952_v54 = vpop.eup %9985  ;;  %9995 = vpow2.f32 %v6136_v15  ;;  %v6138_v2 = vmul.f32 1.442695, %v6107_v40  ;;  %6873 = vmatpush1.bf16.xpose.msra.mxu0 %v9732_v47  ;;  %4948 = vadd.xlane.f32.xlu1 %v14354_v17  ;;  %v14365_v15 = vld [vmem:[#allocation77_spill] sm:$0xff] }
 0x9f4   :  { %9997 = vrcp.f32 %v4533_v10  ;;  %v4535_v11 = vpop.xlane.xlu1 %4534  ;;  %v6176_v16 = vpack.c.bf16 %v12952_v54, %v12950_v29  ;;  %6874 = vmatprep.subr.bf16.mxu0 %v9740_v4 }
 0x9f5   :  { %9999 = vpow2.f32 %v6138_v2  ;;  %4950 = vadd.xlane.f32.xlu0 %v14355_v26  ;;  %v12958_v61 = vpop.eup %9987  ;;  %v9775_v26 = vld [vmem:[#allocation9 + $0x1a0] ss:$12 sps:$4 sm:$0xff]  }
 0x9f6   :  { %10001 = vrcp.f32 %v4535_v11  ;;  %8852 = vmatprep.mubr.bf16.mxu0 %v6176_v16  ;;  %v4131_v63 = vpop.xlane.xlu0 %4130 }
 0x9f7   :  { %v12960_v0 = vpop.eup %9989  ;;  %10003 = vrcp.f32 %v4131_v63  ;;  %4952 = vadd.xlane.f32.xlu1 %v14356_v51  ;;  %v9747_v51 = vld [vmem:[#allocation9 + $0x60] ss:$12 sps:$4 sm:$0xff]  }
 0x9f8   :  { %v6177_v49 = vpack.c.bf16 %v12960_v0, %v12958_v61  ;;  %v4133_v34 = vpop.xlane.xlu1 %4132 }
 0x9f9   :  { %10005 = vrcp.f32 %v4133_v34  ;;  %4954 = vadd.xlane.f32.xlu0 %v14357_v36  ;;  %v12966_v25 = vpop.eup %9991 }
 0x9fa   :  { %8853 = vmatmul.mubr.bf16.gmra.mrb[8].mxu0 %v6177_v49  ;;  %v4537_v35 = vpop.xlane.xlu0 %4536  ;;  %v14367_v49 = vld [vmem:[#allocation93_spill] sm:$0xff] }
 0x9fb   :  { %v12968_v8 = vpop.eup %9993  ;;  %6875 = vmatpush1.bf16.xpose.msra.mxu0 %v9738_v45  ;;  %10007 = vrcp.f32 %v4537_v35  ;;  %4956 = vadd.xlane.f32.xlu1 %v14358_v19  ;;  %v9752_v35 = vld [vmem:[#allocation9 + $0x7c] ss:$12 sps:$4 sm:$0xff]  }
 0x9fc   :  { %v4539_v9 = vpop.xlane.xlu1 %4538  ;;  %v6178_v43 = vpack.c.bf16 %v12968_v8, %v12966_v25  ;;  %6876 = vmatprep.subr.bf16.mxu0 %v9746_v37  ;;  %v14368_v37 = vld [vmem:[#allocation64_spill] sm:$0xff] }
 0x9fd   :  { %v12973_v39 = vpop.eup %9995  ;;  %10009 = vrcp.f32 %v4539_v9  ;;  %4958 = vadd.xlane.f32.xlu0 %v14359_v14 }
 0x9fe   :  { %v9998_v28 = vpop.eup %9997  ;;  %v4135_v33 = vpop.xlane.xlu0 %4134  ;;  %8856 = vmatprep.mubr.bf16.mxu0 %v6178_v43  ;;  %v14369_v43 = vld [vmem:[#allocation22_spill] sm:$0xff] }
 0x9ff   :  { %v12976_v18 = vpop.eup %9999  ;;  %10011 = vrcp.f32 %v4135_v33  ;;  %4960 = vadd.xlane.f32.xlu1 %v14360_v1  ;;  %v4685_v27 = vmul.f32 %v9998_v28, %v14362_v46  ;;  %v14370_v28 = vld [vmem:[#allocation75_spill] sm:$0xff] }
 0xa00   :  { %v10002_v41 = vpop.eup %10001  ;;  %v6179_v5 = vpack.c.bf16 %v12976_v18, %v12973_v39  ;;  %v4137_v59 = vpop.xlane.xlu1 %4136 }
 0xa01   :  { %v10004_v56 = vpop.eup %10003  ;;  %10013 = vrcp.f32 %v4137_v59  ;;  %4962 = vadd.xlane.f32.xlu0 %v14361_v20  ;;  %v4686_v6 = vmul.f32 %v10002_v41, %v14363_v3  ;;  %v9779_v41 = vld [vmem:[#allocation9 + $0x1b8] ss:$12 sps:$4 sm:$0xff]  }
 0xa02   :  { %v4541_v47 = vpop.xlane.xlu0 %4540  ;;  %8857 = vmatmul.mubr.bf16.gmra.mrb[12].mxu0 %v6179_v5  ;;  %v4283_v40 = vmul.f32 %v10004_v56, %v14365_v15  ;;  %v14372_v20 = vld [vmem:[#allocation14_spill] sm:$0xff] }
 0xa03   :  { %v10006_v55 = vpop.eup %10005  ;;  %6877 = vmatpush1.bf16.xpose.msra.mxu0 %v9744_v57  ;;  %10015 = vrcp.f32 %v4541_v47  ;;  %4964 = vadd.xlane.f32.xlu1 %v14364_v58  ;;  %v4701_v4 = vpack.c.bf16 %v4686_v6, %v4685_v27  ;;  %v9755_v27 = vld [vmem:[#allocation9 + $0x94] ss:$12 sps:$4 sm:$0xff]   ;;  %v14374_v58 = vld [vmem:[#allocation51_spill] sm:$0xff] }
 0xa04   :  { %v4284_v10 = vmul.f32 %v10006_v55, %v14366_v38  ;;  %v4543_v2 = vpop.xlane.xlu1 %4542  ;;  %6878 = vmatprep.subr.bf16.mxu0 %v9749_v50  ;;  %v14371_v50 = vld [vmem:[#allocation95_spill] sm:$0xff] }
 0xa05   :  { %v10008_v17 = vpop.eup %10007  ;;  %6902 = vmatprep.mubr.bf16.mxu0 %v4701_v4  ;;  %7288 = vmatprep.mubr.bf16.mxu1 %v4701_v4  ;;  %10017 = vrcp.f32 %v4543_v2 }
 0xa06   :  { %v12987_v11 = vpack.c.bf16 %v4284_v10, %v4283_v40  ;;  %6140 = vadd.xlane.f32.xlu0 %v12910_v52  ;;  %v4139_v16 = vpop.xlane.xlu0 %4138  ;;  %v4687_v34 = vmul.f32 %v10008_v17, %v14367_v49  ;;  %v9783_v10 = vld [vmem:[#allocation9 + $0x1d0] ss:$12 sps:$4 sm:$0xff]  }
 0xa07   :  { %v10010_v63 = vpop.eup %10009  ;;  %10019 = vrcp.f32 %v4139_v16  ;;  %6142 = vadd.xlane.f32.xlu1 %v12912_v22  ;;  %v14375_v16 = vld [vmem:[#allocation96_spill] sm:$0xff] }
 0xa08   :  { %7289 = vmatmul.mubr.bf16.vlgmr.msra.gmra.mrb[48].mxu1 %v12987_v11  ;;  %v4141_v45 = vpop.xlane.xlu1 %4140  ;;  %v4688_v36 = vmul.f32 %v10010_v63, %v14368_v37  ;;  %v14376_v63 = vld [vmem:[#allocation98_spill] sm:$0xff] }
 0xa09   :  { %v10012_v19 = vpop.eup %10011  ;;  %10021 = vrcp.f32 %v4141_v45  ;;  %8861 = vmatpush3.bf16.xpose.msra.mxu1 %v12886_v31  ;;  %v9758_v45 = vld [vmem:[#allocation9 + $0xac] ss:$12 sps:$4 sm:$0xff]  }
 0xa0a   :  { %6144 = vadd.xlane.f32.xlu0 %v12920_v53  ;;  %v4545_v52 = vpop.xlane.xlu0 %4544  ;;  %v12996_v9 = vpack.c.bf16 %v4688_v36, %v4687_v34  ;;  %8862 = vmatprep.subr.bf16.mxu1 %v9775_v26  ;;  %v4285_v14 = vmul.f32 %v10012_v19, %v14369_v43 }
 0xa0b   :  { %v10014_v22 = vpop.eup %10013  ;;  %6879 = vmatpush1.bf16.xpose.msra.mxu0 %v9747_v51  ;;  %10023 = vrcp.f32 %v4545_v52  ;;  %6146 = vadd.xlane.f32.xlu1 %v12922_v48  ;;  %v9750_v48 = vld [vmem:[#allocation9 + $0x78] ss:$12 sps:$4 sm:$0xff]  }
 0xa0c   :  { %v4286_v33 = vmul.f32 %v10014_v22, %v14370_v28  ;;  %7296 = vmatprep.mubr.bf16.mxu1 %v12996_v9  ;;  %v4547_v1 = vpop.xlane.xlu1 %4546  ;;  %6880 = vmatprep.subr.bf16.mxu0 %v9752_v35  ;;  %v14378_v35 = vld [vmem:[#allocation101_spill] sm:$0xff] }
 0xa0d   :  { %v10016_v31 = vpop.eup %10015  ;;  %10025 = vrcp.f32 %v4547_v1  ;;  %v14379_v1 = vld [vmem:[#allocation67_spill] sm:$0xff] }
 0xa0e   :  { %v13002_v53 = vpack.c.bf16 %v4286_v33, %v4285_v14  ;;  %6148 = vadd.xlane.f32.xlu0 %v12930_v42  ;;  %v4143_v57 = vpop.xlane.xlu0 %4142  ;;  %v4689_v56 = vmul.f32 %v10016_v31, %v14371_v50  ;;  %v9787_v14 = vld [vmem:[#allocation9 + $0x1e8] ss:$12 sps:$4 sm:$0xff]  }
 0xa0f   :  { %v10018_v5 = vpop.eup %10017  ;;  %10027 = vrcp.f32 %v4143_v57  ;;  %6150 = vadd.xlane.f32.xlu1 %v12932_v44  ;;  %v14373_v44 = vld [vmem:[#allocation27_spill] sm:$0xff] }
 0xa10   :  { %7297 = vmatmul.mubr.bf16.gmra.mrb[52].mxu1 %v13002_v53  ;;  %v4145_v59 = vpop.xlane.xlu1 %4144  ;;  %v4690_v46 = vmul.f32 %v10018_v5, %v14372_v20  ;;  %v14380_v57 = vld [vmem:[#allocation15_spill] sm:$0xff]  ;;  %v9761_v5 = vld [vmem:[#allocation9 + $0xc4] ss:$12 sps:$4 sm:$0xff]  }
 0xa11   :  { %v10020_v3 = vpop.eup %10019  ;;  %10029 = vrcp.f32 %v4145_v59  ;;  %8863 = vmatpush3.bf16.xpose.msra.mxu1 %v9775_v26  ;;  %v14382_v20 = vld [vmem:[#allocation83_spill] sm:$0xff] }
 0xa12   :  { %6152 = vadd.xlane.f32.xlu0 %v12940_v7  ;;  %v4549_v42 = vpop.xlane.xlu0 %4548  ;;  %v13010_v6 = vpack.c.bf16 %v4690_v46, %v4689_v56  ;;  %8864 = vmatprep.subr.bf16.mxu1 %v9779_v41  ;;  %v4287_v55 = vmul.f32 %v10020_v3, %v14373_v44 }
 0xa13   :  { %v10022_v47 = vpop.eup %10021  ;;  %6881 = vmatpush1.bf16.xpose.msra.mxu0 %v9750_v48  ;;  %10031 = vrcp.f32 %v4549_v42  ;;  %6154 = vadd.xlane.f32.xlu1 %v12942_v13  ;;  %v9753_v13 = vld [vmem:[#allocation9 + $0x90] ss:$12 sps:$4 sm:$0xff]  }
 0xa14   :  { %v4288_v4 = vmul.f32 %v10022_v47, %v14374_v58  ;;  %7304 = vmatprep.mubr.bf16.mxu1 %v13010_v6  ;;  %v4551_v15 = vpop.xlane.xlu1 %4550  ;;  %6882 = vmatprep.subr.bf16.mxu0 %v9755_v27  ;;  %v9788_v47 = vld [vmem:[#allocation9 + $0x200] ss:$12 sps:$4 sm:$0xff]   ;;  %v14383_v58 = vld [vmem:[#allocation69_spill] sm:$0xff] }
 0xa15   :  { %v10024_v40 = vpop.eup %10023  ;;  %10033 = vrcp.f32 %v4551_v15  ;;  %v14384_v15 = vld [vmem:[#allocation17_spill] sm:$0xff] }
 0xa16   :  { %v13016_v7 = vpack.c.bf16 %v4288_v4, %v4287_v55  ;;  %6156 = vadd.xlane.f32.xlu0 %v12950_v29  ;;  %v4147_v38 = vpop.xlane.xlu0 %4146  ;;  %v4691_v26 = vmul.f32 %v10024_v40, %v14375_v16  ;;  %v9759_v55 = vld [vmem:[#allocation9 + $0xc0] ss:$12 sps:$4 sm:$0xff]   ;;  %v14385_v16 = vld [vmem:[#allocation81_spill] sm:$0xff] }
 0xa17   :  { %v10026_v2 = vpop.eup %10025  ;;  %10035 = vrcp.f32 %v4147_v38  ;;  %6158 = vadd.xlane.f32.xlu1 %v12952_v54  ;;  %v14377_v54 = vld [vmem:[#allocation66_spill] sm:$0xff]  ;;  %v9764_v38 = vld [vmem:[#allocation9 + $0xdc] ss:$12 sps:$4 sm:$0xff]  }
 0xa18   :  { %7305 = vmatmul.mubr.bf16.gmra.mrb[56].mxu1 %v13016_v7  ;;  %v4149_v17 = vpop.xlane.xlu1 %4148  ;;  %v4692_v51 = vmul.f32 %v10026_v2, %v14376_v63  ;;  %v14386_v63 = vld [vmem:[#allocation85_spill] sm:$0xff] }
 0xa19   :  { %v10028_v49 = vpop.eup %10027  ;;  %10037 = vrcp.f32 %v4149_v17  ;;  %8865 = vmatpush3.bf16.xpose.msra.mxu1 %v9779_v41 }
 0xa1a   :  { %6160 = vadd.xlane.f32.xlu0 %v12958_v61  ;;  %v4553_v29 = vpop.xlane.xlu0 %4552  ;;  %v13024_v34 = vpack.c.bf16 %v4692_v51, %v4691_v26  ;;  %8866 = vmatprep.subr.bf16.mxu1 %v9783_v10  ;;  %v4289_v36 = vmul.f32 %v10028_v49, %v14377_v54  ;;  %v9789_v54 = vld [vmem:[#allocation9 + $0x218] ss:$12 sps:$4 sm:$0xff]  }
 0xa1b   :  { %v10030_v37 = vpop.eup %10029  ;;  %6883 = vmatpush1.bf16.xpose.msra.mxu0 %v9753_v13  ;;  %10039 = vrcp.f32 %v4553_v29  ;;  %6162 = vadd.xlane.f32.xlu1 %v12960_v0  ;;  %v9756_v0 = vld [vmem:[#allocation9 + $0xa8] ss:$12 sps:$4 sm:$0xff]  }
 0xa1c   :  { %v4290_v19 = vmul.f32 %v10030_v37, %v14378_v35  ;;  %7312 = vmatprep.mubr.bf16.mxu1 %v13024_v34  ;;  %v4555_v52 = vpop.xlane.xlu1 %4554  ;;  %6884 = vmatprep.subr.bf16.mxu0 %v9758_v45  ;;  %v9762_v35 = vld [vmem:[#allocation9 + $0xd8] ss:$12 sps:$4 sm:$0xff]  }
 0xa1d   :  { %v10032_v22 = vpop.eup %10031  ;;  %10041 = vrcp.f32 %v4555_v52  ;;  %v14387_v52 = vld [vmem:[#allocation35_spill] sm:$0xff] }
 0xa1e   :  { %v13030_v61 = vpack.c.bf16 %v4290_v19, %v4289_v36  ;;  %6164 = vadd.xlane.f32.xlu0 %v12966_v25  ;;  %v4151_v43 = vpop.xlane.xlu0 %4150  ;;  %v4693_v31 = vmul.f32 %v10032_v22, %v14379_v1 }
 0xa1f   :  { %v10034_v28 = vpop.eup %10033  ;;  %10043 = vrcp.f32 %v4151_v43  ;;  %6166 = vadd.xlane.f32.xlu1 %v12968_v8  ;;  %v14381_v8 = vld [vmem:[#allocation79_spill] sm:$0xff] }
 0xa20   :  { %7313 = vmatmul.mubr.bf16.gmra.mrb[60].mxu1 %v13030_v61  ;;  %v4153_v33 = vpop.xlane.xlu1 %4152  ;;  %v4694_v41 = vmul.f32 %v10034_v28, %v14380_v57  ;;  %v14388_v43 = vld [vmem:[#allocation147_spill] sm:$0xff]  ;;  %v9767_v28 = vld [vmem:[#allocation9 + $0xf4] ss:$12 sps:$4 sm:$0xff]   ;;  %v14389_v57 = vld [vmem:[#allocation57_spill] sm:$0xff] }
 0xa21   :  { %v10036_v48 = vpop.eup %10035  ;;  %10045 = vrcp.f32 %v4153_v33  ;;  %8867 = vmatpush3.bf16.xpose.msra.mxu1 %v9783_v10 }
 0xa22   :  { %6168 = vadd.xlane.f32.xlu0 %v12973_v39  ;;  %v4557_v25 = vpop.xlane.xlu0 %4556  ;;  %v13038_v59 = vpack.c.bf16 %v4694_v41, %v4693_v31  ;;  %8868 = vmatprep.subr.bf16.mxu1 %v9787_v14  ;;  %v4291_v56 = vmul.f32 %v10036_v48, %v14381_v8 }
 0xa23   :  { %v10038_v50 = vpop.eup %10037  ;;  %6885 = vmatpush1.bf16.xpose.msra.mxu0 %v9756_v0  ;;  %10047 = vrcp.f32 %v4557_v25  ;;  %6170 = vadd.xlane.f32.xlu1 %v12976_v18 }
 0xa24   :  { %v4292_v46 = vmul.f32 %v10038_v50, %v14382_v20  ;;  %7320 = vmatprep.mubr.bf16.mxu1 %v13038_v59  ;;  %v4559_v27 = vpop.xlane.xlu1 %4558  ;;  %6886 = vmatprep.subr.bf16.mxu0 %v9761_v5  ;;  %v14390_v5 = vld [vmem:[#allocation87_spill] sm:$0xff]  ;;  %v9792_v20 = vld [vmem:[#allocation9 + $0x230] ss:$12 sps:$4 sm:$0xff]  }
 0xa25   :  { %v10040_v3 = vpop.eup %10039  ;;  %10049 = vrcp.f32 %v4559_v27  ;;  %v9765_v27 = vld [vmem:[#allocation9 + $0xf0] ss:$12 sps:$4 sm:$0xff]  }
 0xa26   :  { %v13044_v39 = vpack.c.bf16 %v4292_v46, %v4291_v56  ;;  %v4155_v42 = vpop.xlane.xlu0 %4154  ;;  %v4695_v4 = vmul.f32 %v10040_v3, %v14383_v58 }
 0xa27   :  { %v10042_v44 = vpop.eup %10041  ;;  %10051 = vrcp.f32 %v4155_v42  ;;  %v14391_v42 = vld [vmem:[#allocation73_spill] sm:$0xff] }
 0xa28   :  { %7321 = vmatmul.mubr.bf16.gmra.mrb[64].mxu1 %v13044_v39  ;;  %v4157_v18 = vpop.xlane.xlu1 %4156  ;;  %v4696_v40 = vmul.f32 %v10042_v44, %v14384_v15  ;;  %v14392_v44 = vld [vmem:[#allocation146_spill] sm:$0xff] }
 0xa29   :  { %v10044_v10 = vpop.eup %10043  ;;  %10053 = vrcp.f32 %v4157_v18  ;;  %8869 = vmatpush3.bf16.xpose.msra.mxu1 %v9787_v14  ;;  %v9770_v18 = vld [vmem:[#allocation9 + $0x10c] ss:$12 sps:$4 sm:$0xff]  }
 0xa2a   :  { %v4561_v2 = vpop.xlane.xlu0 %4560  ;;  %v13049_v13 = vpack.c.bf16 %v4696_v40, %v4695_v4  ;;  %8870 = vmatprep.subr.bf16.mxu1 %v9788_v47  ;;  %v4293_v26 = vmul.f32 %v10044_v10, %v14385_v16 }
 0xa2b   :  { %v10046_v17 = vpop.eup %10045  ;;  %6887 = vmatpush1.bf16.xpose.msra.mxu0 %v9759_v55  ;;  %10055 = vrcp.f32 %v4561_v2  ;;  %v14394_v2 = vld [vmem:[#allocation89_spill] sm:$0xff] }
 0xa2c   :  { %v4294_v51 = vmul.f32 %v10046_v17, %v14386_v63  ;;  %7328 = vmatprep.mubr.bf16.mxu1 %v13049_v13  ;;  %v4563_v45 = vpop.xlane.xlu1 %4562  ;;  %6888 = vmatprep.subr.bf16.mxu0 %v9764_v38  ;;  %v14393_v38 = vld [vmem:[#allocation59_spill] sm:$0xff] }
 0xa2d   :  { %v10048_v49 = vpop.eup %10047  ;;  %10057 = vrcp.f32 %v4563_v45 }
 0xa2e   :  { %v13054_v29 = vpack.c.bf16 %v4294_v51, %v4293_v26  ;;  %v4159_v37 = vpop.xlane.xlu0 %4158  ;;  %v4697_v22 = vmul.f32 %v10048_v49, %v14387_v52  ;;  %v9768_v49 = vld [vmem:[#allocation9 + $0x108] ss:$12 sps:$4 sm:$0xff]  }
 0xa2f   :  { %v10050_v36 = vpop.eup %10049  ;;  %10059 = vrcp.f32 %v4159_v37 }
 0xa30   :  { %7329 = vmatmul.mubr.bf16.gmra.mrb[68].mxu1 %v13054_v29  ;;  %v4161_v19 = vpop.xlane.xlu1 %4160  ;;  %v4698_v14 = vmul.f32 %v10050_v36, %v14388_v43 }
 0xa31   :  { %v10052_v0 = vpop.eup %10051  ;;  %10061 = vrcp.f32 %v4161_v19  ;;  %8871 = vmatpush3.bf16.xpose.msra.mxu1 %v9788_v47 }
 0xa32   :  { %v5739_v33 = vpop.xlane.xlu0 %5738  ;;  %v13059_v1 = vpack.c.bf16 %v4698_v14, %v4697_v22  ;;  %8872 = vmatprep.subr.bf16.mxu1 %v9789_v54  ;;  %v4295_v41 = vmul.f32 %v10052_v0, %v14389_v57  ;;  %v14395_v14 = vld [vmem:[#allocation76_spill] sm:$0xff]  ;;  %v14396_v0 = vld [vmem:[#allocation65_spill] sm:$0xff] }
 0xa33   :  { %v10054_v31 = vpop.eup %10053  ;;  %6889 = vmatpush1.bf16.xpose.msra.mxu0 %v9762_v35  ;;  %10063 = vrcp.f32 %v5739_v33  ;;  %v9774_v35 = vld [vmem:[#allocation9 + $0x124] ss:$12 sps:$4 sm:$0xff]  }
 0xa34   :  { %v4296_v48 = vmul.f32 %v10054_v31, %v14390_v5  ;;  %7336 = vmatprep.mubr.bf16.mxu1 %v13059_v1  ;;  %v5741_v25 = vpop.xlane.xlu1 %5740  ;;  %6890 = vmatprep.subr.bf16.mxu0 %v9767_v28  ;;  %v9772_v5 = vld [vmem:[#allocation9 + $0x120] ss:$12 sps:$4 sm:$0xff]  }
 0xa35   :  { %v10056_v50 = vpop.eup %10055  ;;  %10065 = vrcp.f32 %v5741_v25 }
 0xa36   :  { %v13064_v8 = vpack.c.bf16 %v4296_v48, %v4295_v41  ;;  %v5337_v56 = vpop.xlane.xlu0 %5336  ;;  %v4699_v47 = vmul.f32 %v10056_v50, %v14391_v42  ;;  %v14397_v42 = vld [vmem:[#allocation78_spill] sm:$0xff] }
 0xa37   :  { %v10058_v46 = vpop.eup %10057  ;;  %10067 = vrcp.f32 %v5337_v56  ;;  %v9778_v56 = vld [vmem:[#allocation9 + $0x13c] ss:$12 sps:$4 sm:$0xff]  }
 0xa38   :  { %7337 = vmatmul.mubr.bf16.gmra.mrb[72].mxu1 %v13064_v8  ;;  %v5339_v3 = vpop.xlane.xlu1 %5338  ;;  %v4700_v55 = vmul.f32 %v10058_v46, %v14392_v44  ;;  %v14398_v44 = vld [vmem:[#allocation60_spill] sm:$0xff] }
 0xa39   :  { %v10060_v58 = vpop.eup %10059  ;;  %10069 = vrcp.f32 %v5339_v3  ;;  %8873 = vmatpush3.bf16.xpose.msra.mxu1 %v9789_v54 }
 0xa3a   :  { %v5743_v4 = vpop.xlane.xlu0 %5742  ;;  %v13069_v15 = vpack.c.bf16 %v4700_v55, %v4699_v47  ;;  %8874 = vmatprep.subr.bf16.mxu1 %v9792_v20  ;;  %v4297_v10 = vmul.f32 %v10060_v58, %v14393_v38 }
 0xa3b   :  { %v10062_v40 = vpop.eup %10061  ;;  %6891 = vmatpush1.bf16.xpose.msra.mxu0 %v9765_v27  ;;  %10071 = vrcp.f32 %v5743_v4 }
 0xa3c   :  { %v4298_v17 = vmul.f32 %v10062_v40, %v14394_v2  ;;  %7344 = vmatprep.mubr.bf16.mxu1 %v13069_v15  ;;  %v5745_v16 = vpop.xlane.xlu1 %5744  ;;  %6892 = vmatprep.subr.bf16.mxu0 %v9770_v18  ;;  %v9776_v40 = vld [vmem:[#allocation9 + $0x138] ss:$12 sps:$4 sm:$0xff]  }
 0xa3d   :  { %v10064_v26 = vpop.eup %10063  ;;  %10073 = vrcp.f32 %v5745_v16 }
 0xa3e   :  { %v13074_v63 = vpack.c.bf16 %v4298_v17, %v4297_v10  ;;  %v5341_v51 = vpop.xlane.xlu0 %5340  ;;  %v5891_v54 = vmul.f32 %v10064_v26, %v12726_v60  ;;  %v9782_v17 = vld [vmem:[#allocation9 + $0x154] ss:$12 sps:$4 sm:$0xff]  }
 0xa3f   :  { %v10066_v45 = vpop.eup %10065  ;;  %10075 = vrcp.f32 %v5341_v51 }
 0xa40   :  { %7345 = vmatmul.mubr.bf16.gmra.mrb[76].mxu1 %v13074_v63  ;;  %v5343_v37 = vpop.xlane.xlu1 %5342  ;;  %v5892_v36 = vmul.f32 %v10066_v45, %v12730_v32 }
 0xa41   :  { %v10068_v19 = vpop.eup %10067  ;;  %10077 = vrcp.f32 %v5343_v37  ;;  %8875 = vmatpush3.bf16.xpose.msra.mxu1 %v9792_v20 }
 0xa42   :  { %v5747_v52 = vpop.xlane.xlu0 %5746  ;;  %v13079_v22 = vpack.c.bf16 %v5892_v36, %v5891_v54  ;;  %v5489_v28 = vmul.f32 %v10068_v19, %v14395_v14  ;;  %v14400_v54 = vld [vmem:[#allocation82_spill] sm:$0xff] }
 0xa43   :  { %v10070_v43 = vpop.eup %10069  ;;  %6893 = vmatpush1.bf16.xpose.msra.mxu0 %v9768_v49  ;;  %10079 = vrcp.f32 %v5747_v52  ;;  %v14399_v49 = vld [vmem:[#allocation74_spill] sm:$0xff] }
 0xa44   :  { %v5490_v33 = vmul.f32 %v10070_v43, %v14396_v0  ;;  %7352 = vmatprep.mubr.bf16.mxu1 %v13079_v22  ;;  %v5749_v31 = vpop.xlane.xlu1 %5748  ;;  %6894 = vmatprep.subr.bf16.mxu0 %v9774_v35  ;;  %v9780_v43 = vld [vmem:[#allocation9 + $0x150] ss:$12 sps:$4 sm:$0xff]  }
 0xa45   :  { %v10072_v60 = vpop.eup %10071  ;;  %10081 = vrcp.f32 %v5749_v31  ;;  %v14401_v0 = vld [vmem:[#allocation92_spill] sm:$0xff]  ;;  %v9786_v31 = vld [vmem:[#allocation9 + $0x16c] ss:$12 sps:$4 sm:$0xff]  }
 0xa46   :  { %v13084_v32 = vpack.c.bf16 %v5490_v33, %v5489_v28  ;;  %v5345_v57 = vpop.xlane.xlu0 %5344  ;;  %v5893_v25 = vmul.f32 %v10072_v60, %v12724_v24 }
 0xa47   :  { %v10074_v41 = vpop.eup %10073  ;;  %10083 = vrcp.f32 %v5345_v57 }
 0xa48   :  { %7353 = vmatmul.mubr.bf16.gmra.mrb[80].mxu1 %v13084_v32  ;;  %v5347_v48 = vpop.xlane.xlu1 %5346  ;;  %v5894_v50 = vmul.f32 %v10074_v41, %v12728_v62 }
 0xa49   :  { %v10076_v20 = vpop.eup %10075  ;;  %10085 = vrcp.f32 %v5347_v48  ;;  %v14402_v48 = vld [vmem:[#allocation70_spill] sm:$0xff] }
 0xa4a   :  { %v5751_v46 = vpop.xlane.xlu0 %5750  ;;  %v13089_v27 = vpack.c.bf16 %v5894_v50, %v5893_v25  ;;  %v5491_v47 = vmul.f32 %v10076_v20, %v14397_v42  ;;  %v14403_v50 = vld [vmem:[#allocation110_spill] sm:$0xff] }
 0xa4b   :  { %v10078_v3 = vpop.eup %10077  ;;  %6895 = vmatpush1.bf16.xpose.msra.mxu0 %v9772_v5  ;;  %10087 = vrcp.f32 %v5751_v46 }
 0xa4c   :  { %v5492_v55 = vmul.f32 %v10078_v3, %v14398_v44  ;;  %7360 = vmatprep.mubr.bf16.mxu1 %v13089_v27  ;;  %v5753_v18 = vpop.xlane.xlu1 %5752  ;;  %6896 = vmatprep.subr.bf16.mxu0 %v9778_v56 }
 0xa4d   :  { %v10080_v24 = vpop.eup %10079  ;;  %10089 = vrcp.f32 %v5753_v18  ;;  %v14404_v18 = vld [vmem:[#allocation97_spill] sm:$0xff] }
 0xa4e   :  { %v13094_v62 = vpack.c.bf16 %v5492_v55, %v5491_v47  ;;  %v5349_v58 = vpop.xlane.xlu0 %5348  ;;  %v5895_v10 = vmul.f32 %v10080_v24, %v12734_v21  ;;  %v9784_v47 = vld [vmem:[#allocation9 + $0x168] ss:$12 sps:$4 sm:$0xff]  }
 0xa4f   :  { %v10082_v4 = vpop.eup %10081  ;;  %10091 = vrcp.f32 %v5349_v58  ;;  %v9790_v58 = vld [vmem:[#allocation9 + $0xc8] ss:$12 sps:$4 sm:$0xff]  }
 0xa50   :  { %7361 = vmatmul.mubr.bf16.gmra.mrb[84].mxu1 %v13094_v62  ;;  %v5351_v38 = vpop.xlane.xlu1 %5350  ;;  %v5896_v2 = vmul.f32 %v10082_v4, %v12738_v30 }
 0xa51   :  { %v10084_v16 = vpop.eup %10083  ;;  %10093 = vrcp.f32 %v5351_v38 }
 0xa52   :  { %v5755_v26 = vpop.xlane.xlu0 %5754  ;;  %v13099_v51 = vpack.c.bf16 %v5896_v2, %v5895_v10  ;;  %v5493_v37 = vmul.f32 %v10084_v16, %v14399_v49  ;;  %v14405_v2 = vld [vmem:[#allocation86_spill] sm:$0xff]  ;;  %v14406_v16 = vld [vmem:[#allocation109_spill] sm:$0xff] }
 0xa53   :  { %v10086_v45 = vpop.eup %10085  ;;  %6897 = vmatpush1.bf16.xpose.msra.mxu0 %v9776_v40  ;;  %10095 = vrcp.f32 %v5755_v26 }
 0xa54   :  { %v5494_v36 = vmul.f32 %v10086_v45, %v14400_v54  ;;  %7368 = vmatprep.mubr.bf16.mxu1 %v13099_v51  ;;  %v5757_v35 = vpop.xlane.xlu1 %5756  ;;  %6898 = vmatprep.subr.bf16.mxu0 %v9782_v17 }
 0xa55   :  { %v10088_v21 = vpop.eup %10087  ;;  %10097 = vrcp.f32 %v5757_v35 }
 0xa56   :  { %v13104_v30 = vpack.c.bf16 %v5494_v36, %v5493_v37  ;;  %v5353_v19 = vpop.xlane.xlu0 %5352  ;;  %v5897_v28 = vmul.f32 %v10088_v21, %v12732_v12  ;;  %v9791_v36 = vld [vmem:[#allocation9 + $0x8] ss:$12 sps:$4 sm:$0xff]  }
 0xa57   :  { %v10090_v52 = vpop.eup %10089  ;;  %10099 = vrcp.f32 %v5353_v19  ;;  %v14407_v21 = vld [vmem:[#allocation111_spill] sm:$0xff] }
 0xa58   :  { %7369 = vmatmul.mubr.bf16.gmra.mrb[88].mxu1 %v13104_v30  ;;  %v5355_v14 = vpop.xlane.xlu1 %5354  ;;  %v5898_v33 = vmul.f32 %v10090_v52, %v14401_v0  ;;  %v14408_v52 = vld [vmem:[#allocation114_spill] sm:$0xff] }
 0xa59   :  { %v10092_v60 = vpop.eup %10091  ;;  %10101 = vrcp.f32 %v5355_v14  ;;  %v9793_v14 = vld [vmem:[#allocation9 + $0xe0] ss:$12 sps:$4 sm:$0xff]  }
 0xa5a   :  { %v5759_v57 = vpop.xlane.xlu0 %5758  ;;  %v13109_v41 = vpack.c.bf16 %v5898_v33, %v5897_v28  ;;  %v5495_v25 = vmul.f32 %v10092_v60, %v14402_v48  ;;  %v14409_v60 = vld [vmem:[#allocation80_spill] sm:$0xff] }
 0xa5b   :  { %v10094_v5 = vpop.eup %10093  ;;  %6899 = vmatpush1.bf16.xpose.msra.mxu0 %v9780_v43  ;;  %10103 = vrcp.f32 %v5759_v57 }
 0xa5c   :  { %v5496_v56 = vmul.f32 %v10094_v5, %v14403_v50  ;;  %7376 = vmatprep.mubr.bf16.mxu1 %v13109_v41  ;;  %v5761_v20 = vpop.xlane.xlu1 %5760  ;;  %6900 = vmatprep.subr.bf16.mxu0 %v9786_v31  ;;  %v14410_v5 = vld [vmem:[#allocation84_spill] sm:$0xff] }
 0xa5d   :  { %v10096_v12 = vpop.eup %10095  ;;  %10105 = vrcp.f32 %v5761_v20 }
 0xa5e   :  { %v13114_v46 = vpack.c.bf16 %v5496_v56, %v5495_v25  ;;  %v5357_v3 = vpop.xlane.xlu0 %5356  ;;  %v5899_v55 = vmul.f32 %v10096_v12, %v12742_v23  ;;  %v9794_v12 = vld [vmem:[#allocation9 + $0x20] ss:$12 sps:$4 sm:$0xff]  }
 0xa5f   :  { %v10098_v42 = vpop.eup %10097  ;;  %10107 = vrcp.f32 %v5357_v3  ;;  %v14411_v3 = vld [vmem:[#allocation99_spill] sm:$0xff] }
 0xa60   :  { %7377 = vmatmul.mubr.bf16.gmra.mrb[92].mxu1 %v13114_v46  ;;  %v5359_v44 = vpop.xlane.xlu1 %5358  ;;  %v5900_v24 = vmul.f32 %v10098_v42, %v14404_v18 }
 0xa61   :  { %v10100_v4 = vpop.eup %10099  ;;  %10109 = vrcp.f32 %v5359_v44 }
 0xa62   :  { %v5763_v40 = vpop.xlane.xlu0 %5762  ;;  %v13119_v38 = vpack.c.bf16 %v5900_v24, %v5899_v55  ;;  %v5497_v17 = vmul.f32 %v10100_v4, %v14405_v2  ;;  %v9795_v55 = vld [vmem:[#allocation9 + $0xf8] ss:$12 sps:$4 sm:$0xff]  }
 0xa63   :  { %v10102_v10 = vpop.eup %10101  ;;  %6901 = vmatpush1.bf16.xpose.msra.mxu0 %v9784_v47  ;;  %10111 = vrcp.f32 %v5763_v40  ;;  %v14412_v47 = vld [vmem:[#allocation113_spill] sm:$0xff]  ;;  %v14413_v40 = vld [vmem:[#allocation90_spill] sm:$0xff] }
 0xa64   :  { %v5498_v26 = vmul.f32 %v10102_v10, %v14406_v16  ;;  %7384 = vmatprep.mubr.bf16.mxu1 %v13119_v38  ;;  %v5765_v45 = vpop.xlane.xlu1 %5764  ;;  %8356 = vmatprep.subr.bf16.mxu0 %v9790_v58  ;;  %v14414_v2 = vld [vmem:[#allocation94_spill] sm:$0xff] }
 0xa65   :  { %v10104_v23 = vpop.eup %10103  ;;  %10113 = vrcp.f32 %v5765_v45 }
 0xa66   :  { %v13124_v49 = vpack.c.bf16 %v5498_v26, %v5497_v17  ;;  %v5361_v37 = vpop.xlane.xlu0 %5360  ;;  %v5901_v19 = vmul.f32 %v10104_v23, %v14407_v21 }
 0xa67   :  { %v10106_v54 = vpop.eup %10105  ;;  %10115 = vrcp.f32 %v5361_v37  ;;  %v9796_v37 = vld [vmem:[#allocation9 + $0x38] ss:$12 sps:$4 sm:$0xff]  }
 0xa68   :  { %7385 = vmatmul.mubr.bf16.gmra.mrb[96].mxu1 %v13124_v49  ;;  %v5363_v35 = vpop.xlane.xlu1 %5362  ;;  %v5902_v43 = vmul.f32 %v10106_v54, %v14408_v52  ;;  %v14415_v54 = vld [vmem:[#allocation29_spill] sm:$0xff] }
 0xa69   :  { %v10108_v28 = vpop.eup %10107  ;;  %10117 = vrcp.f32 %v5363_v35  ;;  %v14416_v35 = vld [vmem:[#allocation30_spill] sm:$0xff] }
 0xa6a   :  { %6903 = vmatmul.mubr.bf16.vlgmr.msra.gmra.mrb[16].mxu0 %v12987_v11  ;;  %v5767_v0 = vpop.xlane.xlu0 %5766  ;;  %v13130_v33 = vpack.c.bf16 %v5902_v43, %v5901_v19  ;;  %v5499_v57 = vmul.f32 %v10108_v28, %v14409_v60  ;;  %v9797_v19 = vld [vmem:[#allocation9 + $0x110] ss:$12 sps:$4 sm:$0xff]  }
 0xa6b   :  { %v10110_v31 = vpop.eup %10109  ;;  %10119 = vrcp.f32 %v5767_v0  ;;  %6912 = vmatprep.mubr.bf16.mxu0 %v12996_v9  ;;  %8357 = vmatpush3.bf16.xpose.msra.mxu0 %v9791_v36  ;;  %v14417_v0 = vld [vmem:[#allocation112_spill] sm:$0xff] }
 0xa6c   :  { %v5500_v48 = vmul.f32 %v10110_v31, %v14410_v5  ;;  %7392 = vmatprep.mubr.bf16.mxu1 %v13130_v33  ;;  %v5769_v25 = vpop.xlane.xlu1 %5768  ;;  %8358 = vmatprep.subr.bf16.mxu0 %v9793_v14  ;;  %v14418_v60 = vld [vmem:[#allocation88_spill] sm:$0xff] }
 0xa6d   :  { %v10112_v50 = vpop.eup %10111  ;;  %10121 = vrcp.f32 %v5769_v25 }
 0xa6e   :  { %v13136_v56 = vpack.c.bf16 %v5500_v48, %v5499_v57  ;;  %v5365_v11 = vpop.xlane.xlu0 %5364  ;;  %v5903_v42 = vmul.f32 %v10112_v50, %v14411_v3 }
 0xa6f   :  { %v10114_v20 = vpop.eup %10113  ;;  %10123 = vrcp.f32 %v5365_v11  ;;  %v9798_v11 = vld [vmem:[#allocation9 + $0x50] ss:$12 sps:$4 sm:$0xff]  }
 0xa70   :  { %7393 = vmatmul.mubr.bf16.gmra.mrb[100].mxu1 %v13136_v56  ;;  %v5367_v9 = vpop.xlane.xlu1 %5366  ;;  %v5904_v44 = vmul.f32 %v10114_v20, %v14412_v47  ;;  %v14419_v20 = vld [vmem:[#allocation149_spill] sm:$0xff] }
 0xa71   :  { %v10116_v18 = vpop.eup %10115  ;;  %10125 = vrcp.f32 %v5367_v9  ;;  %v14420_v9 = vld [vmem:[#allocation151_spill] sm:$0xff] }
 0xa72   :  { %6913 = vmatmul.mubr.bf16.gmra.mrb[20].mxu0 %v13002_v53  ;;  %v4935_v24 = vpop.xlane.xlu0 %4934  ;;  %v13142_v58 = vpack.c.bf16 %v5904_v44, %v5903_v42  ;;  %v5501_v10 = vmul.f32 %v10116_v18, %v14413_v40  ;;  %v9799_v42 = vld [vmem:[#allocation9 + $0x128] ss:$12 sps:$4 sm:$0xff]   ;;  %v14422_v40 = vld [vmem:[#allocation150_spill] sm:$0xff] }
 0xa73   :  { %v10118_v4 = vpop.eup %10117  ;;  %10127 = vrcp.f32 %v4935_v24  ;;  %6922 = vmatprep.mubr.bf16.mxu0 %v13010_v6  ;;  %8359 = vmatpush3.bf16.xpose.msra.mxu0 %v9794_v12  ;;  %v14421_v24 = vld [vmem:[#allocation148_spill] sm:$0xff] }
 0xa74   :  { %v5502_v17 = vmul.f32 %v10118_v4, %v14414_v2  ;;  %7400 = vmatprep.mubr.bf16.mxu1 %v13142_v58  ;;  %v4937_v16 = vpop.xlane.xlu1 %4936  ;;  %8360 = vmatprep.subr.bf16.mxu0 %v9795_v55 }
 0xa75   :  { %v10120_v26 = vpop.eup %10119  ;;  %10129 = vrcp.f32 %v4937_v16 }
 0xa76   :  { %v13148_v45 = vpack.c.bf16 %v5502_v17, %v5501_v10  ;;  %v4939_v53 = vpop.xlane.xlu0 %4938  ;;  %v5905_v36 = vmul.f32 %v10120_v26, %v14415_v54 }
 0xa77   :  { %v10122_v23 = vpop.eup %10121  ;;  %10131 = vrcp.f32 %v4939_v53  ;;  %v9800_v53 = vld [vmem:[#allocation9 + $0x68] ss:$12 sps:$4 sm:$0xff]  }
 0xa78   :  { %7401 = vmatmul.mubr.bf16.gmra.mrb[104].mxu1 %v13148_v45  ;;  %v4941_v6 = vpop.xlane.xlu1 %4940  ;;  %v5906_v21 = vmul.f32 %v10122_v23, %v14416_v35  ;;  %v14423_v23 = vld [vmem:[#allocation153_spill] sm:$0xff] }
 0xa79   :  { %v10124_v52 = vpop.eup %10123  ;;  %10133 = vrcp.f32 %v4941_v6  ;;  %v14424_v6 = vld [vmem:[#allocation155_spill] sm:$0xff] }
 0xa7a   :  { %6923 = vmatmul.mubr.bf16.gmra.mrb[24].mxu0 %v13016_v7  ;;  %v4943_v43 = vpop.xlane.xlu0 %4942  ;;  %v13154_v14 = vpack.c.bf16 %v5906_v21, %v5905_v36  ;;  %v5503_v31 = vmul.f32 %v10124_v52, %v14417_v0  ;;  %v9801_v36 = vld [vmem:[#allocation9 + $0x140] ss:$12 sps:$4 sm:$0xff]  }
 0xa7b   :  { %v10126_v28 = vpop.eup %10125  ;;  %10135 = vrcp.f32 %v4943_v43  ;;  %6932 = vmatprep.mubr.bf16.mxu0 %v13024_v34  ;;  %8361 = vmatpush3.bf16.xpose.msra.mxu0 %v9796_v37  ;;  %v14425_v43 = vld [vmem:[#allocation152_spill] sm:$0xff]  ;;  %v14426_v0 = vld [vmem:[#allocation154_spill] sm:$0xff] }
 0xa7c   :  { %v5504_v57 = vmul.f32 %v10126_v28, %v14418_v60  ;;  %7408 = vmatprep.mubr.bf16.mxu1 %v13154_v14  ;;  %v4945_v5 = vpop.xlane.xlu1 %4944  ;;  %8362 = vmatprep.subr.bf16.mxu0 %v9797_v19 }
 0xa7d   :  { %v10128_v48 = vpop.eup %10127  ;;  %10137 = vrcp.f32 %v4945_v5 }
 0xa7e   :  { %v13160_v25 = vpack.c.bf16 %v5504_v57, %v5503_v31  ;;  %v4947_v7 = vpop.xlane.xlu0 %4946  ;;  %v5087_v12 = vmul.f32 %v10128_v48, %v14419_v20 }
 0xa7f   :  { %v10130_v50 = vpop.eup %10129  ;;  %10139 = vrcp.f32 %v4947_v7  ;;  %v9802_v7 = vld [vmem:[#allocation9 + $0x80] ss:$12 sps:$4 sm:$0xff]  }
 0xa80   :  { %7409 = vmatmul.mubr.bf16.gmra.mrb[108].mxu1 %v13160_v25  ;;  %v4949_v34 = vpop.xlane.xlu1 %4948  ;;  %v5088_v3 = vmul.f32 %v10130_v50, %v14420_v9  ;;  %v14427_v50 = vld [vmem:[#allocation157_spill] sm:$0xff] }
 0xa81   :  { %v10132_v47 = vpop.eup %10131  ;;  %10141 = vrcp.f32 %v4949_v34  ;;  %v14428_v34 = vld [vmem:[#allocation159_spill] sm:$0xff] }
 0xa82   :  { %6933 = vmatmul.mubr.bf16.gmra.mrb[28].mxu0 %v13030_v61  ;;  %v4951_v44 = vpop.xlane.xlu0 %4950  ;;  %v13166_v55 = vpack.c.bf16 %v5088_v3, %v5087_v12  ;;  %v5089_v4 = vmul.f32 %v10132_v47, %v14421_v24  ;;  %v9803_v12 = vld [vmem:[#allocation9 + $0x158] ss:$12 sps:$4 sm:$0xff]   ;;  %v14429_v47 = vld [vmem:[#allocation156_spill] sm:$0xff] }
 0xa83   :  { %v10134_v18 = vpop.eup %10133  ;;  %10143 = vrcp.f32 %v4951_v44  ;;  %6942 = vmatprep.mubr.bf16.mxu0 %v13038_v59  ;;  %8363 = vmatpush3.bf16.xpose.msra.mxu0 %v9798_v11 }
 0xa84   :  { %v5090_v10 = vmul.f32 %v10134_v18, %v14422_v40  ;;  %8876 = vmatprep.mubr.bf16.mxu1 %v13166_v55  ;;  %v4953_v2 = vpop.xlane.xlu1 %4952  ;;  %8364 = vmatprep.subr.bf16.mxu0 %v9799_v42  ;;  %v14430_v18 = vld [vmem:[#allocation158_spill] sm:$0xff] }
 0xa85   :  { %v10136_v17 = vpop.eup %10135  ;;  %10145 = vrcp.f32 %v4953_v2  ;;  %v9804_v2 = vld [vmem:[#allocation9 + $0x98] ss:$12 sps:$4 sm:$0xff]  }
 0xa86   :  { %v13172_v16 = vpack.c.bf16 %v5090_v10, %v5089_v4  ;;  %v4955_v61 = vpop.xlane.xlu0 %4954  ;;  %v5091_v37 = vmul.f32 %v10136_v17, %v14423_v23 }
 0xa87   :  { %v10138_v26 = vpop.eup %10137  ;;  %10147 = vrcp.f32 %v4955_v61  ;;  %v14432_v61 = vld [vmem:[#allocation163_spill] sm:$0xff] }
 0xa88   :  { %8877 = vmatmul.mubr.bf16.vlgmr.msra.gmra.mrb[112].mxu1 %v13172_v16  ;;  %v4957_v59 = vpop.xlane.xlu1 %4956  ;;  %v5092_v54 = vmul.f32 %v10138_v26, %v14424_v6 }
 0xa89   :  { %v10140_v35 = vpop.eup %10139  ;;  %10149 = vrcp.f32 %v4957_v59 }
 0xa8a   :  { %6943 = vmatmul.mubr.bf16.gmra.mrb[32].mxu0 %v13044_v39  ;;  %v4959_v21 = vpop.xlane.xlu0 %4958  ;;  %v13178_v19 = vpack.c.bf16 %v5092_v54, %v5091_v37  ;;  %v5093_v28 = vmul.f32 %v10140_v35, %v14425_v43  ;;  %v14433_v37 = vld [vmem:[#allocation160_spill] sm:$0xff]  ;;  %v14434_v54 = vld [vmem:[#allocation162_spill] sm:$0xff] }
 0xa8b   :  { %v10142_v52 = vpop.eup %10141  ;;  %10151 = vrcp.f32 %v4959_v21  ;;  %6952 = vmatprep.mubr.bf16.mxu0 %v13049_v13  ;;  %8365 = vmatpush3.bf16.xpose.msra.mxu0 %v9800_v53 }
 0xa8c   :  { %v5094_v31 = vmul.f32 %v10142_v52, %v14426_v0  ;;  %8880 = vmatprep.mubr.bf16.mxu1 %v13178_v19  ;;  %v4961_v60 = vpop.xlane.xlu1 %4960  ;;  %8366 = vmatprep.subr.bf16.mxu0 %v9801_v36  ;;  %v9806_v52 = vld [vmem:[#allocation9 + $0xb0] ss:$12 sps:$4 sm:$0xff]  }
 0xa8d   :  { %v10144_v57 = vpop.eup %10143  ;;  %10153 = vrcp.f32 %v4961_v60 }
 0xa8e   :  { %v13184_v5 = vpack.c.bf16 %v5094_v31, %v5093_v28  ;;  %v4963_v39 = vpop.xlane.xlu0 %4962  ;;  %v5095_v11 = vmul.f32 %v10144_v57, %v14427_v50 }
 0xa8f   :  { %v10146_v48 = vpop.eup %10145  ;;  %10155 = vrcp.f32 %v4963_v39 }
 0xa90   :  { %8881 = vmatmul.mubr.bf16.gmra.mrb[116].mxu1 %v13184_v5  ;;  %v4965_v13 = vpop.xlane.xlu1 %4964  ;;  %v5096_v20 = vmul.f32 %v10146_v48, %v14428_v34 }
 0xa91   :  { %v10148_v9 = vpop.eup %10147  ;;  %10157 = vrcp.f32 %v4965_v13 }
 0xa92   :  { %6953 = vmatmul.mubr.bf16.gmra.mrb[36].mxu0 %v13054_v29  ;;  %v13190_v3 = vpack.c.bf16 %v5096_v20, %v5095_v11  ;;  %v5097_v44 = vmul.f32 %v10148_v9, %v14429_v47  ;;  %v14431_v29 = vld [vmem:[#allocation161_spill] sm:$0xff] }
 0xa93   :  { %v10150_v42 = vpop.eup %10149  ;;  %6962 = vmatprep.mubr.bf16.mxu0 %v13059_v1  ;;  %8367 = vmatpush3.bf16.xpose.msra.mxu0 %v9802_v7  ;;  %v9805_v1 = vld [vmem:[#allocation9 + $0x170] ss:$12 sps:$4 sm:$0xff]   ;;  %v6141_v21 = vpop.xlane.xlu0 %6140 }
 0xa94   :  { %v5098_v24 = vmul.f32 %v10150_v42, %v14430_v18  ;;  %8884 = vmatprep.mubr.bf16.mxu1 %v13190_v3  ;;  %8368 = vmatprep.subr.bf16.mxu0 %v9803_v12  ;;  %v6143_v43 = vpop.xlane.xlu1 %6142  ;;  %10159 = vrcp.f32 %v6141_v21 }
 0xa95   :  { %v10152_v4 = vpop.eup %10151 }
 0xa96   :  { %v13196_v40 = vpack.c.bf16 %v5098_v24, %v5097_v44  ;;  %v5099_v17 = vmul.f32 %v10152_v4, %v14431_v29 }
 0xa97   :  { %v10154_v10 = vpop.eup %10153 }
 0xa98   :  { %8885 = vmatmul.mubr.bf16.gmra.mrb[120].mxu1 %v13196_v40  ;;  %v5100_v26 = vmul.f32 %v10154_v10, %v14432_v61 }
 0xa99   :  { %v10156_v53 = vpop.eup %10155 }
 0xa9a   :  { %6963 = vmatmul.mubr.bf16.gmra.mrb[40].mxu0 %v13064_v8  ;;  %v13202_v59 = vpack.c.bf16 %v5100_v26, %v5099_v17  ;;  %v5101_v6 = vmul.f32 %v10156_v53, %v14433_v37  ;;  %v6145_v8 = vpop.xlane.xlu0 %6144 }
 0xa9b   :  { %v10158_v23 = vpop.eup %10157  ;;  %6972 = vmatprep.mubr.bf16.mxu0 %v13069_v15  ;;  %8369 = vmatpush3.bf16.xpose.msra.mxu0 %v9804_v2  ;;  %v6147_v15 = vpop.xlane.xlu1 %6146  ;;  %10161 = vrcp.f32 %v6145_v8 }
 0xa9c   :  { %v5102_v36 = vmul.f32 %v10158_v23, %v14434_v54  ;;  %8888 = vmatprep.mubr.bf16.mxu1 %v13202_v59  ;;  %8370 = vmatprep.subr.bf16.mxu0 %v9805_v1  ;;  %10163 = vrcp.f32 %v6147_v15 }
 0xa9d   :  { %10165 = vrcp.f32 %v6143_v43 }
 0xa9e   :  { %v13208_v35 = vpack.c.bf16 %v5102_v36, %v5101_v6  ;;  %v6149_v28 = vpop.xlane.xlu0 %6148 }
 0xa9f   :  { %v6151_v0 = vpop.xlane.xlu1 %6150  ;;  %10167 = vrcp.f32 %v6149_v28 }
 0xaa0   :  { %8889 = vmatmul.mubr.bf16.gmra.mrb[124].mxu1 %v13208_v35 }
 0xaa2   :  { %6973 = vmatmul.mubr.bf16.gmra.mrb[44].mxu0 %v13074_v63  ;;  %v6153_v31 = vpop.xlane.xlu0 %6152 }
 0xaa3   :  { %6982 = vmatprep.mubr.bf16.mxu0 %v13079_v22  ;;  %8371 = vmatpush3.bf16.xpose.msra.mxu0 %v9806_v52  ;;  %v6155_v60 = vpop.xlane.xlu1 %6154  ;;  %10169 = vrcp.f32 %v6153_v31 }
 0xaa4   :  { %10171 = vrcp.f32 %v6155_v60 }
 0xaa5   :  { %10173 = vrcp.f32 %v6151_v0 }
 0xaa6   :  { %v6157_v63 = vpop.xlane.xlu0 %6156 }
 0xaa7   :  { %v6159_v22 = vpop.xlane.xlu1 %6158  ;;  %10175 = vrcp.f32 %v6157_v63 }
 0xaaa   :  { %6983 = vmatmul.mubr.bf16.gmra.mrb[48].mxu0 %v13084_v32  ;;  %v10160_v32 = vpop.eup %10159 }
 0xaab   :  { %6992 = vmatprep.mubr.bf16.mxu0 %v13089_v27  ;;  %v6161_v27 = vpop.xlane.xlu0 %6160  ;;  %v10162_v39 = vpop.eup %10161 }
 0xaac   :  { %10177 = vrcp.f32 %v6161_v27 }
 0xab2   :  { %6993 = vmatmul.mubr.bf16.gmra.mrb[52].mxu0 %v13094_v62  ;;  %v6163_v62 = vpop.xlane.xlu1 %6162 }
 0xab3   :  { %7002 = vmatprep.mubr.bf16.mxu0 %v13099_v51  ;;  %v10164_v51 = vpop.eup %10163  ;;  %10179 = vrcp.f32 %v6163_v62 }
 0xab4   :  { %v10166_v13 = vpop.eup %10165  ;;  %10181 = vrcp.f32 %v6159_v22 }
 0xab5   :  { %v10168_v47 = vpop.eup %10167 }
 0xab6   :  { %v6167_v42 = vpop.xlane.xlu1 %6166  ;;  %v10170_v18 = vpop.eup %10169 }
 0xab7   :  { %v10172_v4 = vpop.eup %10171 }
 0xab8   :  { %v10174_v10 = vpop.eup %10173 }
 0xab9   :  { %v10176_v37 = vpop.eup %10175 }
 0xaba   :  { %7003 = vmatmul.mubr.bf16.gmra.mrb[56].mxu0 %v13104_v30  ;;  %v6171_v1 = vpop.xlane.xlu1 %6170  ;;  %v10178_v54 = vpop.eup %10177 }
 0xabb   :  { %7012 = vmatprep.mubr.bf16.mxu0 %v13109_v41  ;;  %v6165_v41 = vpop.xlane.xlu0 %6164 }
 0xabc   :  { %10183 = vrcp.f32 %v6165_v41 }
 0xabd   :  { %v8846_v57 = vpop.f32.mrb[0].mxu0  ;;  %v10180_v21 = vpop.eup %10179 }
 0xabe   :  { %v6214_v48 = vpop.f32.mrb[1].mxu0  ;;  %v6295_v50 = vmul.f32 %v10162_v39, %v8846_v57  ;;  %v10182_v43 = vpop.eup %10181 }
 0xabf   :  { %v8847_v7 = vpop.f32.mrb[2].mxu0  ;;  %v6293_v20 = vmul.f32 %v10160_v32, %v6214_v48  ;;  %v6169_v61 = vpop.xlane.xlu0 %6168 }
 0xac0   :  { %v6296_v11 = vmul.f32 %v10164_v51, %v8847_v7  ;;  %v6217_v34 = vpop.f32.mrb[3].mxu0  ;;  %10185 = vrcp.f32 %v6169_v61 }
 0xac1   :  { %v6294_v30 = vmul.f32 %v10166_v13, %v6217_v34  ;;  %10187 = vrcp.f32 %v6171_v1 }
 0xac2   :  { %v13219_v12 = vpack.c.bf16 %v6296_v11, %v6295_v50  ;;  %7013 = vmatmul.mubr.bf16.gmra.mrb[60].mxu0 %v13114_v46  ;;  %10189 = vrcp.f32 %v6167_v42 }
 0xac3   :  { %v13222_v9 = vpack.c.bf16 %v6294_v30, %v6293_v20  ;;  %7022 = vmatprep.mubr.bf16.mxu0 %v13119_v38 }
 0xac5   :  { %v8850_v44 = vpop.f32.mrb[4].mxu0  ;;  %8892 = vmatprep.mubr.bf16.mxu1 %v13222_v9 }
 0xac6   :  { %v6230_v24 = vpop.f32.mrb[5].mxu0  ;;  %8893 = vmatmul.mubr.bf16.gmra.mrb[128].mxu1 %v13219_v12  ;;  %v6299_v2 = vmul.f32 %v10170_v18, %v8850_v44  ;;  %v10184_v60 = vpop.eup %10183 }
 0xac7   :  { %v8851_v46 = vpop.f32.mrb[6].mxu0  ;;  %v6297_v38 = vmul.f32 %v10168_v47, %v6230_v24 }
 0xac8   :  { %v6300_v29 = vmul.f32 %v10172_v4, %v8851_v46  ;;  %v6233_v17 = vpop.f32.mrb[7].mxu0 }
 0xac9   :  { %v6298_v26 = vmul.f32 %v10174_v10, %v6233_v17 }
 0xaca   :  { %v13227_v53 = vpack.c.bf16 %v6300_v29, %v6299_v2  ;;  %7023 = vmatmul.mubr.bf16.gmra.mrb[64].mxu0 %v13124_v49  ;;  %v10186_v22 = vpop.eup %10185 }
 0xacb   :  { %v13230_v23 = vpack.c.bf16 %v6298_v26, %v6297_v38  ;;  %7032 = vmatprep.mubr.bf16.mxu0 %v13130_v33  ;;  %v10188_v27 = vpop.eup %10187 }
 0xacc   :  { %v10190_v39 = vpop.eup %10189 }
 0xacd   :  { %v8854_v6 = vpop.f32.mrb[8].mxu0  ;;  %8896 = vmatprep.mubr.bf16.mxu1 %v13230_v23 }
 0xace   :  { %v6246_v36 = vpop.f32.mrb[9].mxu0  ;;  %8897 = vmatmul.mubr.bf16.gmra.mrb[132].mxu1 %v13227_v53  ;;  %v6303_v49 = vmul.f32 %v10178_v54, %v8854_v6 }
 0xacf   :  { %v8855_v52 = vpop.f32.mrb[10].mxu0  ;;  %v6301_v28 = vmul.f32 %v10176_v37, %v6246_v36 }
 0xad0   :  { %v6304_v8 = vmul.f32 %v10180_v21, %v8855_v52  ;;  %v6249_v15 = vpop.f32.mrb[11].mxu0 }
 0xad1   :  { %v6302_v0 = vmul.f32 %v10182_v43, %v6249_v15 }
 0xad2   :  { %v13235_v33 = vpack.c.bf16 %v6304_v8, %v6303_v49  ;;  %7033 = vmatmul.mubr.bf16.gmra.mrb[68].mxu0 %v13136_v56 }
 0xad3   :  { %v13238_v31 = vpack.c.bf16 %v6302_v0, %v6301_v28  ;;  %7042 = vmatprep.mubr.bf16.mxu0 %v13142_v58 }
 0xad5   :  { %v8858_v63 = vpop.f32.mrb[12].mxu0  ;;  %8900 = vmatprep.mubr.bf16.mxu1 %v13238_v31 }
 0xad6   :  { %v6262_v32 = vpop.f32.mrb[13].mxu0  ;;  %8901 = vmatmul.mubr.bf16.gmra.mrb[136].mxu1 %v13235_v33  ;;  %v6307_v62 = vmul.f32 %v10186_v22, %v8858_v63 }
 0xad7   :  { %v8859_v57 = vpop.f32.mrb[14].mxu0  ;;  %v6305_v7 = vmul.f32 %v10184_v60, %v6262_v32 }
 0xad8   :  { %v6308_v48 = vmul.f32 %v10188_v27, %v8859_v57  ;;  %v6265_v51 = vpop.f32.mrb[15].mxu0 }
 0xad9   :  { %v6306_v56 = vmul.f32 %v10190_v39, %v6265_v51 }
 0xada   :  { %v13243_v13 = vpack.c.bf16 %v6308_v48, %v6307_v62  ;;  %7043 = vmatmul.mubr.bf16.gmra.mrb[72].mxu0 %v13148_v45 }
 0xadb   :  { %v13246_v58 = vpack.c.bf16 %v6306_v56, %v6305_v7  ;;  %7052 = vmatprep.mubr.bf16.mxu0 %v13154_v14  ;;  %v13249_v50 = vpop.f32.mrb[48].mxu1 }
 0xadc   :  { %v7292_v11 = vpop.f32.mrb[49].mxu1 }
 0xadd   :  { %v13251_v34 = vpop.f32.mrb[50].mxu1  ;;  %8904 = vmatprep.mubr.bf16.mxu1 %v13246_v58 }
 0xade   :  { %v7295_v20 = vpop.f32.mrb[51].mxu1  ;;  %8905 = vmatmul.mubr.bf16.gmra.mrb[140].mxu1 %v13243_v13 }
 0xae2   :  { %7053 = vmatmul.mubr.bf16.gmra.mrb[76].mxu0 %v13160_v25 }
 0xae3   :  { %8372 = vmatprep.mubr.bf16.mxu0 %v13166_v55  ;;  %v13257_v30 = vpop.f32.mrb[52].mxu1 }
 0xae4   :  { %v7300_v45 = vpop.f32.mrb[53].mxu1 }
 0xae5   :  { %v13259_v41 = vpop.f32.mrb[54].mxu1 }
 0xae6   :  { %v7303_v14 = vpop.f32.mrb[55].mxu1 }
 0xaea   :  { %8373 = vmatmul.mubr.bf16.vlgmr.msra.gmra.mrb[16].mxu0 %v13166_v55 }
 0xaeb   :  { %8374 = vmatprep.mubr.bf16.mxu0 %v13172_v16  ;;  %v13263_v42 = vpop.f32.mrb[56].mxu1 }
 0xaec   :  { %v7308_v47 = vpop.f32.mrb[57].mxu1 }
 0xaed   :  { %v13265_v44 = vpop.f32.mrb[58].mxu1 }
 0xaee   :  { %v7311_v18 = vpop.f32.mrb[59].mxu1 }
 0xaef   :  { %v10247_v18 = vld [vmem:[%s13497_s3] sm:$0x7]  ;;  %s10350_s3 = smov [#allocation10]  }
 0xaf0   :  { %s7679_s30 = sshll.u32 %s10350_s3, 4  ;;  %s7680_s30 = int_to_ptr.vmem [resolvable:$true] %s7679_s30 }
 0xaf1   :  { %s10314_s5 = scalar_lea.vmem %s7680_s30, 12288  ;;  %p10319_p11 = scmp.lt.s32.totalorder %s7680_s30, %s7680_s30 }
 0xaf2   :  { %8375 = vmatmul.mubr.bf16.gmra.mrb[20].mxu0 %v13172_v16  ;;  %p10315_p10 = scmp.ne.s32.totalorder %s7680_s30, %s10314_s5  ;;  %p10320_p12 = scmp.lt.s32.totalorder %s10314_s5, %s10314_s5 }
 0xaf3   :  { %8376 = vmatprep.mubr.bf16.mxu0 %v13178_v19  ;;  %v13269_v25 = vpop.f32.mrb[60].mxu1 }
 0xaf4   :  { %v7316_v24 = vpop.f32.mrb[61].mxu1  ;;  %p10321_p13 = por %p10320_p12, %p10319_p11 }
 0xaf5   :  { %v13271_v4 = vpop.f32.mrb[62].mxu1 }
 0xaf6   :  { %v7319_v46 = vpop.f32.mrb[63].mxu1  ;;  %p10322_p0 = pnand %p10321_p13, %p10315_p10 }
 0xafa   :  { %8377 = vmatmul.mubr.bf16.gmra.mrb[24].mxu0 %v13178_v19 }
 0xafb   :  { %8378 = vmatprep.mubr.bf16.mxu0 %v13184_v5  ;;  %v13275_v55 = vpop.f32.mrb[64].mxu1 }
 0xafc   :  { %v7324_v10 = vpop.f32.mrb[65].mxu1 }
 0xafd   :  { %v13277_v2 = vpop.f32.mrb[66].mxu1 }
 0xafe   :  { %v7327_v29 = vpop.f32.mrb[67].mxu1 }
 0xb02   :  { %8379 = vmatmul.mubr.bf16.gmra.mrb[28].mxu0 %v13184_v5 }
 0xb03   :  { %8380 = vmatprep.mubr.bf16.mxu0 %v13190_v3  ;;  %v13281_v16 = vpop.f32.mrb[68].mxu1 }
 0xb04   :  { %v7332_v17 = vpop.f32.mrb[69].mxu1 }
 0xb05   :  { %v13283_v61 = vpop.f32.mrb[70].mxu1 }
 0xb06   :  { %v7335_v38 = vpop.f32.mrb[71].mxu1 }
 0xb0a   :  { %8381 = vmatmul.mubr.bf16.gmra.mrb[32].mxu0 %v13190_v3 }
 0xb0b   :  { %8382 = vmatprep.mubr.bf16.mxu0 %v13196_v40  ;;  %v13287_v19 = vpop.f32.mrb[72].mxu1 }
 0xb0c   :  { %v7340_v26 = vpop.f32.mrb[73].mxu1 }
 0xb0d   :  { %v13289_v1 = vpop.f32.mrb[74].mxu1 }
 0xb0e   :  { %v7343_v37 = vpop.f32.mrb[75].mxu1 }
 0xb12   :  { %8383 = vmatmul.mubr.bf16.gmra.mrb[36].mxu0 %v13196_v40 }
 0xb13   :  { %8384 = vmatprep.mubr.bf16.mxu0 %v13202_v59  ;;  %v13293_v5 = vpop.f32.mrb[76].mxu1 }
 0xb14   :  { %v7348_v6 = vpop.f32.mrb[77].mxu1 }
 0xb15   :  { %v13295_v54 = vpop.f32.mrb[78].mxu1 }
 0xb16   :  { %v7351_v36 = vpop.f32.mrb[79].mxu1 }
 0xb1a   :  { %8385 = vmatmul.mubr.bf16.gmra.mrb[40].mxu0 %v13202_v59 }
 0xb1b   :  { %8386 = vmatprep.mubr.bf16.mxu0 %v13208_v35  ;;  %v13299_v3 = vpop.f32.mrb[80].mxu1 }
 0xb1c   :  { %v7356_v21 = vpop.f32.mrb[81].mxu1 }
 0xb1d   :  { %v13301_v52 = vpop.f32.mrb[82].mxu1 }
 0xb1e   :  { %v7359_v43 = vpop.f32.mrb[83].mxu1 }
 0xb22   :  { %8387 = vmatmul.mubr.bf16.gmra.mrb[44].mxu0 %v13208_v35 }
 0xb23   :  { %8388 = vmatprep.mubr.bf16.mxu0 %v13222_v9  ;;  %v13305_v40 = vpop.f32.mrb[84].mxu1 }
 0xb24   :  { %v7364_v49 = vpop.f32.mrb[85].mxu1 }
 0xb25   :  { %v13307_v8 = vpop.f32.mrb[86].mxu1 }
 0xb26   :  { %v7367_v15 = vpop.f32.mrb[87].mxu1 }
 0xb2a   :  { %8389 = vmatmul.mubr.bf16.gmra.mrb[48].mxu0 %v13222_v9 }
 0xb2b   :  { %8390 = vmatprep.mubr.bf16.mxu0 %v13219_v12  ;;  %v13311_v59 = vpop.f32.mrb[88].mxu1 }
 0xb2c   :  { %v7372_v28 = vpop.f32.mrb[89].mxu1 }
 0xb2d   :  { %v13313_v0 = vpop.f32.mrb[90].mxu1 }
 0xb2e   :  { %v7375_v60 = vpop.f32.mrb[91].mxu1 }
 0xb32   :  { %8391 = vmatmul.mubr.bf16.gmra.mrb[52].mxu0 %v13219_v12 }
 0xb33   :  { %8392 = vmatprep.mubr.bf16.mxu0 %v13230_v23  ;;  %v13317_v35 = vpop.f32.mrb[92].mxu1 }
 0xb34   :  { %v7380_v63 = vpop.f32.mrb[93].mxu1 }
 0xb35   :  { %v13319_v22 = vpop.f32.mrb[94].mxu1 }
 0xb36   :  { %v7383_v32 = vpop.f32.mrb[95].mxu1 }
 0xb3a   :  { %8393 = vmatmul.mubr.bf16.gmra.mrb[56].mxu0 %v13230_v23 }
 0xb3b   :  { %8394 = vmatprep.mubr.bf16.mxu0 %v13227_v53  ;;  %v13323_v9 = vpop.f32.mrb[96].mxu1 }
 0xb3c   :  { %v7388_v27 = vpop.f32.mrb[97].mxu1 }
 0xb3d   :  { %v13325_v57 = vpop.f32.mrb[98].mxu1 }
 0xb3e   :  { %v7391_v39 = vpop.f32.mrb[99].mxu1 }
 0xb42   :  { %8395 = vmatmul.mubr.bf16.gmra.mrb[60].mxu0 %v13227_v53  ;;  %v14435_v53 = vld [vmem:[#allocation47_spill] sm:$0xff] }
 0xb43   :  { %8396 = vmatprep.mubr.bf16.mxu0 %v13238_v31  ;;  %v13329_v12 = vpop.f32.mrb[100].mxu1  ;;  %v6481_v20 = vsub.s32 2, %v14435_v53 }
 0xb44   :  { %v7396_v62 = vpop.f32.mrb[101].mxu1 }
 0xb45   :  { %v13331_v48 = vpop.f32.mrb[102].mxu1  ;;  %v13349_v24 = vrot.slane %v10247_v18, %v6481_v20 }
 0xb46   :  { %v7399_v51 = vpop.f32.mrb[103].mxu1 }
 0xb47   :  { %v7299_v46 = vadd.f32 %v13257_v30, %v13349_v24  ;;  %v7302_v29 = vadd.f32 %v13259_v41, %v13349_v24  ;;  %v7294_v26 = vadd.f32 %v13251_v34, %v13349_v24  ;;  %v7307_v41 = vadd.f32 %v13263_v42, %v13349_v24 }
 0xb48   :  { %v7318_v34 = vadd.f32 %v13271_v4, %v13349_v24  ;;  %v7310_v15 = vadd.f32 %v13265_v44, %v13349_v24  ;;  %v7323_v42 = vadd.f32 %v13275_v55, %v13349_v24  ;;  %v7334_v27 = vadd.f32 %v13283_v61, %v13349_v24 }
 0xb49   :  { %v7326_v62 = vadd.f32 %v13277_v2, %v13349_v24  ;;  %v7347_v55 = vadd.f32 %v13293_v5, %v13349_v24  ;;  %v7342_v18 = vadd.f32 %v13289_v1, %v13349_v24  ;;  %v7355_v5 = vadd.f32 %v13299_v3, %v13349_v24 }
 0xb4a   :  { %8397 = vmatmul.mubr.bf16.gmra.mrb[64].mxu0 %v13238_v31  ;;  %v7379_v3 = vadd.f32 %v13317_v35, %v13349_v24  ;;  %v7387_v35 = vadd.f32 %v13323_v9, %v13349_v24 }
 0xb4b   :  { %8398 = vmatprep.mubr.bf16.mxu0 %v13235_v33  ;;  %v13335_v23 = vpop.f32.mrb[104].mxu1 }
 0xb4c   :  { %v7404_v7 = vpop.f32.mrb[105].mxu1 }
 0xb4d   :  { %v13337_v56 = vpop.f32.mrb[106].mxu1 }
 0xb4e   :  { %v7407_v11 = vpop.f32.mrb[107].mxu1 }
 0xb52   :  { %8399 = vmatmul.mubr.bf16.gmra.mrb[68].mxu0 %v13235_v33  ;;  %v7291_v33 = vadd.f32 %v13249_v50, %v13349_v24  ;;  %v7315_v50 = vadd.f32 %v13269_v25, %v13349_v24 }
 0xb53   :  { %8400 = vmatprep.mubr.bf16.mxu0 %v13246_v58  ;;  %v13342_v45 = vpop.f32.mrb[108].mxu1 }
 0xb54   :  { %v7412_v14 = vpop.f32.mrb[109].mxu1  ;;  %v7411_v9 = vadd.f32 %v13342_v45, %v13349_v24 }
 0xb55   :  { %v13344_v47 = vpop.f32.mrb[110].mxu1  ;;  %v7350_v14 = vadd.f32 %v13295_v54, %v13349_v24 }
 0xb56   :  { %v7415_v31 = vpop.f32.mrb[111].mxu1 }
 0xb5a   :  { %8401 = vmatmul.mubr.bf16.gmra.mrb[72].mxu0 %v13246_v58 }
 0xb5b   :  { %8402 = vmatprep.mubr.bf16.mxu0 %v13243_v13  ;;  %v8878_v10 = vpop.f32.mrb[112].mxu1 }
 0xb5c   :  { %v7460_v17 = vadd.f32 %v8878_v10, %v7299_v46  ;;  %v7451_v38 = vpop.f32.mrb[113].mxu1 }
 0xb5d   :  { %v7452_v37 = vadd.f32 %v7451_v38, %v7291_v33  ;;  %v8879_v6 = vpop.f32.mrb[114].mxu1  ;;  %v7366_v38 = vadd.f32 %v13307_v8, %v13349_v24 }
 0xb5e   :  { %7586 = vst [vmem:[#allocation10 + $0x40] sm:$0xff] %v7460_v17  ;;  %v7463_v30 = vadd.f32 %v8879_v6, %v7302_v29  ;;  %v7454_v36 = vpop.f32.mrb[115].mxu1 }
 0xb5f   :  { %7580 = vst [vmem:[#allocation10 + $0x10] sm:$0xff] %v7452_v37  ;;  %v7455_v58 = vadd.f32 %v7454_v36, %v7294_v26  ;;  %v7358_v37 = vadd.f32 %v13301_v52, %v13349_v24 }
 0xb60   :  { %7589 = vst [vmem:[#allocation10 + $0x58] sm:$0xff] %v7463_v30 }
 0xb61   :  { %7583 = vst [vmem:[#allocation10 + $0x28] sm:$0xff] %v7455_v58 }
 0xb62   :  { %8403 = vmatmul.mubr.bf16.gmra.mrb[76].mxu0 %v13243_v13  ;;  %v7331_v13 = vadd.f32 %v13281_v16, %v13349_v24  ;;  %v7339_v16 = vadd.f32 %v13287_v19, %v13349_v24  ;;  %v7363_v19 = vadd.f32 %v13305_v40, %v13349_v24  ;;  %v7371_v40 = vadd.f32 %v13311_v59, %v13349_v24 }
 0xb63   :  { %v8882_v21 = vpop.f32.mrb[116].mxu1  ;;  %v7395_v59 = vadd.f32 %v13329_v12, %v13349_v24  ;;  %v7403_v12 = vadd.f32 %v13335_v23, %v13349_v24  ;;  %v14436_v23 = vld [vmem:[#allocation45_spill] sm:$0xff] }
 0xb64   :  { %v7476_v43 = vadd.f32 %v8882_v21, %v7315_v50  ;;  %v7467_v49 = vpop.f32.mrb[117].mxu1 }
 0xb65   :  { %v7468_v28 = vadd.f32 %v7467_v49, %v7307_v41  ;;  %v8883_v60 = vpop.f32.mrb[118].mxu1  ;;  %v7382_v41 = vadd.f32 %v13319_v22, %v13349_v24 }
 0xb66   :  { %7598 = vst [vmem:[#allocation10 + $0xa0] sm:$0xff] %v7476_v43  ;;  %v7479_v63 = vadd.f32 %v8883_v60, %v7318_v34  ;;  %v7470_v32 = vpop.f32.mrb[119].mxu1  ;;  %v7374_v34 = vadd.f32 %v13313_v0, %v13349_v24 }
 0xb67   :  { %7592 = vst [vmem:[#allocation10 + $0x70] sm:$0xff] %v7468_v28  ;;  %v7471_v25 = vadd.f32 %v7470_v32, %v7310_v15 }
 0xb68   :  { %7601 = vst [vmem:[#allocation10 + $0xb8] sm:$0xff] %v7479_v63  ;;  %v7398_v63 = vadd.f32 %v13331_v48, %v13349_v24 }
 0xb69   :  { %7595 = vst [vmem:[#allocation10 + $0x88] sm:$0xff] %v7471_v25  ;;  %v7390_v25 = vadd.f32 %v13325_v57, %v13349_v24 }
 0xb6b   :  { %v8886_v4 = vpop.f32.mrb[120].mxu1 }
 0xb6c   :  { %v7492_v44 = vadd.f32 %v8886_v4, %v7331_v13  ;;  %v7483_v39 = vpop.f32.mrb[121].mxu1 }
 0xb6d   :  { %v7484_v51 = vadd.f32 %v7483_v39, %v7323_v42  ;;  %v8887_v7 = vpop.f32.mrb[122].mxu1  ;;  %v7414_v39 = vadd.f32 %v13344_v47, %v13349_v24 }
 0xb6e   :  { %7610 = vst [vmem:[#allocation10 + $0x100] sm:$0xff] %v7492_v44  ;;  %v7495_v11 = vadd.f32 %v8887_v7, %v7334_v27  ;;  %v7486_v53 = vpop.f32.mrb[123].mxu1 }
 0xb6f   :  { %7604 = vst [vmem:[#allocation10 + $0xd0] sm:$0xff] %v7484_v51  ;;  %v7487_v20 = vadd.f32 %v7486_v53, %v7326_v62  ;;  %v7406_v51 = vadd.f32 %v13337_v56, %v13349_v24 }
 0xb70   :  { %7613 = vst [vmem:[#allocation10 + $0x118] sm:$0xff] %v7495_v11 }
 0xb71   :  { %7607 = vst [vmem:[#allocation10 + $0xe8] sm:$0xff] %v7487_v20 }
 0xb73   :  { %v8890_v61 = vpop.f32.mrb[124].mxu1 }
 0xb74   :  { %v7508_v2 = vadd.f32 %v8890_v61, %v7347_v55  ;;  %v7499_v31 = vpop.f32.mrb[125].mxu1 }
 0xb75   :  { %v7500_v46 = vadd.f32 %v7499_v31, %v7339_v16  ;;  %v8891_v33 = vpop.f32.mrb[126].mxu1 }
 0xb76   :  { %7622 = vst [vmem:[#allocation10 + $0x160] sm:$0xff] %v7508_v2  ;;  %v7511_v10 = vadd.f32 %v8891_v33, %v7350_v14  ;;  %v7502_v29 = vpop.f32.mrb[127].mxu1  ;;  %v14437_v14 = vld [vmem:[#allocation53_spill] sm:$0xff] }
 0xb77   :  { %7616 = vst [vmem:[#allocation10 + $0x130] sm:$0xff] %v7500_v46  ;;  %v7503_v17 = vadd.f32 %v7502_v29, %v7342_v18 }
 0xb78   :  { %7625 = vst [vmem:[#allocation10 + $0x178] sm:$0xff] %v7511_v10 }
 0xb79   :  { %7619 = vst [vmem:[#allocation10 + $0x148] sm:$0xff] %v7503_v17 }
 0xb99   :  { %v8894_v54 = vpop.f32.mrb[128].mxu1 }
 0xb9a   :  { %v7524_v1 = vadd.f32 %v8894_v54, %v7363_v19  ;;  %v7515_v26 = vpop.f32.mrb[129].mxu1 }
 0xb9b   :  { %v7516_v6 = vadd.f32 %v7515_v26, %v7355_v5  ;;  %v8895_v30 = vpop.f32.mrb[130].mxu1 }
 0xb9c   :  { %7634 = vst [vmem:[#allocation10 + $0x1c0] sm:$0xff] %v7524_v1  ;;  %v7527_v36 = vadd.f32 %v8895_v30, %v7366_v38  ;;  %v7518_v58 = vpop.f32.mrb[131].mxu1 }
 0xb9d   :  { %7628 = vst [vmem:[#allocation10 + $0x190] sm:$0xff] %v7516_v6  ;;  %v7519_v50 = vadd.f32 %v7518_v58, %v7358_v37 }
 0xb9e   :  { %7637 = vst [vmem:[#allocation10 + $0x1d8] sm:$0xff] %v7527_v36 }
 0xb9f   :  { %7631 = vst [vmem:[#allocation10 + $0x1a8] sm:$0xff] %v7519_v50 }
 0xba1   :  { %v8898_v8 = vpop.f32.mrb[132].mxu1 }
 0xba2   :  { %v7540_v52 = vadd.f32 %v8898_v8, %v7379_v3  ;;  %v7531_v21 = vpop.f32.mrb[133].mxu1 }
 0xba3   :  { %v7532_v43 = vadd.f32 %v7531_v21, %v7371_v40  ;;  %v8899_v49 = vpop.f32.mrb[134].mxu1 }
 0xba4   :  { %7646 = vst [vmem:[#allocation10 + $0x220] sm:$0xff] %v7540_v52  ;;  %v7543_v15 = vadd.f32 %v8899_v49, %v7382_v41  ;;  %v7534_v28 = vpop.f32.mrb[135].mxu1 }
 0xba5   :  { %7640 = vst [vmem:[#allocation10 + $0x1f0] sm:$0xff] %v7532_v43  ;;  %v7535_v60 = vadd.f32 %v7534_v28, %v7374_v34 }
 0xba6   :  { %7649 = vst [vmem:[#allocation10 + $0x238] sm:$0xff] %v7543_v15 }
 0xba7   :  { %7643 = vst [vmem:[#allocation10 + $0x208] sm:$0xff] %v7535_v60 }
 0xba9   :  { %v8902_v22 = vpop.f32.mrb[136].mxu1 }
 0xbaa   :  { %v7556_v0 = vadd.f32 %v8902_v22, %v7395_v59  ;;  %v7547_v32 = vpop.f32.mrb[137].mxu1 }
 0xbab   :  { %v7548_v13 = vadd.f32 %v7547_v32, %v7387_v35  ;;  %v8903_v42 = vpop.f32.mrb[138].mxu1 }
 0xbac   :  { %7658 = vst [vmem:[#allocation10 + $0x280] sm:$0xff] %v7556_v0  ;;  %v7559_v4 = vadd.f32 %v8903_v42, %v7398_v63  ;;  %v7550_v27 = vpop.f32.mrb[139].mxu1 }
 0xbad   :  { %7652 = vst [vmem:[#allocation10 + $0x250] sm:$0xff] %v7548_v13  ;;  %v7551_v44 = vadd.f32 %v7550_v27, %v7390_v25 }
 0xbae   :  { %7661 = vst [vmem:[#allocation10 + $0x298] sm:$0xff] %v7559_v4 }
 0xbaf   :  { %7655 = vst [vmem:[#allocation10 + $0x268] sm:$0xff] %v7551_v44 }
 0xbb1   :  { %v8906_v48 = vpop.f32.mrb[140].mxu1 }
 0xbb2   :  { %v7572_v57 = vadd.f32 %v8906_v48, %v7411_v9  ;;  %v7563_v62 = vpop.f32.mrb[141].mxu1 }
 0xbb3   :  { %v7564_v7 = vadd.f32 %v7563_v62, %v7403_v12  ;;  %v8907_v11 = vpop.f32.mrb[142].mxu1 }
 0xbb4   :  { %7670 = vst [vmem:[#allocation10 + $0x2e0] sm:$0xff] %v7572_v57  ;;  %v7575_v53 = vadd.f32 %v8907_v11, %v7414_v39  ;;  %v7566_v20 = vpop.f32.mrb[143].mxu1 }
 0xbb5   :  { %7664 = vst [vmem:[#allocation10 + $0x2b0] sm:$0xff] %v7564_v7  ;;  %v7567_v55 = vadd.f32 %v7566_v20, %v7406_v51 }
 0xbb6   :  { %7673 = vst [vmem:[#allocation10 + $0x2f8] sm:$0xff] %v7575_v53 }
 0xbb7   :  { %7667 = vst [vmem:[#allocation10 + $0x2c8] sm:$0xff] %v7567_v55 }
 0xbbd   :  { %v7097_v45 = vpop.f32.mrb[16].mxu0 }
 0xbbe   :  { %v8972_v16 = vadd.f32 %v7097_v45, %v14436_v23  ;;  %v7099_v61 = vpop.f32.mrb[17].mxu0 }
 0xbbf   :  { %v8973_v47 = vadd.f32 %v7099_v61, %v14437_v14  ;;  %v7101_v2 = vpop.f32.mrb[18].mxu0 }
 0xbc0   :  { %7578 = vst [vmem:[#allocation10] sm:$0xff] %v8972_v16  ;;  %v8974_v31 = vadd.f32 %v7101_v2, %v14436_v23  ;;  %v7103_v56 = vpop.f32.mrb[19].mxu0 }
 0xbc1   :  { %7579 = vst [vmem:[#allocation10 + $0x8] sm:$0xff] %v8973_v47  ;;  %v8975_v24 = vadd.f32 %v7103_v56, %v14437_v14 }
 0xbc2   :  { %7581 = vst [vmem:[#allocation10 + $0x18] sm:$0xff] %v8974_v31 }
 0xbc3   :  { %7582 = vst [vmem:[#allocation10 + $0x20] sm:$0xff] %v8975_v24 }
 0xbc5   :  { %v7107_v18 = vpop.f32.mrb[20].mxu0 }
 0xbc6   :  { %v8976_v46 = vadd.f32 %v7107_v18, %v14436_v23  ;;  %v7109_v33 = vpop.f32.mrb[21].mxu0 }
 0xbc7   :  { %v8977_v10 = vadd.f32 %v7109_v33, %v14437_v14  ;;  %v7111_v29 = vpop.f32.mrb[22].mxu0 }
 0xbc8   :  { %7584 = vst [vmem:[#allocation10 + $0x30] sm:$0xff] %v8976_v46  ;;  %v8978_v17 = vadd.f32 %v7111_v29, %v14436_v23  ;;  %v7113_v19 = vpop.f32.mrb[23].mxu0 }
 0xbc9   :  { %7585 = vst [vmem:[#allocation10 + $0x38] sm:$0xff] %v8977_v10  ;;  %v8979_v5 = vadd.f32 %v7113_v19, %v14437_v14 }
 0xbca   :  { %7587 = vst [vmem:[#allocation10 + $0x48] sm:$0xff] %v8978_v17 }
 0xbcb   :  { %7588 = vst [vmem:[#allocation10 + $0x50] sm:$0xff] %v8979_v5 }
 0xbcd   :  { %v7117_v54 = vpop.f32.mrb[24].mxu0 }
 0xbce   :  { %v8980_v38 = vadd.f32 %v7117_v54, %v14436_v23  ;;  %v7119_v1 = vpop.f32.mrb[25].mxu0 }
 0xbcf   :  { %v8981_v26 = vadd.f32 %v7119_v1, %v14437_v14  ;;  %v7121_v37 = vpop.f32.mrb[26].mxu0 }
 0xbd0   :  { %7590 = vst [vmem:[#allocation10 + $0x60] sm:$0xff] %v8980_v38  ;;  %v8982_v6 = vadd.f32 %v7121_v37, %v14436_v23  ;;  %v7123_v30 = vpop.f32.mrb[27].mxu0 }
 0xbd1   :  { %7591 = vst [vmem:[#allocation10 + $0x68] sm:$0xff] %v8981_v26  ;;  %v8983_v36 = vadd.f32 %v7123_v30, %v14437_v14 }
 0xbd2   :  { %7593 = vst [vmem:[#allocation10 + $0x78] sm:$0xff] %v8982_v6 }
 0xbd3   :  { %7594 = vst [vmem:[#allocation10 + $0x80] sm:$0xff] %v8983_v36 }
 0xbd5   :  { %v7127_v58 = vpop.f32.mrb[28].mxu0 }
 0xbd6   :  { %v8984_v50 = vadd.f32 %v7127_v58, %v14436_v23  ;;  %v7129_v3 = vpop.f32.mrb[29].mxu0 }
 0xbd7   :  { %v8985_v40 = vadd.f32 %v7129_v3, %v14437_v14  ;;  %v7131_v8 = vpop.f32.mrb[30].mxu0 }
 0xbd8   :  { %7596 = vst [vmem:[#allocation10 + $0x90] sm:$0xff] %v8984_v50  ;;  %v8986_v41 = vadd.f32 %v7131_v8, %v14436_v23  ;;  %v7133_v52 = vpop.f32.mrb[31].mxu0 }
 0xbd9   :  { %7597 = vst [vmem:[#allocation10 + $0x98] sm:$0xff] %v8985_v40  ;;  %v8987_v21 = vadd.f32 %v7133_v52, %v14437_v14 }
 0xbda   :  { %7599 = vst [vmem:[#allocation10 + $0xa8] sm:$0xff] %v8986_v41 }
 0xbdb   :  { %7600 = vst [vmem:[#allocation10 + $0xb0] sm:$0xff] %v8987_v21 }
 0xbdd   :  { %v7137_v34 = vpop.f32.mrb[32].mxu0 }
 0xbde   :  { %v8988_v43 = vadd.f32 %v7137_v34, %v14436_v23  ;;  %v7139_v49 = vpop.f32.mrb[33].mxu0 }
 0xbdf   :  { %v8989_v15 = vadd.f32 %v7139_v49, %v14437_v14  ;;  %v7141_v28 = vpop.f32.mrb[34].mxu0 }
 0xbe0   :  { %7602 = vst [vmem:[#allocation10 + $0xc0] sm:$0xff] %v8988_v43  ;;  %v8990_v60 = vadd.f32 %v7141_v28, %v14436_v23  ;;  %v7143_v59 = vpop.f32.mrb[35].mxu0 }
 0xbe1   :  { %7603 = vst [vmem:[#allocation10 + $0xc8] sm:$0xff] %v8989_v15  ;;  %v8991_v35 = vadd.f32 %v7143_v59, %v14437_v14 }
 0xbe2   :  { %7605 = vst [vmem:[#allocation10 + $0xd8] sm:$0xff] %v8990_v60 }
 0xbe3   :  { %7606 = vst [vmem:[#allocation10 + $0xe0] sm:$0xff] %v8991_v35 }
 0xbe5   :  { %v7147_v22 = vpop.f32.mrb[36].mxu0 }
 0xbe6   :  { %v8992_v63 = vadd.f32 %v7147_v22, %v14436_v23  ;;  %v7149_v0 = vpop.f32.mrb[37].mxu0 }
 0xbe7   :  { %v8993_v32 = vadd.f32 %v7149_v0, %v14437_v14  ;;  %v7151_v25 = vpop.f32.mrb[38].mxu0 }
 0xbe8   :  { %7608 = vst [vmem:[#allocation10 + $0xf0] sm:$0xff] %v8992_v63  ;;  %v8994_v13 = vadd.f32 %v7151_v25, %v14436_v23  ;;  %v7153_v42 = vpop.f32.mrb[39].mxu0 }
 0xbe9   :  { %7609 = vst [vmem:[#allocation10 + $0xf8] sm:$0xff] %v8993_v32  ;;  %v8995_v4 = vadd.f32 %v7153_v42, %v14437_v14 }
 0xbea   :  { %7611 = vst [vmem:[#allocation10 + $0x108] sm:$0xff] %v8994_v13 }
 0xbeb   :  { %7612 = vst [vmem:[#allocation10 + $0x110] sm:$0xff] %v8995_v4 }
 0xbed   :  { %v7157_v27 = vpop.f32.mrb[40].mxu0 }
 0xbee   :  { %v8996_v44 = vadd.f32 %v7157_v27, %v14436_v23  ;;  %v7159_v9 = vpop.f32.mrb[41].mxu0 }
 0xbef   :  { %v8997_v12 = vadd.f32 %v7159_v9, %v14437_v14  ;;  %v7161_v48 = vpop.f32.mrb[42].mxu0 }
 0xbf0   :  { %7614 = vst [vmem:[#allocation10 + $0x120] sm:$0xff] %v8996_v44  ;;  %v8998_v39 = vadd.f32 %v7161_v48, %v14436_v23  ;;  %v7163_v57 = vpop.f32.mrb[43].mxu0 }
 0xbf1   :  { %7615 = vst [vmem:[#allocation10 + $0x128] sm:$0xff] %v8997_v12  ;;  %v8999_v62 = vadd.f32 %v7163_v57, %v14437_v14 }
 0xbf2   :  { %7617 = vst [vmem:[#allocation10 + $0x138] sm:$0xff] %v8998_v39 }
 0xbf3   :  { %7618 = vst [vmem:[#allocation10 + $0x140] sm:$0xff] %v8999_v62 }
 0xbf5   :  { %v7167_v51 = vpop.f32.mrb[44].mxu0 }
 0xbf6   :  { %v9000_v7 = vadd.f32 %v7167_v51, %v14436_v23  ;;  %v7169_v11 = vpop.f32.mrb[45].mxu0 }
 0xbf7   :  { %v9001_v53 = vadd.f32 %v7169_v11, %v14437_v14  ;;  %v7171_v20 = vpop.f32.mrb[46].mxu0 }
 0xbf8   :  { %7620 = vst [vmem:[#allocation10 + $0x150] sm:$0xff] %v9000_v7  ;;  %v9002_v55 = vadd.f32 %v7171_v20, %v14436_v23  ;;  %v7173_v45 = vpop.f32.mrb[47].mxu0 }
 0xbf9   :  { %7621 = vst [vmem:[#allocation10 + $0x158] sm:$0xff] %v9001_v53  ;;  %v9003_v16 = vadd.f32 %v7173_v45, %v14437_v14 }
 0xbfa   :  { %7623 = vst [vmem:[#allocation10 + $0x168] sm:$0xff] %v9002_v55 }
 0xbfb   :  { %7624 = vst [vmem:[#allocation10 + $0x170] sm:$0xff] %v9003_v16 }
 0xbfd   :  { %v7177_v61 = vpop.f32.mrb[48].mxu0 }
 0xbfe   :  { %v9004_v47 = vadd.f32 %v7177_v61, %v14436_v23  ;;  %v7179_v2 = vpop.f32.mrb[49].mxu0 }
 0xbff   :  { %v9005_v31 = vadd.f32 %v7179_v2, %v14437_v14  ;;  %v7181_v56 = vpop.f32.mrb[50].mxu0 }
 0xc00   :  { %7626 = vst [vmem:[#allocation10 + $0x180] sm:$0xff] %v9004_v47  ;;  %v9006_v24 = vadd.f32 %v7181_v56, %v14436_v23  ;;  %v7183_v18 = vpop.f32.mrb[51].mxu0 }
 0xc01   :  { %7627 = vst [vmem:[#allocation10 + $0x188] sm:$0xff] %v9005_v31  ;;  %v9007_v46 = vadd.f32 %v7183_v18, %v14437_v14 }
 0xc02   :  { %7629 = vst [vmem:[#allocation10 + $0x198] sm:$0xff] %v9006_v24 }
 0xc03   :  { %7630 = vst [vmem:[#allocation10 + $0x1a0] sm:$0xff] %v9007_v46 }
 0xc05   :  { %v7187_v33 = vpop.f32.mrb[52].mxu0 }
 0xc06   :  { %v9008_v10 = vadd.f32 %v7187_v33, %v14436_v23  ;;  %v7189_v29 = vpop.f32.mrb[53].mxu0 }
 0xc07   :  { %v9009_v17 = vadd.f32 %v7189_v29, %v14437_v14  ;;  %v7191_v19 = vpop.f32.mrb[54].mxu0 }
 0xc08   :  { %7632 = vst [vmem:[#allocation10 + $0x1b0] sm:$0xff] %v9008_v10  ;;  %v9010_v5 = vadd.f32 %v7191_v19, %v14436_v23  ;;  %v7193_v54 = vpop.f32.mrb[55].mxu0 }
 0xc09   :  { %7633 = vst [vmem:[#allocation10 + $0x1b8] sm:$0xff] %v9009_v17  ;;  %v9011_v38 = vadd.f32 %v7193_v54, %v14437_v14 }
 0xc0a   :  { %7635 = vst [vmem:[#allocation10 + $0x1c8] sm:$0xff] %v9010_v5 }
 0xc0b   :  { %7636 = vst [vmem:[#allocation10 + $0x1d0] sm:$0xff] %v9011_v38 }
 0xc0d   :  { %v7197_v1 = vpop.f32.mrb[56].mxu0 }
 0xc0e   :  { %v9012_v26 = vadd.f32 %v7197_v1, %v14436_v23  ;;  %v7199_v37 = vpop.f32.mrb[57].mxu0 }
 0xc0f   :  { %v9013_v6 = vadd.f32 %v7199_v37, %v14437_v14  ;;  %v7201_v30 = vpop.f32.mrb[58].mxu0 }
 0xc10   :  { %7638 = vst [vmem:[#allocation10 + $0x1e0] sm:$0xff] %v9012_v26  ;;  %v9014_v36 = vadd.f32 %v7201_v30, %v14436_v23  ;;  %v7203_v58 = vpop.f32.mrb[59].mxu0 }
 0xc11   :  { %7639 = vst [vmem:[#allocation10 + $0x1e8] sm:$0xff] %v9013_v6  ;;  %v9015_v50 = vadd.f32 %v7203_v58, %v14437_v14 }
 0xc12   :  { %7641 = vst [vmem:[#allocation10 + $0x1f8] sm:$0xff] %v9014_v36 }
 0xc13   :  { %7642 = vst [vmem:[#allocation10 + $0x200] sm:$0xff] %v9015_v50 }
 0xc15   :  { %v7207_v3 = vpop.f32.mrb[60].mxu0 }
 0xc16   :  { %v9016_v40 = vadd.f32 %v7207_v3, %v14436_v23  ;;  %v7209_v8 = vpop.f32.mrb[61].mxu0 }
 0xc17   :  { %v9017_v41 = vadd.f32 %v7209_v8, %v14437_v14  ;;  %v7211_v52 = vpop.f32.mrb[62].mxu0 }
 0xc18   :  { %7644 = vst [vmem:[#allocation10 + $0x210] sm:$0xff] %v9016_v40  ;;  %v9018_v21 = vadd.f32 %v7211_v52, %v14436_v23  ;;  %v7213_v34 = vpop.f32.mrb[63].mxu0 }
 0xc19   :  { %7645 = vst [vmem:[#allocation10 + $0x218] sm:$0xff] %v9017_v41  ;;  %v9019_v43 = vadd.f32 %v7213_v34, %v14437_v14 }
 0xc1a   :  { %7647 = vst [vmem:[#allocation10 + $0x228] sm:$0xff] %v9018_v21 }
 0xc1b   :  { %7648 = vst [vmem:[#allocation10 + $0x230] sm:$0xff] %v9019_v43 }
 0xc1d   :  { %v7217_v49 = vpop.f32.mrb[64].mxu0 }
 0xc1e   :  { %v9020_v15 = vadd.f32 %v7217_v49, %v14436_v23  ;;  %v7219_v28 = vpop.f32.mrb[65].mxu0 }
 0xc1f   :  { %v9021_v60 = vadd.f32 %v7219_v28, %v14437_v14  ;;  %v7221_v59 = vpop.f32.mrb[66].mxu0 }
 0xc20   :  { %7650 = vst [vmem:[#allocation10 + $0x240] sm:$0xff] %v9020_v15  ;;  %v9022_v35 = vadd.f32 %v7221_v59, %v14436_v23  ;;  %v7223_v22 = vpop.f32.mrb[67].mxu0 }
 0xc21   :  { %7651 = vst [vmem:[#allocation10 + $0x248] sm:$0xff] %v9021_v60  ;;  %v9023_v63 = vadd.f32 %v7223_v22, %v14437_v14 }
 0xc22   :  { %7653 = vst [vmem:[#allocation10 + $0x258] sm:$0xff] %v9022_v35 }
 0xc23   :  { %7654 = vst [vmem:[#allocation10 + $0x260] sm:$0xff] %v9023_v63 }
 0xc25   :  { %v7227_v0 = vpop.f32.mrb[68].mxu0 }
 0xc26   :  { %v9024_v32 = vadd.f32 %v7227_v0, %v14436_v23  ;;  %v7229_v25 = vpop.f32.mrb[69].mxu0 }
 0xc27   :  { %v9025_v13 = vadd.f32 %v7229_v25, %v14437_v14  ;;  %v7231_v42 = vpop.f32.mrb[70].mxu0 }
 0xc28   :  { %7656 = vst [vmem:[#allocation10 + $0x270] sm:$0xff] %v9024_v32  ;;  %v9026_v4 = vadd.f32 %v7231_v42, %v14436_v23  ;;  %v7233_v27 = vpop.f32.mrb[71].mxu0 }
 0xc29   :  { %7657 = vst [vmem:[#allocation10 + $0x278] sm:$0xff] %v9025_v13  ;;  %v9027_v44 = vadd.f32 %v7233_v27, %v14437_v14 }
 0xc2a   :  { %7659 = vst [vmem:[#allocation10 + $0x288] sm:$0xff] %v9026_v4 }
 0xc2b   :  { %7660 = vst [vmem:[#allocation10 + $0x290] sm:$0xff] %v9027_v44 }
 0xc2d   :  { %v7237_v9 = vpop.f32.mrb[72].mxu0 }
 0xc2e   :  { %v9028_v12 = vadd.f32 %v7237_v9, %v14436_v23  ;;  %v7239_v48 = vpop.f32.mrb[73].mxu0 }
 0xc2f   :  { %v9029_v39 = vadd.f32 %v7239_v48, %v14437_v14  ;;  %v7241_v57 = vpop.f32.mrb[74].mxu0 }
 0xc30   :  { %7662 = vst [vmem:[#allocation10 + $0x2a0] sm:$0xff] %v9028_v12  ;;  %v9030_v62 = vadd.f32 %v7241_v57, %v14436_v23  ;;  %v7243_v51 = vpop.f32.mrb[75].mxu0 }
 0xc31   :  { %7663 = vst [vmem:[#allocation10 + $0x2a8] sm:$0xff] %v9029_v39  ;;  %v9031_v7 = vadd.f32 %v7243_v51, %v14437_v14 }
 0xc32   :  { %7665 = vst [vmem:[#allocation10 + $0x2b8] sm:$0xff] %v9030_v62 }
 0xc33   :  { %7666 = vst [vmem:[#allocation10 + $0x2c0] sm:$0xff] %v9031_v7 }
 0xc35   :  { %v7247_v11 = vpop.f32.mrb[76].mxu0 }
 0xc36   :  { %v9032_v53 = vadd.f32 %v7247_v11, %v14436_v23  ;;  %v7249_v20 = vpop.f32.mrb[77].mxu0 }
 0xc37   :  { %v9033_v55 = vadd.f32 %v7249_v20, %v14437_v14  ;;  %v7251_v45 = vpop.f32.mrb[78].mxu0 }
 0xc38   :  { %7668 = vst [vmem:[#allocation10 + $0x2d0] sm:$0xff] %v9032_v53  ;;  %v9034_v16 = vadd.f32 %v7251_v45, %v14436_v23  ;;  %v7253_v61 = vpop.f32.mrb[79].mxu0 }
 0xc39   :  { %7669 = vst [vmem:[#allocation10 + $0x2d8] sm:$0xff] %v9033_v55  ;;  %v9035_v47 = vadd.f32 %v7253_v61, %v14437_v14 }
 0xc3a   :  { %7671 = vst [vmem:[#allocation10 + $0x2e8] sm:$0xff] %v9034_v16 }
 0xc3b   :  { %7672 = vst [vmem:[#allocation10 + $0x2f0] sm:$0xff] %v9035_v47 }
 0xc3c   :  { %10325 = shalt.err (!%p10322_p0)
}
 0xc3d   :  { %s10326_s8 = scalar_lea.hbm %s13498_s4, 12288 }
 0xc3e   :  { %p10327_p1 = scmp.ne.s32.totalorder %s13498_s4, %s10326_s8  ;;  %p10330_p2 = scmp.lt.u32.totalorder %s10326_s8, %s13498_s4 }
 0xc40   :  { %p10332_p3 = pnand %p10330_p2, %p10327_p1 }
 0xc42   :  { %10335 = shalt.err (!%p10332_p3)
}
 0xc43   :  { %s10351_s1 = smov 384   ;;  %s10352_s13 = smov 24  }
 0xc44   :  { %7685 = dma.vmem_to_hbm [thread:$0]  %s7680_s30, 12288, %s13498_s4, [#allocation6], %s10351_s1, %s10351_s1, %s10352_s13  }
 0xc45   :  { %10340 = dma.done.wait [#allocation6], 12288  }
 0xc46   :  { %10341 = vsyncadd [#allocation6], 4294955008 }
 0xc47   :  { %7689 = vsyncpa [#allocation5], 1 }
 0xc48   :  { %7690 = vsyncpa [#allocation8], 1 }
 0xc49   :  { %7691 = vsyncpa [#allocation6], 1 }

</bundles_post_ra>
